<compile_context>
chip_gen: v5e
topology: v5e:2x2
jax: 0.10.0
libtpu: 0.0.40
codegen_flags: <defaults>
</compile_context>

<pallas_src>
import functools
import math

import jax
import jax.numpy as jnp
from jax.experimental import pallas as pl
from jax.experimental.pallas import tpu as pltpu

N_HEADS = 4        # nn.TransformerEncoderLayer(nhead=4)
NEG_SLOPE = 0.01   # F.leaky_relu default
LN_EPS = 1e-5      # nn.LayerNorm default


def _leaky_relu(x):
    return jnp.where(x > 0, x, NEG_SLOPE * x)


def _layer_norm(x, gamma, beta):
    mu = jnp.mean(x, axis=-1, keepdims=True)
    d = x - mu
    var = jnp.mean(d * d, axis=-1, keepdims=True)
    return d * jax.lax.rsqrt(var + LN_EPS) * gamma + beta


def fdm_kernel(
    # per-step input: packed [hist | 0] / [0 | cur] rows, flattened
    xin_ref,                                   # (ROWS, 2*lidar) f32
    # fused embedding
    w_emb_ref, b_emb_ref, mask_ref,
    # fused attention projections
    wqkv_ref, bqkv_ref, wo_ref, bo_ref,
    # norm1
    g1_ref, beta1_ref,
    # feed-forward
    w1_ref, b1_ref, w2_ref, b2_ref,
    # norm2
    g2_ref, beta2_ref,
    # final encode (lane-padded)
    we_ref, be_ref,
    # output
    out_ref,
    # scratch: per-head ctx assembled into full-width buffer
    ctx_sc,                                    # (ROWS, d_model) f32
):
    f32, bf16 = jnp.float32, jnp.bfloat16
    rows = xin_ref.shape[0]
    seq_pad = mask_ref.shape[-1]
    b_tile = rows // seq_pad
    d_model = w_emb_ref.shape[1]
    d_head = d_model // N_HEADS
    scale = 1.0 / math.sqrt(d_head)

    # --- fused history/current embedding + leaky relu (bias pre-tiled) ---
    x = _leaky_relu(
        jnp.dot(xin_ref[...].astype(bf16), w_emb_ref[...],
                preferred_element_type=f32) + b_emb_ref[...])       # (ROWS, D) f32

    # --- fused QKV projection: one lane-dense (D, 3D) matmul ---
    qkv = jnp.dot(x.astype(bf16), wqkv_ref[...],
                  preferred_element_type=f32) + bqkv_ref[...]       # (ROWS, 3D) f32
    qkv3 = qkv.astype(bf16).reshape(b_tile, seq_pad, 3 * d_model)
    mask = mask_ref[...]                                            # (1, 1, S)

    # --- per-head attention: tiny batched score/ctx dots only ---
    for h in range(N_HEADS):                   # static unroll (4 heads)
        q3 = qkv3[:, :, h * d_head:(h + 1) * d_head]
        k3 = qkv3[:, :, d_model + h * d_head:d_model + (h + 1) * d_head]
        v3 = qkv3[:, :, 2 * d_model + h * d_head:2 * d_model + (h + 1) * d_head]
        s = jnp.einsum("bqd,bkd->bqk", q3, k3,
                       preferred_element_type=f32) * scale + mask
        s = s - jnp.max(s, axis=-1, keepdims=True)
        p = jnp.exp(s)
        p = p * pl.reciprocal(jnp.sum(p, axis=-1, keepdims=True), approx=True)
        ctx = jnp.einsum("bqk,bkd->bqd", p.astype(bf16), v3,
                         preferred_element_type=f32)                # (b, S, dh)
        # write this head's ctx into its 32-lane slice -> single wo matmul
        ctx_sc[:, h * d_head:(h + 1) * d_head] = ctx.reshape(rows, d_head)

    attn = jnp.dot(ctx_sc[...].astype(bf16), wo_ref[...],
                   preferred_element_type=f32) + bo_ref[...]
    x = _layer_norm(x + attn, g1_ref[...], beta1_ref[...])

    # --- feed forward 128 -> 512 -> 128 (relu) ---
    h1 = jnp.maximum(
        jnp.dot(x.astype(bf16), w1_ref[...], preferred_element_type=f32)
        + b1_ref[...], 0.0)
    ff = jnp.dot(h1.astype(bf16), w2_ref[...],
                 preferred_element_type=f32) + b2_ref[...]
    x = _layer_norm(x + ff, g2_ref[...], beta2_ref[...])

    # --- final encode (lane-dense padded output) ---
    out = jnp.dot(x.astype(bf16), we_ref[...],
                  preferred_element_type=f32) + be_ref[...]
    out_ref[...] = out.astype(out_ref.dtype)


# ----------------------------------------------------------------------------
# Parameter construction / wrapper-side preparation
# ----------------------------------------------------------------------------

def init_params(key, lidar_dim, output_dim, d_model=128, d_ff=512):
    """nn.Linear-style init; weights stored transposed (in, out), f32."""
    def linear(k, fan_in, fan_out):
        kw, kb = jax.random.split(k)
        bound = 1.0 / math.sqrt(fan_in)
        w = jax.random.uniform(kw, (fan_in, fan_out), jnp.float32, -bound, bound)
        b = jax.random.uniform(kb, (1, fan_out), jnp.float32, -bound, bound)
        return w, b

    keys = jax.random.split(key, 9)
    p = {}
    p["w_hist"], p["b_hist"] = linear(keys[0], lidar_dim, d_model)
    p["w_cur"], p["b_cur"] = linear(keys[1], lidar_dim, d_model)
    p["wq"], p["bq"] = linear(keys[2], d_model, d_model)
    p["wk"], p["bk"] = linear(keys[3], d_model, d_model)
    p["wv"], p["bv"] = linear(keys[4], d_model, d_model)
    p["wo"], p["bo"] = linear(keys[5], d_model, d_model)
    p["g1"] = jnp.ones((1, d_model), jnp.float32)
    p["beta1"] = jnp.zeros((1, d_model), jnp.float32)
    p["w1"], p["b1"] = linear(keys[6], d_model, d_ff)
    p["w2"], p["b2"] = linear(keys[7], d_ff, d_model)
    p["g2"] = jnp.ones((1, d_model), jnp.float32)
    p["beta2"] = jnp.zeros((1, d_model), jnp.float32)
    p["we"], p["be"] = linear(keys[8], d_model, output_dim)
    return p


def prepare_params(p):
    """Fuse embedding / QKV weights, pad encode to a lane-dense width, cast
    matmul weights to bf16.  Biases / LayerNorm params stay f32."""
    bf = lambda w: w.astype(jnp.bfloat16)
    out_dim = p["we"].shape[1]
    out_pad = ((out_dim + 127) // 128) * 128
    we_pad = jnp.pad(p["we"], ((0, 0), (0, out_pad - out_dim)))
    be_pad = jnp.pad(p["be"], ((0, 0), (0, out_pad - out_dim)))
    return {
        "w_emb": bf(jnp.concatenate([p["w_hist"], p["w_cur"]], axis=0)),
        "b_hist": p["b_hist"], "b_cur": p["b_cur"],
        "wqkv": bf(jnp.concatenate([p["wq"], p["wk"], p["wv"]], axis=1)),
        "bqkv": jnp.concatenate([p["bq"], p["bk"], p["bv"]], axis=1),
        "wo": bf(p["wo"]), "bo": p["bo"],
        "g1": p["g1"], "beta1": p["beta1"],
        "w1": bf(p["w1"]), "b1": p["b1"],
        "w2": bf(p["w2"]), "b2": p["b2"],
        "g2": p["g2"], "beta2": p["beta2"],
        "we": bf(we_pad), "be": be_pad,
    }


def _resident_spec(arr):
    """Full-array block with a constant index_map -> stays VMEM-resident."""
    rank = arr.ndim
    return pl.BlockSpec(tuple(arr.shape), lambda i, _r=rank: (0,) * _r)


@functools.partial(jax.jit, static_argnames=("output_dim", "b_tile"))
def fdm_forward(history_observation, current_observation, params, *,
                output_dim, b_tile=None):
    f32 = jnp.float32
    B, t_hist, lidar_dim = history_observation.shape
    seq = t_hist + 1
    seq_pad = ((seq + 15) // 16) * 16          # sublane-aligned (f32 & bf16)
    d_model = params["w_emb"].shape[1]
    d_ff = params["w1"].shape[1]
    out_pad = params["we"].shape[1]
    d_head = d_model // N_HEADS

    if b_tile is None:
        # many elements per step, but keep >= 2 grid steps when possible so
        # the "parallel" batch axis can shard across TensorCores (v7x).
        b_tile = max(1, min(128, B // 2)) if B >= 2 else 1
    num_tiles = pl.cdiv(B, b_tile)
    b_pad = num_tiles * b_tile
    rows_tile = b_tile * seq_pad

    # pack [hist | 0] rows and the [0 | cur] row into one per-element slab,
    # pad seq -> seq_pad and batch -> b_pad, flatten to a 2-D row slab.
    hist_p = jnp.pad(history_observation.astype(f32),
                     ((0, 0), (0, 0), (0, lidar_dim)))
    cur_p = jnp.pad(current_observation.astype(f32),
                    ((0, 0), (0, 0), (lidar_dim, 0)))
    packed = jnp.concatenate([hist_p, cur_p], axis=1)           # (B, seq, 2L)
    packed = jnp.pad(packed, ((0, b_pad - B), (0, seq_pad - seq), (0, 0)))
    packed = packed.reshape(b_pad * seq_pad, 2 * lidar_dim)

    # per-row embedding bias (hist rows -> b_hist, current/padded -> b_cur),
    # pre-tiled over the per-step slab so the kernel does a flat f32 add.
    b_emb_rows = jnp.concatenate(
        [jnp.tile(params["b_hist"], (t_hist, 1)),
         jnp.tile(params["b_cur"], (seq_pad - t_hist, 1))], axis=0)
    b_emb = jnp.tile(b_emb_rows, (b_tile, 1))                   # (rows_tile, D)

    # additive key mask: 0 for valid key positions, -1e30 for padded columns
    mask = jnp.where(jnp.arange(seq_pad) < seq, 0.0, -1e30
                     ).astype(f32).reshape(1, 1, seq_pad)

    weight_ops = (params["w_emb"], b_emb, mask,
                  params["wqkv"], params["bqkv"], params["wo"], params["bo"],
                  params["g1"], params["beta1"],
                  params["w1"], params["b1"], params["w2"], params["b2"],
                  params["g2"], params["beta2"],
                  params["we"], params["be"])
    operands = (packed,) + weight_ops

    in_specs = [pl.BlockSpec((rows_tile, 2 * lidar_dim), lambda i: (i, 0))]
    in_specs += [_resident_spec(w) for w in weight_ops]
    out_spec = pl.BlockSpec((rows_tile, out_pad), lambda i: (i, 0))
    out_shape = jax.ShapeDtypeStruct((b_pad * seq_pad, out_pad), f32)

    rows_total = b_pad * seq_pad
    flops = (2 * rows_total * (2 * lidar_dim * d_model
                               + 3 * d_model * d_model + d_model * d_model
                               + 2 * d_model * d_ff + d_model * out_pad)
             + 4 * b_pad * N_HEADS * seq_pad * seq_pad * d_head)
    transcendentals = b_pad * N_HEADS * seq_pad * seq_pad + 3 * rows_total
    bytes_accessed = int(sum(a.size * a.dtype.itemsize for a in operands)
                         + rows_total * out_pad * 4)

    out = pl.pallas_call(
        fdm_kernel,
        out_shape=out_shape,
        grid_spec=pltpu.PrefetchScalarGridSpec(
            num_scalar_prefetch=0,
            grid=(num_tiles,),
            in_specs=in_specs,
            out_specs=out_spec,
            scratch_shapes=[pltpu.VMEM((rows_tile, d_model), jnp.float32)],
        ),
        compiler_params=pltpu.CompilerParams(
            dimension_semantics=("parallel",),
            vmem_limit_bytes=48 * 1024 * 1024),
        cost_estimate=pl.CostEstimate(
            flops=flops, transcendentals=transcendentals,
            bytes_accessed=bytes_accessed),
    )(*operands)

    out = out.reshape(b_pad, seq_pad, out_pad)
    return out[:B, :seq, :output_dim]


# ----------------------------------------------------------------------------
# Pure-JAX reference (same bf16-at-dot-boundary math, unfused raw params)
# ----------------------------------------------------------------------------

def reference_forward(history, current, p, n_heads=N_HEADS):
    f32, bf16 = jnp.float32, jnp.bfloat16
    d_model = p["wq"].shape[0]
    dh = d_model // n_heads
    scale = 1.0 / math.sqrt(dh)

    def dot(a, w):
        return jnp.einsum("...i,io->...o", a.astype(bf16), w.astype(bf16),
                          preferred_element_type=f32)

    hs = _leaky_relu(dot(history, p["w_hist"]) + p["b_hist"])
    co = _leaky_relu(dot(current, p["w_cur"]) + p["b_cur"])
    x = jnp.concatenate([hs, co], axis=1)                      # (B, S, D)

    q = dot(x, p["wq"]) + p["bq"]
    k = dot(x, p["wk"]) + p["bk"]
    v = dot(x, p["wv"]) + p["bv"]
    ctxs = []
    for h in range(n_heads):
        qh, kh, vh = (t[..., h * dh:(h + 1) * dh] for t in (q, k, v))
        s = jnp.einsum("bqd,bkd->bqk", qh.astype(bf16), kh.astype(bf16),
                       preferred_element_type=f32) * scale
        s = s - jnp.max(s, axis=-1, keepdims=True)
        pr = jnp.exp(s)
        pr = pr / jnp.sum(pr, axis=-1, keepdims=True)
        ctxs.append(jnp.einsum("bqk,bkd->bqd", pr.astype(bf16), vh.astype(bf16),
                               preferred_element_type=f32))
    ctx = jnp.concatenate(ctxs, axis=-1)
    attn = dot(ctx, p["wo"]) + p["bo"]

    x = _layer_norm(x + attn, p["g1"], p["beta1"])
    h1 = jnp.maximum(dot(x, p["w1"]) + p["b1"], 0.0)
    ff = dot(h1, p["w2"]) + p["b2"]
    x = _layer_norm(x + ff, p["g2"], p["beta2"])
    return dot(x, p["we"]) + p["be"]


if __name__ == "__main__":
    # Small shapes consistent with FDM.forward:
    #   history_observation: (B, n_history_frame, lidar_dim)
    #   current_observation: (B, 1, lidar_dim)
    B = 16
    T_HIST = 8
    LIDAR_DIM = 32
    OUTPUT_DIM = 64

    key = jax.random.PRNGKey(0)
    k_p, k_h, k_c = jax.random.split(key, 3)

    raw_params = init_params(k_p, LIDAR_DIM, OUTPUT_DIM)
    params = prepare_params(raw_params)

    history = jax.random.normal(k_h, (B, T_HIST, LIDAR_DIM), jnp.float32)
    current = jax.random.normal(k_c, (B, 1, LIDAR_DIM), jnp.float32)

    out = fdm_forward(history, current, params, output_dim=OUTPUT_DIM)
    out = jax.block_until_ready(out)

    ref = reference_forward(history, current, raw_params)
    assert out.shape == (B, T_HIST + 1, OUTPUT_DIM), out.shape
    max_err = float(jnp.max(jnp.abs(out - ref)))
    # bf16 dots + approx EUP reciprocal in-kernel vs exact divide in reference
    assert jnp.allclose(out, ref, atol=2e-2, rtol=2e-2), max_err

    print("KERNEL_OK")
</pallas_src>

<mosaic_0001>
module attributes {stable_mosaic.version = 11 : i64} {
  func.func @fdm_kernel(%arg0: i32, %arg1: memref<128x64xf32, #tpu.memory_space<vmem>>, %arg2: memref<64x128xbf16, #tpu.memory_space<vmem>>, %arg3: memref<128x128xf32, #tpu.memory_space<vmem>>, %arg4: memref<1x1x16xf32, #tpu.memory_space<vmem>>, %arg5: memref<128x384xbf16, #tpu.memory_space<vmem>>, %arg6: memref<1x384xf32, #tpu.memory_space<vmem>>, %arg7: memref<128x128xbf16, #tpu.memory_space<vmem>>, %arg8: memref<1x128xf32, #tpu.memory_space<vmem>>, %arg9: memref<1x128xf32, #tpu.memory_space<vmem>>, %arg10: memref<1x128xf32, #tpu.memory_space<vmem>>, %arg11: memref<128x512xbf16, #tpu.memory_space<vmem>>, %arg12: memref<1x512xf32, #tpu.memory_space<vmem>>, %arg13: memref<512x128xbf16, #tpu.memory_space<vmem>>, %arg14: memref<1x128xf32, #tpu.memory_space<vmem>>, %arg15: memref<1x128xf32, #tpu.memory_space<vmem>>, %arg16: memref<1x128xf32, #tpu.memory_space<vmem>>, %arg17: memref<128x128xbf16, #tpu.memory_space<vmem>>, %arg18: memref<1x128xf32, #tpu.memory_space<vmem>>, %arg19: memref<128x128xf32, #tpu.memory_space<vmem>>, %arg20: memref<128x128xf32, #tpu.memory_space<vmem>>) attributes {dimension_semantics = [#tpu.dimension_semantics<parallel>], iteration_bounds = array<i64: 2>, scalar_prefetch = 0 : i64, scratch_operands = 1 : i64, tpu.core_type = #tpu.core_type<tc>, window_params = [{transform_indices = @transform_0, window_bounds = array<i64: 128, 64>}, {pipeline_mode = #tpu.pipeline_mode<synchronous>, transform_indices = @transform_1, window_bounds = array<i64: 64, 128>}, {pipeline_mode = #tpu.pipeline_mode<synchronous>, transform_indices = @transform_2, window_bounds = array<i64: 128, 128>}, {pipeline_mode = #tpu.pipeline_mode<synchronous>, transform_indices = @transform_3, window_bounds = array<i64: 1, 1, 16>}, {pipeline_mode = #tpu.pipeline_mode<synchronous>, transform_indices = @transform_4, window_bounds = array<i64: 128, 384>}, {pipeline_mode = #tpu.pipeline_mode<synchronous>, transform_indices = @transform_5, window_bounds = array<i64: 1, 384>}, {pipeline_mode = #tpu.pipeline_mode<synchronous>, transform_indices = @transform_6, window_bounds = array<i64: 128, 128>}, {pipeline_mode = #tpu.pipeline_mode<synchronous>, transform_indices = @transform_7, window_bounds = array<i64: 1, 128>}, {pipeline_mode = #tpu.pipeline_mode<synchronous>, transform_indices = @transform_8, window_bounds = array<i64: 1, 128>}, {pipeline_mode = #tpu.pipeline_mode<synchronous>, transform_indices = @transform_9, window_bounds = array<i64: 1, 128>}, {pipeline_mode = #tpu.pipeline_mode<synchronous>, transform_indices = @transform_10, window_bounds = array<i64: 128, 512>}, {pipeline_mode = #tpu.pipeline_mode<synchronous>, transform_indices = @transform_11, window_bounds = array<i64: 1, 512>}, {pipeline_mode = #tpu.pipeline_mode<synchronous>, transform_indices = @transform_12, window_bounds = array<i64: 512, 128>}, {pipeline_mode = #tpu.pipeline_mode<synchronous>, transform_indices = @transform_13, window_bounds = array<i64: 1, 128>}, {pipeline_mode = #tpu.pipeline_mode<synchronous>, transform_indices = @transform_14, window_bounds = array<i64: 1, 128>}, {pipeline_mode = #tpu.pipeline_mode<synchronous>, transform_indices = @transform_15, window_bounds = array<i64: 1, 128>}, {pipeline_mode = #tpu.pipeline_mode<synchronous>, transform_indices = @transform_16, window_bounds = array<i64: 128, 128>}, {pipeline_mode = #tpu.pipeline_mode<synchronous>, transform_indices = @transform_17, window_bounds = array<i64: 1, 128>}, {transform_indices = @transform_18, window_bounds = array<i64: 128, 128>}]} {
    %c0 = arith.constant 0 : index
    %c0_0 = arith.constant 0 : index
    %0 = vector.load %arg1[%c0, %c0_0] : memref<128x64xf32, #tpu.memory_space<vmem>>, vector<128x64xf32>
    %1 = arith.truncf %0 : vector<128x64xf32> to vector<128x64xbf16>
    %c0_1 = arith.constant 0 : index
    %c0_2 = arith.constant 0 : index
    %2 = vector.load %arg2[%c0_1, %c0_2] : memref<64x128xbf16, #tpu.memory_space<vmem>>, vector<64x128xbf16>
    %cst = arith.constant dense<0.000000e+00> : vector<128x128xf32>
    %3 = tpu.matmul %1, %2, %cst {dimension_numbers = #tpu.dot_dimension_numbers<[1], [0], [0], [1], [0, 0, 1, 1], [], []>} : vector<128x64xbf16>, vector<64x128xbf16>, vector<128x128xf32> -> vector<128x128xf32>
    %c0_3 = arith.constant 0 : index
    %c0_4 = arith.constant 0 : index
    %4 = vector.load %arg3[%c0_3, %c0_4] : memref<128x128xf32, #tpu.memory_space<vmem>>, vector<128x128xf32>
    %5 = arith.addf %3, %4 : vector<128x128xf32>
    %cst_5 = arith.constant 0.000000e+00 : f32
    %6 = vector.broadcast %cst_5 : f32 to vector<128x128xf32>
    %7 = arith.cmpf ogt, %5, %6 : vector<128x128xf32>
    %cst_6 = arith.constant 0.00999999977 : f32
    %8 = vector.broadcast %cst_6 : f32 to vector<128x128xf32>
    %9 = arith.mulf %8, %5 : vector<128x128xf32>
    %10 = arith.select %7, %5, %9 : vector<128x128xi1>, vector<128x128xf32>
    %11 = arith.truncf %10 : vector<128x128xf32> to vector<128x128xbf16>
    %c0_7 = arith.constant 0 : index
    %c0_8 = arith.constant 0 : index
    %12 = vector.load %arg5[%c0_7, %c0_8] : memref<128x384xbf16, #tpu.memory_space<vmem>>, vector<128x384xbf16>
    %cst_9 = arith.constant dense<0.000000e+00> : vector<128x384xf32>
    %13 = tpu.matmul %11, %12, %cst_9 {dimension_numbers = #tpu.dot_dimension_numbers<[1], [0], [0], [1], [0, 0, 1, 1], [], []>} : vector<128x128xbf16>, vector<128x384xbf16>, vector<128x384xf32> -> vector<128x384xf32>
    %c0_10 = arith.constant 0 : index
    %c0_11 = arith.constant 0 : index
    %14 = vector.load %arg6[%c0_10, %c0_11] : memref<1x384xf32, #tpu.memory_space<vmem>>, vector<1x384xf32>
    %15 = vector.broadcast %14 : vector<1x384xf32> to vector<128x384xf32>
    %16 = arith.addf %13, %15 : vector<128x384xf32>
    %17 = arith.truncf %16 : vector<128x384xf32> to vector<128x384xbf16>
    %18 = vector.shape_cast %17 : vector<128x384xbf16> to vector<8x16x384xbf16>
    %c0_12 = arith.constant 0 : index
    %c0_13 = arith.constant 0 : index
    %c0_14 = arith.constant 0 : index
    %19 = vector.load %arg4[%c0_12, %c0_13, %c0_14] : memref<1x1x16xf32, #tpu.memory_space<vmem>>, vector<1x1x16xf32>
    %20 = vector.extract_strided_slice %18 {offsets = [0, 0, 0], sizes = [8, 16, 32], strides = [1, 1, 1]} : vector<8x16x384xbf16> to vector<8x16x32xbf16>
    %21 = vector.extract_strided_slice %18 {offsets = [0, 0, 128], sizes = [8, 16, 32], strides = [1, 1, 1]} : vector<8x16x384xbf16> to vector<8x16x32xbf16>
    %22 = vector.extract_strided_slice %18 {offsets = [0, 0, 256], sizes = [8, 16, 32], strides = [1, 1, 1]} : vector<8x16x384xbf16> to vector<8x16x32xbf16>
    "tpu.trace_start"() <{level = 10 : i32, message = "bqd,bkd->bqk"}> : () -> ()
    %cst_15 = arith.constant dense<0.000000e+00> : vector<8x16x16xf32>
    %23 = tpu.matmul %20, %21, %cst_15 {dimension_numbers = #tpu.dot_dimension_numbers<[2], [2], [1], [1], [0, 0, 0, 1, 1, 1], [0], [0]>} : vector<8x16x32xbf16>, vector<8x16x32xbf16>, vector<8x16x16xf32> -> vector<8x16x16xf32>
    "tpu.trace_stop"() : () -> ()
    %cst_16 = arith.constant 0.176776692 : f32
    %24 = vector.broadcast %cst_16 : f32 to vector<8x16x16xf32>
    %25 = arith.mulf %23, %24 : vector<8x16x16xf32>
    %26 = vector.broadcast %19 : vector<1x1x16xf32> to vector<8x16x16xf32>
    %27 = arith.addf %25, %26 : vector<8x16x16xf32>
    %cst_17 = arith.constant dense<0xFF800000> : vector<8x16xf32>
    %28 = vector.multi_reduction <maximumf>, %27, %cst_17 [2] : vector<8x16x16xf32> to vector<8x16xf32>
    %29 = vector.shape_cast %28 : vector<8x16xf32> to vector<8x16x1xf32>
    %30 = vector.broadcast %29 : vector<8x16x1xf32> to vector<8x16x16xf32>
    %31 = arith.subf %27, %30 : vector<8x16x16xf32>
    %32 = math.exp %31 : vector<8x16x16xf32>
    %cst_18 = arith.constant dense<0.000000e+00> : vector<8x16xf32>
    %33 = vector.multi_reduction <add>, %32, %cst_18 [2] : vector<8x16x16xf32> to vector<8x16xf32>
    %34 = vector.shape_cast %33 : vector<8x16xf32> to vector<8x16x1xf32>
    %35 = tpu.reciprocal %34 {approx = true} : vector<8x16x1xf32> -> vector<8x16x1xf32>
    %36 = vector.broadcast %35 : vector<8x16x1xf32> to vector<8x16x16xf32>
    %37 = arith.mulf %32, %36 : vector<8x16x16xf32>
    %38 = arith.truncf %37 : vector<8x16x16xf32> to vector<8x16x16xbf16>
    "tpu.trace_start"() <{level = 10 : i32, message = "bqk,bkd->bqd"}> : () -> ()
    %cst_19 = arith.constant dense<0.000000e+00> : vector<8x16x32xf32>
    %39 = tpu.matmul %38, %22, %cst_19 {dimension_numbers = #tpu.dot_dimension_numbers<[2], [1], [1], [2], [0, 0, 0, 1, 1, 2], [0], [0]>} : vector<8x16x16xbf16>, vector<8x16x32xbf16>, vector<8x16x32xf32> -> vector<8x16x32xf32>
    "tpu.trace_stop"() : () -> ()
    %40 = vector.shape_cast %39 : vector<8x16x32xf32> to vector<128x32xf32>
    %c0_20 = arith.constant 0 : index
    %c0_21 = arith.constant 0 : index
    %41 = vector.load %arg20[%c0_20, %c0_21] : memref<128x128xf32, #tpu.memory_space<vmem>>, vector<128x32xf32>
    tpu.vector_store %arg20[%c0_20, %c0_21], %40 {strides = array<i32>} : memref<128x128xf32, #tpu.memory_space<vmem>>, vector<128x32xf32>,
    %42 = vector.extract_strided_slice %18 {offsets = [0, 0, 32], sizes = [8, 16, 32], strides = [1, 1, 1]} : vector<8x16x384xbf16> to vector<8x16x32xbf16>
    %43 = vector.extract_strided_slice %18 {offsets = [0, 0, 160], sizes = [8, 16, 32], strides = [1, 1, 1]} : vector<8x16x384xbf16> to vector<8x16x32xbf16>
    %44 = vector.extract_strided_slice %18 {offsets = [0, 0, 288], sizes = [8, 16, 32], strides = [1, 1, 1]} : vector<8x16x384xbf16> to vector<8x16x32xbf16>
    "tpu.trace_start"() <{level = 10 : i32, message = "bqd,bkd->bqk"}> : () -> ()
    %cst_22 = arith.constant dense<0.000000e+00> : vector<8x16x16xf32>
    %45 = tpu.matmul %42, %43, %cst_22 {dimension_numbers = #tpu.dot_dimension_numbers<[2], [2], [1], [1], [0, 0, 0, 1, 1, 1], [0], [0]>} : vector<8x16x32xbf16>, vector<8x16x32xbf16>, vector<8x16x16xf32> -> vector<8x16x16xf32>
    "tpu.trace_stop"() : () -> ()
    %cst_23 = arith.constant 0.176776692 : f32
    %46 = vector.broadcast %cst_23 : f32 to vector<8x16x16xf32>
    %47 = arith.mulf %45, %46 : vector<8x16x16xf32>
    %48 = vector.broadcast %19 : vector<1x1x16xf32> to vector<8x16x16xf32>
    %49 = arith.addf %47, %48 : vector<8x16x16xf32>
    %cst_24 = arith.constant dense<0xFF800000> : vector<8x16xf32>
    %50 = vector.multi_reduction <maximumf>, %49, %cst_24 [2] : vector<8x16x16xf32> to vector<8x16xf32>
    %51 = vector.shape_cast %50 : vector<8x16xf32> to vector<8x16x1xf32>
    %52 = vector.broadcast %51 : vector<8x16x1xf32> to vector<8x16x16xf32>
    %53 = arith.subf %49, %52 : vector<8x16x16xf32>
    %54 = math.exp %53 : vector<8x16x16xf32>
    %cst_25 = arith.constant dense<0.000000e+00> : vector<8x16xf32>
    %55 = vector.multi_reduction <add>, %54, %cst_25 [2] : vector<8x16x16xf32> to vector<8x16xf32>
    %56 = vector.shape_cast %55 : vector<8x16xf32> to vector<8x16x1xf32>
    %57 = tpu.reciprocal %56 {approx = true} : vector<8x16x1xf32> -> vector<8x16x1xf32>
    %58 = vector.broadcast %57 : vector<8x16x1xf32> to vector<8x16x16xf32>
    %59 = arith.mulf %54, %58 : vector<8x16x16xf32>
    %60 = arith.truncf %59 : vector<8x16x16xf32> to vector<8x16x16xbf16>
    "tpu.trace_start"() <{level = 10 : i32, message = "bqk,bkd->bqd"}> : () -> ()
    %cst_26 = arith.constant dense<0.000000e+00> : vector<8x16x32xf32>
    %61 = tpu.matmul %60, %44, %cst_26 {dimension_numbers = #tpu.dot_dimension_numbers<[2], [1], [1], [2], [0, 0, 0, 1, 1, 2], [0], [0]>} : vector<8x16x16xbf16>, vector<8x16x32xbf16>, vector<8x16x32xf32> -> vector<8x16x32xf32>
    "tpu.trace_stop"() : () -> ()
    %62 = vector.shape_cast %61 : vector<8x16x32xf32> to vector<128x32xf32>
    %c0_27 = arith.constant 0 : index
    %c32 = arith.constant 32 : index
    %63 = vector.load %arg20[%c0_27, %c32] : memref<128x128xf32, #tpu.memory_space<vmem>>, vector<128x32xf32>
    tpu.vector_store %arg20[%c0_27, %c32], %62 {strides = array<i32>} : memref<128x128xf32, #tpu.memory_space<vmem>>, vector<128x32xf32>,
    %64 = vector.extract_strided_slice %18 {offsets = [0, 0, 64], sizes = [8, 16, 32], strides = [1, 1, 1]} : vector<8x16x384xbf16> to vector<8x16x32xbf16>
    %65 = vector.extract_strided_slice %18 {offsets = [0, 0, 192], sizes = [8, 16, 32], strides = [1, 1, 1]} : vector<8x16x384xbf16> to vector<8x16x32xbf16>
    %66 = vector.extract_strided_slice %18 {offsets = [0, 0, 320], sizes = [8, 16, 32], strides = [1, 1, 1]} : vector<8x16x384xbf16> to vector<8x16x32xbf16>
    "tpu.trace_start"() <{level = 10 : i32, message = "bqd,bkd->bqk"}> : () -> ()
    %cst_28 = arith.constant dense<0.000000e+00> : vector<8x16x16xf32>
    %67 = tpu.matmul %64, %65, %cst_28 {dimension_numbers = #tpu.dot_dimension_numbers<[2], [2], [1], [1], [0, 0, 0, 1, 1, 1], [0], [0]>} : vector<8x16x32xbf16>, vector<8x16x32xbf16>, vector<8x16x16xf32> -> vector<8x16x16xf32>
    "tpu.trace_stop"() : () -> ()
    %cst_29 = arith.constant 0.176776692 : f32
    %68 = vector.broadcast %cst_29 : f32 to vector<8x16x16xf32>
    %69 = arith.mulf %67, %68 : vector<8x16x16xf32>
    %70 = vector.broadcast %19 : vector<1x1x16xf32> to vector<8x16x16xf32>
    %71 = arith.addf %69, %70 : vector<8x16x16xf32>
    %cst_30 = arith.constant dense<0xFF800000> : vector<8x16xf32>
    %72 = vector.multi_reduction <maximumf>, %71, %cst_30 [2] : vector<8x16x16xf32> to vector<8x16xf32>
    %73 = vector.shape_cast %72 : vector<8x16xf32> to vector<8x16x1xf32>
    %74 = vector.broadcast %73 : vector<8x16x1xf32> to vector<8x16x16xf32>
    %75 = arith.subf %71, %74 : vector<8x16x16xf32>
    %76 = math.exp %75 : vector<8x16x16xf32>
    %cst_31 = arith.constant dense<0.000000e+00> : vector<8x16xf32>
    %77 = vector.multi_reduction <add>, %76, %cst_31 [2] : vector<8x16x16xf32> to vector<8x16xf32>
    %78 = vector.shape_cast %77 : vector<8x16xf32> to vector<8x16x1xf32>
    %79 = tpu.reciprocal %78 {approx = true} : vector<8x16x1xf32> -> vector<8x16x1xf32>
    %80 = vector.broadcast %79 : vector<8x16x1xf32> to vector<8x16x16xf32>
    %81 = arith.mulf %76, %80 : vector<8x16x16xf32>
    %82 = arith.truncf %81 : vector<8x16x16xf32> to vector<8x16x16xbf16>
    "tpu.trace_start"() <{level = 10 : i32, message = "bqk,bkd->bqd"}> : () -> ()
    %cst_32 = arith.constant dense<0.000000e+00> : vector<8x16x32xf32>
    %83 = tpu.matmul %82, %66, %cst_32 {dimension_numbers = #tpu.dot_dimension_numbers<[2], [1], [1], [2], [0, 0, 0, 1, 1, 2], [0], [0]>} : vector<8x16x16xbf16>, vector<8x16x32xbf16>, vector<8x16x32xf32> -> vector<8x16x32xf32>
    "tpu.trace_stop"() : () -> ()
    %84 = vector.shape_cast %83 : vector<8x16x32xf32> to vector<128x32xf32>
    %c0_33 = arith.constant 0 : index
    %c64 = arith.constant 64 : index
    %85 = vector.load %arg20[%c0_33, %c64] : memref<128x128xf32, #tpu.memory_space<vmem>>, vector<128x32xf32>
    tpu.vector_store %arg20[%c0_33, %c64], %84 {strides = array<i32>} : memref<128x128xf32, #tpu.memory_space<vmem>>, vector<128x32xf32>,
    %86 = vector.extract_strided_slice %18 {offsets = [0, 0, 96], sizes = [8, 16, 32], strides = [1, 1, 1]} : vector<8x16x384xbf16> to vector<8x16x32xbf16>
    %87 = vector.extract_strided_slice %18 {offsets = [0, 0, 224], sizes = [8, 16, 32], strides = [1, 1, 1]} : vector<8x16x384xbf16> to vector<8x16x32xbf16>
    %88 = vector.extract_strided_slice %18 {offsets = [0, 0, 352], sizes = [8, 16, 32], strides = [1, 1, 1]} : vector<8x16x384xbf16> to vector<8x16x32xbf16>
    "tpu.trace_start"() <{level = 10 : i32, message = "bqd,bkd->bqk"}> : () -> ()
    %cst_34 = arith.constant dense<0.000000e+00> : vector<8x16x16xf32>
    %89 = tpu.matmul %86, %87, %cst_34 {dimension_numbers = #tpu.dot_dimension_numbers<[2], [2], [1], [1], [0, 0, 0, 1, 1, 1], [0], [0]>} : vector<8x16x32xbf16>, vector<8x16x32xbf16>, vector<8x16x16xf32> -> vector<8x16x16xf32>
    "tpu.trace_stop"() : () -> ()
    %cst_35 = arith.constant 0.176776692 : f32
    %90 = vector.broadcast %cst_35 : f32 to vector<8x16x16xf32>
    %91 = arith.mulf %89, %90 : vector<8x16x16xf32>
    %92 = vector.broadcast %19 : vector<1x1x16xf32> to vector<8x16x16xf32>
    %93 = arith.addf %91, %92 : vector<8x16x16xf32>
    %cst_36 = arith.constant dense<0xFF800000> : vector<8x16xf32>
    %94 = vector.multi_reduction <maximumf>, %93, %cst_36 [2] : vector<8x16x16xf32> to vector<8x16xf32>
    %95 = vector.shape_cast %94 : vector<8x16xf32> to vector<8x16x1xf32>
    %96 = vector.broadcast %95 : vector<8x16x1xf32> to vector<8x16x16xf32>
    %97 = arith.subf %93, %96 : vector<8x16x16xf32>
    %98 = math.exp %97 : vector<8x16x16xf32>
    %cst_37 = arith.constant dense<0.000000e+00> : vector<8x16xf32>
    %99 = vector.multi_reduction <add>, %98, %cst_37 [2] : vector<8x16x16xf32> to vector<8x16xf32>
    %100 = vector.shape_cast %99 : vector<8x16xf32> to vector<8x16x1xf32>
    %101 = tpu.reciprocal %100 {approx = true} : vector<8x16x1xf32> -> vector<8x16x1xf32>
    %102 = vector.broadcast %101 : vector<8x16x1xf32> to vector<8x16x16xf32>
    %103 = arith.mulf %98, %102 : vector<8x16x16xf32>
    %104 = arith.truncf %103 : vector<8x16x16xf32> to vector<8x16x16xbf16>
    "tpu.trace_start"() <{level = 10 : i32, message = "bqk,bkd->bqd"}> : () -> ()
    %cst_38 = arith.constant dense<0.000000e+00> : vector<8x16x32xf32>
    %105 = tpu.matmul %104, %88, %cst_38 {dimension_numbers = #tpu.dot_dimension_numbers<[2], [1], [1], [2], [0, 0, 0, 1, 1, 2], [0], [0]>} : vector<8x16x16xbf16>, vector<8x16x32xbf16>, vector<8x16x32xf32> -> vector<8x16x32xf32>
    "tpu.trace_stop"() : () -> ()
    %106 = vector.shape_cast %105 : vector<8x16x32xf32> to vector<128x32xf32>
    %c0_39 = arith.constant 0 : index
    %c96 = arith.constant 96 : index
    %107 = vector.load %arg20[%c0_39, %c96] : memref<128x128xf32, #tpu.memory_space<vmem>>, vector<128x32xf32>
    tpu.vector_store %arg20[%c0_39, %c96], %106 {strides = array<i32>} : memref<128x128xf32, #tpu.memory_space<vmem>>, vector<128x32xf32>,
    %c0_40 = arith.constant 0 : index
    %c0_41 = arith.constant 0 : index
    %108 = vector.load %arg20[%c0_40, %c0_41] : memref<128x128xf32, #tpu.memory_space<vmem>>, vector<128x128xf32>
    %109 = arith.truncf %108 : vector<128x128xf32> to vector<128x128xbf16>
    %c0_42 = arith.constant 0 : index
    %c0_43 = arith.constant 0 : index
    %110 = vector.load %arg7[%c0_42, %c0_43] : memref<128x128xbf16, #tpu.memory_space<vmem>>, vector<128x128xbf16>
    %cst_44 = arith.constant dense<0.000000e+00> : vector<128x128xf32>
    %111 = tpu.matmul %109, %110, %cst_44 {dimension_numbers = #tpu.dot_dimension_numbers<[1], [0], [0], [1], [0, 0, 1, 1], [], []>} : vector<128x128xbf16>, vector<128x128xbf16>, vector<128x128xf32> -> vector<128x128xf32>
    %c0_45 = arith.constant 0 : index
    %c0_46 = arith.constant 0 : index
    %112 = vector.load %arg8[%c0_45, %c0_46] : memref<1x128xf32, #tpu.memory_space<vmem>>, vector<1x128xf32>
    %113 = vector.broadcast %112 : vector<1x128xf32> to vector<128x128xf32>
    %114 = arith.addf %111, %113 : vector<128x128xf32>
    %115 = arith.addf %10, %114 : vector<128x128xf32>
    %c0_47 = arith.constant 0 : index
    %c0_48 = arith.constant 0 : index
    %116 = vector.load %arg9[%c0_47, %c0_48] : memref<1x128xf32, #tpu.memory_space<vmem>>, vector<1x128xf32>
    %c0_49 = arith.constant 0 : index
    %c0_50 = arith.constant 0 : index
    %117 = vector.load %arg10[%c0_49, %c0_50] : memref<1x128xf32, #tpu.memory_space<vmem>>, vector<1x128xf32>
    %cst_51 = arith.constant dense<0.000000e+00> : vector<128xf32>
    %118 = vector.multi_reduction <add>, %115, %cst_51 [1] : vector<128x128xf32> to vector<128xf32>
    %119 = vector.shape_cast %118 : vector<128xf32> to vector<128x1xf32>
    %cst_52 = arith.constant 1.280000e+02 : f32
    %120 = vector.broadcast %cst_52 : f32 to vector<128x1xf32>
    %121 = arith.divf %119, %120 : vector<128x1xf32>
    %122 = vector.broadcast %121 : vector<128x1xf32> to vector<128x128xf32>
    %123 = arith.subf %115, %122 : vector<128x128xf32>
    %124 = arith.mulf %123, %123 : vector<128x128xf32>
    %cst_53 = arith.constant dense<0.000000e+00> : vector<128xf32>
    %125 = vector.multi_reduction <add>, %124, %cst_53 [1] : vector<128x128xf32> to vector<128xf32>
    %126 = vector.shape_cast %125 : vector<128xf32> to vector<128x1xf32>
    %cst_54 = arith.constant 1.280000e+02 : f32
    %127 = vector.broadcast %cst_54 : f32 to vector<128x1xf32>
    %128 = arith.divf %126, %127 : vector<128x1xf32>
    %cst_55 = arith.constant 9.99999974E-6 : f32
    %129 = vector.broadcast %cst_55 : f32 to vector<128x1xf32>
    %130 = arith.addf %128, %129 : vector<128x1xf32>
    %131 = math.rsqrt %130 : vector<128x1xf32>
    %132 = vector.broadcast %131 : vector<128x1xf32> to vector<128x128xf32>
    %133 = arith.mulf %123, %132 : vector<128x128xf32>
    %134 = vector.broadcast %116 : vector<1x128xf32> to vector<128x128xf32>
    %135 = arith.mulf %133, %134 : vector<128x128xf32>
    %136 = vector.broadcast %117 : vector<1x128xf32> to vector<128x128xf32>
    %137 = arith.addf %135, %136 : vector<128x128xf32>
    %138 = arith.truncf %137 : vector<128x128xf32> to vector<128x128xbf16>
    %c0_56 = arith.constant 0 : index
    %c0_57 = arith.constant 0 : index
    %139 = vector.load %arg11[%c0_56, %c0_57] : memref<128x512xbf16, #tpu.memory_space<vmem>>, vector<128x512xbf16>
    %cst_58 = arith.constant dense<0.000000e+00> : vector<128x512xf32>
    %140 = tpu.matmul %138, %139, %cst_58 {dimension_numbers = #tpu.dot_dimension_numbers<[1], [0], [0], [1], [0, 0, 1, 1], [], []>} : vector<128x128xbf16>, vector<128x512xbf16>, vector<128x512xf32> -> vector<128x512xf32>
    %c0_59 = arith.constant 0 : index
    %c0_60 = arith.constant 0 : index
    %141 = vector.load %arg12[%c0_59, %c0_60] : memref<1x512xf32, #tpu.memory_space<vmem>>, vector<1x512xf32>
    %142 = vector.broadcast %141 : vector<1x512xf32> to vector<128x512xf32>
    %143 = arith.addf %140, %142 : vector<128x512xf32>
    %cst_61 = arith.constant 0.000000e+00 : f32
    %144 = vector.broadcast %cst_61 : f32 to vector<128x512xf32>
    %145 = arith.maximumf %143, %144 : vector<128x512xf32>
    %146 = arith.truncf %145 : vector<128x512xf32> to vector<128x512xbf16>
    %c0_62 = arith.constant 0 : index
    %c0_63 = arith.constant 0 : index
    %147 = vector.load %arg13[%c0_62, %c0_63] : memref<512x128xbf16, #tpu.memory_space<vmem>>, vector<512x128xbf16>
    %cst_64 = arith.constant dense<0.000000e+00> : vector<128x128xf32>
    %148 = tpu.matmul %146, %147, %cst_64 {dimension_numbers = #tpu.dot_dimension_numbers<[1], [0], [0], [1], [0, 0, 1, 1], [], []>} : vector<128x512xbf16>, vector<512x128xbf16>, vector<128x128xf32> -> vector<128x128xf32>
    %c0_65 = arith.constant 0 : index
    %c0_66 = arith.constant 0 : index
    %149 = vector.load %arg14[%c0_65, %c0_66] : memref<1x128xf32, #tpu.memory_space<vmem>>, vector<1x128xf32>
    %150 = vector.broadcast %149 : vector<1x128xf32> to vector<128x128xf32>
    %151 = arith.addf %148, %150 : vector<128x128xf32>
    %152 = arith.addf %137, %151 : vector<128x128xf32>
    %c0_67 = arith.constant 0 : index
    %c0_68 = arith.constant 0 : index
    %153 = vector.load %arg15[%c0_67, %c0_68] : memref<1x128xf32, #tpu.memory_space<vmem>>, vector<1x128xf32>
    %c0_69 = arith.constant 0 : index
    %c0_70 = arith.constant 0 : index
    %154 = vector.load %arg16[%c0_69, %c0_70] : memref<1x128xf32, #tpu.memory_space<vmem>>, vector<1x128xf32>
    %cst_71 = arith.constant dense<0.000000e+00> : vector<128xf32>
    %155 = vector.multi_reduction <add>, %152, %cst_71 [1] : vector<128x128xf32> to vector<128xf32>
    %156 = vector.shape_cast %155 : vector<128xf32> to vector<128x1xf32>
    %cst_72 = arith.constant 1.280000e+02 : f32
    %157 = vector.broadcast %cst_72 : f32 to vector<128x1xf32>
    %158 = arith.divf %156, %157 : vector<128x1xf32>
    %159 = vector.broadcast %158 : vector<128x1xf32> to vector<128x128xf32>
    %160 = arith.subf %152, %159 : vector<128x128xf32>
    %161 = arith.mulf %160, %160 : vector<128x128xf32>
    %cst_73 = arith.constant dense<0.000000e+00> : vector<128xf32>
    %162 = vector.multi_reduction <add>, %161, %cst_73 [1] : vector<128x128xf32> to vector<128xf32>
    %163 = vector.shape_cast %162 : vector<128xf32> to vector<128x1xf32>
    %cst_74 = arith.constant 1.280000e+02 : f32
    %164 = vector.broadcast %cst_74 : f32 to vector<128x1xf32>
    %165 = arith.divf %163, %164 : vector<128x1xf32>
    %cst_75 = arith.constant 9.99999974E-6 : f32
    %166 = vector.broadcast %cst_75 : f32 to vector<128x1xf32>
    %167 = arith.addf %165, %166 : vector<128x1xf32>
    %168 = math.rsqrt %167 : vector<128x1xf32>
    %169 = vector.broadcast %168 : vector<128x1xf32> to vector<128x128xf32>
    %170 = arith.mulf %160, %169 : vector<128x128xf32>
    %171 = vector.broadcast %153 : vector<1x128xf32> to vector<128x128xf32>
    %172 = arith.mulf %170, %171 : vector<128x128xf32>
    %173 = vector.broadcast %154 : vector<1x128xf32> to vector<128x128xf32>
    %174 = arith.addf %172, %173 : vector<128x128xf32>
    %175 = arith.truncf %174 : vector<128x128xf32> to vector<128x128xbf16>
    %c0_76 = arith.constant 0 : index
    %c0_77 = arith.constant 0 : index
    %176 = vector.load %arg17[%c0_76, %c0_77] : memref<128x128xbf16, #tpu.memory_space<vmem>>, vector<128x128xbf16>
    %cst_78 = arith.constant dense<0.000000e+00> : vector<128x128xf32>
    %177 = tpu.matmul %175, %176, %cst_78 {dimension_numbers = #tpu.dot_dimension_numbers<[1], [0], [0], [1], [0, 0, 1, 1], [], []>} : vector<128x128xbf16>, vector<128x128xbf16>, vector<128x128xf32> -> vector<128x128xf32>
    %c0_79 = arith.constant 0 : index
    %c0_80 = arith.constant 0 : index
    %178 = vector.load %arg18[%c0_79, %c0_80] : memref<1x128xf32, #tpu.memory_space<vmem>>, vector<1x128xf32>
    %179 = vector.broadcast %178 : vector<1x128xf32> to vector<128x128xf32>
    %180 = arith.addf %177, %179 : vector<128x128xf32>
    %c0_81 = arith.constant 0 : index
    %c0_82 = arith.constant 0 : index
    %181 = vector.load %arg19[%c0_81, %c0_82] : memref<128x128xf32, #tpu.memory_space<vmem>>, vector<128x128xf32>
    tpu.vector_store %arg19[%c0_81, %c0_82], %180 {strides = array<i32>} : memref<128x128xf32, #tpu.memory_space<vmem>>, vector<128x128xf32>,
    return
  }
  func.func @transform_0(%arg0: i32) -> (i32, i32) {
    %c0_i32 = arith.constant 0 : i32
    %c0_i32_0 = arith.constant 0 : i32
    return %arg0, %c0_i32 : i32, i32
  }
  func.func @transform_1(%arg0: i32) -> (i32, i32) {
    %c0_i32 = arith.constant 0 : i32
    %c0_i32_0 = arith.constant 0 : i32
    %c0_i32_1 = arith.constant 0 : i32
    return %c0_i32, %c0_i32_0 : i32, i32
  }
  func.func @transform_2(%arg0: i32) -> (i32, i32) {
    %c0_i32 = arith.constant 0 : i32
    %c0_i32_0 = arith.constant 0 : i32
    %c0_i32_1 = arith.constant 0 : i32
    return %c0_i32, %c0_i32_0 : i32, i32
  }
  func.func @transform_3(%arg0: i32) -> (i32, i32, i32) {
    %c0_i32 = arith.constant 0 : i32
    %c0_i32_0 = arith.constant 0 : i32
    %c0_i32_1 = arith.constant 0 : i32
    %c0_i32_2 = arith.constant 0 : i32
    return %c0_i32, %c0_i32_0, %c0_i32_1 : i32, i32, i32
  }
  func.func @transform_4(%arg0: i32) -> (i32, i32) {
    %c0_i32 = arith.constant 0 : i32
    %c0_i32_0 = arith.constant 0 : i32
    %c0_i32_1 = arith.constant 0 : i32
    return %c0_i32, %c0_i32_0 : i32, i32
  }
  func.func @transform_5(%arg0: i32) -> (i32, i32) {
    %c0_i32 = arith.constant 0 : i32
    %c0_i32_0 = arith.constant 0 : i32
    %c0_i32_1 = arith.constant 0 : i32
    return %c0_i32, %c0_i32_0 : i32, i32
  }
  func.func @transform_6(%arg0: i32) -> (i32, i32) {
    %c0_i32 = arith.constant 0 : i32
    %c0_i32_0 = arith.constant 0 : i32
    %c0_i32_1 = arith.constant 0 : i32
    return %c0_i32, %c0_i32_0 : i32, i32
  }
  func.func @transform_7(%arg0: i32) -> (i32, i32) {
    %c0_i32 = arith.constant 0 : i32
    %c0_i32_0 = arith.constant 0 : i32
    %c0_i32_1 = arith.constant 0 : i32
    return %c0_i32, %c0_i32_0 : i32, i32
  }
  func.func @transform_8(%arg0: i32) -> (i32, i32) {
    %c0_i32 = arith.constant 0 : i32
    %c0_i32_0 = arith.constant 0 : i32
    %c0_i32_1 = arith.constant 0 : i32
    return %c0_i32, %c0_i32_0 : i32, i32
  }
  func.func @transform_9(%arg0: i32) -> (i32, i32) {
    %c0_i32 = arith.constant 0 : i32
    %c0_i32_0 = arith.constant 0 : i32
    %c0_i32_1 = arith.constant 0 : i32
    return %c0_i32, %c0_i32_0 : i32, i32
  }
  func.func @transform_10(%arg0: i32) -> (i32, i32) {
    %c0_i32 = arith.constant 0 : i32
    %c0_i32_0 = arith.constant 0 : i32
    %c0_i32_1 = arith.constant 0 : i32
    return %c0_i32, %c0_i32_0 : i32, i32
  }
  func.func @transform_11(%arg0: i32) -> (i32, i32) {
    %c0_i32 = arith.constant 0 : i32
    %c0_i32_0 = arith.constant 0 : i32
    %c0_i32_1 = arith.constant 0 : i32
    return %c0_i32, %c0_i32_0 : i32, i32
  }
  func.func @transform_12(%arg0: i32) -> (i32, i32) {
    %c0_i32 = arith.constant 0 : i32
    %c0_i32_0 = arith.constant 0 : i32
    %c0_i32_1 = arith.constant 0 : i32
    return %c0_i32, %c0_i32_0 : i32, i32
  }
  func.func @transform_13(%arg0: i32) -> (i32, i32) {
    %c0_i32 = arith.constant 0 : i32
    %c0_i32_0 = arith.constant 0 : i32
    %c0_i32_1 = arith.constant 0 : i32
    return %c0_i32, %c0_i32_0 : i32, i32
  }
  func.func @transform_14(%arg0: i32) -> (i32, i32) {
    %c0_i32 = arith.constant 0 : i32
    %c0_i32_0 = arith.constant 0 : i32
    %c0_i32_1 = arith.constant 0 : i32
    return %c0_i32, %c0_i32_0 : i32, i32
  }
  func.func @transform_15(%arg0: i32) -> (i32, i32) {
    %c0_i32 = arith.constant 0 : i32
    %c0_i32_0 = arith.constant 0 : i32
    %c0_i32_1 = arith.constant 0 : i32
    return %c0_i32, %c0_i32_0 : i32, i32
  }
  func.func @transform_16(%arg0: i32) -> (i32, i32) {
    %c0_i32 = arith.constant 0 : i32
    %c0_i32_0 = arith.constant 0 : i32
    %c0_i32_1 = arith.constant 0 : i32
    return %c0_i32, %c0_i32_0 : i32, i32
  }
  func.func @transform_17(%arg0: i32) -> (i32, i32) {
    %c0_i32 = arith.constant 0 : i32
    %c0_i32_0 = arith.constant 0 : i32
    %c0_i32_1 = arith.constant 0 : i32
    return %c0_i32, %c0_i32_0 : i32, i32
  }
  func.func @transform_18(%arg0: i32) -> (i32, i32) {
    %c0_i32 = arith.constant 0 : i32
    %c0_i32_0 = arith.constant 0 : i32
    return %arg0, %c0_i32 : i32, i32
  }
}

</mosaic_0001>

<bundles_post_ra>
// kernel: fdm_forward.1
= control target key start
LH: loop header
LB: loop body
LE: loop exit
PB: predicated region body
PF: predicated region fallthrough
CT: control target
= control target key end

     0   :  { %s7239_s27 = smov 0   ;;  %s10176_s0 = inlined_call_operand.vmem [shape: f32[256,64], index: 0, kind: input, shape index: {}]   ;;  %s10177_s1 = inlined_call_operand.vmem [shape: bf16[64,128], index: 1, kind: input, shape index: {}]   ;;  %s10178_s2 = inlined_call_operand.vmem [shape: f32[128,128], index: 2, kind: input, shape index: {}]   ;;  %s10179_s3 = inlined_call_operand.vmem [shape: f32[1,1,16], index: 3, kind: input, shape index: {}]   ;;  %s10180_s4 = inlined_call_operand.vmem [shape: bf16[128,384], index: 4, kind: input, shape index: {}]   ;;  %s10181_s5 = inlined_call_operand.vmem [shape: f32[1,384], index: 5, kind: input, shape index: {}]   ;;  %s10182_s6 = inlined_call_operand.vmem [shape: bf16[128,128], index: 6, kind: input, shape index: {}]   ;;  %s10183_s7 = inlined_call_operand.vmem [shape: f32[1,128], index: 7, kind: input, shape index: {}]   ;;  %s10184_s8 = inlined_call_operand.vmem [shape: f32[1,128], index: 8, kind: input, shape index: {}]   ;;  %s10185_s9 = inlined_call_operand.vmem [shape: f32[1,128], index: 9, kind: input, shape index: {}]   ;;  %s10186_s10 = inlined_call_operand.vmem [shape: bf16[128,512], index: 10, kind: input, shape index: {}]   ;;  %s10187_s11 = inlined_call_operand.vmem [shape: f32[1,512], index: 11, kind: input, shape index: {}]   ;;  %s10188_s12 = inlined_call_operand.vmem [shape: bf16[512,128], index: 12, kind: input, shape index: {}]   ;;  %s10189_s13 = inlined_call_operand.vmem [shape: f32[1,128], index: 13, kind: input, shape index: {}]   ;;  %s10190_s14 = inlined_call_operand.vmem [shape: f32[1,128], index: 14, kind: input, shape index: {}]   ;;  %s10191_s15 = inlined_call_operand.vmem [shape: f32[1,128], index: 15, kind: input, shape index: {}]   ;;  %s10192_s16 = inlined_call_operand.vmem [shape: bf16[128,128], index: 16, kind: input, shape index: {}]   ;;  %s10193_s17 = inlined_call_operand.vmem [shape: f32[1,128], index: 17, kind: input, shape index: {}]   ;;  %s10194_s18 = inlined_call_operand.vmem [shape: f32[256,128], index: 18, kind: output, shape index: {}]  }
   0x1   :  { %10244 = sst [smem:[#allocation44_spill]] %s10176_s0 }
   0x2   :  { %10245 = sst [smem:[#allocation45_spill]] %s10177_s1 }
   0x3   :  { %10246 = sst [smem:[#allocation46_spill]] %s10178_s2 }
   0x4 LB: > { %s6153_s28 = sadd.s32 4294967295, %s7138_s27   ;;  %p6157_p0 = scmp.ge.s32.totalorder %s7138_s27, 1  ;;  %s7138_s27 = sphi %s7239_s27, %s28_s27  }
   0x5   : > { %p513_p1 = scmp.lt.s32.totalorder %s7138_s27, 3 }
   0x7   : > { %p514_p2 = pnand %p6157_p0, %p513_p1 }
   0x9   : > { %517 = sbr.rel (%p514_p2) target bundleno = 4064 (0xfe0), region = 92 }
   0xe   : > { %s10247_s0 = sld [smem:[#allocation45_spill]]  ;;  %s6158_s19 = sshll.u32 %s6153_s28, 4  ;;  %vm652_vm0 = vcmask 523264   ;;  %v6272_v13 = vld [vmem:[%s10180_s4 + $0xa8] sm:$0xf] }
   0xf   : > { %p568_p3 = scmp.lt.s32.totalorder %s6158_s19, 31  ;;  %s10248_s25 = sld [smem:[#allocation44_spill]]  ;;  %v6694_v14 = vld [vmem:[%s10180_s4 + $0xb0] sm:$0xf0]  ;;  %v6693_v15 = vld [vmem:[%s10180_s4 + $0xac] sm:$0xf] }
  0x10   : > { %v6273_v16 = vor.u32 %v6694_v14, %v6272_v13  ;;  %v6274_v17 = vld [vmem:[%s10180_s4 + $0xb4] sm:$0xf0]  ;;  %v6260_v25 = vld [vmem:[%s10180_s4 + $0x90] sm:$0xf]  ;;  %v6691_v26 = vld [vmem:[%s10180_s4 + $0x98] sm:$0xf0] }
  0x11   : > { %s10353_s19 = smov (!%p568_p3, %s6158_s19), 31  ;;  %v6277_v18 = vor.u32 %v6693_v15, %v6274_v17  ;;  %v6690_v27 = vld [vmem:[%s10180_s4 + $0x94] sm:$0xf]  ;;  %v6261_v28 = vor.u32 %v6691_v26, %v6260_v25  ;;  %v6262_v29 = vld [vmem:[%s10180_s4 + $0x9c] sm:$0xf0]  ;;  %s7140_s28 = smov 96  }
  0x12   : > { %s10243_s21 = sshll.u32 %s10353_s19, 3  ;;  %v6248_v30 = vld [vmem:[%s10180_s4 + $0x78] sm:$0xf]  ;;  %v6688_v31 = vld [vmem:[%s10180_s4 + $0x80] sm:$0xf0]  ;;  %v6265_v32 = vor.u32 %v6690_v27, %v6262_v29  ;;  %s7141_s30 = smov 64  }
  0x13   : > { %999 = vmatpush.bf16.msra.mxu2 %v6277_v18  ;;  %v6687_v33 = vld [vmem:[%s10180_s4 + $0x7c] sm:$0xf]  ;;  %v6250_v34 = vld [vmem:[%s10180_s4 + $0x84] sm:$0xf0]  ;;  %v6249_v35 = vor.u32 %v6688_v31, %v6248_v30  ;;  %v6236_v37 = vld [vmem:[%s10180_s4 + $0x60] sm:$0xf] }
  0x14   : > { %v6671_v0 = vld [vmem:[%s10247_s0 + $0x18] sm:$0xff]  ;;  %v6670_v1 = vld [vmem:[%s10247_s0 + $0x10] sm:$0xff]  ;;  %v6669_v2 = vld [vmem:[%s10247_s0 + $0x8] sm:$0xff]  ;;  %v6253_v36 = vor.u32 %v6687_v33, %v6250_v34  ;;  %s7142_s22 = smov 32  }
  0x15   : > { %681 = vmatpush.bf16.msra.mxu0 %v6671_v0  ;;  %6776 = vmatpush.bf16.msra.mxu1 %v6671_v0  ;;  %s7264_s26 = scalar_lea.vmem %s10248_s25, %s10243_s21  ;;  %v6668_v3 = vld [vmem:[%s10247_s0] sm:$0xff]  ;;  %v6685_v38 = vld [vmem:[%s10180_s4 + $0x68] sm:$0xf0]  ;;  %v6238_v40 = vld [vmem:[%s10180_s4 + $0x6c] sm:$0xf0]  ;;  %s10249_s25 = sld [smem:[#allocation46_spill]] }
  0x16   : > { %v580_v4 = vld [vmem:[%s7264_s26] sm:$0xff]  ;;  %v581_v5 = vld [vmem:[%s7264_s26 + $0x8] sm:$0xff]  ;;  %v582_v7 = vld [vmem:[%s7264_s26 + $0x10] sm:$0xff]  ;;  %v6237_v43 = vor.u32 %v6685_v38, %v6236_v37 }
  0x17   : > { %v596_v6 = vpack.c.bf16 %v581_v5, %v580_v4  ;;  %v583_v8 = vld [vmem:[%s7264_s26 + $0x18] sm:$0xff]  ;;  %v588_v10 = vld [vmem:[%s7264_s26 + $0x40] sm:$0xff]  ;;  %v589_v11 = vld [vmem:[%s7264_s26 + $0x48] sm:$0xff]  ;;  %1000 = vmatpush.bf16.msra.mxu2 %v6265_v32 }
  0x18   : > { %v597_v9 = vpack.c.bf16 %v583_v8, %v582_v7  ;;  %v600_v12 = vpack.c.bf16 %v589_v11, %v588_v10  ;;  %v584_v19 = vld [vmem:[%s7264_s26 + $0x20] sm:$0xff]  ;;  %v585_v20 = vld [vmem:[%s7264_s26 + $0x28] sm:$0xff]  ;;  %v590_v22 = vld [vmem:[%s7264_s26 + $0x50] sm:$0xff] }
  0x19   : > { %682 = vmatpush.bf16.msra.mxu0 %v6670_v1  ;;  %6777 = vmatpush.bf16.msra.mxu1 %v6670_v1  ;;  %v598_v21 = vpack.c.bf16 %v585_v20, %v584_v19  ;;  %v591_v23 = vld [vmem:[%s7264_s26 + $0x58] sm:$0xff]  ;;  %v6684_v39 = vld [vmem:[%s10180_s4 + $0x64] sm:$0xf]  ;;  %v586_v41 = vld [vmem:[%s7264_s26 + $0x30] sm:$0xff] }
  0x1a   : > { %v601_v24 = vpack.c.bf16 %v591_v23, %v590_v22  ;;  %v587_v42 = vld [vmem:[%s7264_s26 + $0x38] sm:$0xff]  ;;  %v6241_v44 = vor.u32 %v6684_v39, %v6238_v40  ;;  %v592_v46 = vld [vmem:[%s7264_s26 + $0x60] sm:$0xff]  ;;  %v593_v47 = vld [vmem:[%s7264_s26 + $0x68] sm:$0xff] }
  0x1b   : > { %1001 = vmatpush.bf16.msra.mxu2 %v6253_v36  ;;  %v599_v45 = vpack.c.bf16 %v587_v42, %v586_v41  ;;  %v602_v48 = vpack.c.bf16 %v593_v47, %v592_v46  ;;  %v594_v49 = vld [vmem:[%s7264_s26 + $0x70] sm:$0xff]  ;;  %v595_v50 = vld [vmem:[%s7264_s26 + $0x78] sm:$0xff]  ;;  %v6224_v52 = vld [vmem:[%s10180_s4 + $0x48] sm:$0xf] }
  0x1c   : > { %v603_v51 = vpack.c.bf16 %v595_v50, %v594_v49  ;;  %v6682_v53 = vld [vmem:[%s10180_s4 + $0x50] sm:$0xf0]  ;;  %v6681_v54 = vld [vmem:[%s10180_s4 + $0x4c] sm:$0xf]  ;;  %v6226_v56 = vld [vmem:[%s10180_s4 + $0x54] sm:$0xf0] }
  0x1d   : > { %683 = vmatpush.bf16.msra.mxu0 %v6669_v2  ;;  %6778 = vmatpush.bf16.msra.mxu1 %v6669_v2  ;;  %v6225_v55 = vor.u32 %v6682_v53, %v6224_v52  ;;  %v6229_v57 = vor.u32 %v6681_v54, %v6226_v56  ;;  %v6212_v58 = vld [vmem:[%s10180_s4 + $0x30] sm:$0xf]  ;;  %v6679_v59 = vld [vmem:[%s10180_s4 + $0x38] sm:$0xf0]  ;;  %v6678_v60 = vld [vmem:[%s10180_s4 + $0x34] sm:$0xf] }
  0x1e   : > { %v6213_v61 = vor.u32 %v6679_v59, %v6212_v58  ;;  %v6214_v62 = vld [vmem:[%s10180_s4 + $0x3c] sm:$0xf0]  ;;  %v6200_v0 = vld [vmem:[%s10180_s4 + $0x18] sm:$0xf]  ;;  %v6676_v1 = vld [vmem:[%s10180_s4 + $0x20] sm:$0xf0] }
  0x1f   : > { %1002 = vmatpush.bf16.msra.mxu2 %v6241_v44  ;;  %v6217_v63 = vor.u32 %v6678_v60, %v6214_v62  ;;  %v6675_v2 = vld [vmem:[%s10180_s4 + $0x1c] sm:$0xf]  ;;  %v6202_v4 = vld [vmem:[%s10180_s4 + $0x24] sm:$0xf0]  ;;  %v6673_v7 = vld [vmem:[%s10180_s4 + $0x8] sm:$0xf0] }
  0x20   : > { %v6205_v5 = vor.u32 %v6675_v2, %v6202_v4  ;;  %v6672_v8 = vld [vmem:[%s10180_s4 + $0x4] sm:$0xf]  ;;  %v6190_v10 = vld [vmem:[%s10180_s4 + $0xc] sm:$0xf0]  ;;  %v6695_v13 = vld [vmem:[%s10180_s4 + $0xb8] sm:$0xf0] }
  0x21   : > { %684 = vmatpush.bf16.msra.mxu0 %v6668_v3  ;;  %6779 = vmatpush.bf16.msra.mxu1 %v6668_v3  ;;  %v6201_v3 = vor.u32 %v6676_v1, %v6200_v0  ;;  %v6193_v11 = vor.u32 %v6672_v8, %v6190_v10  ;;  %v6268_v17 = vld [vmem:[%s10180_s4 + $0x98] sm:$0xf]  ;;  %v6692_v18 = vld [vmem:[%s10180_s4 + $0xa0] sm:$0xf0]  ;;  %v6256_v22 = vld [vmem:[%s10180_s4 + $0x80] sm:$0xf] }
  0x22   : > { %v6269_v19 = vor.u32 %v6692_v18, %v6268_v17  ;;  %v6689_v23 = vld [vmem:[%s10180_s4 + $0x88] sm:$0xf0]  ;;  %v6686_v29 = vld [vmem:[%s10180_s4 + $0x70] sm:$0xf0]  ;;  %v6683_v36 = vld [vmem:[%s10180_s4 + $0x58] sm:$0xf0] }
  0x23   : > { %1003 = vmatpush.bf16.msra.mxu2 %v6229_v57  ;;  %v614_v39 = vld [vmem:[%s10249_s25 + $0x10] sm:$0xff]  ;;  %v6220_v40 = vld [vmem:[%s10180_s4 + $0x38] sm:$0xf]  ;;  %v6680_v41 = vld [vmem:[%s10180_s4 + $0x40] sm:$0xf0] }
  0x24   : > { %6178 = vmatmul.msk.bf16.vlgmr.msra.gmra.mxu0 %vm652_vm0, %v596_v6  ;;  %6182 = vmatmul.msk.bf16.vlgmr.msra.gmra.mxu1 %vm652_vm0, %v600_v12  ;;  %v6188_v6 = vld [vmem:[%s10180_s4] sm:$0xf]  ;;  %v6280_v12 = vld [vmem:[%s10180_s4 + $0xb0] sm:$0xf]  ;;  %v6221_v42 = vor.u32 %v6680_v41, %v6220_v40  ;;  %v615_v44 = vld [vmem:[%s10249_s25 + $0x18] sm:$0xff] }
  0x25   : > { %950 = vmatpush.bf16.msrb.mxu1 %v6273_v16  ;;  %v6281_v14 = vor.u32 %v6695_v13, %v6280_v12  ;;  %v612_v16 = vld [vmem:[%s10249_s25] sm:$0xff]  ;;  %v6677_v46 = vld [vmem:[%s10180_s4 + $0x28] sm:$0xf0]  ;;  %v6674_v52 = vld [vmem:[%s10180_s4 + $0x10] sm:$0xf0] }
  0x26   : > { %v616_v59 = vld [vmem:[%s10249_s25 + $0x20] sm:$0xff]  ;;  %v619_v10 = vld [vmem:[%s10249_s25 + $0x38] sm:$0xff] }
  0x27   : > { %1004 = vmatpush.bf16.msra.mxu2 %v6217_v63  ;;  %6780 = vmatpush.bf16.msra.mxu3 %v6281_v14 }
  0x29   : > { %951 = vmatpush.bf16.msrb.mxu1 %v6261_v28  ;;  %v6244_v28 = vld [vmem:[%s10180_s4 + $0x68] sm:$0xf] }
  0x2a   : > { %v6245_v31 = vor.u32 %v6686_v29, %v6244_v28  ;;  %v622_v28 = vld [vmem:[%s10249_s25 + $0x50] sm:$0xff] }
  0x2b   : > { %1005 = vmatpush.bf16.msra.mxu2 %v6205_v5  ;;  %6781 = vmatpush.bf16.msra.mxu3 %v6269_v19 }
  0x2d   : > { %952 = vmatpush.bf16.msrb.mxu1 %v6249_v35  ;;  %v6232_v35 = vld [vmem:[%s10180_s4 + $0x50] sm:$0xf] }
  0x2e   : > { %v6233_v37 = vor.u32 %v6683_v36, %v6232_v35 }
  0x2f   : > { %1006 = vmatpush.bf16.msra.mxu2 %v6193_v11 }
  0x31   : > { %953 = vmatpush.bf16.msrb.mxu1 %v6237_v43 }
  0x33   : > { %1048 = vmatpush.bf16.msrb.mxu2 %v6281_v14 }
  0x34   : > { %6179 = vmatmul.msk.bf16.gmra.mxu0 %vm652_vm0, %v597_v9  ;;  %6183 = vmatmul.msk.bf16.gmra.mxu1 %vm652_vm0, %v601_v24  ;;  %v6189_v9 = vor.u32 %v6673_v7, %v6188_v6  ;;  %v6257_v24 = vor.u32 %v6689_v23, %v6256_v22  ;;  %v618_v7 = vld [vmem:[%s10249_s25 + $0x30] sm:$0xff] }
  0x35   : > { %954 = vmatpush.bf16.msrb.mxu1 %v6225_v55 }
  0x36   : > { %6782 = vmatpush.bf16.msra.mxu3 %v6257_v24 }
  0x37   : > { %1049 = vmatpush.bf16.msrb.mxu2 %v6269_v19  ;;  %v620_v19 = vld [vmem:[%s10249_s25 + $0x40] sm:$0xff] }
  0x39   : > { %955 = vmatpush.bf16.msrb.mxu1 %v6213_v61  ;;  %v617_v61 = vld [vmem:[%s10249_s25 + $0x28] sm:$0xff] }
  0x3a   : > { %6783 = vmatpush.bf16.msra.mxu3 %v6245_v31 }
  0x3b   : > { %1050 = vmatpush.bf16.msrb.mxu2 %v6257_v24 }
  0x3d   : > { %956 = vmatpush.bf16.msrb.mxu1 %v6201_v3 }
  0x3e   : > { %6784 = vmatpush.bf16.msra.mxu3 %v6233_v37 }
  0x3f   : > { %1051 = vmatpush.bf16.msrb.mxu2 %v6245_v31 }
  0x41   : > { %957 = vmatpush.bf16.msrb.mxu1 %v6189_v9 }
  0x42   : > { %6785 = vmatpush.bf16.msra.mxu3 %v6221_v42 }
  0x43   : > { %1052 = vmatpush.bf16.msrb.mxu2 %v6233_v37 }
  0x44   : > { %6180 = vmatmul.msk.bf16.gmra.mxu0 %vm652_vm0, %v598_v21  ;;  %6184 = vmatmul.msk.bf16.gmra.mxu1 %vm652_vm0, %v602_v48  ;;  %v613_v21 = vld [vmem:[%s10249_s25 + $0x8] sm:$0xff] }
  0x47   : > { %1053 = vmatpush.bf16.msrb.mxu2 %v6221_v42 }
  0x54   : > { %6181 = vmatmul.msk.bf16.gmra.mxu0 %vm652_vm0, %v599_v45  ;;  %6185 = vmatmul.msk.bf16.gmra.mxu1 %vm652_vm0, %v603_v51  ;;  %v6208_v45 = vld [vmem:[%s10180_s4 + $0x20] sm:$0xf]  ;;  %v6196_v51 = vld [vmem:[%s10180_s4 + $0x8] sm:$0xf] }
  0x55   : > { %v6209_v47 = vor.u32 %v6677_v46, %v6208_v45  ;;  %v6197_v54 = vor.u32 %v6674_v52, %v6196_v51 }
  0x57   : > { %6786 = vmatpush.bf16.msra.mxu3 %v6209_v47  ;;  %1054 = vmatpush.bf16.msrb.mxu2 %v6209_v47 }
  0x5b   : > { %6787 = vmatpush.bf16.msra.mxu3 %v6197_v54  ;;  %1055 = vmatpush.bf16.msrb.mxu2 %v6197_v54  ;;  %v627_v54 = vld [vmem:[%s10249_s25 + $0x78] sm:$0xff] }
  0xa1   : > { %v686_v15 = vpop.f32.mrf.mxu0  ;;  %v706_v1 = vpop.f32.mrf.mxu1 }
  0xa2   : > { %v687_v20 = vadd.f32 %v686_v15, %v612_v16 }
  0xa4   : > { %v742_v26 = vmul.f32 0.01, %v687_v20  ;;  %vm726_vm1 = vcmp.gt.f32.partialorder %v687_v20, 0.0 }
  0xa6   : > { %v7419_v32 = vsel %vm726_vm1, %v687_v20, %v742_v26  ;;  %v621_v20 = vld [vmem:[%s10249_s25 + $0x48] sm:$0xff]  ;;  %vm1140_vm1 = vcmask 261120  }
  0xa7   : > { %10250 = vst [vmem:[#allocation3_spill] sm:$0xff] %v7419_v32 }
  0xa9   : > { %v688_v25 = vpop.f32.mrf.mxu0  ;;  %v708_v8 = vpop.f32.mrf.mxu1 }
  0xaa   : > { %v689_v27 = vadd.f32 %v688_v25, %v613_v21  ;;  %v707_v21 = vadd.f32 %v706_v1, %v620_v19  ;;  %v709_v22 = vadd.f32 %v708_v8, %v621_v20 }
  0xac   : > { %vm727_vm2 = vcmp.gt.f32.partialorder %v689_v27, 0.0  ;;  %v743_v30 = vmul.f32 0.01, %v689_v27  ;;  %v750_v24 = vmul.f32 0.01, %v707_v21  ;;  %vm734_vm9 = vcmp.gt.f32.partialorder %v707_v21, 0.0 }
  0xad   : > { %v751_v25 = vmul.f32 0.01, %v709_v22  ;;  %vm735_vm10 = vcmp.gt.f32.partialorder %v709_v22, 0.0 }
  0xae   : > { %v7421_v33 = vsel %vm727_vm2, %v689_v27, %v743_v30  ;;  %v7503_v26 = vsel %vm734_vm9, %v707_v21, %v750_v24  ;;  %v623_v30 = vld [vmem:[%s10249_s25 + $0x58] sm:$0xff]  ;;  %vm1406_vm2 = vcmask 130048  }
  0xaf   : > { %10251 = vst [vmem:[#allocation4_spill] sm:$0xff] %v7421_v33  ;;  %v7425_v34 = vpack.c.bf16 %v7421_v33, %v7419_v32  ;;  %v7505_v27 = vsel %vm735_vm10, %v709_v22, %v751_v25 }
  0xb0   : > { %10258 = vst [vmem:[#allocation11_spill] sm:$0xff] %v7503_v26  ;;  %v778_v29 = vpack.c.bf16 %v7505_v27, %v7503_v26 }
  0xb1   : > { %v691_v38 = vpop.f32.mrf.mxu0  ;;  %958 = vmatmul.bf16.vlgmr.msrb.gmra.mxu1 %v7425_v34  ;;  %1007 = vmatmul.bf16.vlgmr.msra.gmra.mxu2 %v7425_v34  ;;  %v711_v15 = vpop.f32.mrf.mxu1  ;;  %10259 = vst [vmem:[#allocation12_spill] sm:$0xff] %v7505_v27 }
  0xb2   : > { %v692_v43 = vadd.f32 %v691_v38, %v614_v39  ;;  %v712_v35 = vadd.f32 %v711_v15, %v622_v28 }
  0xb4   : > { %v744_v49 = vmul.f32 0.01, %v692_v43  ;;  %vm728_vm3 = vcmp.gt.f32.partialorder %v692_v43, 0.0  ;;  %v752_v37 = vmul.f32 0.01, %v712_v35  ;;  %vm736_vm11 = vcmp.gt.f32.partialorder %v712_v35, 0.0 }
  0xb6   : > { %v7459_v55 = vsel %vm728_vm3, %v692_v43, %v744_v49  ;;  %v7515_v39 = vsel %vm736_vm11, %v712_v35, %v752_v37  ;;  %v624_v43 = vld [vmem:[%s10249_s25 + $0x60] sm:$0xff]  ;;  %vm2575_vm3 = vcmask 523520  }
  0xb7   : > { %10252 = vst [vmem:[#allocation5_spill] sm:$0xff] %v7459_v55 }
  0xb8   : > { %10260 = vst [vmem:[#allocation13_spill] sm:$0xff] %v7515_v39 }
  0xb9   : > { %v693_v48 = vpop.f32.mrf.mxu0  ;;  %v713_v23 = vpop.f32.mrf.mxu1 }
  0xba   : > { %v694_v50 = vadd.f32 %v693_v48, %v615_v44  ;;  %v714_v36 = vadd.f32 %v713_v23, %v623_v30  ;;  %v625_v44 = vld [vmem:[%s10249_s25 + $0x68] sm:$0xff] }
  0xbc   : > { %vm729_vm4 = vcmp.gt.f32.partialorder %v694_v50, 0.0  ;;  %v745_v53 = vmul.f32 0.01, %v694_v50  ;;  %v753_v38 = vmul.f32 0.01, %v714_v36  ;;  %vm737_vm12 = vcmp.gt.f32.partialorder %v714_v36, 0.0 }
  0xbe   : > { %v7461_v56 = vsel %vm729_vm4, %v694_v50, %v745_v53  ;;  %v7517_v40 = vsel %vm737_vm12, %v714_v36, %v753_v38  ;;  %v626_v53 = vld [vmem:[%s10249_s25 + $0x70] sm:$0xff]  ;;  %vm3328_vm4 = vcmask 785920  }
  0xbf   : > { %10253 = vst [vmem:[#allocation6_spill] sm:$0xff] %v7461_v56  ;;  %v7465_v57 = vpack.c.bf16 %v7461_v56, %v7459_v55  ;;  %v779_v42 = vpack.c.bf16 %v7517_v40, %v7515_v39 }
  0xc0   : > { %10261 = vst [vmem:[#allocation14_spill] sm:$0xff] %v7517_v40 }
  0xc1   : > { %v696_v58 = vpop.f32.mrf.mxu0  ;;  %963 = vmatmul.bf16.gmra.mxu1 %v7465_v57  ;;  %1012 = vmatmul.bf16.gmra.mxu2 %v7465_v57  ;;  %v716_v31 = vpop.f32.mrf.mxu1 }
  0xc2   : > { %v697_v60 = vadd.f32 %v696_v58, %v616_v59  ;;  %v717_v45 = vadd.f32 %v716_v31, %v624_v43 }
  0xc4   : > { %v746_v63 = vmul.f32 0.01, %v697_v60  ;;  %vm730_vm5 = vcmp.gt.f32.partialorder %v697_v60, 0.0  ;;  %v754_v48 = vmul.f32 0.01, %v717_v45  ;;  %vm738_vm13 = vcmp.gt.f32.partialorder %v717_v45, 0.0 }
  0xc6   : > { %v7475_v3 = vsel %vm730_vm5, %v697_v60, %v746_v63  ;;  %v7527_v50 = vsel %vm738_vm13, %v717_v45, %v754_v48  ;;  %vm4081_vm5 = vcmask 1048320  }
  0xc7   : > { %10254 = vst [vmem:[#allocation7_spill] sm:$0xff] %v7475_v3 }
  0xc8   : > { %10262 = vst [vmem:[#allocation15_spill] sm:$0xff] %v7527_v50 }
  0xc9   : > { %v698_v62 = vpop.f32.mrf.mxu0  ;;  %v718_v41 = vpop.f32.mrf.mxu1 }
  0xca   : > { %v699_v0 = vadd.f32 %v698_v62, %v617_v61  ;;  %v719_v46 = vadd.f32 %v718_v41, %v625_v44 }
  0xcc   : > { %vm731_vm6 = vcmp.gt.f32.partialorder %v699_v0, 0.0  ;;  %v747_v2 = vmul.f32 0.01, %v699_v0  ;;  %v755_v49 = vmul.f32 0.01, %v719_v46  ;;  %vm739_vm14 = vcmp.gt.f32.partialorder %v719_v46, 0.0 }
  0xce   : > { %v7477_v4 = vsel %vm731_vm6, %v699_v0, %v747_v2  ;;  %v7529_v51 = vsel %vm739_vm14, %v719_v46, %v755_v49  ;;  %v7548_v2 = vld [vmem:[%s10181_s5] sm:$0x7] }
  0xcf   : > { %10255 = vst [vmem:[#allocation8_spill] sm:$0xff] %v7477_v4  ;;  %v7481_v5 = vpack.c.bf16 %v7477_v4, %v7475_v3  ;;  %v780_v52 = vpack.c.bf16 %v7529_v51, %v7527_v50  ;;  %v7555_v8 = vperm.slane %v7548_v2, 1 }
  0xd0   : > { %10263 = vst [vmem:[#allocation16_spill] sm:$0xff] %v7529_v51 }
  0xd1   : > { %v701_v6 = vpop.f32.mrf.mxu0  ;;  %968 = vmatmul.bf16.gmra.mxu1 %v7481_v5  ;;  %1017 = vmatmul.bf16.gmra.mxu2 %v7481_v5  ;;  %v721_v47 = vpop.f32.mrf.mxu1 }
  0xd2   : > { %v702_v9 = vadd.f32 %v701_v6, %v618_v7  ;;  %v722_v59 = vadd.f32 %v721_v47, %v626_v53  ;;  %v7551_v7 = vperm.slane %v7548_v2, 0 }
  0xd4   : > { %v748_v12 = vmul.f32 0.01, %v702_v9  ;;  %vm732_vm7 = vcmp.gt.f32.partialorder %v702_v9, 0.0  ;;  %v756_v61 = vmul.f32 0.01, %v722_v59  ;;  %vm740_vm15 = vcmp.gt.f32.partialorder %v722_v59, 0.0 }
  0xd6   : > { %v7491_v16 = vsel %vm732_vm7, %v702_v9, %v748_v12  ;;  %v7539_v63 = vsel %vm740_vm15, %v722_v59, %v756_v61 }
  0xd7   : > { %10256 = vst [vmem:[#allocation9_spill] sm:$0xff] %v7491_v16 }
  0xd8   : > { %10264 = vst [vmem:[#allocation17_spill] sm:$0xff] %v7539_v63 }
  0xd9   : > { %v703_v11 = vpop.f32.mrf.mxu0  ;;  %v723_v58 = vpop.f32.mrf.mxu1 }
  0xda   : > { %v704_v13 = vadd.f32 %v703_v11, %v619_v10  ;;  %v724_v60 = vadd.f32 %v723_v58, %v627_v54 }
  0xdc   : > { %vm733_vm8 = vcmp.gt.f32.partialorder %v704_v13, 0.0  ;;  %v749_v14 = vmul.f32 0.01, %v704_v13  ;;  %v757_v62 = vmul.f32 0.01, %v724_v60  ;;  %vm741_vm0 = vcmp.gt.f32.partialorder %v724_v60, 0.0 }
  0xde   : > { %v7493_v17 = vsel %vm733_vm8, %v704_v13, %v749_v14  ;;  %v7541_v0 = vsel %vm741_vm0, %v724_v60, %v757_v62 }
  0xdf   : > { %10257 = vst [vmem:[#allocation10_spill] sm:$0xff] %v7493_v17  ;;  %v777_v18 = vpack.c.bf16 %v7493_v17, %v7491_v16  ;;  %v781_v1 = vpack.c.bf16 %v7541_v0, %v7539_v63 }
  0xe0   : > { %10265 = vst [vmem:[#allocation18_spill] sm:$0xff] %v7541_v0 }
  0xe1   : > { %1022 = vmatmul.bf16.gmra.mxu2 %v777_v18  ;;  %973 = vmatmul.bf16.gmra.mxu1 %v777_v18 }
  0xe2   : > { %1071 = vmatmul.bf16.vlgmr.msra.gmra.mxu3 %v777_v18 }
  0xf1   : > { %1027 = vmatmul.bf16.gmra.mxu2 %v778_v29  ;;  %978 = vmatmul.bf16.gmra.mxu1 %v778_v29 }
  0xf2   : > { %1076 = vmatmul.bf16.gmra.mxu3 %v778_v29 }
 0x101   : > { %1032 = vmatmul.bf16.gmra.mxu2 %v779_v42  ;;  %983 = vmatmul.bf16.gmra.mxu1 %v779_v42 }
 0x102   : > { %1081 = vmatmul.bf16.gmra.mxu3 %v779_v42 }
 0x111   : > { %1037 = vmatmul.bf16.gmra.mxu2 %v780_v52  ;;  %988 = vmatmul.bf16.gmra.mxu1 %v780_v52 }
 0x112   : > { %1086 = vmatmul.bf16.gmra.mxu3 %v780_v52 }
 0x121   : > { %1042 = vmatmul.bf16.gmra.mxu2 %v781_v1  ;;  %993 = vmatmul.bf16.gmra.mxu1 %v781_v1 }
 0x122   : > { %1091 = vmatmul.bf16.gmra.mxu3 %v781_v1 }
 0x12e   : > { %v959_v6 = vpop.f32.mrf.mxu1 }
 0x12f   : > { %v960_v10 = vadd.f32 %v959_v6, %v7551_v7 }
 0x131   : > { %1056 = vmatmul.bf16.vlgmr.msrb.gmra.mxu2 %v7425_v34 }
 0x134   : > { %v1008_v9 = vpop.f32.mrf.mxu2 }
 0x135   : > { %v1009_v11 = vadd.f32 %v1008_v9, %v7555_v8 }
 0x136   : > { %v961_v12 = vpop.f32.mrf.mxu1 }
 0x137   : > { %v7559_v13 = vpack.c.bf16 %v1009_v11, %v960_v10  ;;  %v962_v15 = vadd.f32 %v961_v12, %v7551_v7 }
 0x139   : > { %10266 = vst [vmem:[#allocation19_spill] sm:$0xff] %v7559_v13  ;;  %1839 = vrot.lane.b32.xlu2 %v7559_v13, %s7140_s28  ;;  %v1132_v20 = vrot.slane %v7559_v13, 4  ;;  %v1134_v29 = vunpack.c.l.b16 %v7559_v13 }
 0x13b   : > { %v1137_v22 = vunpack.c.l.b16 %v1132_v20 }
 0x13c   : > { %v1010_v14 = vpop.f32.mrf.mxu2 }
 0x13d   : > { %v1011_v34 = vadd.f32 %v1010_v14, %v7555_v8 }
 0x13e   : > { %v964_v18 = vpop.f32.mrf.mxu1 }
 0x13f   : > { %v7565_v19 = vpack.c.bf16 %v1011_v34, %v962_v15  ;;  %v965_v36 = vadd.f32 %v964_v18, %v7551_v7 }
 0x141   : > { %1061 = vmatmul.bf16.gmra.mxu2 %v7465_v57  ;;  %1841 = vrot.lane.b32.xlu0 %v7565_v19, %s7140_s28  ;;  %v1133_v21 = vrot.slane %v7565_v19, 4  ;;  %v1135_v24 = vunpack.c.l.b16 %v7565_v19 }
 0x143   : > { %v1138_v23 = vunpack.c.l.b16 %v1133_v21  ;;  %v7576_v57 = vpack.c.b16 %v1135_v24, %v1134_v29 }
 0x144   : > { %v1013_v25 = vpop.f32.mrf.mxu2 }
 0x145   : > { %v1139_v28 = vpack.c.b16 %v1138_v23, %v1137_v22  ;;  %v1014_v31 = vadd.f32 %v1013_v25, %v7555_v8 }
 0x146   : > { %v966_v30 = vpop.f32.mrf.mxu1 }
 0x147   : > { %v1145_v35 = vsel %vm1140_vm1, %v1139_v28, 0  ;;  %v7581_v37 = vpack.c.bf16 %v1014_v31, %v965_v36  ;;  %v967_v41 = vadd.f32 %v966_v30, %v7551_v7 }
 0x148   : > { %1154 = vmatpush.bf16.xpose.msrb.mxu0 %v1145_v35 }
 0x149   : > { %1845 = vrot.lane.b32.xlu0 %v7576_v57, %s7140_s28  ;;  %v1163_v45 = vrot.slane %v7581_v37, 4 }
 0x14b   : > { %v1168_v47 = vunpack.c.l.b16 %v1163_v45 }
 0x14c   : > { %v1015_v38 = vpop.f32.mrf.mxu2 }
 0x14d   : > { %v1016_v42 = vadd.f32 %v1015_v38, %v7555_v8 }
 0x14e   : > { %v969_v43 = vpop.f32.mrf.mxu1 }
 0x14f   : > { %v7585_v44 = vpack.c.bf16 %v1016_v42, %v967_v41  ;;  %6282 = vmatmul.msk.bf16.vlgmr.msrb.gmra.mxu0 %vm1140_vm1, %v7576_v57  ;;  %v970_v53 = vadd.f32 %v969_v43, %v7551_v7 }
 0x151   : > { %1066 = vmatmul.bf16.gmra.mxu2 %v7481_v5  ;;  %1872 = vrot.lane.b32.xlu1 %v7585_v44, %s7140_s28  ;;  %v1164_v46 = vrot.slane %v7585_v44, 4  ;;  %v1166_v52 = vunpack.c.l.b16 %v7585_v44  ;;  %v1165_v5 = vunpack.c.l.b16 %v7581_v37 }
 0x152   : > { %1870 = vrot.lane.b32.xlu0 %v7581_v37, %s7140_s28 }
 0x153   : > { %v1169_v48 = vunpack.c.l.b16 %v1164_v46  ;;  %v7603_v62 = vpack.c.b16 %v1166_v52, %v1165_v5 }
 0x154   : > { %v1018_v49 = vpop.f32.mrf.mxu2 }
 0x155   : > { %v1019_v54 = vadd.f32 %v1018_v49, %v7555_v8  ;;  %v1170_v58 = vpack.c.b16 %v1169_v48, %v1168_v47 }
 0x156   : > { %v971_v59 = vpop.f32.mrf.mxu1 }
 0x157   : > { %v7600_v60 = vpack.c.bf16 %v1019_v54, %v970_v53  ;;  %v1175_v61 = vsel %vm1140_vm1, %v1170_v58, 0  ;;  %v972_v6 = vadd.f32 %v971_v59, %v7551_v7 }
 0x158   : > { %1184 = vmatpush.bf16.xpose.msra.mxu0 %v1175_v61 }
 0x159   : > { %10267 = vst [vmem:[#allocation20_spill] sm:$0xff] %v7600_v60  ;;  %1901 = vrot.lane.b32.xlu2 %v7600_v60, %s7140_s28  ;;  %v1193_v12 = vrot.slane %v7600_v60, 4  ;;  %v1195_v30 = vunpack.c.l.b16 %v7600_v60 }
 0x15a   : > { %1876 = vrot.lane.b32.xlu0 %v7603_v62, %s7140_s28 }
 0x15b   : > { %v1198_v15 = vunpack.c.l.b16 %v1193_v12 }
 0x15c   : > { %v1020_v1 = vpop.f32.mrf.mxu2 }
 0x15d   : > { %v1021_v9 = vadd.f32 %v1020_v1, %v7555_v8 }
 0x15e   : > { %v974_v10 = vpop.f32.mrf.mxu1 }
 0x15f   : > { %v7611_v11 = vpack.c.bf16 %v1021_v9, %v972_v6  ;;  %6283 = vmatmul.msk.bf16.vlgmr.msra.gmra.mxu0 %vm1140_vm1, %v7603_v62  ;;  %v975_v20 = vadd.f32 %v974_v10, %v7551_v7 }
 0x161   : > { %10268 = vst [vmem:[#allocation21_spill] sm:$0xff] %v7611_v11  ;;  %v1194_v14 = vrot.slane %v7611_v11, 4  ;;  %v1196_v29 = vunpack.c.l.b16 %v7611_v11 }
 0x162   : > { %1903 = vrot.lane.b32.xlu0 %v7611_v11, %s7140_s28 }
 0x163   : > { %v1199_v34 = vunpack.c.l.b16 %v1194_v14  ;;  %v7634_v41 = vpack.c.b16 %v1196_v29, %v1195_v30 }
 0x164   : > { %v1023_v18 = vpop.f32.mrf.mxu2 }
 0x165   : > { %v1024_v21 = vadd.f32 %v1023_v18, %v7555_v8  ;;  %v7621_v22 = vpop.f32.mrf.mxu3  ;;  %v1200_v23 = vpack.c.b16 %v1199_v34, %v1198_v15  ;;  %10269 = vst [vmem:[#allocation22_spill] sm:$0xff] %v7634_v41 }
 0x166   : > { %v976_v24 = vpop.f32.mrf.mxu1 }
 0x167   : > { %v7623_v25 = vpack.c.bf16 %v1024_v21, %v975_v20  ;;  %v1205_v28 = vsel %vm1140_vm1, %v1200_v23, 0  ;;  %v977_v35 = vadd.f32 %v976_v24, %v7551_v7 }
 0x168   : > { %1214 = vmatpush.bf16.xpose.msra.mxu1 %v1205_v28 }
 0x169   : > { %1932 = vrot.lane.b32.xlu2 %v7623_v25, %s7140_s28  ;;  %v1223_v45 = vrot.slane %v7623_v25, 4  ;;  %v1225_v46 = vunpack.c.l.b16 %v7623_v25 }
 0x16b   : > { %v1228_v52 = vunpack.c.l.b16 %v1223_v45 }
 0x16c   : > { %v1025_v31 = vpop.f32.mrf.mxu2 }
 0x16d   : > { %v1026_v36 = vadd.f32 %v1025_v31, %v7555_v8  ;;  %v7632_v38 = vpop.f32.mrf.mxu3 }
 0x16e   : > { %v979_v42 = vpop.f32.mrf.mxu1 }
 0x16f   : > { %v7636_v43 = vpack.c.bf16 %v1026_v36, %v977_v35  ;;  %6284 = vmatmul.msk.bf16.vlgmr.msra.gmra.mxu1 %vm1140_vm1, %v7634_v41  ;;  %v980_v58 = vadd.f32 %v979_v42, %v7551_v7 }
 0x171   : > { %10270 = vst [vmem:[#allocation23_spill] sm:$0xff] %v7636_v43  ;;  %1934 = vrot.lane.b32.xlu2 %v7636_v43, %s7140_s28  ;;  %v1226_v47 = vunpack.c.l.b16 %v7636_v43  ;;  %v1224_v48 = vrot.slane %v7636_v43, 4 }
 0x173   : > { %v7646_v49 = vpack.c.b16 %v1226_v47, %v1225_v46  ;;  %v1229_v53 = vunpack.c.l.b16 %v1224_v48 }
 0x174   : > { %v1028_v54 = vpop.f32.mrf.mxu2 }
 0x175   : > { %10271 = vst [vmem:[#allocation24_spill] sm:$0xff] %v7646_v49  ;;  %v1029_v59 = vadd.f32 %v1028_v54, %v7555_v8  ;;  %v7650_v5 = vpop.f32.mrf.mxu3  ;;  %1938 = vrot.lane.b32.xlu0 %v7646_v49, %s7140_s28  ;;  %v1230_v61 = vpack.c.b16 %v1229_v53, %v1228_v52 }
 0x176   : > { %v981_v1 = vpop.f32.mrf.mxu1 }
 0x177   : > { %v7654_v6 = vpack.c.bf16 %v1029_v59, %v980_v58  ;;  %v1235_v9 = vsel %vm1140_vm1, %v1230_v61, 0  ;;  %v982_v12 = vadd.f32 %v981_v1, %v7551_v7 }
 0x178   : > { %1244 = vmatpush.bf16.xpose.msra.mxu2 %v1235_v9 }
 0x179   : > { %10272 = vst [vmem:[#allocation25_spill] sm:$0xff] %v7654_v6  ;;  %1963 = vrot.lane.b32.xlu1 %v7654_v6, %s7140_s28  ;;  %v1253_v20 = vrot.slane %v7654_v6, 4  ;;  %v1255_v21 = vunpack.c.l.b16 %v7654_v6 }
 0x17b   : > { %v1258_v30 = vunpack.c.l.b16 %v1253_v20 }
 0x17c   : > { %v1030_v10 = vpop.f32.mrf.mxu2 }
 0x17d   : > { %v1031_v14 = vadd.f32 %v1030_v10, %v7555_v8  ;;  %v7661_v15 = vpop.f32.mrf.mxu3 }
 0x17e   : > { %v984_v34 = vpop.f32.mrf.mxu1 }
 0x17f   : > { %v7663_v18 = vpack.c.bf16 %v1031_v14, %v982_v12  ;;  %6285 = vmatmul.msk.bf16.vlgmr.msra.gmra.mxu2 %vm1140_vm1, %v7646_v49  ;;  %v985_v28 = vadd.f32 %v984_v34, %v7551_v7 }
 0x181   : > { %10273 = vst [vmem:[#allocation26_spill] sm:$0xff] %v7663_v18  ;;  %1965 = vrot.lane.b32.xlu0 %v7663_v18, %s7140_s28  ;;  %v1256_v23 = vunpack.c.l.b16 %v7663_v18  ;;  %v1254_v24 = vrot.slane %v7663_v18, 4 }
 0x183   : > { %v7674_v29 = vpack.c.b16 %v1256_v23, %v1255_v21  ;;  %v1259_v31 = vunpack.c.l.b16 %v1254_v24 }
 0x184   : > { %v1033_v35 = vpop.f32.mrf.mxu2 }
 0x185   : > { %10274 = vst [vmem:[#allocation27_spill] sm:$0xff] %v7674_v29  ;;  %v1034_v36 = vadd.f32 %v1033_v35, %v7555_v8  ;;  %v7677_v42 = vpop.f32.mrf.mxu3  ;;  %1969 = vrot.lane.b32.xlu2 %v7674_v29, %s7140_s28  ;;  %v1260_v45 = vpack.c.b16 %v1259_v31, %v1258_v30 }
 0x186   : > { %v986_v46 = vpop.f32.mrf.mxu1 }
 0x187   : > { %v7681_v47 = vpack.c.bf16 %v1034_v36, %v985_v28  ;;  %v1265_v48 = vsel %vm1140_vm1, %v1260_v45, 0  ;;  %v987_v53 = vadd.f32 %v986_v46, %v7551_v7 }
 0x188   : > { %1274 = vmatpush.bf16.xpose.msrb.mxu3 %v1265_v48 }
 0x189   : > { %10275 = vst [vmem:[#allocation28_spill] sm:$0xff] %v7681_v47  ;;  %1994 = vrot.lane.b32.xlu1 %v7681_v47, %s7140_s28  ;;  %v1283_v1 = vrot.slane %v7681_v47, 4  ;;  %v1285_v35 = vunpack.c.l.b16 %v7681_v47 }
 0x18b   : > { %v1288_v10 = vunpack.c.l.b16 %v1283_v1 }
 0x18c   : > { %v1035_v52 = vpop.f32.mrf.mxu2 }
 0x18d   : > { %v1036_v54 = vadd.f32 %v1035_v52, %v7555_v8  ;;  %v7688_v58 = vpop.f32.mrf.mxu3 }
 0x18e   : > { %v989_v59 = vpop.f32.mrf.mxu1 }
 0x18f   : > { %v7690_v61 = vpack.c.bf16 %v1036_v54, %v987_v53  ;;  %6286 = vmatmul.msk.bf16.vlgmr.msrb.gmra.mxu3 %vm1140_vm1, %v7674_v29  ;;  %v990_v23 = vadd.f32 %v989_v59, %v7551_v7 }
 0x191   : > { %10276 = vst [vmem:[#allocation29_spill] sm:$0xff] %v7690_v61  ;;  %1996 = vrot.lane.b32.xlu2 %v7690_v61, %s7140_s28  ;;  %v1284_v9 = vrot.slane %v7690_v61, 4  ;;  %v1286_v30 = vunpack.c.l.b16 %v7690_v61 }
 0x193   : > { %v1289_v12 = vunpack.c.l.b16 %v1284_v9  ;;  %v7711_v52 = vpack.c.b16 %v1286_v30, %v1285_v35  ;;  %v7725_v30 = vperm.slane %v7548_v2, 2 }
 0x194   : > { %v1038_v14 = vpop.f32.mrf.mxu2 }
 0x195   : > { %v7698_v34 = vpop.f32.mrf.mxu3  ;;  %v1290_v20 = vpack.c.b16 %v1289_v12, %v1288_v10  ;;  %v1039_v24 = vadd.f32 %v1038_v14, %v7555_v8  ;;  %10277 = vst [vmem:[#allocation30_spill] sm:$0xff] %v7711_v52 }
 0x196   : > { %v991_v21 = vpop.f32.mrf.mxu1 }
 0x197   : > { %v1295_v28 = vsel %vm1140_vm1, %v1290_v20, 0  ;;  %v7704_v31 = vpack.c.bf16 %v1039_v24, %v990_v23  ;;  %v992_v45 = vadd.f32 %v991_v21, %v7551_v7 }
 0x198   : > { %1304 = vmatpush.bf16.xpose.msrb.mxu0 %v1295_v28 }
 0x199   : > { %v1313_v54 = vrot.slane %v7704_v31, 4 }
 0x19b   : > { %v1318_v10 = vunpack.c.l.b16 %v1313_v54 }
 0x19c   : > { %v1040_v36 = vpop.f32.mrf.mxu2 }
 0x19d   : > { %v1041_v46 = vadd.f32 %v1040_v36, %v7555_v8  ;;  %v7709_v48 = vpop.f32.mrf.mxu3 }
 0x19e   : > { %v994_v59 = vpop.f32.mrf.mxu1 }
 0x19f   : > { %v7713_v53 = vpack.c.bf16 %v1041_v46, %v992_v45  ;;  %6287 = vmatmul.msk.bf16.vlgmr.msrb.gmra.mxu0 %vm1140_vm1, %v7711_v52  ;;  %v995_v9 = vadd.f32 %v994_v59, %v7551_v7  ;;  %v1075_v45 = vadd.f32 %v7632_v38, %v7725_v30  ;;  %v1315_v46 = vunpack.c.l.b16 %v7704_v31 }
 0x1a0   : > { %v1073_v59 = vadd.f32 %v7621_v22, %v7725_v30 }
 0x1a1   : > { %10278 = vst [vmem:[#allocation31_spill] sm:$0xff] %v7713_v53  ;;  %v1314_v1 = vrot.slane %v7713_v53, 4  ;;  %v1316_v35 = vunpack.c.l.b16 %v7713_v53 }
 0x1a3   : > { %v1319_v12 = vunpack.c.l.b16 %v1314_v1 }
 0x1a4   : > { %v1043_v14 = vpop.f32.mrf.mxu2 }
 0x1a5   : > { %v1044_v20 = vadd.f32 %v1043_v14, %v7555_v8  ;;  %v1092_v21 = vpop.f32.mrf.mxu3  ;;  %v1320_v23 = vpack.c.b16 %v1319_v12, %v1318_v10  ;;  %v1112_v10 = vpack.c.bf16 %v1075_v45, %v1075_v45 }
 0x1a6   : > { %v996_v36 = vpop.f32.mrf.mxu1  ;;  %v1093_v22 = vadd.f32 %v1092_v21, %v7725_v30 }
 0x1a7   : > { %v7721_v24 = vpack.c.bf16 %v1044_v20, %v995_v9  ;;  %v1325_v28 = vsel %vm1140_vm1, %v1320_v23, 0  ;;  %v997_v1 = vadd.f32 %v996_v36, %v7551_v7  ;;  %v7737_v9 = vpack.c.b16 %v1316_v35, %v1315_v46 }
 0x1a8   : > { %1334 = vmatpush.bf16.xpose.msrb.mxu1 %v1325_v28  ;;  %v1110_v20 = vpack.c.bf16 %v1073_v59, %v1073_v59  ;;  %v1691_v28 = vunpack.c.l.b16 %v1112_v10  ;;  %v1080_v59 = vadd.f32 %v7661_v15, %v7725_v30  ;;  %v1078_v10 = vadd.f32 %v7650_v5, %v7725_v30 }
 0x1a9   : > { %10279 = vst [vmem:[#allocation32_spill] sm:$0xff] %v7721_v24  ;;  %2056 = vrot.lane.b32.xlu1 %v7721_v24, %s7140_s28  ;;  %v1343_v38 = vrot.slane %v7721_v24, 4 }
 0x1aa   : > { %v1690_v45 = vunpack.c.l.b16 %v1110_v20 }
 0x1ac   : > { %v1045_v54 = vpop.f32.mrf.mxu2 }
 0x1ad   : > { %v1046_v2 = vadd.f32 %v1045_v54, %v7555_v8  ;;  %v1094_v14 = vpop.f32.mrf.mxu3  ;;  %v1348_v8 = vunpack.c.l.b16 %v1343_v38  ;;  %v1126_v54 = vpack.c.bf16 %v1093_v22, %v1093_v22  ;;  %v1116_v22 = vpack.c.bf16 %v1080_v59, %v1080_v59 }
 0x1ae   : > { %v1095_v7 = vadd.f32 %v1094_v14, %v7725_v30 }
 0x1af   : > { %v7739_v12 = vpack.c.bf16 %v1046_v2, %v997_v1  ;;  %6288 = vmatmul.msk.bf16.vlgmr.msrb.gmra.mxu1 %vm1140_vm1, %v7737_v9  ;;  %v7747_v2 = vpack.c.b16 %v1691_v28, %v1690_v45  ;;  %v1802_v38 = vunpack.c.l.b16 %v1126_v54  ;;  %v1719_v45 = vunpack.c.l.b16 %v1116_v22 }
 0x1b0   : > { %v1128_v1 = vpack.c.bf16 %v1095_v7, %v1095_v7 }
 0x1b1   : > { %10280 = vst [vmem:[#allocation33_spill] sm:$0xff] %v7739_v12  ;;  %v1344_v23 = vrot.slane %v7739_v12, 4  ;;  %v1346_v21 = vunpack.c.l.b16 %v7739_v12 }
 0x1b2   : > { %v1803_v20 = vunpack.c.l.b16 %v1128_v1 }
 0x1b3   : > { %v1349_v35 = vunpack.c.l.b16 %v1344_v23  ;;  %v1345_v23 = vunpack.c.l.b16 %v7721_v24 }
 0x1b4   : > { %v1057_v36 = vpop.f32.mrf.mxu2 }
 0x1b5   : > { %v1350_v46 = vpack.c.b16 %v1349_v35, %v1348_v8  ;;  %v1058_v14 = vadd.f32 %v1057_v36, %v7725_v30  ;;  %v7759_v15 = vpack.c.b16 %v1346_v21, %v1345_v23  ;;  %v7761_v35 = vpack.c.b16 %v1803_v20, %v1802_v38 }
 0x1b6   : > { %v1083_v21 = vadd.f32 %v7677_v42, %v7725_v30 }
 0x1b7   : > { %v1355_v0 = vsel %vm1140_vm1, %v1350_v46, 0  ;;  %v1098_v28 = vpack.c.bf16 %v1058_v14, %v1058_v14 }
 0x1b8   : > { %1364 = vmatpush.bf16.xpose.msrb.mxu2 %v1355_v0  ;;  %v1114_v0 = vpack.c.bf16 %v1078_v10, %v1078_v10  ;;  %v1085_v10 = vadd.f32 %v7688_v58, %v7725_v30  ;;  %v1118_v20 = vpack.c.bf16 %v1083_v21, %v1083_v21 }
 0x1b9   : > { %v1606_v5 = vunpack.c.l.b16 %v1098_v28 }
 0x1ba   : > { %v1718_v54 = vunpack.c.l.b16 %v1114_v0  ;;  %v1120_v23 = vpack.c.bf16 %v1085_v10, %v1085_v10  ;;  %v1746_v42 = vunpack.c.l.b16 %v1118_v20  ;;  %v1088_v20 = vadd.f32 %v7698_v34, %v7725_v30 }
 0x1bc   : > { %v1059_v7 = vpop.f32.mrf.mxu2  ;;  %v7768_v59 = vpack.c.b16 %v1719_v45, %v1718_v54 }
 0x1bd   : > { %v1060_v8 = vadd.f32 %v1059_v7, %v7725_v30  ;;  %v7780_v7 = vld [vmem:[%s10179_s3] ss:$0 sm:$0xff] }
 0x1be   : > { %10281 = vst [vmem:[#allocation34_spill] sm:$0xff] %v7768_v59 }
 0x1bf   : > { %v1100_v36 = vpack.c.bf16 %v1060_v8, %v1060_v8  ;;  %6289 = vmatmul.msk.bf16.vlgmr.msrb.gmra.mxu2 %vm1140_vm1, %v7759_v15  ;;  %10282 = vst [vmem:[#allocation35_spill] sm:$0xff] %v7780_v7 }
 0x1c0   : > { %1704 = vmatpush.bf16.msra.mxu2 %v7747_v2 }
 0x1c1   : > { %v1607_v46 = vunpack.c.l.b16 %v1100_v36 }
 0x1c3   : > { %v7766_v1 = vpack.c.b16 %v1607_v46, %v1606_v5  ;;  %v1747_v5 = vunpack.c.l.b16 %v1120_v23  ;;  %v1090_v23 = vadd.f32 %v7709_v48, %v7725_v30 }
 0x1c4   : > { %1816 = vmatpush.bf16.msrb.mxu2 %v7761_v35  ;;  %v1062_v14 = vpop.f32.mrf.mxu2 }
 0x1c5   : > { %1620 = vmatpush.bf16.msra.mxu3 %v7766_v1  ;;  %v1063_v38 = vadd.f32 %v1062_v14, %v7725_v30  ;;  %v7790_v10 = vpack.c.b16 %v1747_v5, %v1746_v42  ;;  %v1124_v42 = vpack.c.bf16 %v1090_v23, %v1090_v23 }
 0x1c7   : > { %v1102_v28 = vpack.c.bf16 %v1063_v38, %v1063_v38  ;;  %10283 = vst [vmem:[#allocation36_spill] sm:$0xff] %v7790_v10  ;;  %v1775_v48 = vunpack.c.l.b16 %v1124_v42 }
 0x1c9   : > { %1732 = vmatpush.bf16.msrb.mxu3 %v7768_v59  ;;  %v1634_v46 = vunpack.c.l.b16 %v1102_v28 }
 0x1cc   : > { %v1064_v22 = vpop.f32.mrf.mxu2  ;;  %v1156_v0 = vpop.f32.mrf.mxu0 }
 0x1cd   : > { %v1065_v8 = vadd.f32 %v1064_v22, %v7725_v30  ;;  %v1371_v36 = vmul.f32 0.17677669, %v1156_v0 }
 0x1cf   : > { %v1104_v45 = vpack.c.bf16 %v1065_v8, %v1065_v8  ;;  %v7784_v58 = vadd.f32 %v7780_v7, %v1371_v36 }
 0x1d1   : > { %v1635_v54 = vunpack.c.l.b16 %v1104_v45  ;;  %v1407_v14 = vsel %vm1406_vm2, %v7784_v58, -inf  ;;  %v1122_v45 = vpack.c.bf16 %v1088_v20, %v1088_v20 }
 0x1d2   : > { %1408 = vmax.xlane.f32.xlu0 %v1407_v14 }
 0x1d3   : > { %v7788_v21 = vpack.c.b16 %v1635_v54, %v1634_v46  ;;  %v1774_v63 = vunpack.c.l.b16 %v1122_v45 }
 0x1d4   : > { %v1067_v38 = vpop.f32.mrf.mxu2  ;;  %v1158_v22 = vpop.f32.mrf.mxu0 }
 0x1d5   : > { %1648 = vmatpush.bf16.msra.mxu0 %v7788_v21  ;;  %v1372_v8 = vmul.f32 0.17677669, %v1158_v22  ;;  %v1068_v0 = vadd.f32 %v1067_v38, %v7725_v30  ;;  %v7812_v20 = vpack.c.b16 %v1775_v48, %v1774_v63 }
 0x1d7   : > { %v7799_v28 = vadd.f32 %v7780_v7, %v1372_v8  ;;  %v1106_v46 = vpack.c.bf16 %v1068_v0, %v1068_v0 }
 0x1d9   : > { %1760 = vmatpush.bf16.msrb.mxu0 %v7790_v10  ;;  %v1410_v36 = vsel %vm1406_vm2, %v7799_v28, -inf  ;;  %v1662_v51 = vunpack.c.l.b16 %v1106_v46 }
 0x1da   : > { %1411 = vmax.xlane.f32.xlu0 %v1410_v36 }
 0x1dc   : > { %v1069_v5 = vpop.f32.mrf.mxu2  ;;  %v1186_v14 = vpop.f32.mrf.mxu0 }
 0x1dd   : > { %v1070_v54 = vadd.f32 %v1069_v5, %v7725_v30  ;;  %v1373_v34 = vmul.f32 0.17677669, %v1186_v14 }
 0x1df   : > { %v1108_v22 = vpack.c.bf16 %v1070_v54, %v1070_v54  ;;  %v7806_v8 = vadd.f32 %v7780_v7, %v1373_v34 }
 0x1e1   : > { %v1663_v38 = vunpack.c.l.b16 %v1108_v22  ;;  %v1413_v50 = vsel %vm1406_vm2, %v7806_v8, -inf }
 0x1e2   : > { %1414 = vmax.xlane.f32.xlu2 %v1413_v50 }
 0x1e3   : > { %v7810_v36 = vpack.c.b16 %v1663_v38, %v1662_v51  ;;  %v7834_v38 = vpop.permute.xlu0 %1841 }
 0x1e4   : > { %v1188_v23 = vpop.f32.mrf.mxu0 }
 0x1e5   : > { %1676 = vmatpush.bf16.msra.mxu1 %v7810_v36  ;;  %v1374_v30 = vmul.f32 0.17677669, %v1188_v23 }
 0x1e7   : > { %v7817_v0 = vadd.f32 %v7780_v7, %v1374_v30 }
 0x1e9   : > { %1788 = vmatpush.bf16.msrb.mxu1 %v7812_v20  ;;  %v1416_v45 = vsel %vm1406_vm2, %v7817_v0, -inf }
 0x1ea   : > { %1417 = vmax.xlane.f32.xlu2 %v1416_v45 }
 0x1ec   : > { %v1216_v42 = vpop.f32.mrf.mxu1 }
 0x1ed   : > { %v1375_v5 = vmul.f32 0.17677669, %v1216_v42 }
 0x1ef   : > { %v7822_v51 = vadd.f32 %v7780_v7, %v1375_v5 }
 0x1f1   : > { %v1419_v50 = vsel %vm1406_vm2, %v7822_v51, -inf }
 0x1f2   : > { %1420 = vmax.xlane.f32.xlu1 %v1419_v50  ;;  %v7843_v50 = vpop.permute.xlu0 %1845 }
 0x1f4   : > { %v1218_v63 = vpop.f32.mrf.mxu1 }
 0x1f5   : > { %v1376_v46 = vmul.f32 0.17677669, %v1218_v63 }
 0x1f7   : > { %v7827_v54 = vadd.f32 %v7780_v7, %v1376_v46 }
 0x1f9   : > { %v1422_v14 = vsel %vm1406_vm2, %v7827_v54, -inf }
 0x1fa   : > { %1423 = vmax.xlane.f32.xlu2 %v1422_v14 }
 0x202   : > { %v1246_v34 = vpop.f32.mrf.mxu2 }
 0x203   : > { %v1377_v22 = vmul.f32 0.17677669, %v1246_v34 }
 0x205   : > { %v7832_v48 = vadd.f32 %v7780_v7, %v1377_v22  ;;  %v7850_v22 = vpop.permute.xlu0 %1870 }
 0x207   : > { %v1425_v23 = vsel %vm1406_vm2, %v7832_v48, -inf }
 0x208   : > { %1426 = vmax.xlane.f32.xlu0 %v1425_v23 }
 0x20a   : > { %v1248_v30 = vpop.f32.mrf.mxu2 }
 0x20b   : > { %v1378_v45 = vmul.f32 0.17677669, %v1248_v30 }
 0x20d   : > { %v7839_v42 = vadd.f32 %v7780_v7, %v1378_v45  ;;  %v7864_v27 = vpop.permute.xlu0 %1876 }
 0x20e   : > { %10284 = vst [vmem:[#allocation37_spill] sm:$0xff] %v7864_v27 }
 0x20f   : > { %v1428_v5 = vsel %vm1406_vm2, %v7839_v42, -inf }
 0x210   : > { %1429 = vmax.xlane.f32.xlu1 %v1428_v5 }
 0x212   : > { %v1276_v63 = vpop.f32.mrf.mxu3 }
 0x213   : > { %v1379_v46 = vmul.f32 0.17677669, %v1276_v63 }
 0x215   : > { %v7846_v14 = vadd.f32 %v7780_v7, %v1379_v46  ;;  %v7873_v16 = vpop.permute.xlu0 %1903 }
 0x217   : > { %v1431_v34 = vsel %vm1406_vm2, %v7846_v14, -inf }
 0x218   : > { %1432 = vmax.xlane.f32.xlu1 %v1431_v34  ;;  %v7862_v34 = vpop.permute.xlu2 %1839 }
 0x21a   : > { %v1278_v23 = vpop.f32.mrf.mxu3 }
 0x21b   : > { %v1380_v30 = vmul.f32 0.17677669, %v1278_v23 }
 0x21c   : > { %v1306_v45 = vpop.f32.mrf.mxu0 }
 0x21d   : > { %v1381_v40 = vmul.f32 0.17677669, %v1306_v45  ;;  %v7853_v39 = vadd.f32 %v7780_v7, %v1380_v30  ;;  %v7882_v55 = vpop.permute.xlu0 %1938 }
 0x21e   : > { %10285 = vst [vmem:[#allocation38_spill] sm:$0xff] %v7882_v55 }
 0x21f   : > { %v1434_v5 = vsel %vm1406_vm2, %v7853_v39, -inf  ;;  %v7858_v63 = vadd.f32 %v7780_v7, %v1381_v40 }
 0x220   : > { %1435 = vmax.xlane.f32.xlu1 %v1434_v5  ;;  %v7871_v40 = vpop.permute.xlu2 %1901 }
 0x221   : > { %v1437_v46 = vsel %vm1406_vm2, %v7858_v63, -inf }
 0x222   : > { %1438 = vmax.xlane.f32.xlu0 %v1437_v46 }
 0x224   : > { %v1308_v23 = vpop.f32.mrf.mxu0 }
 0x225   : > { %v1382_v45 = vmul.f32 0.17677669, %v1308_v23 }
 0x227   : > { %v7867_v30 = vadd.f32 %v7780_v7, %v1382_v45 }
 0x228   : > { %v7880_v23 = vpop.permute.xlu2 %1932 }
 0x229   : > { %v1440_v26 = vsel %vm1406_vm2, %v7867_v30, -inf }
 0x22a   : > { %1441 = vmax.xlane.f32.xlu1 %v1440_v26 }
 0x22c   : > { %v1336_v5 = vpop.f32.mrf.mxu1 }
 0x22d   : > { %v1383_v17 = vmul.f32 0.17677669, %v1336_v5 }
 0x22f   : > { %v7876_v46 = vadd.f32 %v7780_v7, %v1383_v17  ;;  %v7891_v17 = vpop.permute.xlu0 %1965 }
 0x230   : > { %v7889_v56 = vpop.permute.xlu2 %1934 }
 0x231   : > { %v1443_v4 = vsel %vm1406_vm2, %v7876_v46, -inf }
 0x232   : > { %1444 = vmax.xlane.f32.xlu0 %v1443_v4  ;;  %v7893_v4 = vpop.permute.xlu1 %1872 }
 0x234   : > { %v1338_v45 = vpop.f32.mrf.mxu1 }
 0x235   : > { %v1384_v3 = vmul.f32 0.17677669, %v1338_v45 }
 0x237   : > { %v7885_v26 = vadd.f32 %v7780_v7, %v1384_v3 }
 0x238   : > { %v7898_v45 = vpop.permute.xlu2 %1969 }
 0x239   : > { %v1446_v5 = vsel %vm1406_vm2, %v7885_v26, -inf  ;;  %10286 = vst [vmem:[#allocation39_spill] sm:$0xff] %v7898_v45 }
 0x23a   : > { %1447 = vmax.xlane.f32.xlu1 %v1446_v5  ;;  %v7903_v11 = vpop.permute.xlu1 %1963 }
 0x242   : > { %v1366_v33 = vpop.f32.mrf.mxu2 }
 0x243   : > { %v1385_v32 = vmul.f32 0.17677669, %v1366_v33 }
 0x245   : > { %v7896_v24 = vadd.f32 %v7780_v7, %v1385_v32  ;;  %v1409_v49 = vpop.xlane.xlu0 %1408  ;;  %v7908_v32 = vpop.permute.xlu2 %1996 }
 0x246   : > { %v1455_v3 = vsub.f32 %v7784_v58, %v1409_v49  ;;  %10287 = vst [vmem:[#allocation40_spill] sm:$0xff] %v7908_v32 }
 0x247   : > { %v1449_v55 = vsel %vm1406_vm2, %v7896_v24, -inf }
 0x248   : > { %1450 = vmax.xlane.f32.xlu2 %v1449_v55  ;;  %v1471_v5 = vmul.f32 1.442695, %v1455_v3  ;;  %v7917_v3 = vpop.permute.xlu1 %1994 }
 0x249   : > { %10288 = vst [vmem:[#allocation41_spill] sm:$0xff] %v7917_v3 }
 0x24a   : > { %v1368_v27 = vpop.f32.mrf.mxu2  ;;  %6808 = vpow2.f32 %v1471_v5 }
 0x24b   : > { %v1386_v61 = vmul.f32 0.17677669, %v1368_v27 }
 0x24d   : > { %v7906_v33 = vadd.f32 %v7780_v7, %v1386_v61  ;;  %v1412_v43 = vpop.xlane.xlu0 %1411 }
 0x24e   : > { %v1456_v47 = vsub.f32 %v7799_v28, %v1412_v43 }
 0x24f   : > { %v1452_v49 = vsel %vm1406_vm2, %v7906_v33, -inf }
 0x250   : > { %1453 = vmax.xlane.f32.xlu0 %v1452_v49  ;;  %v7913_v58 = vpop.eup %6808  ;;  %v1473_v55 = vmul.f32 1.442695, %v1456_v47  ;;  %v7924_v49 = vpop.permute.xlu1 %2056 }
 0x251   : > { %v1503_v27 = vsel %vm1406_vm2, %v7913_v58, 0.0  ;;  %10289 = vst [vmem:[#allocation42_spill] sm:$0xff] %v7924_v49 }
 0x252   : > { %6810 = vpow2.f32 %v1473_v55  ;;  %1504 = vadd.xlane.f32.xlu2 %v1503_v27 }
 0x255   : > { %v1415_v61 = vpop.xlane.xlu2 %1414 }
 0x256   : > { %v1457_v5 = vsub.f32 %v7806_v8, %v1415_v61 }
 0x258   : > { %v7920_v7 = vpop.eup %6810  ;;  %v1475_v43 = vmul.f32 1.442695, %v1457_v5 }
 0x259   : > { %v1506_v28 = vsel %vm1406_vm2, %v7920_v7, 0.0 }
 0x25a   : > { %6812 = vpow2.f32 %v1475_v43  ;;  %1507 = vadd.xlane.f32.xlu0 %v1506_v28 }
 0x25d   : > { %v1418_v47 = vpop.xlane.xlu2 %1417 }
 0x25e   : > { %v1458_v32 = vsub.f32 %v7817_v0, %v1418_v47 }
 0x260   : > { %v7927_v55 = vpop.eup %6812  ;;  %v1477_v27 = vmul.f32 1.442695, %v1458_v32 }
 0x261   : > { %v1509_v3 = vsel %vm1406_vm2, %v7927_v55, 0.0 }
 0x262   : > { %6814 = vpow2.f32 %v1477_v27  ;;  %1510 = vadd.xlane.f32.xlu1 %v1509_v3 }
 0x265   : > { %v1421_v8 = vpop.xlane.xlu1 %1420 }
 0x266   : > { %v1459_v61 = vsub.f32 %v7822_v51, %v1421_v8 }
 0x268   : > { %v1479_v5 = vmul.f32 1.442695, %v1459_v61  ;;  %v7932_v45 = vpop.eup %6814 }
 0x269   : > { %v1512_v43 = vsel %vm1406_vm2, %v7932_v45, 0.0 }
 0x26a   : > { %6816 = vpow2.f32 %v1479_v5  ;;  %1513 = vadd.xlane.f32.xlu1 %v1512_v43 }
 0x26d   : > { %v1424_v0 = vpop.xlane.xlu2 %1423 }
 0x26e   : > { %v1460_v28 = vsub.f32 %v7827_v54, %v1424_v0 }
 0x270   : > { %v7937_v32 = vpop.eup %6816  ;;  %v1481_v47 = vmul.f32 1.442695, %v1460_v28 }
 0x271   : > { %v1515_v3 = vsel %vm1406_vm2, %v7937_v32, 0.0 }
 0x272   : > { %6818 = vpow2.f32 %v1481_v47  ;;  %1516 = vadd.xlane.f32.xlu0 %v1515_v3 }
 0x278   : > { %v7941_v51 = vpop.eup %6818 }
 0x279   : > { %v1518_v27 = vsel %vm1406_vm2, %v7941_v51, 0.0 }
 0x27a   : > { %1519 = vadd.xlane.f32.xlu1 %v1518_v27 }
 0x27b   : > { %v1427_v8 = vpop.xlane.xlu0 %1426 }
 0x27c   : > { %v1461_v61 = vsub.f32 %v7832_v48, %v1427_v8 }
 0x27e   : > { %v1483_v5 = vmul.f32 1.442695, %v1461_v61 }
 0x280   : > { %6820 = vpow2.f32 %v1483_v5 }
 0x283   : > { %v1430_v54 = vpop.xlane.xlu1 %1429 }
 0x284   : > { %v1462_v43 = vsub.f32 %v7839_v42, %v1430_v54 }
 0x286   : > { %v7947_v0 = vpop.eup %6820  ;;  %v1485_v28 = vmul.f32 1.442695, %v1462_v43  ;;  %1907 = vrot.lane.b32.xlu0 %v7634_v41, %s7140_s28 }
 0x287   : > { %v1521_v47 = vsel %vm1406_vm2, %v7947_v0, 0.0 }
 0x288   : > { %6822 = vpow2.f32 %v1485_v28  ;;  %1522 = vadd.xlane.f32.xlu1 %v1521_v47 }
 0x28b   : > { %v1433_v3 = vpop.xlane.xlu1 %1432 }
 0x28c   : > { %v1463_v27 = vsub.f32 %v7846_v14, %v1433_v3 }
 0x28e   : > { %v7954_v48 = vpop.eup %6822  ;;  %v1487_v8 = vmul.f32 1.442695, %v1463_v27 }
 0x28f   : > { %v1524_v42 = vsel %vm1406_vm2, %v7954_v48, 0.0 }
 0x290   : > { %6824 = vpow2.f32 %v1487_v8  ;;  %1525 = vadd.xlane.f32.xlu2 %v1524_v42 }
 0x293   : > { %v1436_v61 = vpop.xlane.xlu1 %1435 }
 0x294   : > { %v1464_v5 = vsub.f32 %v7853_v39, %v1436_v61 }
 0x295   : > { %v1439_v14 = vpop.xlane.xlu0 %1438 }
 0x296   : > { %v7959_v54 = vpop.eup %6824  ;;  %v1489_v43 = vmul.f32 1.442695, %v1464_v5 }
 0x297   : > { %v1527_v28 = vsel %vm1406_vm2, %v7959_v54, 0.0 }
 0x298   : > { %6826 = vpow2.f32 %v1489_v43  ;;  %1528 = vadd.xlane.f32.xlu1 %v1527_v28 }
 0x29d   : > { %v1442_v5 = vpop.xlane.xlu1 %1441 }
 0x29e   : > { %v7963_v47 = vpop.eup %6826 }
 0x29f   : > { %v1530_v3 = vsel %vm1406_vm2, %v7963_v47, 0.0 }
 0x2a0   : > { %1531 = vadd.xlane.f32.xlu2 %v1530_v3 }
 0x2a5   : > { %v1445_v27 = vpop.xlane.xlu0 %1444 }
 0x2a6   : > { %v1467_v8 = vsub.f32 %v7876_v46, %v1445_v27 }
 0x2a8   : > { %v1495_v42 = vmul.f32 1.442695, %v1467_v8 }
 0x2aa   : > { %6828 = vpow2.f32 %v1495_v42 }
 0x2ad   : > { %v1448_v28 = vpop.xlane.xlu1 %1447 }
 0x2ae   : > { %v1468_v27 = vsub.f32 %v7885_v26, %v1448_v28 }
 0x2b0   : > { %v7968_v39 = vpop.eup %6828  ;;  %v1497_v8 = vmul.f32 1.442695, %v1468_v27 }
 0x2b1   : > { %10290 = vst [vmem:[#allocation43_spill] sm:$0xff] %v7968_v39  ;;  %2000 = vrot.lane.b32.xlu1 %v7711_v52, %s7140_s28  ;;  %v1539_v61 = vsel %vm1406_vm2, %v7968_v39, 0.0  ;;  %v1844_v52 = vrot.slane %v7834_v38, 4 }
 0x2b2   : > { %1540 = vadd.xlane.f32.xlu0 %v1539_v61 }
 0x2b3   : > { %v1848_v28 = vunpack.c.l.b16 %v1844_v52 }
 0x2b8   : > { %2058 = vrot.lane.b32.xlu2 %v7739_v12, %s7140_s28  ;;  %v1465_v12 = vsub.f32 %v7858_v63, %v1439_v14 }
 0x2ba   : > { %v1491_v49 = vmul.f32 1.442695, %v1465_v12 }
 0x2bb   : > { %v1451_v43 = vpop.xlane.xlu2 %1450 }
 0x2c3   : > { %v7976_v3 = vpop.xlane.xlu0 %1453 }
 0x2c5   : > { %v1505_v46 = vpop.xlane.xlu2 %1504 }
 0x2c6   : > { %2027 = vrot.lane.b32.xlu0 %v7713_v53, %s7140_s28  ;;  %6830 = vrcp.f32 %v1505_v46  ;;  %v1843_v53 = vrot.slane %v7862_v34, 4  ;;  %v1466_v46 = vsub.f32 %v7867_v30, %v1442_v5  ;;  %v1875_v5 = vrot.slane %v7893_v4, 4 }
 0x2c8   : > { %v1847_v38 = vunpack.c.l.b16 %v1843_v53  ;;  %v1493_v34 = vmul.f32 1.442695, %v1466_v46 }
 0x2cc   : > { %v6831_v61 = vpop.eup %6830 }
 0x2cd   : > { %v1508_v42 = vpop.xlane.xlu0 %1507  ;;  %v1567_v41 = vmul.f32 %v6831_v61, %v7913_v58  ;;  %v1849_v58 = vpack.c.b16 %v1848_v28, %v1847_v38  ;;  %v1879_v38 = vunpack.c.l.b16 %v1875_v5 }
 0x2ce   : > { %2592 = vrot.lane.b32.xlu0 %v7559_v13, %s7141_s30  ;;  %6832 = vrcp.f32 %v1508_v42  ;;  %v1874_v42 = vrot.slane %v7850_v22, 4 }
 0x2cf   : > { %6834 = vpow2.f32 %v1497_v8  ;;  %v1583_v27 = vpack.c.bf16 %v1567_v41, %v1567_v41  ;;  %v1854_v30 = vsel %vm1140_vm1, %v1849_v58, 0 }
 0x2d0   : > { %6836 = vpow2.f32 %v1491_v49  ;;  %v1469_v49 = vsub.f32 %v7896_v24, %v1451_v43 }
 0x2d1   : > { %v1601_v12 = vunpack.c.l.b16 %v1583_v27 }
 0x2d4   : > { %v6833_v26 = vpop.eup %6832 }
 0x2d5   : > { %v1568_v39 = vmul.f32 %v6833_v26, %v7920_v7  ;;  %v1511_v13 = vpop.xlane.xlu1 %1510  ;;  %v7991_v63 = vpop.eup %6834  ;;  %v1499_v26 = vmul.f32 1.442695, %v1469_v49  ;;  %v1905_v49 = vrot.slane %v7871_v40, 4 }
 0x2d6   : > { %2341 = vrot.lane.b32.xlu0 %v7788_v21, %s7140_s28  ;;  %6838 = vrcp.f32 %v1511_v13  ;;  %v1542_v52 = vsel %vm1406_vm2, %v7991_v63, 0.0  ;;  %v7995_v7 = vpop.eup %6836 }
 0x2d7   : > { %v1584_v14 = vpack.c.bf16 %v1568_v39, %v1568_v39  ;;  %6840 = vpow2.f32 %v1493_v34  ;;  %v1533_v39 = vsel %vm1406_vm2, %v7995_v7, 0.0 }
 0x2d9   : > { %v1602_v8 = vunpack.c.l.b16 %v1584_v14  ;;  %v1878_v14 = vunpack.c.l.b16 %v1874_v42 }
 0x2db   : > { %1543 = vadd.xlane.f32.xlu1 %v1542_v52  ;;  %v1603_v41 = vpack.c.b16 %v1602_v8, %v1601_v12  ;;  %v1880_v4 = vpack.c.b16 %v1879_v38, %v1878_v14 }
 0x2dc   : > { %v6839_v13 = vpop.eup %6838 }
 0x2dd   : > { %6290 = vmatmul.msk.bf16.vlgmr.msra.gmra.mxu3 %vm1406_vm2, %v1603_v41  ;;  %v1514_v53 = vpop.xlane.xlu1 %1513  ;;  %v1569_v61 = vmul.f32 %v6839_v13, %v7927_v55  ;;  %v8007_v28 = vpop.eup %6840 }
 0x2de   : > { %2716 = vrot.lane.b32.xlu0 %v7654_v6, %s7141_s30  ;;  %1863 = vmatpush.bf16.xpose.msra.mxu3 %v1854_v30  ;;  %6842 = vrcp.f32 %v1514_v53  ;;  %v1536_v22 = vsel %vm1406_vm2, %v8007_v28, 0.0  ;;  %v1906_v53 = vrot.slane %v7873_v16, 4 }
 0x2df   : > { %v1585_v24 = vpack.c.bf16 %v1569_v61, %v1569_v61  ;;  %6844 = vpow2.f32 %v1499_v26  ;;  %v1909_v26 = vunpack.c.l.b16 %v1905_v49  ;;  %v1470_v49 = vsub.f32 %v7906_v33, %v7976_v3 }
 0x2e0   : > { %v1910_v5 = vunpack.c.l.b16 %v1906_v53 }
 0x2e1   : > { %1534 = vadd.xlane.f32.xlu2 %v1533_v39  ;;  %v1629_v55 = vunpack.c.l.b16 %v1585_v24 }
 0x2e4   : > { %v6843_v46 = vpop.eup %6842 }
 0x2e5   : > { %v1517_v27 = vpop.xlane.xlu0 %1516  ;;  %v1570_v43 = vmul.f32 %v6843_v46, %v7932_v45  ;;  %v8014_v8 = vpop.eup %6844  ;;  %v1885_v45 = vsel %vm1140_vm1, %v1880_v4, 0 }
 0x2e6   : > { %2391 = vrot.lane.b32.xlu0 %v7747_v2, %s7140_s28  ;;  %6846 = vrcp.f32 %v1517_v27  ;;  %v1545_v30 = vsel %vm1406_vm2, %v8014_v8, 0.0  ;;  %v1911_v27 = vpack.c.b16 %v1910_v5, %v1909_v26  ;;  %v1501_v26 = vmul.f32 1.442695, %v1470_v49 }
 0x2e7   : > { %v1586_v58 = vpack.c.bf16 %v1570_v43, %v1570_v43  ;;  %v1937_v43 = vrot.slane %v7889_v56, 4 }
 0x2e8   : > { %v1916_v40 = vsel %vm1140_vm1, %v1911_v27, 0 }
 0x2e9   : > { %1537 = vadd.xlane.f32.xlu2 %v1536_v22  ;;  %v1630_v34 = vunpack.c.l.b16 %v1586_v58  ;;  %v1936_v22 = vrot.slane %v7880_v23, 4 }
 0x2eb   : > { %v1631_v12 = vpack.c.b16 %v1630_v34, %v1629_v55  ;;  %v1941_v55 = vunpack.c.l.b16 %v1937_v43 }
 0x2ec   : > { %v6847_v41 = vpop.eup %6846 }
 0x2ed   : > { %v1520_v52 = vpop.xlane.xlu1 %1519  ;;  %6291 = vmatmul.msk.bf16.vlgmr.msra.gmra.mxu0 %vm1406_vm2, %v1631_v12  ;;  %v1571_v13 = vmul.f32 %v6847_v41, %v7937_v32  ;;  %v1940_v41 = vunpack.c.l.b16 %v1936_v22 }
 0x2ee   : > { %6848 = vrcp.f32 %v1520_v52  ;;  %2625 = vrot.lane.b32.xlu0 %v7585_v44, %s7141_s30  ;;  %1894 = vmatpush.bf16.xpose.msra.mxu0 %v1885_v45 }
 0x2ef   : > { %v1587_v42 = vpack.c.bf16 %v1571_v13, %v1571_v13  ;;  %v1942_v56 = vpack.c.b16 %v1941_v55, %v1940_v41 }
 0x2f1   : > { %1546 = vadd.xlane.f32.xlu2 %v1545_v30  ;;  %v1657_v16 = vunpack.c.l.b16 %v1587_v42  ;;  %v1947_v13 = vsel %vm1140_vm1, %v1942_v56, 0  ;;  %v1967_v42 = vrot.slane %v7903_v11, 4 }
 0x2f4   : > { %v6849_v39 = vpop.eup %6848  ;;  %2062 = vrot.lane.b32.xlu1 %v7759_v15, %s7140_s28 }
 0x2f5   : > { %v1572_v61 = vmul.f32 %v6849_v39, %v7941_v51  ;;  %v1968_v39 = vrot.slane %v7891_v17, 4 }
 0x2f6   : > { %2491 = vrot.lane.b32.xlu0 %v7761_v35, %s7140_s28 }
 0x2f7   : > { %v1588_v46 = vpack.c.bf16 %v1572_v61, %v1572_v61 }
 0x2f9   : > { %v1658_v38 = vunpack.c.l.b16 %v1588_v46  ;;  %v1972_v46 = vunpack.c.l.b16 %v1968_v39 }
 0x2fb   : > { %v1659_v32 = vpack.c.b16 %v1658_v38, %v1657_v16  ;;  %v1523_v14 = vpop.xlane.xlu1 %1522  ;;  %v1971_v38 = vunpack.c.l.b16 %v1967_v42 }
 0x2fc   : > { %2316 = vrot.lane.b32.xlu1 %v7766_v1, %s7140_s28  ;;  %6850 = vrcp.f32 %v1523_v14 }
 0x2fd   : > { %6292 = vmatmul.msk.bf16.vlgmr.msra.gmra.mxu1 %vm1406_vm2, %v1659_v32  ;;  %v1973_v17 = vpack.c.b16 %v1972_v46, %v1971_v38 }
 0x2fe   : > { %1925 = vmatpush.bf16.xpose.msra.mxu1 %v1916_v40  ;;  %2685 = vrot.lane.b32.xlu0 %v7623_v25, %s7141_s30  ;;  %v1908_v40 = vpop.permute.xlu0 %1907 }
 0x2ff   : > { %v1978_v11 = vsel %vm1140_vm1, %v1973_v17, 0 }
 0x302   : > { %v6851_v24 = vpop.eup %6850 }
 0x303   : > { %v1526_v51 = vpop.xlane.xlu2 %1525  ;;  %v1573_v58 = vmul.f32 %v6851_v24, %v7947_v0  ;;  %v10292_v24 = vld [vmem:[#allocation28_spill] sm:$0xff] }
 0x304   : > { %6852 = vrcp.f32 %v1526_v51  ;;  %2598 = vrot.lane.b32.xlu1 %v7576_v57, %s7141_s30  ;;  %v10291_v51 = vld [vmem:[#allocation39_spill] sm:$0xff] }
 0x305   : > { %v1589_v34 = vpack.c.bf16 %v1573_v58, %v1573_v58 }
 0x307   : > { %v1685_v30 = vunpack.c.l.b16 %v1589_v34 }
 0x309   : > { %2025 = vrot.lane.b32.xlu2 %v7704_v31, %s7140_s28 }
 0x30a   : > { %v6853_v4 = vpop.eup %6852 }
 0x30b   : > { %v1574_v12 = vmul.f32 %v6853_v4, %v7954_v48  ;;  %v1529_v52 = vpop.xlane.xlu1 %1528 }
 0x30c   : > { %2441 = vrot.lane.b32.xlu1 %v7790_v10, %s7140_s28  ;;  %6854 = vrcp.f32 %v1529_v52  ;;  %v10295_v52 = vld [vmem:[#allocation43_spill] sm:$0xff] }
 0x30d   : > { %v1590_v45 = vpack.c.bf16 %v1574_v12, %v1574_v12  ;;  %v10294_v12 = vld [vmem:[#allocation21_spill] sm:$0xff] }
 0x30f   : > { %v1686_v0 = vunpack.c.l.b16 %v1590_v45 }
 0x311   : > { %v1687_v53 = vpack.c.b16 %v1686_v0, %v1685_v30  ;;  %2031 = vrot.lane.b32.xlu2 %v7737_v9, %s7140_s28 }
 0x312   : > { %v6855_v48 = vpop.eup %6854 }
 0x313   : > { %v1532_v23 = vpop.xlane.xlu2 %1531  ;;  %6293 = vmatmul.msk.bf16.vlgmr.msra.gmra.mxu2 %vm1406_vm2, %v1687_v53  ;;  %v1575_v5 = vmul.f32 %v6855_v48, %v7959_v54 }
 0x314   : > { %6856 = vrcp.f32 %v1532_v23  ;;  %1956 = vmatpush.bf16.xpose.msra.mxu2 %v1947_v13  ;;  %2722 = vrot.lane.b32.xlu1 %v7674_v29, %s7141_s30  ;;  %v10296_v13 = vld [vmem:[#allocation29_spill] sm:$0xff] }
 0x315   : > { %v1591_v27 = vpack.c.bf16 %v1575_v5, %v1575_v5  ;;  %6858 = vpow2.f32 %v1501_v26 }
 0x317   : > { %v1713_v3 = vunpack.c.l.b16 %v1591_v27 }
 0x319   : > { %2416 = vrot.lane.b32.xlu2 %v7768_v59, %s7140_s28 }
 0x31a   : > { %v6857_v61 = vpop.eup %6856 }
 0x31b   : > { %v1576_v16 = vmul.f32 %v6857_v61, %v7963_v47  ;;  %v8066_v14 = vpop.eup %6858  ;;  %v8090_v22 = vpop.permute.xlu2 %2058  ;;  %v10297_v61 = vld [vmem:[#allocation41_spill] sm:$0xff] }
 0x31c   : > { %2629 = vrot.lane.b32.xlu1 %v7603_v62, %s7141_s30  ;;  %v1548_v47 = vsel %vm1406_vm2, %v8066_v14, 0.0  ;;  %v1998_v26 = vrot.slane %v10297_v61, 4 }
 0x31d   : > { %v1592_v33 = vpack.c.bf16 %v1576_v16, %v1576_v16  ;;  %v10298_v16 = vld [vmem:[#allocation40_spill] sm:$0xff] }
 0x31e   : > { %v1999_v38 = vrot.slane %v10298_v16, 4  ;;  %v2002_v17 = vunpack.c.l.b16 %v1998_v26 }
 0x31f   : > { %v1714_v54 = vunpack.c.l.b16 %v1592_v33 }
 0x321   : > { %v1715_v32 = vpack.c.b16 %v1714_v54, %v1713_v3  ;;  %2594 = vrot.lane.b32.xlu2 %v7565_v19, %s7141_s30 }
 0x323   : > { %6294 = vmatmul.msk.bf16.vlgmr.msrb.gmra.mxu3 %vm1406_vm2, %v1715_v32  ;;  %v8086_v58 = vpop.permute.xlu1 %2000 }
 0x324   : > { %1987 = vmatpush.bf16.xpose.msrb.mxu3 %v1978_v11  ;;  %v2003_v11 = vunpack.c.l.b16 %v1999_v38 }
 0x325   : > { %v1541_v43 = vpop.xlane.xlu0 %1540 }
 0x326   : > { %6860 = vrcp.f32 %v1541_v43  ;;  %v2004_v43 = vpack.c.b16 %v2003_v11, %v2002_v17 }
 0x328   : > { %1549 = vadd.xlane.f32.xlu0 %v1548_v47 }
 0x329   : > { %2718 = vrot.lane.b32.xlu2 %v7663_v18, %s7141_s30 }
 0x32c   : > { %v6861_v34 = vpop.eup %6860 }
 0x32d   : > { %v1579_v41 = vmul.f32 %v6861_v34, %v10295_v52 }
 0x32f   : > { %v1595_v30 = vpack.c.bf16 %v1579_v41, %v1579_v41 }
 0x331   : > { %2366 = vrot.lane.b32.xlu2 %v7810_v36, %s7140_s28  ;;  %v1769_v48 = vunpack.c.l.b16 %v1595_v30 }
 0x333   : > { %6298 = vmatmul.msk.bf16.vlgmr.msra.gmra.mxu3 %vm1140_vm1, %v7843_v50  ;;  %v10293_v50 = vld [vmem:[#allocation23_spill] sm:$0xff] }
 0x338   : > { %v2028_v4 = vpop.permute.xlu0 %2027 }
 0x339   : > { %2623 = vrot.lane.b32.xlu2 %v7581_v37, %s7141_s30  ;;  %v2030_v41 = vrot.slane %v2028_v4, 4 }
 0x33c   : > { %2654 = vrot.lane.b32.xlu0 %v7600_v60, %s7141_s30 }
 0x340   : > { %v8096_v53 = vpop.permute.xlu0 %2592 }
 0x341   : > { %2466 = vrot.lane.b32.xlu2 %v7812_v20, %s7140_s28 }
 0x343   : > { %6302 = vmatmul.msk.bf16.vlgmr.msrb.gmra.mxu3 %vm1140_vm1, %v10291_v51 }
 0x344   : > { %2747 = vrot.lane.b32.xlu0 %v10292_v24, %s7141_s30 }
 0x349   : > { %2687 = vrot.lane.b32.xlu2 %v10293_v50, %s7141_s30 }
 0x34e   : > { %v1544_v55 = vpop.xlane.xlu1 %1543 }
 0x34f   : > { %6862 = vrcp.f32 %v1544_v55 }
 0x351   : > { %2656 = vrot.lane.b32.xlu2 %v10294_v12, %s7141_s30 }
 0x354   : > { %v1535_v45 = vpop.xlane.xlu2 %1534 }
 0x355   : > { %v6863_v56 = vpop.eup %6862  ;;  %6864 = vrcp.f32 %v1535_v45 }
 0x356   : > { %v1580_v0 = vmul.f32 %v6863_v56, %v7991_v63  ;;  %v2342_v63 = vpop.permute.xlu0 %2341 }
 0x358   : > { %v1596_v23 = vpack.c.bf16 %v1580_v0, %v1580_v0 }
 0x359   : > { %2749 = vrot.lane.b32.xlu2 %v10296_v13, %s7141_s30 }
 0x35a   : > { %v1770_v49 = vunpack.c.l.b16 %v1596_v23 }
 0x35b   : > { %v6865_v42 = vpop.eup %6864 }
 0x35c   : > { %v1771_v39 = vpack.c.b16 %v1770_v49, %v1769_v48  ;;  %v1538_v5 = vpop.xlane.xlu2 %1537  ;;  %v1577_v46 = vmul.f32 %v6865_v42, %v7995_v7  ;;  %v2034_v48 = vunpack.c.l.b16 %v2030_v41 }
 0x35d   : > { %6866 = vrcp.f32 %v1538_v5 }
 0x35e   : > { %6296 = vmatmul.msk.bf16.vlgmr.msrb.gmra.mxu1 %vm1406_vm2, %v1771_v39  ;;  %v1593_v3 = vpack.c.bf16 %v1577_v46, %v1577_v46  ;;  %v8109_v45 = vpop.permute.xlu0 %2716 }
 0x360   : > { %v1622_v27 = vpop.f32.mrf.mxu3  ;;  %v1741_v55 = vunpack.c.l.b16 %v1593_v3 }
 0x361   : > { %1823 = vst.msk [vmem:[#allocation2] sm:$0xff] %vm1140_vm1, %v1622_v27  ;;  %v10299_v27 = vld [vmem:[#allocation37_spill] sm:$0xff] }
 0x363   : > { %v6867_v33 = vpop.eup %6866 }
 0x364   : > { %v1578_v54 = vmul.f32 %v6867_v33, %v8007_v28  ;;  %v1547_v32 = vpop.xlane.xlu2 %1546  ;;  %v2009_v28 = vsel %vm1140_vm1, %v2004_v43, 0 }
 0x365   : > { %6868 = vrcp.f32 %v1547_v32 }
 0x366   : > { %v1594_v47 = vpack.c.bf16 %v1578_v54, %v1578_v54  ;;  %v8106_v51 = vpop.permute.xlu1 %2062  ;;  %v2392_v61 = vpop.permute.xlu0 %2391 }
 0x368   : > { %v1742_v34 = vunpack.c.l.b16 %v1594_v47  ;;  %v1624_v7 = vpop.f32.mrf.mxu3 }
 0x369   : > { %1824 = vst.msk [vmem:[#allocation2 + $0x8] sm:$0xff] %vm1140_vm1, %v1624_v7 }
 0x36a   : > { %v1743_v52 = vpack.c.b16 %v1742_v34, %v1741_v55  ;;  %v1650_v56 = vpop.f32.mrf.mxu0 }
 0x36b   : > { %1825 = vst.msk [vmem:[#allocation2 + $0x10] sm:$0xff] %vm1140_vm1, %v1650_v56  ;;  %v6869_v55 = vpop.eup %6868 }
 0x36c   : > { %v2026_v30 = vpop.permute.xlu2 %2025  ;;  %6295 = vmatmul.msk.bf16.vlgmr.msrb.gmra.mxu0 %vm1406_vm2, %v1743_v52  ;;  %v2061_v52 = vrot.slane %v8090_v22, 4  ;;  %v1581_v41 = vmul.f32 %v6869_v55, %v8014_v8 }
 0x36d   : > { %v2029_v0 = vrot.slane %v2026_v30, 4  ;;  %2018 = vmatpush.bf16.xpose.msrb.mxu0 %v2009_v28 }
 0x36e   : > { %6300 = vmatmul.msk.bf16.vlgmr.msra.gmra.mxu1 %vm1140_vm1, %v1908_v40  ;;  %v2317_v23 = vpop.permute.xlu1 %2316  ;;  %v8121_v40 = vpop.permute.xlu0 %2625  ;;  %v2065_v28 = vunpack.c.l.b16 %v2061_v52  ;;  %v1597_v32 = vpack.c.bf16 %v1581_v41, %v1581_v41 }
 0x36f   : > { %v2033_v49 = vunpack.c.l.b16 %v2029_v0  ;;  %2329 = vmatpush.bf16.msra.mxu3 %v2317_v23 }
 0x371   : > { %v2035_v39 = vpack.c.b16 %v2034_v48, %v2033_v49 }
 0x372   : > { %v1652_v4 = vpop.f32.mrf.mxu0 }
 0x373   : > { %v2040_v5 = vsel %vm1140_vm1, %v2035_v39, 0  ;;  %1826 = vst.msk [vmem:[#allocation2 + $0x18] sm:$0xff] %vm1140_vm1, %v1652_v4 }
 0x374   : > { %v2032_v42 = vpop.permute.xlu2 %2031  ;;  %2049 = vmatpush.bf16.xpose.msrb.mxu1 %v2040_v5  ;;  %v1797_v5 = vunpack.c.l.b16 %v1597_v32  ;;  %v8167_v32 = vld [vmem:[%s10179_s3] ss:$0 sm:$0xff] }
 0x376   : > { %v8123_v16 = vpop.permute.xlu1 %2598  ;;  %v2492_v17 = vpop.permute.xlu0 %2491 }
 0x37a   : > { %v1678_v26 = vpop.f32.mrf.mxu1 }
 0x37b   : > { %1827 = vst.msk [vmem:[#allocation2 + $0x20] sm:$0xff] %vm1140_vm1, %v1678_v26 }
 0x37c   : > { %v2417_v46 = vpop.permute.xlu2 %2416  ;;  %6299 = vmatmul.msk.bf16.vlgmr.msra.gmra.mxu0 %vm1140_vm1, %v10299_v27  ;;  %v10301_v27 = vld [vmem:[#allocation35_spill] sm:$0xff] }
 0x37d   : > { %2354 = vmatpush.bf16.msra.mxu0 %v2342_v63  ;;  %2429 = vmatpush.bf16.msrb.mxu3 %v2417_v46 }
 0x37e   : > { %6304 = vmatmul.msk.bf16.vlgmr.msrb.gmra.mxu1 %vm1140_vm1, %v2032_v42  ;;  %v2442_v3 = vpop.permute.xlu1 %2441  ;;  %v8132_v63 = vpop.permute.xlu0 %2685 }
 0x382   : > { %v1680_v38 = vpop.f32.mrf.mxu1 }
 0x383   : > { %1828 = vst.msk [vmem:[#allocation2 + $0x28] sm:$0xff] %vm1140_vm1, %v1680_v38 }
 0x384   : > { %v8126_v33 = vpop.permute.xlu2 %2594 }
 0x38c   : > { %v8128_v54 = vpop.permute.xlu2 %2718  ;;  %6303 = vmatmul.msk.bf16.vlgmr.msrb.gmra.mxu0 %vm1140_vm1, %v8086_v58  ;;  %v10300_v58 = vld [vmem:[#allocation42_spill] sm:$0xff] }
 0x38d   : > { %2454 = vmatpush.bf16.msrb.mxu0 %v2442_v3  ;;  %v2060_v56 = vrot.slane %v10300_v58, 4  ;;  %v10302_v3 = vld [vmem:[#allocation38_spill] sm:$0xff] }
 0x38f   : > { %v2064_v48 = vunpack.c.l.b16 %v2060_v56 }
 0x391   : > { %v2066_v4 = vpack.c.b16 %v2065_v28, %v2064_v48 }
 0x393   : > { %v2071_v22 = vsel %vm1140_vm1, %v2066_v4, 0 }
 0x394   : > { %v2367_v11 = vpop.permute.xlu2 %2366 }
 0x395   : > { %2379 = vmatpush.bf16.msra.mxu1 %v2367_v11 }
 0x396   : > { %v1706_v47 = vpop.f32.mrf.mxu2 }
 0x397   : > { %1829 = vst.msk [vmem:[#allocation2 + $0x30] sm:$0xff] %vm1140_vm1, %v1706_v47 }
 0x39b   : > { %v1550_v43 = vpop.xlane.xlu0 %1549 }
 0x39c   : > { %6870 = vrcp.f32 %v1550_v43  ;;  %v8135_v34 = vpop.permute.xlu2 %2623 }
 0x39e   : > { %v1708_v7 = vpop.f32.mrf.mxu2 }
 0x39f   : > { %1830 = vst.msk [vmem:[#allocation2 + $0x38] sm:$0xff] %vm1140_vm1, %v1708_v7 }
 0x3a2   : > { %v6871_v30 = vpop.eup %6870 }
 0x3a3   : > { %v1582_v0 = vmul.f32 %v6871_v30, %v8066_v14 }
 0x3a4   : > { %v2467_v23 = vpop.permute.xlu2 %2466 }
 0x3a5   : > { %v1598_v49 = vpack.c.bf16 %v1582_v0, %v1582_v0  ;;  %2479 = vmatpush.bf16.msrb.mxu1 %v2467_v23 }
 0x3a6   : > { %v1734_v39 = vpop.f32.mrf.mxu3 }
 0x3a7   : > { %v1798_v42 = vunpack.c.l.b16 %v1598_v49  ;;  %1831 = vst.msk [vmem:[#allocation2 + $0x40] sm:$0xff] %vm1140_vm1, %v1734_v39 }
 0x3a9   : > { %v1799_v8 = vpack.c.b16 %v1798_v42, %v1797_v5 }
 0x3ab   : > { %6297 = vmatmul.msk.bf16.vlgmr.msrb.gmra.mxu2 %vm1406_vm2, %v1799_v8 }
 0x3ac   : > { %2080 = vmatpush.bf16.xpose.msrb.mxu2 %v2071_v22 }
 0x3ae   : > { %v1736_v26 = vpop.f32.mrf.mxu3 }
 0x3af   : > { %1832 = vst.msk [vmem:[#allocation2 + $0x48] sm:$0xff] %vm1140_vm1, %v1736_v26 }
 0x3b6   : > { %v1865_v14 = vpop.f32.mrf.mxu3 }
 0x3b7   : > { %v2087_v46 = vmul.f32 0.17677669, %v1865_v14 }
 0x3b9   : > { %v8147_v38 = vadd.f32 %v10301_v27, %v2087_v46 }
 0x3bb   : > { %6301 = vmatmul.msk.bf16.vlgmr.msra.gmra.mxu2 %vm1140_vm1, %v10302_v3  ;;  %v2119_v11 = vsel %vm1406_vm2, %v8147_v38, -inf }
 0x3bc   : > { %2404 = vmatpush.bf16.msra.mxu2 %v2392_v61  ;;  %2120 = vmax.xlane.f32.xlu0 %v2119_v11 }
 0x3be   : > { %v1867_v47 = vpop.f32.mrf.mxu3 }
 0x3bf   : > { %v2088_v5 = vmul.f32 0.17677669, %v1867_v47 }
 0x3c1   : > { %v8180_v26 = vadd.f32 %v8167_v32, %v2088_v5 }
 0x3c3   : > { %v2122_v47 = vsel %vm1406_vm2, %v8180_v26, -inf }
 0x3c6   : > { %v1989_v43 = vpop.f32.mrf.mxu3 }
 0x3c7   : > { %v2095_v3 = vmul.f32 0.17677669, %v1989_v43 }
 0x3cb   : > { %6305 = vmatmul.msk.bf16.vlgmr.msrb.gmra.mxu2 %vm1140_vm1, %v8106_v51 }
 0x3cc   : > { %2504 = vmatpush.bf16.msrb.mxu2 %v2492_v17 }
 0x3ce   : > { %v1991_v55 = vpop.f32.mrf.mxu3 }
 0x3cf   : > { %v2096_v7 = vmul.f32 0.17677669, %v1991_v55 }
 0x3d1   : > { %v8156_v52 = vadd.f32 %v10301_v27, %v2096_v7 }
 0x3d3   : > { %v2146_v41 = vsel %vm1406_vm2, %v8156_v52, -inf }
 0x3d4   : > { %2147 = vmax.xlane.f32.xlu0 %v2146_v41 }
 0x3db   : > { %v1790_v58 = vpop.f32.mrf.mxu1 }
 0x3dc   : > { %1835 = vst.msk [vmem:[#allocation2 + $0x60] sm:$0xff] %vm1140_vm1, %v1790_v58 }
 0x3e3   : > { %v1792_v61 = vpop.f32.mrf.mxu1 }
 0x3e4   : > { %1836 = vst.msk [vmem:[#allocation2 + $0x68] sm:$0xff] %vm1140_vm1, %v1792_v61  ;;  %v8195_v61 = vadd.f32 %v8167_v32, %v2095_v3  ;;  %v8221_v3 = vpop.permute.xlu0 %2654 }
 0x3e9   : > { %v1762_v56 = vpop.f32.mrf.mxu0 }
 0x3ea   : > { %1833 = vst.msk [vmem:[#allocation2 + $0x50] sm:$0xff] %vm1140_vm1, %v1762_v56 }
 0x3eb   : > { %v1927_v51 = vpop.f32.mrf.mxu1 }
 0x3ec   : > { %v2091_v56 = vmul.f32 0.17677669, %v1927_v51 }
 0x3f1   : > { %v1764_v17 = vpop.f32.mrf.mxu0 }
 0x3f2   : > { %1834 = vst.msk [vmem:[#allocation2 + $0x58] sm:$0xff] %vm1140_vm1, %v1764_v17  ;;  %v2143_v17 = vsel %vm1406_vm2, %v8195_v61, -inf }
 0x3f3   : > { %v1929_v30 = vpop.f32.mrf.mxu1 }
 0x3f4   : > { %v2092_v28 = vmul.f32 0.17677669, %v1929_v30 }
 0x3f6   : > { %v8170_v0 = vadd.f32 %v8167_v32, %v2092_v28  ;;  %v8205_v28 = vadd.f32 %v8167_v32, %v2091_v56 }
 0x3f8   : > { %v2134_v23 = vsel %vm1406_vm2, %v8170_v0, -inf }
 0x3f9   : > { %v1896_v48 = vpop.f32.mrf.mxu0  ;;  %2135 = vmax.xlane.f32.xlu0 %v2134_v23 }
 0x3fa   : > { %v2089_v49 = vmul.f32 0.17677669, %v1896_v48 }
 0x3fb   : > { %v2051_v39 = vpop.f32.mrf.mxu1 }
 0x3fc   : > { %v8175_v4 = vadd.f32 %v8167_v32, %v2089_v49  ;;  %v2131_v49 = vsel %vm1406_vm2, %v8205_v28, -inf  ;;  %v2099_v51 = vmul.f32 0.17677669, %v2051_v39 }
 0x3fe   : > { %v2125_v42 = vsel %vm1406_vm2, %v8175_v4, -inf }
 0x3ff   : > { %2126 = vmax.xlane.f32.xlu1 %v2125_v42 }
 0x401   : > { %v1898_v8 = vpop.f32.mrf.mxu0 }
 0x402   : > { %v2090_v22 = vmul.f32 0.17677669, %v1898_v8  ;;  %v8215_v8 = vadd.f32 %v8167_v32, %v2099_v51 }
 0x403   : > { %v2053_v14 = vpop.f32.mrf.mxu1 }
 0x404   : > { %v2100_v46 = vmul.f32 0.17677669, %v2053_v14  ;;  %v8183_v27 = vadd.f32 %v8167_v32, %v2090_v22  ;;  %v2155_v22 = vsel %vm1406_vm2, %v8215_v8, -inf }
 0x406   : > { %v2128_v11 = vsel %vm1406_vm2, %v8183_v27, -inf  ;;  %v8190_v55 = vadd.f32 %v8167_v32, %v2100_v46 }
 0x407   : > { %2129 = vmax.xlane.f32.xlu2 %v2128_v11  ;;  %2123 = vmax.xlane.f32.xlu1 %v2122_v47 }
 0x408   : > { %v2158_v7 = vsel %vm1406_vm2, %v8190_v55, -inf }
 0x409   : > { %v2020_v41 = vpop.f32.mrf.mxu0  ;;  %2159 = vmax.xlane.f32.xlu0 %v2158_v7 }
 0x40a   : > { %v2097_v58 = vmul.f32 0.17677669, %v2020_v41 }
 0x40c   : > { %v8198_v43 = vadd.f32 %v8167_v32, %v2097_v58  ;;  %v8228_v58 = vpop.permute.xlu0 %2747 }
 0x40e   : > { %v2149_v30 = vsel %vm1406_vm2, %v8198_v43, -inf }
 0x40f   : > { %2144 = vmax.xlane.f32.xlu2 %v2143_v17  ;;  %2150 = vmax.xlane.f32.xlu1 %v2149_v30 }
 0x411   : > { %v2022_v23 = vpop.f32.mrf.mxu0 }
 0x412   : > { %v2098_v48 = vmul.f32 0.17677669, %v2022_v23 }
 0x414   : > { %v8210_v5 = vadd.f32 %v8167_v32, %v2098_v48 }
 0x416   : > { %v2152_v42 = vsel %vm1406_vm2, %v8210_v5, -inf }
 0x417   : > { %2132 = vmax.xlane.f32.xlu2 %v2131_v49 }
 0x41f   : > { %2153 = vmax.xlane.f32.xlu2 %v2152_v42 }
 0x427   : > { %2156 = vmax.xlane.f32.xlu2 %v2155_v22 }
 0x42e   : > { %v1818_v14 = vpop.f32.mrf.mxu2 }
 0x42f   : > { %1837 = vst.msk [vmem:[#allocation2 + $0x70] sm:$0xff] %vm1140_vm1, %v1818_v14  ;;  %v2121_v48 = vpop.xlane.xlu0 %2120 }
 0x430   : > { %v2167_v42 = vsub.f32 %v8147_v38, %v2121_v48  ;;  %v8250_v38 = vpop.permute.xlu1 %2722 }
 0x432   : > { %v2183_v14 = vmul.f32 1.442695, %v2167_v42 }
 0x434   : > { %6872 = vpow2.f32 %v2183_v14 }
 0x436   : > { %v1820_v46 = vpop.f32.mrf.mxu2 }
 0x437   : > { %1838 = vst.msk [vmem:[#allocation2 + $0x78] sm:$0xff] %vm1140_vm1, %v1820_v46 }
 0x438   : > { %v8256_v48 = vpop.permute.xlu1 %2629 }
 0x43e   : > { %v1958_v39 = vpop.f32.mrf.mxu2 }
 0x43f   : > { %v2093_v11 = vmul.f32 0.17677669, %v1958_v39 }
 0x441   : > { %v8224_v47 = vadd.f32 %v8167_v32, %v2093_v11 }
 0x443   : > { %v2137_v7 = vsel %vm1406_vm2, %v8224_v47, -inf }
 0x444   : > { %2138 = vmax.xlane.f32.xlu0 %v2137_v7 }
 0x446   : > { %v1960_v41 = vpop.f32.mrf.mxu2 }
 0x447   : > { %v2094_v56 = vmul.f32 0.17677669, %v1960_v41  ;;  %v8246_v41 = vpop.permute.xlu2 %2687 }
 0x449   : > { %v8231_v17 = vadd.f32 %v8167_v32, %v2094_v56  ;;  %v8248_v56 = vpop.eup %6872 }
 0x44b   : > { %v2140_v30 = vsel %vm1406_vm2, %v8231_v17, -inf }
 0x44c   : > { %2141 = vmax.xlane.f32.xlu1 %v2140_v30  ;;  %v2215_v30 = vsel %vm1406_vm2, %v8248_v56, 0.0 }
 0x44e   : > { %v2082_v23 = vpop.f32.mrf.mxu2 }
 0x44f   : > { %v2101_v49 = vmul.f32 0.17677669, %v2082_v23  ;;  %v8254_v23 = vpop.permute.xlu2 %2656 }
 0x451   : > { %v8236_v51 = vadd.f32 %v8167_v32, %v2101_v49 }
 0x453   : > { %v2161_v22 = vsel %vm1406_vm2, %v8236_v51, -inf }
 0x454   : > { %2162 = vmax.xlane.f32.xlu2 %v2161_v22 }
 0x456   : > { %v2084_v46 = vpop.f32.mrf.mxu2 }
 0x457   : > { %v2102_v39 = vmul.f32 0.17677669, %v2084_v46  ;;  %v8258_v49 = vpop.permute.xlu2 %2749  ;;  %v2148_v46 = vpop.xlane.xlu0 %2147 }
 0x459   : > { %v8242_v11 = vadd.f32 %v8167_v32, %v2102_v39 }
 0x45b   : > { %v2164_v7 = vsel %vm1406_vm2, %v8242_v11, -inf }
 0x45c   : > { %2165 = vmax.xlane.f32.xlu0 %v2164_v7 }
 0x464   : > { %2216 = vadd.xlane.f32.xlu0 %v2215_v30 }
 0x46c   : > { %v2136_v6 = vpop.xlane.xlu0 %2135 }
 0x472   : > { %v2127_v42 = vpop.xlane.xlu1 %2126 }
 0x473   : > { %v2169_v22 = vsub.f32 %v8175_v4, %v2127_v42  ;;  %v2172_v4 = vsub.f32 %v8170_v0, %v2136_v6 }
 0x475   : > { %v2187_v14 = vmul.f32 1.442695, %v2169_v22 }
 0x477   : > { %6874 = vpow2.f32 %v2187_v14 }
 0x47a   : > { %v2130_v39 = vpop.xlane.xlu2 %2129  ;;  %v2124_v7 = vpop.xlane.xlu1 %2123 }
 0x47b   : > { %v2168_v13 = vsub.f32 %v8180_v26, %v2124_v7 }
 0x47d   : > { %v8262_v24 = vpop.eup %6874  ;;  %v2185_v18 = vmul.f32 1.442695, %v2168_v13  ;;  %v2193_v13 = vmul.f32 1.442695, %v2172_v4 }
 0x47e   : > { %v2221_v30 = vsel %vm1406_vm2, %v8262_v24, 0.0 }
 0x47f   : > { %2222 = vadd.xlane.f32.xlu0 %v2221_v30  ;;  %6876 = vpow2.f32 %v2185_v18 }
 0x482   : > { %v2145_v29 = vpop.xlane.xlu2 %2144 }
 0x483   : > { %v2175_v50 = vsub.f32 %v8195_v61, %v2145_v29 }
 0x485   : > { %v2199_v42 = vmul.f32 1.442695, %v2175_v50  ;;  %v8268_v22 = vpop.eup %6876  ;;  %v10303_v50 = vld [vmem:[#allocation22_spill] sm:$0xff] }
 0x486   : > { %v2218_v26 = vsel %vm1406_vm2, %v8268_v22, 0.0 }
 0x487   : > { %6878 = vpow2.f32 %v2199_v42  ;;  %2219 = vadd.xlane.f32.xlu1 %v2218_v26  ;;  %v10304_v26 = vld [vmem:[#allocation24_spill] sm:$0xff] }
 0x488   : > { %6880 = vpow2.f32 %v2193_v13  ;;  %v2151_v13 = vpop.xlane.xlu1 %2150 }
 0x48a   : > { %v2133_v14 = vpop.xlane.xlu2 %2132 }
 0x48d   : > { %v8272_v7 = vpop.eup %6878 }
 0x48e   : > { %v2239_v18 = vsel %vm1406_vm2, %v8272_v7, 0.0  ;;  %v8276_v61 = vpop.eup %6880 }
 0x48f   : > { %2240 = vadd.xlane.f32.xlu2 %v2239_v18  ;;  %v2230_v30 = vsel %vm1406_vm2, %v8276_v61, 0.0  ;;  %v2160_v18 = vpop.xlane.xlu0 %2159 }
 0x492   : > { %v2154_v29 = vpop.xlane.xlu2 %2153 }
 0x493   : > { %v2178_v6 = vsub.f32 %v8210_v5, %v2154_v29  ;;  %2660 = vrot.lane.b32.xlu0 %v10303_v50, %s7141_s30  ;;  %v2177_v5 = vsub.f32 %v8198_v43, %v2151_v13  ;;  %v2170_v50 = vsub.f32 %v8183_v27, %v2130_v39 }
 0x495   : > { %v2205_v0 = vmul.f32 1.442695, %v2178_v6  ;;  %v2203_v29 = vmul.f32 1.442695, %v2177_v5  ;;  %v2176_v6 = vsub.f32 %v8156_v52, %v2148_v46  ;;  %v2189_v13 = vmul.f32 1.442695, %v2170_v50 }
 0x497   : > { %6882 = vpow2.f32 %v2205_v0  ;;  %2231 = vadd.xlane.f32.xlu2 %v2230_v30  ;;  %v2201_v12 = vmul.f32 1.442695, %v2176_v6 }
 0x498   : > { %6884 = vpow2.f32 %v2203_v29 }
 0x499   : > { %6886 = vpow2.f32 %v2201_v12 }
 0x49a   : > { %v2157_v39 = vpop.xlane.xlu2 %2156 }
 0x49d   : > { %v8283_v4 = vpop.eup %6882 }
 0x49e   : > { %v2248_v42 = vsel %vm1406_vm2, %v8283_v4, 0.0  ;;  %v8292_v60 = vpop.eup %6884 }
 0x49f   : > { %2249 = vadd.xlane.f32.xlu2 %v2248_v42  ;;  %v2245_v43 = vsel %vm1406_vm2, %v8292_v60, 0.0  ;;  %v8298_v46 = vpop.eup %6886 }
 0x4a0   : > { %2691 = vrot.lane.b32.xlu1 %v10304_v26, %s7141_s30  ;;  %v2180_v26 = vsub.f32 %v8190_v55, %v2160_v18  ;;  %v2242_v27 = vsel %vm1406_vm2, %v8298_v46, 0.0 }
 0x4a2   : > { %v2209_v52 = vmul.f32 1.442695, %v2180_v26 }
 0x4b7   : > { %v2139_v0 = vpop.xlane.xlu0 %2138 }
 0x4b8   : > { %v2173_v30 = vsub.f32 %v8224_v47, %v2139_v0  ;;  %v2171_v47 = vsub.f32 %v8205_v28, %v2133_v14  ;;  %v2179_v28 = vsub.f32 %v8215_v8, %v2157_v39 }
 0x4ba   : > { %v2195_v42 = vmul.f32 1.442695, %v2173_v30  ;;  %v2191_v55 = vmul.f32 1.442695, %v2171_v47  ;;  %v2207_v29 = vmul.f32 1.442695, %v2179_v28 }
 0x4bc   : > { %6888 = vpow2.f32 %v2195_v42  ;;  %v10305_v42 = vld [vmem:[#allocation30_spill] sm:$0xff] }
 0x4bd   : > { %2246 = vadd.xlane.f32.xlu0 %v2245_v43  ;;  %6890 = vpow2.f32 %v2189_v13  ;;  %v10306_v43 = vld [vmem:[#allocation33_spill] sm:$0xff] }
 0x4be   : > { %6892 = vpow2.f32 %v2209_v52 }
 0x4bf   : > { %6894 = vpow2.f32 %v2191_v55  ;;  %v2142_v52 = vpop.xlane.xlu1 %2141 }
 0x4c0   : > { %6896 = vpow2.f32 %v2207_v29  ;;  %v2174_v39 = vsub.f32 %v8231_v17, %v2142_v52 }
 0x4c2   : > { %v8301_v5 = vpop.eup %6888  ;;  %v2197_v29 = vmul.f32 1.442695, %v2174_v39 }
 0x4c3   : > { %v2233_v12 = vsel %vm1406_vm2, %v8301_v5, 0.0  ;;  %v8307_v50 = vpop.eup %6890 }
 0x4c4   : > { %2234 = vadd.xlane.f32.xlu2 %v2233_v12  ;;  %v8309_v26 = vpop.eup %6892  ;;  %v2224_v14 = vsel %vm1406_vm2, %v8307_v50, 0.0 }
 0x4c5   : > { %2243 = vadd.xlane.f32.xlu0 %v2242_v27  ;;  %v2254_v18 = vsel %vm1406_vm2, %v8309_v26, 0.0  ;;  %v8316_v6 = vpop.eup %6894  ;;  %v10307_v27 = vld [vmem:[#allocation32_spill] sm:$0xff] }
 0x4c6   : > { %v2227_v0 = vsel %vm1406_vm2, %v8316_v6, 0.0  ;;  %v8320_v30 = vpop.eup %6896 }
 0x4c7   : > { %v2251_v8 = vsel %vm1406_vm2, %v8320_v30, 0.0 }
 0x4ca   : > { %2225 = vadd.xlane.f32.xlu1 %v2224_v14 }
 0x4cd   : > { %2255 = vadd.xlane.f32.xlu0 %v2254_v18  ;;  %v10308_v18 = vld [vmem:[#allocation31_spill] sm:$0xff] }
 0x4cf   : > { %v2166_v13 = vpop.xlane.xlu0 %2165 }
 0x4d0   : > { %v2182_v47 = vsub.f32 %v8242_v11, %v2166_v13 }
 0x4d2   : > { %2228 = vadd.xlane.f32.xlu1 %v2227_v0  ;;  %v2213_v55 = vmul.f32 1.442695, %v2182_v47  ;;  %v2163_v0 = vpop.xlane.xlu2 %2162 }
 0x4d3   : > { %v2181_v17 = vsub.f32 %v8236_v51, %v2163_v0 }
 0x4d7   : > { %v2217_v12 = vpop.xlane.xlu0 %2216 }
 0x4d8   : > { %6898 = vrcp.f32 %v2217_v12  ;;  %v2596_v12 = vrot.slane %v8096_v53, 4 }
 0x4d9   : > { %6900 = vpow2.f32 %v2213_v55 }
 0x4da   : > { %2252 = vadd.xlane.f32.xlu1 %v2251_v8  ;;  %v2597_v8 = vrot.slane %v8126_v33, 4  ;;  %v2600_v39 = vunpack.c.l.b16 %v2596_v12 }
 0x4dc   : > { %2753 = vrot.lane.b32.xlu2 %v10305_v42, %s7141_s30  ;;  %v2601_v47 = vunpack.c.l.b16 %v2597_v8 }
 0x4de   : > { %v6899_v14 = vpop.eup %6898  ;;  %v2602_v53 = vpack.c.b16 %v2601_v47, %v2600_v39 }
 0x4df   : > { %v2279_v11 = vmul.f32 %v6899_v14, %v8248_v56  ;;  %v8336_v13 = vpop.eup %6900  ;;  %v2211_v56 = vmul.f32 1.442695, %v2181_v17 }
 0x4e0   : > { %v2260_v33 = vsel %vm1406_vm2, %v8336_v13, 0.0  ;;  %v2607_v8 = vsel %vm1140_vm1, %v2602_v53, 0 }
 0x4e1   : > { %2811 = vrot.lane.b32.xlu0 %v10306_v43, %s7141_s30  ;;  %v2295_v55 = vpack.c.bf16 %v2279_v11, %v2279_v11 }
 0x4f2   : > { %v2223_v17 = vpop.xlane.xlu0 %2222 }
 0x4f3   : > { %2809 = vrot.lane.b32.xlu1 %v10307_v27, %s7141_s30 }
 0x4fa   : > { %v2220_v28 = vpop.xlane.xlu1 %2219 }
 0x4fb   : > { %6902 = vrcp.f32 %v2220_v28  ;;  %2780 = vrot.lane.b32.xlu1 %v10308_v18, %s7141_s30 }
 0x4fc   : > { %6904 = vpow2.f32 %v2197_v29  ;;  %v2313_v29 = vunpack.c.l.b16 %v2295_v55 }
 0x4fd   : > { %6906 = vpow2.f32 %v2211_v56  ;;  %v2721_v56 = vrot.slane %v8128_v54, 4 }
 0x501   : > { %v6903_v52 = vpop.eup %6902 }
 0x502   : > { %v2280_v28 = vmul.f32 %v6903_v52, %v8268_v22  ;;  %v8345_v43 = vpop.eup %6904  ;;  %v10309_v52 = vld [vmem:[#allocation19_spill] sm:$0xff]  ;;  %v2241_v47 = vpop.xlane.xlu2 %2240 }
 0x503   : > { %3069 = vrot.lane.b32.xlu1 %v7766_v1, %s7141_s30  ;;  %v2236_v22 = vsel %vm1406_vm2, %v8345_v43, 0.0  ;;  %v8353_v11 = vpop.eup %6906  ;;  %6908 = vrcp.f32 %v2241_v47  ;;  %v2628_v47 = vrot.slane %v8121_v40, 4 }
 0x504   : > { %v2296_v14 = vpack.c.bf16 %v2280_v28, %v2280_v28  ;;  %v2257_v12 = vsel %vm1406_vm2, %v8353_v11, 0.0  ;;  %6910 = vrcp.f32 %v2223_v17  ;;  %v2627_v17 = vrot.slane %v8135_v34, 4 }
 0x505   : > { %2261 = vadd.xlane.f32.xlu2 %v2260_v33 }
 0x506   : > { %v2314_v51 = vunpack.c.l.b16 %v2296_v14 }
 0x508   : > { %v2315_v0 = vpack.c.b16 %v2314_v51, %v2313_v29  ;;  %v2720_v51 = vrot.slane %v8109_v45, 4 }
 0x509   : > { %v6909_v39 = vpop.eup %6908 }
 0x50a   : > { %6306 = vmatmul.msk.bf16.vlgmr.msra.gmra.mxu3 %vm1406_vm2, %v2315_v0  ;;  %v2287_v14 = vmul.f32 %v6909_v39, %v8272_v7  ;;  %v2232_v53 = vpop.xlane.xlu2 %2231  ;;  %v6911_v29 = vpop.eup %6910  ;;  %v2724_v54 = vunpack.c.l.b16 %v2720_v51 }
 0x50b   : > { %2237 = vadd.xlane.f32.xlu0 %v2236_v22  ;;  %2616 = vmatpush.bf16.xpose.msra.mxu3 %v2607_v8  ;;  %v2725_v8 = vunpack.c.l.b16 %v2721_v56  ;;  %v2281_v7 = vmul.f32 %v6911_v29, %v8262_v24  ;;  %v2632_v24 = vunpack.c.l.b16 %v2628_v47 }
 0x50c   : > { %3347 = vrot.lane.b32.xlu1 %v7565_v19, %s7142_s22  ;;  %v8367_v19 = vpop.permute.xlu0 %2660 }
 0x50d   : > { %v2297_v56 = vpack.c.bf16 %v2281_v7, %v2281_v7 }
 0x512   : > { %v8375_v28 = vpop.permute.xlu1 %2691 }
 0x513   : > { %2258 = vadd.xlane.f32.xlu0 %v2257_v12 }
 0x514   : > { %3094 = vrot.lane.b32.xlu1 %v7788_v21, %s7141_s30 }
 0x51c   : > { %3119 = vrot.lane.b32.xlu1 %v7810_v36, %s7141_s30 }
 0x51d   : > { %2778 = vrot.lane.b32.xlu2 %v7704_v31, %s7141_s30 }
 0x525   : > { %2784 = vrot.lane.b32.xlu2 %v7737_v9, %s7141_s30 }
 0x527   : > { %2815 = vrot.lane.b32.xlu0 %v7759_v15, %s7141_s30 }
 0x52d   : > { %3169 = vrot.lane.b32.xlu2 %v7768_v59, %s7141_s30  ;;  %v2631_v59 = vunpack.c.l.b16 %v2627_v17 }
 0x52f   : > { %3345 = vrot.lane.b32.xlu0 %v10309_v52, %s7142_s22 }
 0x530   : > { %v2247_v55 = vpop.xlane.xlu0 %2246 }
 0x535   : > { %3194 = vrot.lane.b32.xlu2 %v7790_v10, %s7141_s30 }
 0x537   : > { %3351 = vrot.lane.b32.xlu0 %v7576_v57, %s7142_s22  ;;  %v2303_v57 = vpack.c.bf16 %v2287_v14, %v2287_v14  ;;  %v2250_v14 = vpop.xlane.xlu2 %2249 }
 0x538   : > { %v2244_v33 = vpop.xlane.xlu0 %2243 }
 0x539   : > { %6912 = vrcp.f32 %v2244_v33  ;;  %v2726_v33 = vpack.c.b16 %v2725_v8, %v2724_v54  ;;  %v2413_v39 = vunpack.c.l.b16 %v2303_v57 }
 0x53b   : > { %v2731_v40 = vsel %vm1140_vm1, %v2726_v33, 0 }
 0x53d   : > { %3144 = vrot.lane.b32.xlu2 %v7747_v2, %s7141_s30  ;;  %v2226_v0 = vpop.xlane.xlu1 %2225 }
 0x53e   : > { %6914 = vrcp.f32 %v2226_v0  ;;  %v2659_v0 = vrot.slane %v8254_v23, 4 }
 0x53f   : > { %v6913_v22 = vpop.eup %6912  ;;  %6916 = vrcp.f32 %v2232_v53 }
 0x540   : > { %v2288_v12 = vmul.f32 %v6913_v22, %v8298_v46  ;;  %6918 = vrcp.f32 %v2247_v55  ;;  %v2338_v22 = vunpack.c.l.b16 %v2297_v56  ;;  %v2663_v17 = vunpack.c.l.b16 %v2659_v0  ;;  %v2256_v7 = vpop.xlane.xlu0 %2255 }
 0x542   : > { %v2304_v52 = vpack.c.bf16 %v2288_v12, %v2288_v12 }
 0x544   : > { %v2414_v10 = vunpack.c.l.b16 %v2304_v52  ;;  %v6915_v45 = vpop.eup %6914 }
 0x545   : > { %3376 = vrot.lane.b32.xlu2 %v7581_v37, %s7142_s22  ;;  %v2282_v34 = vmul.f32 %v6915_v45, %v8307_v50  ;;  %v2229_v53 = vpop.xlane.xlu1 %2228  ;;  %v6917_v51 = vpop.eup %6916  ;;  %v2633_v37 = vpack.c.b16 %v2632_v24, %v2631_v59  ;;  %v2658_v50 = vrot.slane %v8221_v3, 4 }
 0x546   : > { %v2415_v46 = vpack.c.b16 %v2414_v10, %v2413_v39  ;;  %6920 = vrcp.f32 %v2229_v53  ;;  %v2284_v55 = vmul.f32 %v6917_v51, %v8276_v61  ;;  %v6919_v8 = vpop.eup %6918 }
 0x547   : > { %v2298_v29 = vpack.c.bf16 %v2282_v34, %v2282_v34  ;;  %6922 = vrcp.f32 %v2250_v14  ;;  %v2638_v59 = vsel %vm1140_vm1, %v2633_v37, 0  ;;  %v2662_v47 = vunpack.c.l.b16 %v2658_v50 }
 0x548   : > { %6310 = vmatmul.msk.bf16.vlgmr.msrb.gmra.mxu3 %vm1406_vm2, %v2415_v46  ;;  %v2300_v54 = vpack.c.bf16 %v2284_v55, %v2284_v55  ;;  %v2289_v3 = vmul.f32 %v6919_v8, %v8292_v60  ;;  %v2751_v14 = vrot.slane %v8228_v58, 4 }
 0x549   : > { %2740 = vmatpush.bf16.xpose.msrb.mxu3 %v2731_v40  ;;  %v2339_v10 = vunpack.c.l.b16 %v2298_v29  ;;  %v2664_v39 = vpack.c.b16 %v2663_v17, %v2662_v47  ;;  %v2235_v17 = vpop.xlane.xlu2 %2234 }
 0x54a   : > { %v2364_v45 = vunpack.c.l.b16 %v2300_v54  ;;  %v2305_v46 = vpack.c.bf16 %v2289_v3, %v2289_v3  ;;  %v2755_v40 = vunpack.c.l.b16 %v2751_v14  ;;  %v2690_v3 = vrot.slane %v8246_v41, 4 }
 0x54b   : > { %v2340_v57 = vpack.c.b16 %v2339_v10, %v2338_v22  ;;  %v2669_v60 = vsel %vm1140_vm1, %v2664_v39, 0 }
 0x54c   : > { %v6921_v12 = vpop.eup %6920  ;;  %v2438_v0 = vunpack.c.l.b16 %v2305_v46 }
 0x54d   : > { %3378 = vrot.lane.b32.xlu2 %v7585_v44, %s7142_s22  ;;  %v2283_v23 = vmul.f32 %v6921_v12, %v8316_v6  ;;  %6307 = vmatmul.msk.bf16.vlgmr.msra.gmra.mxu0 %vm1406_vm2, %v2340_v57  ;;  %v2253_v52 = vpop.xlane.xlu1 %2252  ;;  %v6923_v61 = vpop.eup %6922  ;;  %v2752_v44 = vrot.slane %v8258_v49, 4 }
 0x54e   : > { %2647 = vmatpush.bf16.xpose.msra.mxu0 %v2638_v59  ;;  %6924 = vrcp.f32 %v2253_v52  ;;  %v2290_v56 = vmul.f32 %v6923_v61, %v8283_v4 }
 0x54f   : > { %v2299_v33 = vpack.c.bf16 %v2283_v23, %v2283_v23  ;;  %6926 = vrcp.f32 %v2256_v7  ;;  %v2756_v51 = vunpack.c.l.b16 %v2752_v44  ;;  %v2689_v44 = vrot.slane %v8132_v63, 4 }
 0x550   : > { %v2306_v24 = vpack.c.bf16 %v2290_v56, %v2290_v56  ;;  %6928 = vrcp.f32 %v2235_v17 }
 0x551   : > { %v2363_v6 = vunpack.c.l.b16 %v2299_v33  ;;  %v2757_v4 = vpack.c.b16 %v2756_v51, %v2755_v40 }
 0x552   : > { %v2439_v58 = vunpack.c.l.b16 %v2306_v24  ;;  %v2693_v24 = vunpack.c.l.b16 %v2689_v44 }
 0x553   : > { %v2365_v34 = vpack.c.b16 %v2364_v45, %v2363_v6  ;;  %v2762_v50 = vsel %vm1140_vm1, %v2757_v4, 0  ;;  %v2812_v54 = vpop.permute.xlu0 %2811  ;;  %v2694_v6 = vunpack.c.l.b16 %v2690_v3 }
 0x554   : > { %v6925_v53 = vpop.eup %6924  ;;  %v2440_v22 = vpack.c.b16 %v2439_v58, %v2438_v0 }
 0x555   : > { %6308 = vmatmul.msk.bf16.vlgmr.msra.gmra.mxu1 %vm1406_vm2, %v2365_v34  ;;  %v6927_v29 = vpop.eup %6926  ;;  %v2291_v49 = vmul.f32 %v6925_v53, %v8320_v30 }
 0x556   : > { %2678 = vmatpush.bf16.xpose.msra.mxu1 %v2669_v60  ;;  %v2292_v37 = vmul.f32 %v6927_v29, %v8309_v26  ;;  %v2754_v26 = vpop.permute.xlu2 %2753  ;;  %v6929_v61 = vpop.eup %6928 }
 0x557   : > { %v2307_v55 = vpack.c.bf16 %v2291_v49, %v2291_v49  ;;  %v2285_v33 = vmul.f32 %v6929_v61, %v8301_v5  ;;  %v2695_v5 = vpack.c.b16 %v2694_v6, %v2693_v24 }
 0x558   : > { %6314 = vmatmul.msk.bf16.vlgmr.msra.gmra.mxu3 %vm1140_vm1, %v8123_v16  ;;  %v2308_v10 = vpack.c.bf16 %v2292_v37, %v2292_v37 }
 0x559   : > { %v2463_v8 = vunpack.c.l.b16 %v2307_v55  ;;  %v2301_v14 = vpack.c.bf16 %v2285_v33, %v2285_v33 }
 0x55a   : > { %v2464_v57 = vunpack.c.l.b16 %v2308_v10  ;;  %v2814_v10 = vrot.slane %v2812_v54, 4 }
 0x55b   : > { %v2388_v29 = vunpack.c.l.b16 %v2301_v14 }
 0x55c   : > { %v2465_v12 = vpack.c.b16 %v2464_v57, %v2463_v8 }
 0x55d   : > { %6311 = vmatmul.msk.bf16.vlgmr.msrb.gmra.mxu0 %vm1406_vm2, %v2440_v22 }
 0x55e   : > { %2771 = vmatpush.bf16.xpose.msrb.mxu0 %v2762_v50 }
 0x565   : > { %6312 = vmatmul.msk.bf16.vlgmr.msrb.gmra.mxu1 %vm1406_vm2, %v2465_v12  ;;  %v2810_v30 = vpop.permute.xlu1 %2809  ;;  %v2818_v12 = vunpack.c.l.b16 %v2814_v10 }
 0x566   : > { %v2813_v22 = vrot.slane %v2810_v30, 4 }
 0x568   : > { %6318 = vmatmul.msk.bf16.vlgmr.msrb.gmra.mxu3 %vm1140_vm1, %v8250_v38  ;;  %v2817_v8 = vunpack.c.l.b16 %v2813_v22 }
 0x56d   : > { %6315 = vmatmul.msk.bf16.vlgmr.msra.gmra.mxu0 %vm1140_vm1, %v8256_v48  ;;  %v2781_v16 = vpop.permute.xlu1 %2780 }
 0x56e   : > { %v2783_v38 = vrot.slane %v2781_v16, 4 }
 0x570   : > { %v2787_v39 = vunpack.c.l.b16 %v2783_v38 }
 0x575   : > { %6316 = vmatmul.msk.bf16.vlgmr.msra.gmra.mxu1 %vm1140_vm1, %v8367_v19  ;;  %v3070_v7 = vpop.permute.xlu1 %3069 }
 0x576   : > { %3082 = vmatpush.bf16.msra.mxu3 %v3070_v7 }
 0x578   : > { %v2262_v23 = vpop.xlane.xlu2 %2261 }
 0x57d   : > { %6319 = vmatmul.msk.bf16.vlgmr.msrb.gmra.mxu0 %vm1140_vm1, %v2754_v26  ;;  %v2819_v26 = vpack.c.b16 %v2818_v12, %v2817_v8 }
 0x57e   : > { %v8421_v59 = vpop.permute.xlu1 %3347  ;;  %v2238_v52 = vpop.xlane.xlu0 %2237 }
 0x57f   : > { %6930 = vrcp.f32 %v2238_v52 }
 0x580   : > { %v2779_v47 = vpop.permute.xlu2 %2778 }
 0x581   : > { %v2782_v48 = vrot.slane %v2779_v47, 4 }
 0x583   : > { %v2786_v19 = vunpack.c.l.b16 %v2782_v48 }
 0x585   : > { %v6931_v45 = vpop.eup %6930  ;;  %v2788_v56 = vpack.c.b16 %v2787_v39, %v2786_v19 }
 0x586   : > { %v2286_v46 = vmul.f32 %v6931_v45, %v8345_v43  ;;  %v3095_v34 = vpop.permute.xlu1 %3094  ;;  %v2259_v53 = vpop.xlane.xlu0 %2258  ;;  %v2700_v43 = vsel %vm1140_vm1, %v2695_v5, 0 }
 0x587   : > { %6932 = vrcp.f32 %v2259_v53  ;;  %3107 = vmatpush.bf16.msra.mxu0 %v3095_v34  ;;  %v2793_v51 = vsel %vm1140_vm1, %v2788_v56, 0 }
 0x588   : > { %v2302_v41 = vpack.c.bf16 %v2286_v46, %v2286_v46  ;;  %v2785_v60 = vpop.permute.xlu2 %2784  ;;  %2802 = vmatpush.bf16.xpose.msrb.mxu1 %v2793_v51  ;;  %6934 = vrcp.f32 %v2262_v23 }
 0x58a   : > { %v2389_v63 = vunpack.c.l.b16 %v2302_v41 }
 0x58c   : > { %v2390_v40 = vpack.c.b16 %v2389_v63, %v2388_v29 }
 0x58d   : > { %v6933_v0 = vpop.eup %6932 }
 0x58e   : > { %v3120_v49 = vpop.permute.xlu1 %3119  ;;  %6309 = vmatmul.msk.bf16.vlgmr.msra.gmra.mxu2 %vm1406_vm2, %v2390_v40  ;;  %v6935_v4 = vpop.eup %6934  ;;  %v2293_v58 = vmul.f32 %v6933_v0, %v8353_v11  ;;  %v2824_v11 = vsel %vm1140_vm1, %v2819_v26, 0 }
 0x58f   : > { %2709 = vmatpush.bf16.xpose.msra.mxu2 %v2700_v43  ;;  %6320 = vmatmul.msk.bf16.vlgmr.msrb.gmra.mxu1 %vm1140_vm1, %v2785_v60  ;;  %v2294_v55 = vmul.f32 %v6935_v4, %v8336_v13  ;;  %v8437_v13 = vpop.f32.mrf.mxu3 }
 0x590   : > { %3132 = vmatpush.bf16.msra.mxu1 %v3120_v49  ;;  %v3170_v37 = vpop.permute.xlu2 %3169  ;;  %v2309_v50 = vpack.c.bf16 %v2293_v58, %v2293_v58 }
 0x591   : > { %3182 = vmatpush.bf16.msrb.mxu3 %v3170_v37  ;;  %v2310_v57 = vpack.c.bf16 %v2294_v55, %v2294_v55 }
 0x592   : > { %v2488_v17 = vunpack.c.l.b16 %v2309_v50 }
 0x593   : > { %v2489_v7 = vunpack.c.l.b16 %v2310_v57 }
 0x595   : > { %v2490_v23 = vpack.c.b16 %v2489_v7, %v2488_v17 }
 0x597   : > { %v8440_v54 = vpop.f32.mrf.mxu3 }
 0x598   : > { %v3195_v16 = vpop.permute.xlu2 %3194 }
 0x599   : > { %3207 = vmatpush.bf16.msrb.mxu0 %v3195_v16  ;;  %v2816_v30 = vpop.permute.xlu0 %2815 }
 0x59e   : > { %6313 = vmatmul.msk.bf16.vlgmr.msrb.gmra.mxu2 %vm1406_vm2, %v2490_v23 }
 0x59f   : > { %2833 = vmatpush.bf16.xpose.msrb.mxu2 %v2824_v11 }
 0x5a0   : > { %v3145_v52 = vpop.permute.xlu2 %3144 }
 0x5ae   : > { %6317 = vmatmul.msk.bf16.vlgmr.msra.gmra.mxu2 %vm1140_vm1, %v8375_v28 }
 0x5af   : > { %3157 = vmatpush.bf16.msra.mxu2 %v3145_v52 }
 0x5be   : > { %6321 = vmatmul.msk.bf16.vlgmr.msrb.gmra.mxu2 %vm1140_vm1, %v2816_v30 }
 0x5ca   : > { %v8442_v61 = vpop.f32.mrf.mxu0 }
 0x5cb   : > { %v8444_v38 = vpop.f32.mrf.mxu3 }
 0x5d2   : > { %v8446_v47 = vpop.f32.mrf.mxu0  ;;  %v8448_v48 = vpop.f32.mrf.mxu1 }
 0x5d3   : > { %v8450_v3 = vpop.f32.mrf.mxu3 }
 0x5d4   : > { %10310 = vst [vmem:[#allocation39_spill] sm:$0xff] %v8450_v3 }
 0x5da   : > { %v8452_v33 = vpop.f32.mrf.mxu1  ;;  %v8454_v28 = vpop.f32.mrf.mxu0 }
 0x5db   : > { %v2618_v39 = vpop.f32.mrf.mxu3 }
 0x5dc   : > { %v2840_v19 = vmul.f32 0.17677669, %v2618_v39 }
 0x5de   : > { %v8457_v44 = vadd.f32 %v8167_v32, %v2840_v19 }
 0x5e0   : > { %v2872_v45 = vsel %vm1406_vm2, %v8457_v44, -inf }
 0x5e1   : > { %2873 = vmax.xlane.f32.xlu1 %v2872_v45 }
 0x5e2   : > { %v8461_v56 = vpop.f32.mrf.mxu0  ;;  %v8463_v6 = vpop.f32.mrf.mxu1 }
 0x5e3   : > { %10311 = vst [vmem:[#allocation43_spill] sm:$0xff] %v8461_v56  ;;  %v2620_v14 = vpop.f32.mrf.mxu3 }
 0x5e4   : > { %v2841_v4 = vmul.f32 0.17677669, %v2620_v14 }
 0x5e6   : > { %v8488_v8 = vadd.f32 %v8167_v32, %v2841_v4 }
 0x5e8   : > { %v2875_v17 = vsel %vm1406_vm2, %v8488_v8, -inf }
 0x5ea   : > { %v8465_v46 = vpop.f32.mrf.mxu1  ;;  %v2649_v34 = vpop.f32.mrf.mxu0 }
 0x5eb   : > { %10312 = vst [vmem:[#allocation41_spill] sm:$0xff] %v8465_v46  ;;  %v2842_v53 = vmul.f32 0.17677669, %v2649_v34  ;;  %v2742_v51 = vpop.f32.mrf.mxu3 }
 0x5ec   : > { %v2848_v41 = vmul.f32 0.17677669, %v2742_v51 }
 0x5ed   : > { %v8468_v24 = vadd.f32 %v8167_v32, %v2842_v53 }
 0x5ee   : > { %v8473_v0 = vadd.f32 %v8167_v32, %v2848_v41 }
 0x5ef   : > { %v2878_v60 = vsel %vm1406_vm2, %v8468_v24, -inf }
 0x5f0   : > { %2879 = vmax.xlane.f32.xlu2 %v2878_v60  ;;  %v2896_v58 = vsel %vm1406_vm2, %v8473_v0, -inf }
 0x5f2   : > { %v2651_v5 = vpop.f32.mrf.mxu0  ;;  %v2680_v29 = vpop.f32.mrf.mxu1 }
 0x5f3   : > { %v2843_v63 = vmul.f32 0.17677669, %v2651_v5  ;;  %v2844_v40 = vmul.f32 0.17677669, %v2680_v29  ;;  %v2744_v11 = vpop.f32.mrf.mxu3 }
 0x5f4   : > { %v2849_v30 = vmul.f32 0.17677669, %v2744_v11 }
 0x5f5   : > { %v8476_v49 = vadd.f32 %v8167_v32, %v2843_v63  ;;  %v8479_v43 = vadd.f32 %v8167_v32, %v2844_v40 }
 0x5f6   : > { %v8508_v45 = vadd.f32 %v8167_v32, %v2849_v30 }
 0x5f7   : > { %v2881_v37 = vsel %vm1406_vm2, %v8476_v49, -inf  ;;  %v2884_v22 = vsel %vm1406_vm2, %v8479_v43, -inf }
 0x5f8   : > { %2897 = vmax.xlane.f32.xlu2 %v2896_v58  ;;  %2882 = vmax.xlane.f32.xlu0 %v2881_v37  ;;  %v2899_v14 = vsel %vm1406_vm2, %v8508_v45, -inf }
 0x5f9   : > { %2885 = vmax.xlane.f32.xlu1 %v2884_v22 }
 0x5fa   : > { %v2682_v55 = vpop.f32.mrf.mxu1  ;;  %v2773_v10 = vpop.f32.mrf.mxu0 }
 0x5fb   : > { %v2845_v50 = vmul.f32 0.17677669, %v2682_v55  ;;  %v2850_v12 = vmul.f32 0.17677669, %v2773_v10 }
 0x5fd   : > { %v8491_v57 = vadd.f32 %v8167_v32, %v2845_v50  ;;  %v8498_v23 = vadd.f32 %v8167_v32, %v2850_v12 }
 0x5ff   : > { %v2887_v16 = vsel %vm1406_vm2, %v8491_v57, -inf  ;;  %v2902_v39 = vsel %vm1406_vm2, %v8498_v23, -inf }
 0x600   : > { %2876 = vmax.xlane.f32.xlu0 %v2875_v17  ;;  %2888 = vmax.xlane.f32.xlu2 %v2887_v16 }
 0x602   : > { %v2775_v26 = vpop.f32.mrf.mxu0 }
 0x603   : > { %v2851_v7 = vmul.f32 0.17677669, %v2775_v26 }
 0x605   : > { %v8501_v52 = vadd.f32 %v8167_v32, %v2851_v7  ;;  %v8544_v7 = vpop.permute.xlu2 %3376 }
 0x607   : > { %v2905_v19 = vsel %vm1406_vm2, %v8501_v52, -inf }
 0x608   : > { %2903 = vmax.xlane.f32.xlu0 %v2902_v39  ;;  %2906 = vmax.xlane.f32.xlu1 %v2905_v19 }
 0x60c   : > { %v2804_v40 = vpop.f32.mrf.mxu1 }
 0x60d   : > { %v2852_v22 = vmul.f32 0.17677669, %v2804_v40 }
 0x60f   : > { %v8537_v50 = vadd.f32 %v8167_v32, %v2852_v22 }
 0x610   : > { %2900 = vmax.xlane.f32.xlu1 %v2899_v14 }
 0x611   : > { %v8512_v34 = vpop.f32.mrf.mxu2  ;;  %v2908_v16 = vsel %vm1406_vm2, %v8537_v50, -inf }
 0x614   : > { %v2806_v10 = vpop.f32.mrf.mxu1 }
 0x615   : > { %v2853_v12 = vmul.f32 0.17677669, %v2806_v10 }
 0x617   : > { %v8542_v26 = vadd.f32 %v8167_v32, %v2853_v12 }
 0x619   : > { %v8514_v53 = vpop.f32.mrf.mxu2  ;;  %v2911_v39 = vsel %vm1406_vm2, %v8542_v26, -inf }
 0x61c   : > { %3382 = vrot.lane.b32.xlu0 %v7603_v62, %s7142_s22 }
 0x621   : > { %v8518_v51 = vpop.f32.mrf.mxu2 }
 0x622   : > { %10313 = vst [vmem:[#allocation40_spill] sm:$0xff] %v8518_v51 }
 0x624   : > { %3244 = vrot.lane.b32.xlu0 %v7761_v35, %s7141_s30 }
 0x629   : > { %v8522_v41 = vpop.f32.mrf.mxu2  ;;  %3219 = vrot.lane.b32.xlu1 %v7812_v20, %s7141_s30 }
 0x62a   : > { %10314 = vst [vmem:[#allocation37_spill] sm:$0xff] %v8522_v41 }
 0x631   : > { %v2711_v60 = vpop.f32.mrf.mxu2 }
 0x632   : > { %v2846_v5 = vmul.f32 0.17677669, %v2711_v60 }
 0x634   : > { %v8527_v29 = vadd.f32 %v8167_v32, %v2846_v5 }
 0x636   : > { %v2890_v63 = vsel %vm1406_vm2, %v8527_v29, -inf }
 0x637   : > { %2891 = vmax.xlane.f32.xlu2 %v2890_v63 }
 0x639   : > { %v2713_v62 = vpop.f32.mrf.mxu2 }
 0x63a   : > { %v2847_v17 = vmul.f32 0.17677669, %v2713_v62  ;;  %v8554_v62 = vpop.permute.xlu0 %3345 }
 0x63c   : > { %v8547_v11 = vadd.f32 %v8167_v32, %v2847_v17 }
 0x63e   : > { %v2893_v5 = vsel %vm1406_vm2, %v8547_v11, -inf }
 0x641   : > { %v2835_v4 = vpop.f32.mrf.mxu2 }
 0x642   : > { %v2854_v58 = vmul.f32 0.17677669, %v2835_v4  ;;  %v8559_v4 = vpop.permute.xlu2 %3378 }
 0x644   : > { %v8532_v37 = vadd.f32 %v8167_v32, %v2854_v58 }
 0x646   : > { %v2914_v55 = vsel %vm1406_vm2, %v8532_v37, -inf }
 0x647   : > { %2915 = vmax.xlane.f32.xlu2 %v2914_v55  ;;  %v8567_v55 = vpop.permute.xlu0 %3351 }
 0x649   : > { %v2837_v30 = vpop.f32.mrf.mxu2 }
 0x64a   : > { %v2855_v14 = vmul.f32 0.17677669, %v2837_v30 }
 0x64c   : > { %v8557_v40 = vadd.f32 %v8167_v32, %v2855_v14 }
 0x64e   : > { %2909 = vmax.xlane.f32.xlu0 %v2908_v16  ;;  %v2917_v58 = vsel %vm1406_vm2, %v8557_v40, -inf }
 0x653   : > { %2912 = vmax.xlane.f32.xlu1 %v2911_v39 }
 0x654   : > { %v2874_v19 = vpop.xlane.xlu1 %2873 }
 0x655   : > { %v2920_v60 = vsub.f32 %v8457_v44, %v2874_v19 }
 0x656   : > { %2894 = vmax.xlane.f32.xlu0 %v2893_v5 }
 0x657   : > { %v2936_v63 = vmul.f32 1.442695, %v2920_v60 }
 0x659   : > { %6936 = vpow2.f32 %v2936_v63 }
 0x65e   : > { %2918 = vmax.xlane.f32.xlu0 %v2917_v58 }
 0x65f   : > { %v8563_v22 = vpop.eup %6936 }
 0x660   : > { %v2968_v44 = vsel %vm1406_vm2, %v8563_v22, 0.0 }
 0x661   : > { %2969 = vadd.xlane.f32.xlu1 %v2968_v44 }
 0x663   : > { %v2880_v10 = vpop.xlane.xlu2 %2879 }
 0x664   : > { %v2922_v12 = vsub.f32 %v8468_v24, %v2880_v10 }
 0x666   : > { %v2940_v17 = vmul.f32 1.442695, %v2922_v12 }
 0x668   : > { %6938 = vpow2.f32 %v2940_v17 }
 0x66b   : > { %v2898_v32 = vpop.xlane.xlu2 %2897  ;;  %v2883_v16 = vpop.xlane.xlu0 %2882 }
 0x66c   : > { %v2923_v30 = vsub.f32 %v8476_v49, %v2883_v16  ;;  %v2886_v39 = vpop.xlane.xlu1 %2885 }
 0x66d   : > { %v2924_v60 = vsub.f32 %v8479_v43, %v2886_v39 }
 0x66e   : > { %v8571_v19 = vpop.eup %6938  ;;  %v2942_v14 = vmul.f32 1.442695, %v2923_v30 }
 0x66f   : > { %v2974_v5 = vsel %vm1406_vm2, %v8571_v19, 0.0  ;;  %v2944_v63 = vmul.f32 1.442695, %v2924_v60  ;;  %v2928_v60 = vsub.f32 %v8473_v0, %v2898_v32 }
 0x670   : > { %2975 = vadd.xlane.f32.xlu2 %v2974_v5  ;;  %6940 = vpow2.f32 %v2942_v14 }
 0x671   : > { %6942 = vpow2.f32 %v2944_v63 }
 0x673   : > { %v2877_v58 = vpop.xlane.xlu0 %2876  ;;  %v2889_v24 = vpop.xlane.xlu2 %2888 }
 0x674   : > { %v2921_v44 = vsub.f32 %v8488_v8, %v2877_v58  ;;  %v2925_v10 = vsub.f32 %v8491_v57, %v2889_v24 }
 0x676   : > { %v2938_v12 = vmul.f32 1.442695, %v2921_v44  ;;  %v2946_v49 = vmul.f32 1.442695, %v2925_v10  ;;  %v8578_v17 = vpop.eup %6940  ;;  %v2952_v44 = vmul.f32 1.442695, %v2928_v60 }
 0x677   : > { %v2977_v43 = vsel %vm1406_vm2, %v8578_v17, 0.0  ;;  %v8584_v8 = vpop.eup %6942 }
 0x678   : > { %6944 = vpow2.f32 %v2938_v12  ;;  %2978 = vadd.xlane.f32.xlu0 %v2977_v43 }
 0x679   : > { %6946 = vpow2.f32 %v2946_v49 }
 0x67b   : > { %v2904_v16 = vpop.xlane.xlu0 %2903  ;;  %v2907_v30 = vpop.xlane.xlu1 %2906 }
 0x67c   : > { %v2930_v39 = vsub.f32 %v8498_v23, %v2904_v16  ;;  %v2931_v14 = vsub.f32 %v8501_v52, %v2907_v30  ;;  %v2980_v52 = vsel %vm1406_vm2, %v8584_v8, 0.0 }
 0x67e   : > { %v8586_v57 = vpop.eup %6944  ;;  %v2956_v5 = vmul.f32 1.442695, %v2930_v39  ;;  %v2958_v63 = vmul.f32 1.442695, %v2931_v14 }
 0x67f   : > { %v8589_v58 = vpop.eup %6946  ;;  %v2971_v24 = vsel %vm1406_vm2, %v8586_v57, 0.0 }
 0x680   : > { %6948 = vpow2.f32 %v2956_v5  ;;  %2972 = vadd.xlane.f32.xlu2 %v2971_v24  ;;  %v2983_v23 = vsel %vm1406_vm2, %v8589_v58, 0.0  ;;  %2981 = vadd.xlane.f32.xlu0 %v2980_v52 }
 0x681   : > { %6950 = vpow2.f32 %v2958_v63  ;;  %2984 = vadd.xlane.f32.xlu1 %v2983_v23 }
 0x682   : > { %6952 = vpow2.f32 %v2952_v44 }
 0x683   : > { %v2901_v0 = vpop.xlane.xlu1 %2900 }
 0x684   : > { %v2929_v32 = vsub.f32 %v8508_v45, %v2901_v0 }
 0x686   : > { %v8598_v10 = vpop.eup %6948  ;;  %v2954_v12 = vmul.f32 1.442695, %v2929_v32 }
 0x687   : > { %v8600_v49 = vpop.eup %6950  ;;  %v2998_v43 = vsel %vm1406_vm2, %v8598_v10, 0.0 }
 0x688   : > { %6954 = vpow2.f32 %v2954_v12  ;;  %2999 = vadd.xlane.f32.xlu2 %v2998_v43  ;;  %v3001_v16 = vsel %vm1406_vm2, %v8600_v49, 0.0  ;;  %v8606_v30 = vpop.eup %6952 }
 0x689   : > { %3002 = vadd.xlane.f32.xlu0 %v3001_v16  ;;  %v2992_v14 = vsel %vm1406_vm2, %v8606_v30, 0.0 }
 0x68e   : > { %v8608_v39 = vpop.eup %6954  ;;  %v8610_v45 = vpop.permute.xlu0 %3382 }
 0x68f   : > { %v2995_v60 = vsel %vm1406_vm2, %v8608_v39, 0.0 }
 0x690   : > { %2993 = vadd.xlane.f32.xlu2 %v2992_v14 }
 0x691   : > { %2996 = vadd.xlane.f32.xlu0 %v2995_v60 }
 0x696   : > { %v3245_v5 = vpop.permute.xlu0 %3244 }
 0x697   : > { %3257 = vmatpush.bf16.msrb.mxu2 %v3245_v5 }
 0x69b   : > { %v3220_v63 = vpop.permute.xlu1 %3219 }
 0x69c   : > { %3232 = vmatpush.bf16.msrb.mxu1 %v3220_v63 }
 0x6aa   : > { %v2892_v44 = vpop.xlane.xlu2 %2891 }
 0x6ab   : > { %v2926_v12 = vsub.f32 %v8527_v29, %v2892_v44 }
 0x6ad   : > { %v2948_v63 = vmul.f32 1.442695, %v2926_v12  ;;  %v10315_v12 = vld [vmem:[#allocation22_spill] sm:$0xff] }
 0x6ba   : > { %v8636_v44 = vpop.xlane.xlu2 %2915 }
 0x6c1   : > { %v2910_v24 = vpop.xlane.xlu0 %2909 }
 0x6c2   : > { %v2932_v23 = vsub.f32 %v8537_v50, %v2910_v24 }
 0x6c4   : > { %v2960_v52 = vmul.f32 1.442695, %v2932_v23 }
 0x6c6   : > { %6956 = vpow2.f32 %v2960_v52  ;;  %v2913_v0 = vpop.xlane.xlu1 %2912 }
 0x6c7   : > { %v2933_v32 = vsub.f32 %v8542_v26, %v2913_v0 }
 0x6c9   : > { %v2962_v43 = vmul.f32 1.442695, %v2933_v32  ;;  %v2895_v16 = vpop.xlane.xlu0 %2894 }
 0x6ca   : > { %v2927_v14 = vsub.f32 %v8547_v11, %v2895_v16 }
 0x6cb   : > { %6958 = vpow2.f32 %v2962_v43 }
 0x6cc   : > { %v8620_v60 = vpop.eup %6956  ;;  %v2950_v5 = vmul.f32 1.442695, %v2927_v14 }
 0x6cd   : > { %v3004_v50 = vsel %vm1406_vm2, %v8620_v60, 0.0 }
 0x6ce   : > { %6960 = vpow2.f32 %v2950_v5  ;;  %3005 = vadd.xlane.f32.xlu0 %v3004_v50  ;;  %v10316_v5 = vld [vmem:[#allocation20_spill] sm:$0xff] }
 0x6cf   : > { %6962 = vpow2.f32 %v2948_v63  ;;  %v3381_v63 = vrot.slane %v8559_v4, 4 }
 0x6d1   : > { %v8624_v24 = vpop.eup %6958  ;;  %v8640_v0 = vpop.xlane.xlu0 %2918 }
 0x6d2   : > { %v3007_v29 = vsel %vm1406_vm2, %v8624_v24, 0.0 }
 0x6d3   : > { %3008 = vadd.xlane.f32.xlu1 %v3007_v29 }
 0x6d4   : > { %v8628_v26 = vpop.eup %6960  ;;  %v2970_v43 = vpop.xlane.xlu1 %2969 }
 0x6d5   : > { %v2989_v11 = vsel %vm1406_vm2, %v8628_v26, 0.0  ;;  %v8632_v23 = vpop.eup %6962 }
 0x6d6   : > { %2990 = vadd.xlane.f32.xlu2 %v2989_v11  ;;  %v2986_v52 = vsel %vm1406_vm2, %v8632_v23, 0.0 }
 0x6db   : > { %2987 = vadd.xlane.f32.xlu1 %v2986_v52 }
 0x6e2   : > { %3438 = vrot.lane.b32.xlu0 %v7623_v25, %s7142_s22  ;;  %v3380_v25 = vrot.slane %v8544_v7, 4 }
 0x6e3   : > { %v2976_v32 = vpop.xlane.xlu2 %2975 }
 0x6e4   : > { %6964 = vrcp.f32 %v2976_v32  ;;  %v3385_v32 = vunpack.c.l.b16 %v3381_v63 }
 0x6ea   : > { %3413 = vrot.lane.b32.xlu0 %v10315_v12, %s7142_s22  ;;  %v6965_v14 = vpop.eup %6964 }
 0x6eb   : > { %v2979_v16 = vpop.xlane.xlu0 %2978  ;;  %v3034_v50 = vmul.f32 %v6965_v14, %v8571_v19  ;;  %v3349_v19 = vrot.slane %v8554_v62, 4 }
 0x6ec   : > { %6966 = vrcp.f32 %v2979_v16 }
 0x6ed   : > { %6968 = vrcp.f32 %v2970_v43  ;;  %v3050_v41 = vpack.c.bf16 %v3034_v50, %v3034_v50  ;;  %v10317_v43 = vld [vmem:[#allocation21_spill] sm:$0xff]  ;;  %v3350_v50 = vrot.slane %v8421_v59, 4  ;;  %v3353_v3 = vunpack.c.l.b16 %v3349_v19 }
 0x6ee   : > { %3407 = vrot.lane.b32.xlu2 %v10316_v5, %s7142_s22  ;;  %v3384_v5 = vunpack.c.l.b16 %v3380_v25 }
 0x6ef   : > { %v3091_v56 = vunpack.c.l.b16 %v3050_v41  ;;  %v3354_v59 = vunpack.c.l.b16 %v3350_v50 }
 0x6f0   : > { %v3386_v14 = vpack.c.b16 %v3385_v32, %v3384_v5 }
 0x6f1   : > { %v3355_v32 = vpack.c.b16 %v3354_v59, %v3353_v3 }
 0x6f2   : > { %v6967_v29 = vpop.eup %6966  ;;  %v3391_v62 = vsel %vm1140_vm1, %v3386_v14, 0  ;;  %v2935_v14 = vsub.f32 %v8557_v40, %v8640_v0  ;;  %v2934_v40 = vsub.f32 %v8532_v37, %v8636_v44  ;;  %v10320_v37 = vld [vmem:[#allocation27_spill] sm:$0xff] }
 0x6f3   : > { %v2973_v11 = vpop.xlane.xlu2 %2972  ;;  %v6969_v52 = vpop.eup %6968  ;;  %v3035_v12 = vmul.f32 %v6967_v29, %v8578_v17 }
 0x6f4   : > { %6970 = vrcp.f32 %v2973_v11  ;;  %v2982_v46 = vpop.xlane.xlu0 %2981  ;;  %v2985_v16 = vpop.xlane.xlu1 %2984  ;;  %3409 = vrot.lane.b32.xlu1 %v10317_v43, %s7142_s22  ;;  %v3032_v7 = vmul.f32 %v6969_v52, %v8563_v22  ;;  %v10318_v22 = vld [vmem:[#allocation23_spill] sm:$0xff] }
 0x6f5   : > { %6972 = vrcp.f32 %v2982_v46  ;;  %v3051_v4 = vpack.c.bf16 %v3035_v12, %v3035_v12 }
 0x6f6   : > { %6974 = vrcp.f32 %v2985_v16  ;;  %v3048_v51 = vpack.c.bf16 %v3032_v7, %v3032_v7 }
 0x6f7   : > { %v3092_v63 = vunpack.c.l.b16 %v3051_v4 }
 0x6f8   : > { %v3066_v16 = vunpack.c.l.b16 %v3048_v51 }
 0x6f9   : > { %v3093_v29 = vpack.c.b16 %v3092_v63, %v3091_v56 }
 0x6fa   : > { %v6971_v17 = vpop.eup %6970 }
 0x6fb   : > { %v6973_v11 = vpop.eup %6972  ;;  %v3033_v43 = vmul.f32 %v6971_v17, %v8586_v57  ;;  %v3000_v46 = vpop.xlane.xlu2 %2999  ;;  %6323 = vmatmul.msk.bf16.vlgmr.msra.gmra.mxu0 %vm1406_vm2, %v3093_v29 }
 0x6fc   : > { %v6975_v25 = vpop.eup %6974  ;;  %v3036_v12 = vmul.f32 %v6973_v11, %v8584_v8  ;;  %6976 = vrcp.f32 %v3000_v46  ;;  %v3003_v41 = vpop.xlane.xlu0 %3002  ;;  %3440 = vrot.lane.b32.xlu1 %v10318_v22, %s7142_s22  ;;  %3400 = vmatpush.bf16.xpose.msra.mxu0 %v3391_v62  ;;  %v2964_v62 = vmul.f32 1.442695, %v2934_v40 }
 0x6fd   : > { %v3049_v56 = vpack.c.bf16 %v3033_v43, %v3033_v43  ;;  %v3037_v52 = vmul.f32 %v6975_v25, %v8589_v58  ;;  %6978 = vrcp.f32 %v3003_v41  ;;  %v3360_v58 = vsel %vm1140_vm1, %v3355_v32, 0  ;;  %v10319_v43 = vld [vmem:[#allocation24_spill] sm:$0xff] }
 0x6fe   : > { %v3052_v57 = vpack.c.bf16 %v3036_v12, %v3036_v12 }
 0x6ff   : > { %v3067_v5 = vunpack.c.l.b16 %v3049_v56  ;;  %v3053_v8 = vpack.c.bf16 %v3037_v52, %v3037_v52 }
 0x700   : > { %v3116_v4 = vunpack.c.l.b16 %v3052_v57 }
 0x701   : > { %v3068_v19 = vpack.c.b16 %v3067_v5, %v3066_v16  ;;  %v3117_v7 = vunpack.c.l.b16 %v3053_v8 }
 0x702   : > { %v6977_v63 = vpop.eup %6976 }
 0x703   : > { %v6979_v17 = vpop.eup %6978  ;;  %v3118_v29 = vpack.c.b16 %v3117_v7, %v3116_v4  ;;  %v3042_v50 = vmul.f32 %v6977_v63, %v8598_v10  ;;  %v2994_v11 = vpop.xlane.xlu2 %2993  ;;  %6322 = vmatmul.msk.bf16.vlgmr.msra.gmra.mxu3 %vm1406_vm2, %v3068_v19  ;;  %v2966_v10 = vmul.f32 1.442695, %v2935_v14  ;;  %v10321_v4 = vld [vmem:[#allocation25_spill] sm:$0xff]  ;;  %v10323_v19 = vld [vmem:[#allocation28_spill] sm:$0xff] }
 0x704   : > { %v3043_v3 = vmul.f32 %v6979_v17, %v8600_v49  ;;  %6980 = vrcp.f32 %v2994_v11  ;;  %v2997_v51 = vpop.xlane.xlu0 %2996  ;;  %3369 = vmatpush.bf16.xpose.msra.mxu3 %v3360_v58  ;;  %3444 = vrot.lane.b32.xlu1 %v10319_v43, %s7142_s22 }
 0x705   : > { %v3058_v0 = vpack.c.bf16 %v3042_v50, %v3042_v50  ;;  %6982 = vrcp.f32 %v2997_v51  ;;  %6324 = vmatmul.msk.bf16.vlgmr.msra.gmra.mxu1 %vm1406_vm2, %v3118_v29 }
 0x706   : > { %v3059_v46 = vpack.c.bf16 %v3043_v3, %v3043_v3  ;;  %6984 = vpow2.f32 %v2966_v10 }
 0x707   : > { %v3191_v25 = vunpack.c.l.b16 %v3058_v0  ;;  %6986 = vpow2.f32 %v2964_v62 }
 0x708   : > { %v3192_v12 = vunpack.c.l.b16 %v3059_v46 }
 0x70a   : > { %v6981_v41 = vpop.eup %6980  ;;  %v3193_v49 = vpack.c.b16 %v3192_v12, %v3191_v25 }
 0x70b   : > { %v6983_v22 = vpop.eup %6982  ;;  %v3040_v59 = vmul.f32 %v6981_v41, %v8606_v30 }
 0x70c   : > { %v3041_v56 = vmul.f32 %v6983_v22, %v8608_v39  ;;  %6327 = vmatmul.msk.bf16.vlgmr.msrb.gmra.mxu0 %vm1406_vm2, %v3193_v49  ;;  %3475 = vrot.lane.b32.xlu1 %v10320_v37, %s7142_s22  ;;  %v8678_v32 = vpop.eup %6984 }
 0x70d   : > { %v3056_v44 = vpack.c.bf16 %v3040_v59, %v3040_v59  ;;  %v8680_v8 = vpop.eup %6986  ;;  %v3013_v30 = vsel %vm1406_vm2, %v8678_v32, 0.0 }
 0x70e   : > { %v3057_v52 = vpack.c.bf16 %v3041_v56, %v3041_v56  ;;  %v3010_v39 = vsel %vm1406_vm2, %v8680_v8, 0.0 }
 0x70f   : > { %v3166_v57 = vunpack.c.l.b16 %v3056_v44 }
 0x710   : > { %v3167_v16 = vunpack.c.l.b16 %v3057_v52 }
 0x712   : > { %v3168_v5 = vpack.c.b16 %v3167_v16, %v3166_v57 }
 0x714   : > { %6326 = vmatmul.msk.bf16.vlgmr.msrb.gmra.mxu3 %vm1406_vm2, %v3168_v5  ;;  %3014 = vadd.xlane.f32.xlu0 %v3013_v30 }
 0x715   : > { %3506 = vrot.lane.b32.xlu1 %v10305_v42, %s7142_s22  ;;  %v10322_v42 = vld [vmem:[#allocation26_spill] sm:$0xff] }
 0x717   : > { %3011 = vadd.xlane.f32.xlu2 %v3010_v39 }
 0x71c   : > { %6331 = vmatmul.msk.bf16.vlgmr.msra.gmra.mxu0 %vm1140_vm1, %v8610_v45  ;;  %v10324_v45 = vld [vmem:[#allocation29_spill] sm:$0xff] }
 0x71d   : > { %3562 = vrot.lane.b32.xlu1 %v10307_v27, %s7142_s22 }
 0x724   : > { %6330 = vmatmul.msk.bf16.vlgmr.msra.gmra.mxu3 %vm1140_vm1, %v8567_v55 }
 0x725   : > { %3568 = vrot.lane.b32.xlu1 %v7759_v15, %s7142_s22  ;;  %v10325_v15 = vld [vmem:[#allocation33_spill] sm:$0xff] }
 0x728   : > { %3469 = vrot.lane.b32.xlu0 %v10321_v4, %s7142_s22 }
 0x72f   : > { %3471 = vrot.lane.b32.xlu2 %v10322_v42, %s7142_s22 }
 0x730   : > { %3500 = vrot.lane.b32.xlu0 %v10323_v19, %s7142_s22 }
 0x737   : > { %3502 = vrot.lane.b32.xlu2 %v10324_v45, %s7142_s22 }
 0x738   : > { %3531 = vrot.lane.b32.xlu0 %v7704_v31, %s7142_s22 }
 0x73f   : > { %3533 = vrot.lane.b32.xlu2 %v10308_v18, %s7142_s22 }
 0x740   : > { %3564 = vrot.lane.b32.xlu0 %v10325_v15, %s7142_s22 }
 0x741   : > { %v3006_v27 = vpop.xlane.xlu0 %3005 }
 0x742   : > { %6988 = vrcp.f32 %v3006_v27 }
 0x746   : > { %v3009_v55 = vpop.xlane.xlu1 %3008 }
 0x747   : > { %6990 = vrcp.f32 %v3009_v55  ;;  %3537 = vrot.lane.b32.xlu2 %v7737_v9, %s7142_s22 }
 0x748   : > { %v6989_v7 = vpop.eup %6988 }
 0x749   : > { %v2991_v63 = vpop.xlane.xlu2 %2990  ;;  %v3044_v14 = vmul.f32 %v6989_v7, %v8620_v60 }
 0x74a   : > { %6992 = vrcp.f32 %v2991_v63 }
 0x74b   : > { %v3060_v31 = vpack.c.bf16 %v3044_v14, %v3044_v14 }
 0x74d   : > { %v6991_v17 = vpop.eup %6990  ;;  %v3216_v58 = vunpack.c.l.b16 %v3060_v31 }
 0x74e   : > { %v3045_v29 = vmul.f32 %v6991_v17, %v8624_v24  ;;  %v2988_v18 = vpop.xlane.xlu1 %2987 }
 0x74f   : > { %6994 = vrcp.f32 %v2988_v18 }
 0x750   : > { %v6993_v50 = vpop.eup %6992  ;;  %v3061_v11 = vpack.c.bf16 %v3045_v29, %v3045_v29 }
 0x751   : > { %v3039_v51 = vmul.f32 %v6993_v50, %v8628_v26  ;;  %v3408_v24 = vpop.permute.xlu2 %3407 }
 0x752   : > { %v3217_v3 = vunpack.c.l.b16 %v3061_v11  ;;  %v3411_v12 = vrot.slane %v3408_v24, 4 }
 0x753   : > { %v3055_v9 = vpack.c.bf16 %v3039_v51, %v3039_v51 }
 0x754   : > { %v3218_v43 = vpack.c.b16 %v3217_v3, %v3216_v58  ;;  %v3415_v49 = vunpack.c.l.b16 %v3411_v12  ;;  %v3439_v26 = vpop.permute.xlu0 %3438 }
 0x755   : > { %v6995_v40 = vpop.eup %6994  ;;  %v3142_v10 = vunpack.c.l.b16 %v3055_v9  ;;  %v3442_v56 = vrot.slane %v3439_v26, 4 }
 0x756   : > { %v3038_v0 = vmul.f32 %v6995_v40, %v8632_v23  ;;  %6328 = vmatmul.msk.bf16.vlgmr.msrb.gmra.mxu1 %vm1406_vm2, %v3218_v43 }
 0x757   : > { %v3446_v52 = vunpack.c.l.b16 %v3442_v56 }
 0x758   : > { %v3054_v60 = vpack.c.bf16 %v3038_v0, %v3038_v0 }
 0x75a   : > { %v3141_v46 = vunpack.c.l.b16 %v3054_v60 }
 0x75c   : > { %v3143_v25 = vpack.c.b16 %v3142_v10, %v3141_v46  ;;  %v3414_v5 = vpop.permute.xlu0 %3413  ;;  %v8742_v10 = vld [vmem:[%s10179_s3] ss:$0 sm:$0xff] }
 0x75e   : > { %6325 = vmatmul.msk.bf16.vlgmr.msra.gmra.mxu2 %vm1406_vm2, %v3143_v25 }
 0x766   : > { %v3410_v62 = vpop.permute.xlu1 %3409 }
 0x767   : > { %v3412_v41 = vrot.slane %v3410_v62, 4 }
 0x769   : > { %v3416_v22 = vunpack.c.l.b16 %v3412_v41 }
 0x76b   : > { %v3417_v59 = vpack.c.b16 %v3416_v22, %v3415_v49 }
 0x76d   : > { %v3422_v37 = vsel %vm1140_vm1, %v3417_v59, 0 }
 0x76e   : > { %3431 = vmatpush.bf16.xpose.msra.mxu1 %v3422_v37  ;;  %v3441_v23 = vpop.permute.xlu1 %3440 }
 0x76f   : > { %v3443_v44 = vrot.slane %v3441_v23, 4 }
 0x771   : > { %v3447_v57 = vunpack.c.l.b16 %v3443_v44 }
 0x773   : > { %v3448_v16 = vpack.c.b16 %v3447_v57, %v3446_v52 }
 0x775   : > { %6332 = vmatmul.msk.bf16.vlgmr.msra.gmra.mxu1 %vm1140_vm1, %v3414_v5  ;;  %v3453_v30 = vsel %vm1140_vm1, %v3448_v16, 0 }
 0x776   : > { %3462 = vmatpush.bf16.xpose.msra.mxu2 %v3453_v30  ;;  %v3445_v63 = vpop.permute.xlu1 %3444 }
 0x778   : > { %v8722_v39 = vpop.f32.mrf.mxu0 }
 0x77e   : > { %v3476_v9 = vpop.permute.xlu1 %3475 }
 0x780   : > { %v8724_v4 = vpop.f32.mrf.mxu0 }
 0x786   : > { %v8726_v42 = vpop.f32.mrf.mxu3 }
 0x787   : > { %v3015_v19 = vpop.xlane.xlu0 %3014  ;;  %v3507_v56 = vpop.permute.xlu1 %3506 }
 0x788   : > { %6996 = vrcp.f32 %v3015_v19 }
 0x789   : > { %v8728_v45 = vpop.f32.mrf.mxu0 }
 0x78a   : > { %v3012_v15 = vpop.xlane.xlu2 %3011 }
 0x78b   : > { %6998 = vrcp.f32 %v3012_v15 }
 0x78e   : > { %v6997_v27 = vpop.eup %6996  ;;  %v8730_v55 = vpop.f32.mrf.mxu3 }
 0x78f   : > { %v3047_v7 = vmul.f32 %v6997_v27, %v8678_v32 }
 0x791   : > { %v6999_v14 = vpop.eup %6998  ;;  %v8733_v17 = vpop.f32.mrf.mxu0  ;;  %v3063_v31 = vpack.c.bf16 %v3047_v7, %v3047_v7 }
 0x792   : > { %v3046_v29 = vmul.f32 %v6999_v14, %v8680_v8  ;;  %v3472_v18 = vpop.permute.xlu2 %3471 }
 0x793   : > { %v3242_v11 = vunpack.c.l.b16 %v3063_v31  ;;  %v3474_v43 = vrot.slane %v3472_v18, 4 }
 0x794   : > { %v3062_v50 = vpack.c.bf16 %v3046_v29, %v3046_v29 }
 0x795   : > { %v3478_v25 = vunpack.c.l.b16 %v3474_v43 }
 0x796   : > { %v3241_v58 = vunpack.c.l.b16 %v3062_v50  ;;  %v3563_v50 = vpop.permute.xlu1 %3562 }
 0x797   : > { %v8736_v3 = vpop.f32.mrf.mxu3 }
 0x798   : > { %v3243_v51 = vpack.c.b16 %v3242_v11, %v3241_v58 }
 0x799   : > { %v3402_v40 = vpop.f32.mrf.mxu0 }
 0x79a   : > { %v3595_v0 = vmul.f32 0.17677669, %v3402_v40  ;;  %v3470_v60 = vpop.permute.xlu0 %3469  ;;  %6329 = vmatmul.msk.bf16.vlgmr.msrb.gmra.mxu2 %vm1406_vm2, %v3243_v51  ;;  %v3503_v46 = vpop.permute.xlu2 %3502  ;;  %v3566_v40 = vrot.slane %v3563_v50, 4 }
 0x79b   : > { %v3473_v32 = vrot.slane %v3470_v60, 4  ;;  %v3505_v49 = vrot.slane %v3503_v46, 4 }
 0x79c   : > { %v8745_v8 = vadd.f32 %v8742_v10, %v3595_v0 }
 0x79d   : > { %v3477_v24 = vunpack.c.l.b16 %v3473_v32  ;;  %v3509_v37 = vunpack.c.l.b16 %v3505_v49 }
 0x79e   : > { %v3631_v12 = vsel %vm1406_vm2, %v8745_v8, -inf }
 0x79f   : > { %v3479_v62 = vpack.c.b16 %v3478_v25, %v3477_v24  ;;  %3632 = vmax.xlane.f32.xlu1 %v3631_v12  ;;  %v8749_v41 = vpop.f32.mrf.mxu3  ;;  %v3570_v25 = vunpack.c.l.b16 %v3566_v40 }
 0x7a1   : > { %v3484_v22 = vsel %vm1140_vm1, %v3479_v62, 0  ;;  %v3404_v5 = vpop.f32.mrf.mxu0 }
 0x7a2   : > { %v3501_v26 = vpop.permute.xlu0 %3500  ;;  %3493 = vmatpush.bf16.xpose.msrb.mxu3 %v3484_v22  ;;  %v3534_v44 = vpop.permute.xlu2 %3533  ;;  %v3596_v14 = vmul.f32 0.17677669, %v3404_v5 }
 0x7a3   : > { %v3504_v59 = vrot.slane %v3501_v26, 4  ;;  %v3536_v30 = vrot.slane %v3534_v44, 4  ;;  %v3569_v22 = vpop.permute.xlu1 %3568  ;;  %v8772_v26 = vpop.f32.mrf.mxu1 }
 0x7a4   : > { %v8761_v43 = vadd.f32 %v8742_v10, %v3596_v14 }
 0x7a5   : > { %v3508_v23 = vunpack.c.l.b16 %v3504_v59  ;;  %v3540_v29 = vunpack.c.l.b16 %v3536_v30 }
 0x7a6   : > { %v3634_v32 = vsel %vm1406_vm2, %v8761_v43, -inf }
 0x7a7   : > { %v3510_v52 = vpack.c.b16 %v3509_v37, %v3508_v23  ;;  %v3371_v57 = vpop.f32.mrf.mxu3 }
 0x7a8   : > { %v3593_v16 = vmul.f32 0.17677669, %v3371_v57 }
 0x7a9   : > { %6334 = vmatmul.msk.bf16.vlgmr.msrb.gmra.mxu3 %vm1140_vm1, %v3476_v9  ;;  %v3515_v19 = vsel %vm1140_vm1, %v3510_v52, 0 }
 0x7aa   : > { %v8755_v15 = vadd.f32 %v8742_v10, %v3593_v16  ;;  %3524 = vmatpush.bf16.xpose.msrb.mxu0 %v3515_v19  ;;  %v3532_v27 = vpop.permute.xlu0 %3531  ;;  %6333 = vmatmul.msk.bf16.vlgmr.msra.gmra.mxu2 %vm1140_vm1, %v3445_v63  ;;  %v3538_v62 = vpop.permute.xlu2 %3537 }
 0x7ab   : > { %v3535_v7 = vrot.slane %v3532_v27, 4  ;;  %v8774_v59 = vpop.f32.mrf.mxu1 }
 0x7ac   : > { %v3625_v31 = vsel %vm1406_vm2, %v8755_v15, -inf }
 0x7ad   : > { %v3539_v18 = vunpack.c.l.b16 %v3535_v7  ;;  %3626 = vmax.xlane.f32.xlu0 %v3625_v31 }
 0x7af   : > { %v3541_v11 = vpack.c.b16 %v3540_v29, %v3539_v18  ;;  %v3373_v58 = vpop.f32.mrf.mxu3 }
 0x7b0   : > { %v3594_v51 = vmul.f32 0.17677669, %v3373_v58 }
 0x7b1   : > { %6335 = vmatmul.msk.bf16.vlgmr.msrb.gmra.mxu0 %vm1140_vm1, %v3507_v56  ;;  %v3546_v63 = vsel %vm1140_vm1, %v3541_v11, 0 }
 0x7b2   : > { %v3565_v9 = vpop.permute.xlu0 %3564  ;;  %3555 = vmatpush.bf16.xpose.msrb.mxu1 %v3546_v63  ;;  %v3610_v0 = vadd.f32 %v8742_v10, %v3594_v51 }
 0x7b3   : > { %v3567_v60 = vrot.slane %v3565_v9, 4 }
 0x7b4   : > { %v3628_v46 = vsel %vm1406_vm2, %v3610_v0, -inf }
 0x7b5   : > { %v3571_v24 = vunpack.c.l.b16 %v3567_v60  ;;  %3635 = vmax.xlane.f32.xlu0 %v3634_v32  ;;  %3629 = vmax.xlane.f32.xlu2 %v3628_v46 }
 0x7b7   : > { %v3572_v12 = vpack.c.b16 %v3571_v24, %v3570_v25 }
 0x7b9   : > { %6336 = vmatmul.msk.bf16.vlgmr.msrb.gmra.mxu1 %vm1140_vm1, %v3538_v62  ;;  %v3577_v49 = vsel %vm1140_vm1, %v3572_v12, 0 }
 0x7ba   : > { %3586 = vmatpush.bf16.xpose.msrb.mxu2 %v3577_v49 }
 0x7c1   : > { %6337 = vmatmul.msk.bf16.vlgmr.msrb.gmra.mxu2 %vm1140_vm1, %v3569_v22 }
 0x7d3   : > { %v8776_v56 = vpop.f32.mrf.mxu1 }
 0x7db   : > { %v8778_v37 = vpop.f32.mrf.mxu1 }
 0x7e1   : > { %v8790_v27 = vpop.f32.mrf.mxu2 }
 0x7e9   : > { %v8792_v7 = vpop.f32.mrf.mxu2 }
 0x7f2   : > { %v3433_v23 = vpop.f32.mrf.mxu1 }
 0x7f3   : > { %v3597_v44 = vmul.f32 0.17677669, %v3433_v23 }
 0x7f5   : > { %v8781_v52 = vadd.f32 %v8742_v10, %v3597_v44 }
 0x7f7   : > { %v3637_v57 = vsel %vm1406_vm2, %v8781_v52, -inf }
 0x7f8   : > { %3638 = vmax.xlane.f32.xlu2 %v3637_v57 }
 0x7fa   : > { %v3435_v16 = vpop.f32.mrf.mxu1 }
 0x7fb   : > { %v3598_v5 = vmul.f32 0.17677669, %v3435_v16 }
 0x7fd   : > { %v8786_v30 = vadd.f32 %v8742_v10, %v3598_v5 }
 0x7ff   : > { %v3640_v19 = vsel %vm1406_vm2, %v8786_v30, -inf }
 0x800   : > { %3641 = vmax.xlane.f32.xlu1 %v3640_v19 }
 0x812   : > { %v3633_v63 = vpop.xlane.xlu1 %3632 }
 0x813   : > { %v3675_v25 = vsub.f32 %v8745_v8, %v3633_v63 }
 0x815   : > { %v3693_v49 = vmul.f32 1.442695, %v3675_v25 }
 0x81d   : > { %v8794_v14 = vpop.f32.mrf.mxu2 }
 0x820   : > { %v3627_v50 = vpop.xlane.xlu0 %3626 }
 0x821   : > { %v3673_v32 = vsub.f32 %v8755_v15, %v3627_v50 }
 0x823   : > { %v3689_v12 = vmul.f32 1.442695, %v3673_v32 }
 0x825   : > { %v8796_v31 = vpop.f32.mrf.mxu2 }
 0x828   : > { %v3630_v29 = vpop.xlane.xlu2 %3629  ;;  %v3636_v22 = vpop.xlane.xlu0 %3635 }
 0x829   : > { %v3674_v18 = vsub.f32 %v3610_v0, %v3630_v29  ;;  %v3676_v16 = vsub.f32 %v8761_v43, %v3636_v22 }
 0x82b   : > { %v3691_v58 = vmul.f32 1.442695, %v3674_v18  ;;  %v3695_v50 = vmul.f32 1.442695, %v3676_v16 }
 0x82c   : > { %v3495_v11 = vpop.f32.mrf.mxu3 }
 0x82d   : > { %v3601_v51 = vmul.f32 0.17677669, %v3495_v11  ;;  %v3464_v40 = vpop.f32.mrf.mxu2  ;;  %7000 = vpow2.f32 %v3691_v58 }
 0x82e   : > { %v3599_v9 = vmul.f32 0.17677669, %v3464_v40  ;;  %7002 = vpow2.f32 %v3689_v12  ;;  %v3526_v11 = vpop.f32.mrf.mxu0 }
 0x82f   : > { %v8799_v60 = vadd.f32 %v8742_v10, %v3601_v51  ;;  %7004 = vpow2.f32 %v3693_v49  ;;  %v3603_v40 = vmul.f32 0.17677669, %v3526_v11 }
 0x830   : > { %v8803_v46 = vadd.f32 %v8742_v10, %v3599_v9  ;;  %7006 = vpow2.f32 %v3695_v50 }
 0x831   : > { %v3649_v0 = vsel %vm1406_vm2, %v8799_v60, -inf  ;;  %v8836_v25 = vadd.f32 %v8742_v10, %v3603_v40 }
 0x832   : > { %3650 = vmax.xlane.f32.xlu2 %v3649_v0  ;;  %v3643_v24 = vsel %vm1406_vm2, %v8803_v46, -inf }
 0x833   : > { %3644 = vmax.xlane.f32.xlu0 %v3643_v24  ;;  %v8810_v57 = vpop.eup %7000 }
 0x834   : > { %v3497_v62 = vpop.f32.mrf.mxu3  ;;  %v3724_v29 = vsel %vm1406_vm2, %v8810_v57, 0.0  ;;  %v8825_v58 = vpop.eup %7002 }
 0x835   : > { %v3602_v23 = vmul.f32 0.17677669, %v3497_v62  ;;  %v3466_v15 = vpop.f32.mrf.mxu2  ;;  %v8827_v43 = vpop.eup %7004  ;;  %v3721_v51 = vsel %vm1406_vm2, %v8825_v58, 0.0  ;;  %v3655_v62 = vsel %vm1406_vm2, %v8836_v25, -inf }
 0x836   : > { %v3600_v44 = vmul.f32 0.17677669, %v3466_v15  ;;  %v3727_v63 = vsel %vm1406_vm2, %v8827_v43, 0.0  ;;  %v3557_v9 = vpop.f32.mrf.mxu1  ;;  %v8833_v32 = vpop.eup %7006 }
 0x837   : > { %v8813_v8 = vadd.f32 %v8742_v10, %v3602_v23  ;;  %v3528_v0 = vpop.f32.mrf.mxu0  ;;  %v3730_v12 = vsel %vm1406_vm2, %v8833_v32, 0.0  ;;  %v3605_v40 = vmul.f32 0.17677669, %v3557_v9 }
 0x838   : > { %v8817_v5 = vadd.f32 %v8742_v10, %v3600_v44  ;;  %v3604_v24 = vmul.f32 0.17677669, %v3528_v0 }
 0x839   : > { %v3652_v19 = vsel %vm1406_vm2, %v8813_v8, -inf }
 0x83a   : > { %3653 = vmax.xlane.f32.xlu1 %v3652_v19  ;;  %v3646_v18 = vsel %vm1406_vm2, %v8817_v5, -inf  ;;  %v8843_v49 = vadd.f32 %v8742_v10, %v3604_v24 }
 0x83b   : > { %3725 = vadd.xlane.f32.xlu0 %v3724_v29  ;;  %3647 = vmax.xlane.f32.xlu2 %v3646_v18 }
 0x83c   : > { %v3658_v15 = vsel %vm1406_vm2, %v8843_v49, -inf }
 0x83e   : > { %v3559_v22 = vpop.f32.mrf.mxu1 }
 0x83f   : > { %v3606_v23 = vmul.f32 0.17677669, %v3559_v22 }
 0x841   : > { %v8850_v44 = vadd.f32 %v8742_v10, %v3606_v23 }
 0x842   : > { %3722 = vadd.xlane.f32.xlu1 %v3721_v51 }
 0x843   : > { %3728 = vadd.xlane.f32.xlu2 %v3727_v63  ;;  %v3664_v16 = vsel %vm1406_vm2, %v8850_v44, -inf }
 0x844   : > { %v3588_v18 = vpop.f32.mrf.mxu2 }
 0x845   : > { %v3607_v11 = vmul.f32 0.17677669, %v3588_v18 }
 0x847   : > { %v8864_v63 = vadd.f32 %v8742_v10, %v3607_v11 }
 0x84a   : > { %3731 = vadd.xlane.f32.xlu1 %v3730_v12 }
 0x84b   : > { %3656 = vmax.xlane.f32.xlu2 %v3655_v62 }
 0x84f   : > { %3822 = vrot.lane.b32.xlu0 %v7766_v1, %s7142_s22 }
 0x852   : > { %3659 = vmax.xlane.f32.xlu1 %v3658_v15 }
 0x85a   : > { %3665 = vmax.xlane.f32.xlu1 %v3664_v16 }
 0x863   : > { %3847 = vrot.lane.b32.xlu2 %v7788_v21, %s7142_s22  ;;  %v3590_v21 = vpop.f32.mrf.mxu2 }
 0x864   : > { %v3608_v0 = vmul.f32 0.17677669, %v3590_v21 }
 0x866   : > { %v8875_v9 = vadd.f32 %v8742_v10, %v3608_v0 }
 0x868   : > { %v3670_v23 = vsel %vm1406_vm2, %v8875_v9, -inf }
 0x86b   : > { %v3639_v24 = vpop.xlane.xlu2 %3638 }
 0x86c   : > { %v3677_v12 = vsub.f32 %v8781_v52, %v3639_v24 }
 0x86e   : > { %v3697_v22 = vmul.f32 1.442695, %v3677_v12 }
 0x873   : > { %3872 = vrot.lane.b32.xlu1 %v7810_v36, %s7142_s22  ;;  %v3642_v19 = vpop.xlane.xlu1 %3641  ;;  %v8867_v36 = vadd.f32 %v8742_v10, %v3605_v40 }
 0x874   : > { %v3678_v1 = vsub.f32 %v8786_v30, %v3642_v19  ;;  %v3667_v30 = vsel %vm1406_vm2, %v8864_v63, -inf }
 0x875   : > { %v3661_v62 = vsel %vm1406_vm2, %v8867_v36, -inf }
 0x876   : > { %v3699_v29 = vmul.f32 1.442695, %v3678_v1 }
 0x878   : > { %7008 = vpow2.f32 %v3699_v29 }
 0x879   : > { %7010 = vpow2.f32 %v3697_v22 }
 0x87e   : > { %v8859_v50 = vpop.eup %7008 }
 0x87f   : > { %v3736_v51 = vsel %vm1406_vm2, %v8859_v50, 0.0  ;;  %v8879_v15 = vpop.eup %7010 }
 0x880   : > { %3737 = vadd.xlane.f32.xlu0 %v3736_v51  ;;  %v3733_v16 = vsel %vm1406_vm2, %v8879_v15, 0.0 }
 0x888   : > { %3668 = vmax.xlane.f32.xlu0 %v3667_v30 }
 0x88c   : > { %3662 = vmax.xlane.f32.xlu2 %v3661_v62 }
 0x890   : > { %3671 = vmax.xlane.f32.xlu0 %v3670_v23 }
 0x89d   : > { %3734 = vadd.xlane.f32.xlu1 %v3733_v16 }
 0x8a5   : > { %v3651_v52 = vpop.xlane.xlu2 %3650 }
 0x8a6   : > { %v3681_v19 = vsub.f32 %v8799_v60, %v3651_v52  ;;  %v8884_v1 = vpop.xlane.xlu0 %3644 }
 0x8a8   : > { %v3705_v10 = vmul.f32 1.442695, %v3681_v19 }
 0x8aa   : > { %7012 = vpow2.f32 %v3705_v10  ;;  %v10326_v10 = vld [vmem:[#allocation34_spill] sm:$0xff] }
 0x8ad   : > { %v3654_v29 = vpop.xlane.xlu1 %3653 }
 0x8ae   : > { %v3682_v18 = vsub.f32 %v8813_v8, %v3654_v29  ;;  %v3726_v11 = vpop.xlane.xlu0 %3725  ;;  %v8887_v51 = vpop.xlane.xlu2 %3647 }
 0x8af   : > { %7014 = vrcp.f32 %v3726_v11 }
 0x8b0   : > { %v8889_v40 = vpop.eup %7012  ;;  %v3707_v21 = vmul.f32 1.442695, %v3682_v18 }
 0x8b1   : > { %v3745_v0 = vsel %vm1406_vm2, %v8889_v40, 0.0 }
 0x8b2   : > { %7016 = vpow2.f32 %v3707_v21  ;;  %3746 = vadd.xlane.f32.xlu0 %v3745_v0 }
 0x8b5   : > { %v3723_v60 = vpop.xlane.xlu1 %3722  ;;  %v7015_v30 = vpop.eup %7014 }
 0x8b6   : > { %7018 = vrcp.f32 %v3723_v60  ;;  %3897 = vrot.lane.b32.xlu1 %v7747_v2, %s7142_s22  ;;  %v3729_v24 = vpop.xlane.xlu2 %3728  ;;  %v3786_v12 = vmul.f32 %v7015_v30, %v8810_v57 }
 0x8b7   : > { %7020 = vrcp.f32 %v3729_v24 }
 0x8b8   : > { %v8895_v8 = vpop.eup %7016  ;;  %v3802_v23 = vpack.c.bf16 %v3786_v12, %v3786_v12 }
 0x8b9   : > { %v3748_v62 = vsel %vm1406_vm2, %v8895_v8, 0.0 }
 0x8ba   : > { %3749 = vadd.xlane.f32.xlu2 %v3748_v62  ;;  %v3820_v11 = vunpack.c.l.b16 %v3802_v23 }
 0x8bc   : > { %v7019_v22 = vpop.eup %7018 }
 0x8bd   : > { %v3785_v16 = vmul.f32 %v7019_v22, %v8825_v58  ;;  %v3732_v52 = vpop.xlane.xlu1 %3731  ;;  %v7021_v19 = vpop.eup %7020 }
 0x8be   : > { %7022 = vrcp.f32 %v3732_v52  ;;  %3922 = vrot.lane.b32.xlu1 %v10326_v10, %s7142_s22  ;;  %v3657_v2 = vpop.xlane.xlu2 %3656  ;;  %v3787_v21 = vmul.f32 %v7021_v19, %v8827_v43 }
 0x8bf   : > { %v3801_v29 = vpack.c.bf16 %v3785_v16, %v3785_v16  ;;  %v3683_v18 = vsub.f32 %v8836_v25, %v3657_v2 }
 0x8c0   : > { %v3803_v24 = vpack.c.bf16 %v3787_v21, %v3787_v21 }
 0x8c1   : > { %v3819_v57 = vunpack.c.l.b16 %v3801_v29  ;;  %v3709_v0 = vmul.f32 1.442695, %v3683_v18  ;;  %v3823_v60 = vpop.permute.xlu0 %3822 }
 0x8c2   : > { %3835 = vmatpush.bf16.msra.mxu3 %v3823_v60  ;;  %v3844_v43 = vunpack.c.l.b16 %v3803_v24 }
 0x8c3   : > { %v3821_v30 = vpack.c.b16 %v3820_v11, %v3819_v57  ;;  %7024 = vpow2.f32 %v3709_v0  ;;  %v3679_v57 = vsub.f32 %v8803_v46, %v8884_v1 }
 0x8c4   : > { %v7023_v58 = vpop.eup %7022 }
 0x8c5   : > { %v3788_v12 = vmul.f32 %v7023_v58, %v8833_v32  ;;  %6338 = vmatmul.msk.bf16.vlgmr.msra.gmra.mxu3 %vm1406_vm2, %v3821_v30  ;;  %v3660_v62 = vpop.xlane.xlu1 %3659  ;;  %v3701_v60 = vmul.f32 1.442695, %v3679_v57 }
 0x8c6   : > { %v3684_v22 = vsub.f32 %v8843_v49, %v3660_v62  ;;  %v3848_v16 = vpop.permute.xlu2 %3847 }
 0x8c7   : > { %v3804_v25 = vpack.c.bf16 %v3788_v12, %v3788_v12  ;;  %3860 = vmatpush.bf16.msra.mxu0 %v3848_v16 }
 0x8c8   : > { %v3711_v23 = vmul.f32 1.442695, %v3684_v22 }
 0x8c9   : > { %v8908_v52 = vpop.eup %7024  ;;  %v3845_v19 = vunpack.c.l.b16 %v3804_v25 }
 0x8ca   : > { %7026 = vpow2.f32 %v3711_v23  ;;  %v3751_v10 = vsel %vm1406_vm2, %v8908_v52, 0.0 }
 0x8cb   : > { %v3846_v2 = vpack.c.b16 %v3845_v19, %v3844_v43  ;;  %3752 = vadd.xlane.f32.xlu0 %v3751_v10  ;;  %v10327_v19 = vld [vmem:[#allocation36_spill] sm:$0xff] }
 0x8cd   : > { %6339 = vmatmul.msk.bf16.vlgmr.msra.gmra.mxu0 %vm1406_vm2, %v3846_v2  ;;  %v3666_v32 = vpop.xlane.xlu1 %3665 }
 0x8ce   : > { %v3686_v29 = vsub.f32 %v8850_v44, %v3666_v32  ;;  %v3680_v44 = vsub.f32 %v8817_v5, %v8887_v51 }
 0x8d0   : > { %v8914_v49 = vpop.eup %7026  ;;  %v3715_v18 = vmul.f32 1.442695, %v3686_v29  ;;  %v3703_v30 = vmul.f32 1.442695, %v3680_v44 }
 0x8d1   : > { %v3754_v11 = vsel %vm1406_vm2, %v8914_v49, 0.0 }
 0x8d2   : > { %7028 = vpow2.f32 %v3715_v18  ;;  %3755 = vadd.xlane.f32.xlu2 %v3754_v11 }
 0x8d3   : > { %7030 = vpow2.f32 %v3701_v60 }
 0x8d4   : > { %7032 = vpow2.f32 %v3703_v30 }
 0x8d8   : > { %v8920_v21 = vpop.eup %7028 }
 0x8d9   : > { %v3760_v0 = vsel %vm1406_vm2, %v8920_v21, 0.0  ;;  %v8926_v58 = vpop.eup %7030 }
 0x8da   : > { %3761 = vadd.xlane.f32.xlu2 %v3760_v0  ;;  %v3739_v46 = vsel %vm1406_vm2, %v8926_v58, 0.0  ;;  %v8930_v1 = vpop.eup %7032 }
 0x8db   : > { %v3742_v12 = vsel %vm1406_vm2, %v8930_v1, 0.0 }
 0x8e5   : > { %v3873_v24 = vpop.permute.xlu1 %3872 }
 0x8e6   : > { %3885 = vmatpush.bf16.msra.mxu1 %v3873_v24 }
 0x8e8   : > { %3740 = vadd.xlane.f32.xlu1 %v3739_v46 }
 0x8f0   : > { %3743 = vadd.xlane.f32.xlu1 %v3742_v12 }
 0x8f2   : > { %3972 = vrot.lane.b32.xlu2 %v7812_v20, %s7142_s22 }
 0x8f3   : > { %v3738_v5 = vpop.xlane.xlu0 %3737 }
 0x8fa   : > { %2527 = vrot.lane.b32.xlu2 %v8437_v13, %s7142_s22 }
 0x8fb   : > { %v3669_v51 = vpop.xlane.xlu0 %3668 }
 0x8fc   : > { %v3687_v44 = vsub.f32 %v8864_v63, %v3669_v51 }
 0x8fe   : > { %v3717_v30 = vmul.f32 1.442695, %v3687_v44 }
 0x8ff   : > { %v3663_v62 = vpop.xlane.xlu2 %3662 }
 0x900   : > { %v3685_v22 = vsub.f32 %v8867_v36, %v3663_v62 }
 0x902   : > { %v3713_v16 = vmul.f32 1.442695, %v3685_v22  ;;  %3280 = vrot.lane.b32.xlu2 %v8726_v42, %s7141_s30 }
 0x903   : > { %v3672_v25 = vpop.xlane.xlu0 %3671 }
 0x904   : > { %7034 = vpow2.f32 %v3713_v16  ;;  %v3688_v23 = vsub.f32 %v8875_v9, %v3672_v25 }
 0x906   : > { %v3719_v43 = vmul.f32 1.442695, %v3688_v23 }
 0x908   : > { %7036 = vpow2.f32 %v3719_v43 }
 0x909   : > { %3947 = vrot.lane.b32.xlu1 %v10327_v19, %s7142_s22  ;;  %7038 = vrcp.f32 %v3738_v5 }
 0x90a   : > { %v8944_v20 = vpop.eup %7034 }
 0x90b   : > { %v3757_v13 = vsel %vm1406_vm2, %v8944_v20, 0.0 }
 0x90c   : > { %3758 = vadd.xlane.f32.xlu0 %v3757_v13 }
 0x90e   : > { %v8948_v36 = vpop.eup %7036 }
 0x90f   : > { %v7039_v42 = vpop.eup %7038  ;;  %v3766_v9 = vsel %vm1406_vm2, %v8948_v36, 0.0 }
 0x910   : > { %v3735_v10 = vpop.xlane.xlu1 %3734  ;;  %v3790_v2 = vmul.f32 %v7039_v42, %v8859_v50 }
 0x911   : > { %7040 = vrcp.f32 %v3735_v10 }
 0x912   : > { %v3806_v29 = vpack.c.bf16 %v3790_v2, %v3790_v2 }
 0x914   : > { %3767 = vadd.xlane.f32.xlu0 %v3766_v9  ;;  %v3870_v57 = vunpack.c.l.b16 %v3806_v29 }
 0x917   : > { %v7041_v32 = vpop.eup %7040 }
 0x918   : > { %v3789_v18 = vmul.f32 %v7041_v32, %v8879_v15 }
 0x91a   : > { %v3805_v11 = vpack.c.bf16 %v3789_v18, %v3789_v18 }
 0x91c   : > { %v3869_v0 = vunpack.c.l.b16 %v3805_v11 }
 0x91e   : > { %v3871_v60 = vpack.c.b16 %v3870_v57, %v3869_v0 }
 0x920   : > { %6340 = vmatmul.msk.bf16.vlgmr.msra.gmra.mxu1 %vm1406_vm2, %v3871_v60 }
 0x925   : > { %v3747_v24 = vpop.xlane.xlu0 %3746 }
 0x926   : > { %7042 = vrcp.f32 %v3747_v24 }
 0x927   : > { %7044 = vpow2.f32 %v3717_v30 }
 0x928   : > { %3997 = vrot.lane.b32.xlu0 %v7761_v35, %s7142_s22  ;;  %v3898_v50 = vpop.permute.xlu1 %3897 }
 0x929   : > { %3910 = vmatpush.bf16.msra.mxu2 %v3898_v50 }
 0x92c   : > { %v7043_v12 = vpop.eup %7042 }
 0x92d   : > { %v3750_v46 = vpop.xlane.xlu2 %3749  ;;  %v8958_v15 = vpop.eup %7044  ;;  %v3793_v63 = vmul.f32 %v7043_v12, %v8889_v40 }
 0x92e   : > { %7046 = vrcp.f32 %v3750_v46  ;;  %v3763_v51 = vsel %vm1406_vm2, %v8958_v15, 0.0 }
 0x92f   : > { %v3809_v62 = vpack.c.bf16 %v3793_v63, %v3793_v63 }
 0x930   : > { %2529 = vrot.lane.b32.xlu0 %v8440_v54, %s7142_s22  ;;  %v3923_v5 = vpop.permute.xlu1 %3922 }
 0x931   : > { %3935 = vmatpush.bf16.msrb.mxu3 %v3923_v5  ;;  %v3919_v25 = vunpack.c.l.b16 %v3809_v62 }
 0x933   : > { %3764 = vadd.xlane.f32.xlu1 %v3763_v51  ;;  %v6703_v51 = vld [vmem:[%s10182_s6 + $0x38] sm:$0xff] }
 0x934   : > { %v7047_v35 = vpop.eup %7046 }
 0x935   : > { %v3794_v22 = vmul.f32 %v7047_v35, %v8895_v8  ;;  %4190 = vmatpush.bf16.msra.mxu3 %v6703_v51 }
 0x937   : > { %v3810_v16 = vpack.c.bf16 %v3794_v22, %v3794_v22 }
 0x938   : > { %3282 = vrot.lane.b32.xlu0 %v8730_v55, %s7141_s30 }
 0x939   : > { %v3920_v23 = vunpack.c.l.b16 %v3810_v16 }
 0x93b   : > { %v3921_v43 = vpack.c.b16 %v3920_v23, %v3919_v25  ;;  %v6699_v25 = vld [vmem:[%s10182_s6 + $0x18] sm:$0xff] }
 0x93d   : > { %6342 = vmatmul.msk.bf16.vlgmr.msrb.gmra.mxu3 %vm1406_vm2, %v3921_v43  ;;  %v6697_v43 = vld [vmem:[%s10182_s6 + $0x8] sm:$0xff] }
 0x940   : > { %2531 = vrot.lane.b32.xlu0 %v8442_v61, %s7142_s22 }
 0x945   : > { %v3756_v54 = vpop.xlane.xlu2 %3755 }
 0x948   : > { %3284 = vrot.lane.b32.xlu0 %v8722_v39, %s7141_s30  ;;  %v3837_v40 = vpop.f32.mrf.mxu3 }
 0x94a   : > { %v3862_v19 = vpop.f32.mrf.mxu0 }
 0x94c   : > { %4033 = vrot.lane.b32.xlu1 %v3837_v40, %s7140_s28 }
 0x94d   : > { %v3762_v8 = vpop.xlane.xlu2 %3761 }
 0x950   : > { %v3839_v13 = vpop.f32.mrf.mxu3  ;;  %4037 = vrot.lane.b32.xlu0 %v3862_v19, %s7140_s28 }
 0x951   : > { %4035 = vrot.lane.b32.xlu2 %v3839_v13, %s7140_s28 }
 0x952   : > { %v3864_v55 = vpop.f32.mrf.mxu0 }
 0x954   : > { %4039 = vrot.lane.b32.xlu1 %v3864_v55, %s7140_s28 }
 0x955   : > { %v3973_v10 = vpop.permute.xlu2 %3972 }
 0x956   : > { %3985 = vmatpush.bf16.msrb.mxu1 %v3973_v10 }
 0x958   : > { %2537 = vrot.lane.b32.xlu0 %v8452_v33, %s7142_s22 }
 0x959   : > { %2533 = vrot.lane.b32.xlu2 %v8446_v47, %s7142_s22  ;;  %v3753_v47 = vpop.xlane.xlu0 %3752 }
 0x95b   : > { %v3741_v61 = vpop.xlane.xlu1 %3740 }
 0x95c   : > { %3288 = vrot.lane.b32.xlu1 %v8772_v26, %s7141_s30  ;;  %7048 = vrcp.f32 %v3741_v61 }
 0x95d   : > { %v2528_v39 = vpop.permute.xlu2 %2527 }
 0x95e   : > { %2576 = vst.msk [vmem:[#allocation2] sm:$0xff] %vm2575_vm3, %v2528_v39 }
 0x961   : > { %3286 = vrot.lane.b32.xlu2 %v8724_v4, %s7141_s30 }
 0x962   : > { %v7049_v9 = vpop.eup %7048 }
 0x963   : > { %v3744_v42 = vpop.xlane.xlu1 %3743  ;;  %v3791_v2 = vmul.f32 %v7049_v9, %v8926_v58 }
 0x964   : > { %7050 = vrcp.f32 %v3744_v42 }
 0x965   : > { %v3281_v33 = vpop.permute.xlu2 %3280  ;;  %7052 = vrcp.f32 %v3756_v54  ;;  %v3807_v32 = vpack.c.bf16 %v3791_v2, %v3791_v2  ;;  %v6696_v54 = vld [vmem:[%s10182_s6] sm:$0xff] }
 0x966   : > { %3329 = vst.msk [vmem:[#allocation2] sm:$0xff] %vm3328_vm4, %v3281_v33  ;;  %7054 = vrcp.f32 %v3753_v47 }
 0x967   : > { %v3894_v11 = vunpack.c.l.b16 %v3807_v32  ;;  %7056 = vrcp.f32 %v3762_v8 }
 0x969   : > { %2535 = vrot.lane.b32.xlu2 %v8448_v48, %s7142_s22 }
 0x96a   : > { %v7051_v26 = vpop.eup %7050 }
 0x96b   : > { %v3792_v29 = vmul.f32 %v7051_v26, %v8930_v1  ;;  %v7053_v18 = vpop.eup %7052 }
 0x96c   : > { %v7055_v0 = vpop.eup %7054  ;;  %v3796_v60 = vmul.f32 %v7053_v18, %v8914_v49 }
 0x96d   : > { %v3808_v4 = vpack.c.bf16 %v3792_v29, %v3792_v29  ;;  %v3795_v58 = vmul.f32 %v7055_v0, %v8908_v52  ;;  %v7057_v12 = vpop.eup %7056 }
 0x96e   : > { %v3812_v48 = vpack.c.bf16 %v3796_v60, %v3796_v60 }
 0x96f   : > { %v3895_v57 = vunpack.c.l.b16 %v3808_v4  ;;  %v3811_v30 = vpack.c.bf16 %v3795_v58, %v3795_v58 }
 0x970   : > { %v3945_v24 = vunpack.c.l.b16 %v3812_v48 }
 0x971   : > { %v3896_v44 = vpack.c.b16 %v3895_v57, %v3894_v11  ;;  %3290 = vrot.lane.b32.xlu2 %v8774_v59, %s7141_s30  ;;  %v3944_v1 = vunpack.c.l.b16 %v3811_v30  ;;  %v3798_v59 = vmul.f32 %v7057_v12, %v8920_v21  ;;  %v10329_v12 = vld [vmem:[#allocation39_spill] sm:$0xff] }
 0x973   : > { %6341 = vmatmul.msk.bf16.vlgmr.msra.gmra.mxu2 %vm1406_vm2, %v3896_v44  ;;  %v3946_v46 = vpack.c.b16 %v3945_v24, %v3944_v1  ;;  %v3814_v5 = vpack.c.bf16 %v3798_v59, %v3798_v59 }
 0x975   : > { %v3970_v35 = vunpack.c.l.b16 %v3814_v5 }
 0x979   : > { %2539 = vrot.lane.b32.xlu2 %v8512_v34, %s7142_s22 }
 0x97b   : > { %v3948_v50 = vpop.permute.xlu1 %3947 }
 0x97c   : > { %3960 = vmatpush.bf16.msrb.mxu0 %v3948_v50 }
 0x97f   : > { %v3759_v49 = vpop.xlane.xlu0 %3758  ;;  %6343 = vmatmul.msk.bf16.vlgmr.msrb.gmra.mxu0 %vm1406_vm2, %v3946_v46 }
 0x980   : > { %7058 = vrcp.f32 %v3759_v49 }
 0x981   : > { %3294 = vrot.lane.b32.xlu2 %v8792_v7, %s7141_s30  ;;  %v6702_v7 = vld [vmem:[%s10182_s6 + $0x30] sm:$0xff] }
 0x982   : > { %4191 = vmatpush.bf16.msra.mxu3 %v6702_v7 }
 0x986   : > { %v7059_v52 = vpop.eup %7058 }
 0x987   : > { %v3797_v63 = vmul.f32 %v7059_v52, %v8944_v20  ;;  %v3768_v21 = vpop.xlane.xlu0 %3767  ;;  %v6700_v20 = vld [vmem:[%s10182_s6 + $0x20] sm:$0xff] }
 0x988   : > { %7060 = vrcp.f32 %v3768_v21  ;;  %v10331_v21 = vld [vmem:[#allocation41_spill] sm:$0xff] }
 0x989   : > { %v3813_v34 = vpack.c.bf16 %v3797_v63, %v3797_v63  ;;  %2543 = vrot.lane.b32.xlu2 %v8444_v38, %s7142_s22  ;;  %v6701_v38 = vld [vmem:[%s10182_s6 + $0x28] sm:$0xff] }
 0x98a   : > { %4192 = vmatpush.bf16.msra.mxu3 %v6701_v38 }
 0x98b   : > { %v3969_v62 = vunpack.c.l.b16 %v3813_v34  ;;  %v10330_v34 = vld [vmem:[#allocation43_spill] sm:$0xff] }
 0x98d   : > { %v3971_v22 = vpack.c.b16 %v3970_v35, %v3969_v62 }
 0x98e   : > { %4193 = vmatpush.bf16.msra.mxu3 %v6700_v20 }
 0x98f   : > { %6344 = vmatmul.msk.bf16.vlgmr.msrb.gmra.mxu1 %vm1406_vm2, %v3971_v22 }
 0x991   : > { %3298 = vrot.lane.b32.xlu2 %v8749_v41, %s7141_s30  ;;  %v6698_v41 = vld [vmem:[%s10182_s6 + $0x10] sm:$0xff] }
 0x992   : > { %4194 = vmatpush.bf16.msra.mxu3 %v6699_v25 }
 0x996   : > { %4195 = vmatpush.bf16.msra.mxu3 %v6698_v41 }
 0x999   : > { %2547 = vrot.lane.b32.xlu2 %v8454_v28, %s7142_s22 }
 0x99a   : > { %v3998_v16 = vpop.permute.xlu0 %3997  ;;  %4196 = vmatpush.bf16.msra.mxu3 %v6697_v43 }
 0x99b   : > { %4010 = vmatpush.bf16.msrb.mxu2 %v3998_v16 }
 0x99d   : > { %v3887_v23 = vpop.f32.mrf.mxu1 }
 0x99e   : > { %4041 = vrot.lane.b32.xlu0 %v3887_v23, %s7140_s28  ;;  %4197 = vmatpush.bf16.msra.mxu3 %v6696_v54  ;;  %v10332_v23 = vld [vmem:[#allocation37_spill] sm:$0xff]  ;;  %v9112_v54 = vld [vmem:[%s10183_s7] ss:$0 sm:$0xff] }
 0x9a1   : > { %3302 = vrot.lane.b32.xlu2 %v8733_v17, %s7141_s30  ;;  %v7061_v17 = vpop.eup %7060 }
 0x9a2   : > { %v2530_v28 = vpop.permute.xlu0 %2529  ;;  %v3800_v8 = vmul.f32 %v7061_v17, %v8948_v36 }
 0x9a3   : > { %2577 = vst.msk [vmem:[#allocation2 + $0x8] sm:$0xff] %vm2575_vm3, %v2530_v28 }
 0x9a5   : > { %v3889_v40 = vpop.f32.mrf.mxu1 }
 0x9a6   : > { %2541 = vrot.lane.b32.xlu0 %v8514_v53, %s7142_s22  ;;  %4043 = vrot.lane.b32.xlu1 %v3889_v40, %s7140_s28  ;;  %v3765_v19 = vpop.xlane.xlu1 %3764  ;;  %v3816_v53 = vpack.c.bf16 %v3800_v8, %v3800_v8 }
 0x9a7   : > { %7062 = vrcp.f32 %v3765_v19  ;;  %v10333_v19 = vld [vmem:[#allocation3_spill] sm:$0xff] }
 0x9a9   : > { %2551 = vrot.lane.b32.xlu2 %v8463_v6, %s7142_s22  ;;  %v3995_v6 = vunpack.c.l.b16 %v3816_v53 }
 0x9aa   : > { %v3283_v13 = vpop.permute.xlu0 %3282 }
 0x9ab   : > { %3330 = vst.msk [vmem:[#allocation2 + $0x8] sm:$0xff] %vm3328_vm4, %v3283_v13  ;;  %v4036_v55 = vpop.permute.xlu2 %4035 }
 0x9ac   : > { %4083 = vst.msk [vmem:[#allocation2 + $0x8] sm:$0xff] %vm4081_vm5, %v4036_v55  ;;  %v10334_v55 = vld [vmem:[#allocation4_spill] sm:$0xff] }
 0x9ad   : > { %v7063_v10 = vpop.eup %7062 }
 0x9ae   : > { %v3799_v61 = vmul.f32 %v7063_v10, %v8958_v15  ;;  %3292 = vrot.lane.b32.xlu1 %v8790_v27, %s7141_s30  ;;  %v10328_v15 = vld [vmem:[#allocation40_spill] sm:$0xff] }
 0x9b0   : > { %v3815_v39 = vpack.c.bf16 %v3799_v61, %v3799_v61 }
 0x9b1   : > { %3306 = vrot.lane.b32.xlu2 %v8778_v37, %s7141_s30 }
 0x9b2   : > { %v3994_v42 = vunpack.c.l.b16 %v3815_v39  ;;  %v2532_v36 = vpop.permute.xlu0 %2531 }
 0x9b3   : > { %2578 = vst.msk [vmem:[#allocation2 + $0x10] sm:$0xff] %vm2575_vm3, %v2532_v36  ;;  %v2534_v9 = vpop.permute.xlu2 %2533  ;;  %v4099_v4 = vld [vmem:[#allocation2 + $0x8] sm:$0xff] }
 0x9b4   : > { %v3996_v33 = vpack.c.b16 %v3995_v6, %v3994_v42  ;;  %2579 = vst.msk [vmem:[#allocation2 + $0x18] sm:$0xff] %vm2575_vm3, %v2534_v9  ;;  %v10335_v6 = vld [vmem:[#allocation6_spill] sm:$0xff]  ;;  %v10336_v9 = vld [vmem:[#allocation5_spill] sm:$0xff] }
 0x9b6   : > { %6345 = vmatmul.msk.bf16.vlgmr.msrb.gmra.mxu2 %vm1406_vm2, %v3996_v33 }
 0x9b9   : > { %2555 = vrot.lane.b32.xlu2 %v10328_v15, %s7142_s22 }
 0x9ba   : > { %v3285_v47 = vpop.permute.xlu0 %3284 }
 0x9bb   : > { %3331 = vst.msk [vmem:[#allocation2 + $0x10] sm:$0xff] %vm3328_vm4, %v3285_v47  ;;  %v3287_v27 = vpop.permute.xlu2 %3286 }
 0x9bc   : > { %3332 = vst.msk [vmem:[#allocation2 + $0x18] sm:$0xff] %vm3328_vm4, %v3287_v27 }
 0x9be   : > { %v4034_v37 = vpop.permute.xlu1 %4033 }
 0x9bf   : > { %4082 = vst.msk [vmem:[#allocation2] sm:$0xff] %vm4081_vm5, %v4034_v37 }
 0x9c0   : > { %v3937_v52 = vpop.f32.mrf.mxu3 }
 0x9c1   : > { %3310 = vrot.lane.b32.xlu2 %v8796_v31, %s7141_s30 }
 0x9c2   : > { %v4038_v2 = vpop.permute.xlu0 %4037 }
 0x9c3   : > { %4084 = vst.msk [vmem:[#allocation2 + $0x10] sm:$0xff] %vm4081_vm5, %v4038_v2  ;;  %v2536_v26 = vpop.permute.xlu2 %2535 }
 0x9c4   : > { %2580 = vst.msk [vmem:[#allocation2 + $0x20] sm:$0xff] %vm2575_vm3, %v2536_v26 }
 0x9c6   : > { %v4040_v32 = vpop.permute.xlu1 %4039  ;;  %v4098_v29 = vld [vmem:[#allocation2] sm:$0xff] }
 0x9c7   : > { %4085 = vst.msk [vmem:[#allocation2 + $0x18] sm:$0xff] %vm4081_vm5, %v4040_v32  ;;  %v4114_v18 = vpack.c.bf16 %v4099_v4, %v4098_v29 }
 0x9c8   : > { %v3939_v63 = vpop.f32.mrf.mxu3 }
 0x9c9   : > { %4198 = vmatmul.bf16.vlgmr.msra.gmra.mxu3 %v4114_v18 }
 0x9ca   : > { %v2538_v11 = vpop.permute.xlu0 %2537  ;;  %v4100_v44 = vld [vmem:[#allocation2 + $0x10] sm:$0xff] }
 0x9cb   : > { %2581 = vst.msk [vmem:[#allocation2 + $0x28] sm:$0xff] %vm2575_vm3, %v2538_v11  ;;  %v3291_v57 = vpop.permute.xlu2 %3290 }
 0x9cc   : > { %3334 = vst.msk [vmem:[#allocation2 + $0x28] sm:$0xff] %vm3328_vm4, %v3291_v57 }
 0x9ce   : > { %v3289_v31 = vpop.permute.xlu1 %3288  ;;  %v4101_v60 = vld [vmem:[#allocation2 + $0x18] sm:$0xff] }
 0x9cf   : > { %3333 = vst.msk [vmem:[#allocation2 + $0x20] sm:$0xff] %vm3328_vm4, %v3289_v31  ;;  %v4115_v58 = vpack.c.bf16 %v4101_v60, %v4100_v44 }
 0x9d3   : > { %v2540_v0 = vpop.permute.xlu2 %2539 }
 0x9d4   : > { %2582 = vst.msk [vmem:[#allocation2 + $0x30] sm:$0xff] %vm2575_vm3, %v2540_v0 }
 0x9d9   : > { %4203 = vmatmul.bf16.gmra.mxu3 %v4115_v58 }
 0x9db   : > { %v3295_v48 = vpop.permute.xlu2 %3294 }
 0x9e3   : > { %v2544_v30 = vpop.permute.xlu2 %2543 }
 0x9e4   : > { %2584 = vst.msk [vmem:[#allocation2 + $0x40] sm:$0xff] %vm2575_vm3, %v2544_v30 }
 0x9eb   : > { %v9069_v24 = vpop.permute.xlu2 %3298 }
 0x9f3   : > { %v2548_v1 = vpop.permute.xlu2 %2547 }
 0x9f4   : > { %2586 = vst.msk [vmem:[#allocation2 + $0x50] sm:$0xff] %vm2575_vm3, %v2548_v1 }
 0x9f6   : > { %v3912_v50 = vpop.f32.mrf.mxu2 }
 0x9f7   : > { %4045 = vrot.lane.b32.xlu0 %v3912_v50, %s7140_s28 }
 0x9fb   : > { %v9073_v46 = vpop.permute.xlu2 %3302 }
 0x9fc   : > { %v3962_v62 = vpop.f32.mrf.mxu0 }
 0x9fe   : > { %v3914_v49 = vpop.f32.mrf.mxu2 }
 0x9ff   : > { %2545 = vrot.lane.b32.xlu0 %v10329_v12, %s7142_s22  ;;  %4047 = vrot.lane.b32.xlu1 %v3914_v49, %s7140_s28 }
 0xa03   : > { %v2552_v59 = vpop.permute.xlu2 %2551 }
 0xa04   : > { %2588 = vst.msk [vmem:[#allocation2 + $0x60] sm:$0xff] %vm2575_vm3, %v2552_v59  ;;  %v3964_v7 = vpop.f32.mrf.mxu0 }
 0xa07   : > { %4049 = vrot.lane.b32.xlu0 %v3937_v52, %s7140_s28  ;;  %3296 = vrot.lane.b32.xlu1 %v8736_v3, %s7141_s30 }
 0xa0b   : > { %v9082_v5 = vpop.permute.xlu2 %3306 }
 0xa0c   : > { %v3987_v25 = vpop.f32.mrf.mxu1 }
 0xa0f   : > { %2549 = vrot.lane.b32.xlu0 %v10330_v34, %s7142_s22  ;;  %4051 = vrot.lane.b32.xlu1 %v3939_v63, %s7140_s28  ;;  %v10337_v63 = vld [vmem:[#allocation7_spill] sm:$0xff] }
 0xa10   : > { %v4042_v51 = vpop.permute.xlu0 %4041 }
 0xa11   : > { %4086 = vst.msk [vmem:[#allocation2 + $0x20] sm:$0xff] %vm4081_vm5, %v4042_v51 }
 0xa13   : > { %v2556_v35 = vpop.permute.xlu2 %2555 }
 0xa14   : > { %2590 = vst.msk [vmem:[#allocation2 + $0x70] sm:$0xff] %vm2575_vm3, %v2556_v35  ;;  %v3989_v41 = vpop.f32.mrf.mxu1 }
 0xa17   : > { %3300 = vrot.lane.b32.xlu1 %v8728_v45, %s7141_s30  ;;  %4053 = vrot.lane.b32.xlu0 %v3962_v62, %s7140_s28 }
 0xa18   : > { %v2542_v3 = vpop.permute.xlu0 %2541  ;;  %v4044_v22 = vpop.permute.xlu1 %4043  ;;  %v4102_v45 = vld [vmem:[#allocation2 + $0x20] sm:$0xff] }
 0xa19   : > { %2583 = vst.msk [vmem:[#allocation2 + $0x38] sm:$0xff] %vm2575_vm3, %v2542_v3 }
 0xa1a   : > { %3336 = vst.msk [vmem:[#allocation2 + $0x38] sm:$0xff] %vm3328_vm4, %v3295_v48 }
 0xa1b   : > { %4087 = vst.msk [vmem:[#allocation2 + $0x28] sm:$0xff] %vm4081_vm5, %v4044_v22  ;;  %v3311_v49 = vpop.permute.xlu2 %3310 }
 0xa1f   : > { %2553 = vrot.lane.b32.xlu0 %v10331_v21, %s7142_s22  ;;  %4055 = vrot.lane.b32.xlu1 %v3964_v7, %s7140_s28 }
 0xa20   : > { %v3293_v38 = vpop.permute.xlu1 %3292 }
 0xa21   : > { %3335 = vst.msk [vmem:[#allocation2 + $0x30] sm:$0xff] %vm3328_vm4, %v3293_v38 }
 0xa22   : > { %v4103_v20 = vld [vmem:[#allocation2 + $0x28] sm:$0xff] }
 0xa23   : > { %v4116_v16 = vpack.c.bf16 %v4103_v20, %v4102_v45  ;;  %v10338_v45 = vld [vmem:[#allocation8_spill] sm:$0xff] }
 0xa25   : > { %4208 = vmatmul.bf16.gmra.mxu3 %v4116_v16 }
 0xa27   : > { %4057 = vrot.lane.b32.xlu0 %v3987_v25, %s7140_s28  ;;  %3304 = vrot.lane.b32.xlu1 %v8776_v56, %s7141_s30 }
 0xa2f   : > { %2557 = vrot.lane.b32.xlu0 %v10332_v23, %s7142_s22  ;;  %4059 = vrot.lane.b32.xlu1 %v3989_v41, %s7140_s28  ;;  %s10351_s22 = sshll.u32 %s10353_s19, 3 }
 0xa30   : > { %s10112_s20 = scalar_lea.vmem %s10194_s18, %s10351_s22 }
 0xa37   : > { %3308 = vrot.lane.b32.xlu1 %v8794_v14, %s7141_s30 }
 0xa39   : > { %v4012_v28 = vpop.f32.mrf.mxu2 }
 0xa3a   : > { %4061 = vrot.lane.b32.xlu0 %v4012_v28, %s7140_s28 }
 0xa41   : > { %v4014_v43 = vpop.f32.mrf.mxu2 }
 0xa42   : > { %4063 = vrot.lane.b32.xlu1 %v4014_v43, %s7140_s28 }
 0xa4c   : > { %v4199_v56 = vpop.f32.mrf.mxu3 }
 0xa4d   : > { %v4200_v40 = vadd.f32 %v9112_v54, %v4199_v56 }
 0xa4f   : > { %v9116_v17 = vadd.f32 %v4200_v40, %v10333_v19 }
 0xa51   : > { %4257 = vadd.xlane.f32.xlu2 %v9116_v17 }
 0xa54   : > { %v4201_v14 = vpop.f32.mrf.mxu3 }
 0xa55   : > { %v4202_v13 = vadd.f32 %v9112_v54, %v4201_v14 }
 0xa57   : > { %v9121_v10 = vadd.f32 %v4202_v13, %v10334_v55 }
 0xa5c   : > { %v4204_v8 = vpop.f32.mrf.mxu3 }
 0xa5d   : > { %v4205_v39 = vadd.f32 %v9112_v54, %v4204_v8 }
 0xa5f   : > { %v9131_v33 = vadd.f32 %v4205_v39, %v10336_v9 }
 0xa64   : > { %4259 = vadd.xlane.f32.xlu0 %v9121_v10  ;;  %v4206_v53 = vpop.f32.mrf.mxu3 }
 0xa65   : > { %v4207_v61 = vadd.f32 %v9112_v54, %v4206_v53 }
 0xa67   : > { %v9127_v42 = vadd.f32 %v4207_v61, %v10335_v6 }
 0xa69   : > { %v4046_v36 = vpop.permute.xlu0 %4045  ;;  %4263 = vadd.xlane.f32.xlu2 %v9127_v42 }
 0xa6a   : > { %4088 = vst.msk [vmem:[#allocation2 + $0x30] sm:$0xff] %vm4081_vm5, %v4046_v36 }
 0xa6c   : > { %4261 = vadd.xlane.f32.xlu1 %v9131_v33 }
 0xa71   : > { %v2546_v15 = vpop.permute.xlu0 %2545  ;;  %v4048_v47 = vpop.permute.xlu1 %4047  ;;  %v4104_v2 = vld [vmem:[#allocation2 + $0x30] sm:$0xff] }
 0xa72   : > { %2585 = vst.msk [vmem:[#allocation2 + $0x48] sm:$0xff] %vm2575_vm3, %v2546_v15 }
 0xa73   : > { %3338 = vst.msk [vmem:[#allocation2 + $0x48] sm:$0xff] %vm3328_vm4, %v9069_v24 }
 0xa74   : > { %4089 = vst.msk [vmem:[#allocation2 + $0x38] sm:$0xff] %vm4081_vm5, %v4048_v47 }
 0xa79   : > { %v4050_v27 = vpop.permute.xlu0 %4049  ;;  %v3297_v37 = vpop.permute.xlu1 %3296 }
 0xa7a   : > { %3337 = vst.msk [vmem:[#allocation2 + $0x40] sm:$0xff] %vm3328_vm4, %v3297_v37  ;;  %v10339_v37 = vld [vmem:[#allocation9_spill] sm:$0xff] }
 0xa7b   : > { %4090 = vst.msk [vmem:[#allocation2 + $0x40] sm:$0xff] %vm4081_vm5, %v4050_v27  ;;  %v4105_v26 = vld [vmem:[#allocation2 + $0x38] sm:$0xff] }
 0xa7c   : > { %v4117_v32 = vpack.c.bf16 %v4105_v26, %v4104_v2 }
 0xa7e   : > { %4213 = vmatmul.bf16.gmra.mxu3 %v4117_v32 }
 0xa81   : > { %v2550_v29 = vpop.permute.xlu0 %2549  ;;  %v4052_v4 = vpop.permute.xlu1 %4051 }
 0xa82   : > { %2587 = vst.msk [vmem:[#allocation2 + $0x58] sm:$0xff] %vm2575_vm3, %v2550_v29  ;;  %v4106_v57 = vld [vmem:[#allocation2 + $0x40] sm:$0xff]  ;;  %v10340_v29 = vld [vmem:[#allocation10_spill] sm:$0xff] }
 0xa83   : > { %3340 = vst.msk [vmem:[#allocation2 + $0x58] sm:$0xff] %vm3328_vm4, %v9073_v46 }
 0xa84   : > { %4091 = vst.msk [vmem:[#allocation2 + $0x48] sm:$0xff] %vm4081_vm5, %v4052_v4 }
 0xa89   : > { %v4054_v18 = vpop.permute.xlu0 %4053  ;;  %v3301_v11 = vpop.permute.xlu1 %3300 }
 0xa8a   : > { %3339 = vst.msk [vmem:[#allocation2 + $0x50] sm:$0xff] %vm3328_vm4, %v3301_v11 }
 0xa8b   : > { %4092 = vst.msk [vmem:[#allocation2 + $0x50] sm:$0xff] %vm4081_vm5, %v4054_v18  ;;  %v4107_v31 = vld [vmem:[#allocation2 + $0x48] sm:$0xff] }
 0xa8c   : > { %v4118_v0 = vpack.c.bf16 %v4107_v31, %v4106_v57  ;;  %v10341_v31 = vld [vmem:[#allocation11_spill] sm:$0xff] }
 0xa8e   : > { %4218 = vmatmul.bf16.gmra.mxu3 %v4118_v0 }
 0xa91   : > { %v2554_v60 = vpop.permute.xlu0 %2553  ;;  %v4056_v44 = vpop.permute.xlu1 %4055 }
 0xa92   : > { %2589 = vst.msk [vmem:[#allocation2 + $0x68] sm:$0xff] %vm2575_vm3, %v2554_v60  ;;  %v4108_v30 = vld [vmem:[#allocation2 + $0x50] sm:$0xff] }
 0xa93   : > { %3342 = vst.msk [vmem:[#allocation2 + $0x68] sm:$0xff] %vm3328_vm4, %v9082_v5  ;;  %v7143_v5 = vmov 128.0  }
 0xa94   : > { %4093 = vst.msk [vmem:[#allocation2 + $0x58] sm:$0xff] %vm4081_vm5, %v4056_v44  ;;  %7064 = vrcp.f32 %v7143_v5  ;;  %v10342_v44 = vld [vmem:[#allocation12_spill] sm:$0xff] }
 0xa99   : > { %v4058_v58 = vpop.permute.xlu0 %4057  ;;  %v3305_v48 = vpop.permute.xlu1 %3304 }
 0xa9a   : > { %3341 = vst.msk [vmem:[#allocation2 + $0x60] sm:$0xff] %vm3328_vm4, %v3305_v48  ;;  %v7065_v22 = vpop.eup %7064 }
 0xa9b   : > { %4094 = vst.msk [vmem:[#allocation2 + $0x60] sm:$0xff] %vm4081_vm5, %v4058_v58  ;;  %v4109_v24 = vld [vmem:[#allocation2 + $0x58] sm:$0xff]  ;;  %v4290_v38 = vmul.f32 128.0, %v7065_v22  ;;  %vm4294_vm6 = vweird.f32 %v7065_v22 }
 0xa9c   : > { %v4119_v1 = vpack.c.bf16 %v4109_v24, %v4108_v30 }
 0xa9d   : > { %v4291_v25 = vsub.f32 1.0, %v4290_v38 }
 0xa9e   : > { %4223 = vmatmul.bf16.gmra.mxu3 %v4119_v1 }
 0xa9f   : > { %v4292_v41 = vmul.f32 %v7065_v22, %v4291_v25 }
 0xaa1   : > { %v2558_v50 = vpop.permute.xlu0 %2557  ;;  %v4060_v46 = vpop.permute.xlu1 %4059  ;;  %v4293_v56 = vadd.f32 %v7065_v22, %v4292_v41 }
 0xaa2   : > { %2591 = vst.msk [vmem:[#allocation2 + $0x78] sm:$0xff] %vm2575_vm3, %v2558_v50  ;;  %v4110_v51 = vld [vmem:[#allocation2 + $0x60] sm:$0xff] }
 0xaa3   : > { %3344 = vst.msk [vmem:[#allocation2 + $0x78] sm:$0xff] %vm3328_vm4, %v3311_v49  ;;  %v9166_v40 = vsel %vm4294_vm6, %v7065_v22, %v4293_v56  ;;  %v6734_v22 = vld [vmem:[%s10186_s10 + $0xec] sm:$0xf0] }
 0xaa4   : > { %4095 = vst.msk [vmem:[#allocation2 + $0x68] sm:$0xff] %vm4081_vm5, %v4060_v46  ;;  %v10343_v46 = vld [vmem:[#allocation13_spill] sm:$0xff] }
 0xaa8   : > { %v4209_v12 = vpop.f32.mrf.mxu3 }
 0xaa9   : > { %v4210_v59 = vadd.f32 %v9112_v54, %v4209_v12  ;;  %v3309_v52 = vpop.permute.xlu1 %3308 }
 0xaaa   : > { %3343 = vst.msk [vmem:[#allocation2 + $0x70] sm:$0xff] %vm3328_vm4, %v3309_v52 }
 0xaab   : > { %v9159_v34 = vadd.f32 %v4210_v59, %v10337_v63  ;;  %v4111_v35 = vld [vmem:[#allocation2 + $0x68] sm:$0xff] }
 0xaac   : > { %v4062_v62 = vpop.permute.xlu0 %4061  ;;  %v4120_v3 = vpack.c.bf16 %v4111_v35, %v4110_v51  ;;  %v10344_v35 = vld [vmem:[#allocation14_spill] sm:$0xff] }
 0xaad   : > { %4265 = vadd.xlane.f32.xlu0 %v9159_v34  ;;  %4096 = vst.msk [vmem:[#allocation2 + $0x70] sm:$0xff] %vm4081_vm5, %v4062_v62 }
 0xaae   : > { %4228 = vmatmul.bf16.gmra.mxu3 %v4120_v3  ;;  %v6492_v3 = vld [vmem:[%s10186_s10 + $0xe0] sm:$0xf] }
 0xaaf   : > { %v6493_v38 = vor.u32 %v6734_v22, %v6492_v3  ;;  %v6721_v3 = vld [vmem:[%s10186_s10 + $0x8c] sm:$0xf]  ;;  %v6454_v22 = vld [vmem:[%s10186_s10 + $0x98] sm:$0xf0] }
 0xab0   : > { %v4211_v7 = vpop.f32.mrf.mxu3 }
 0xab1   : > { %v4212_v21 = vadd.f32 %v9112_v54, %v4211_v7  ;;  %v6732_v7 = vld [vmem:[%s10186_s10 + $0xe4] sm:$0xf]  ;;  %4832 = vmatpush.bf16.msra.mxu0 %v6493_v38  ;;  %v6428_v38 = vld [vmem:[%s10186_s10 + $0x60] sm:$0xf] }
 0xab3   : > { %v4244_v20 = vadd.f32 %v4212_v21, %v10338_v45  ;;  %v6494_v45 = vld [vmem:[%s10186_s10 + $0xf0] sm:$0xf0] }
 0xab4   : > { %v4064_v16 = vpop.permute.xlu1 %4063  ;;  %v4112_v23 = vld [vmem:[#allocation2 + $0x70] sm:$0xff]  ;;  %v6497_v41 = vor.u32 %v6732_v7, %v6494_v45 }
 0xab5   : > { %4267 = vadd.xlane.f32.xlu1 %v4244_v20  ;;  %4097 = vst.msk [vmem:[#allocation2 + $0x78] sm:$0xff] %vm4081_vm5, %v4064_v16  ;;  %v6735_v16 = vld [vmem:[%s10186_s10 + $0xf4] sm:$0xf0]  ;;  %v6718_v45 = vld [vmem:[%s10186_s10 + $0x6c] sm:$0xf0] }
 0xab6   : > { %4881 = vmatpush.bf16.msra.mxu1 %v6497_v41  ;;  %v6430_v41 = vld [vmem:[%s10186_s10 + $0x70] sm:$0xf0] }
 0xabc   : > { %v4113_v28 = vld [vmem:[#allocation2 + $0x78] sm:$0xff] }
 0xabd   : > { %v4121_v43 = vpack.c.bf16 %v4113_v28, %v4112_v23  ;;  %v6733_v28 = vld [vmem:[%s10186_s10 + $0xec] sm:$0xf] }
 0xabf   : > { %4233 = vmatmul.bf16.gmra.mxu3 %v4121_v43  ;;  %v6502_v43 = vld [vmem:[%s10186_s10 + $0xf8] sm:$0xf0] }
 0xac0   : > { %v6505_v56 = vor.u32 %v6733_v28, %v6502_v43  ;;  %v6719_v43 = vld [vmem:[%s10186_s10 + $0x74] sm:$0xf0] }
 0xac2   : > { %4979 = vmatpush.bf16.msrb.mxu3 %v6505_v56  ;;  %v6717_v56 = vld [vmem:[%s10186_s10 + $0x6c] sm:$0xf] }
 0xac4   : > { %v4258_v19 = vpop.xlane.xlu2 %4257 }
 0xac5   : > { %v4296_v14 = vmul.f32 %v9166_v40, %v4258_v19  ;;  %v10345_v19 = vld [vmem:[#allocation15_spill] sm:$0xff] }
 0xac7   : > { %v9170_v8 = vsub.f32 %v9116_v17, %v4296_v14 }
 0xac9   : > { %v4328_v13 = vmul.f32 %v9170_v8, %v9170_v8 }
 0xacb   : > { %4344 = vadd.xlane.f32.xlu2 %v4328_v13  ;;  %v6476_v13 = vld [vmem:[%s10186_s10 + $0xc0] sm:$0xf] }
 0xad7   : > { %v4260_v55 = vpop.xlane.xlu0 %4259 }
 0xad8   : > { %v4297_v53 = vmul.f32 %v9166_v40, %v4260_v55  ;;  %v6730_v55 = vld [vmem:[%s10186_s10 + $0xcc] sm:$0xf0] }
 0xada   : > { %v9176_v61 = vsub.f32 %v9121_v10, %v4297_v53  ;;  %v6728_v53 = vld [vmem:[%s10186_s10 + $0xc4] sm:$0xf] }
 0xadc   : > { %v4329_v39 = vmul.f32 %v9176_v61, %v9176_v61  ;;  %v4264_v15 = vpop.xlane.xlu2 %4263 }
 0xadd   : > { %v4299_v10 = vmul.f32 %v9166_v40, %v4264_v15 }
 0xade   : > { %4346 = vadd.xlane.f32.xlu0 %v4329_v39  ;;  %v6477_v39 = vor.u32 %v6730_v55, %v6476_v13 }
 0xadf   : > { %v4262_v6 = vpop.xlane.xlu1 %4261  ;;  %v9193_v26 = vsub.f32 %v9127_v42, %v4299_v10  ;;  %v6486_v10 = vld [vmem:[%s10186_s10 + $0xd8] sm:$0xf0] }
 0xae0   : > { %v4298_v36 = vmul.f32 %v9166_v40, %v4262_v6  ;;  %v6478_v6 = vld [vmem:[%s10186_s10 + $0xd0] sm:$0xf0]  ;;  %4833 = vmatpush.bf16.msra.mxu0 %v6477_v39  ;;  %v6714_v39 = vld [vmem:[%s10186_s10 + $0x4c] sm:$0xf0] }
 0xae1   : > { %v4331_v18 = vmul.f32 %v9193_v26, %v9193_v26  ;;  %v6481_v15 = vor.u32 %v6728_v53, %v6478_v6  ;;  %v6412_v53 = vld [vmem:[%s10186_s10 + $0x40] sm:$0xf]  ;;  %v6712_v6 = vld [vmem:[%s10186_s10 + $0x44] sm:$0xf] }
 0xae2   : > { %v9182_v17 = vsub.f32 %v9131_v33, %v4298_v36  ;;  %v6484_v36 = vld [vmem:[%s10186_s10 + $0xc8] sm:$0xf] }
 0xae3   : > { %4882 = vmatpush.bf16.msra.mxu1 %v6481_v15  ;;  %v6420_v15 = vld [vmem:[%s10186_s10 + $0x48] sm:$0xf] }
 0xae4   : > { %v4330_v9 = vmul.f32 %v9182_v17, %v9182_v17 }
 0xae6   : > { %4348 = vadd.xlane.f32.xlu0 %v4330_v9  ;;  %v6731_v9 = vld [vmem:[%s10186_s10 + $0xd4] sm:$0xf0] }
 0xb01   : > { %v4214_v47 = vpop.f32.mrf.mxu3 }
 0xb02   : > { %v4215_v27 = vadd.f32 %v9112_v54, %v4214_v47  ;;  %v6485_v47 = vor.u32 %v6731_v9, %v6484_v36  ;;  %v6413_v36 = vor.u32 %v6714_v39, %v6412_v53  ;;  %v6414_v9 = vld [vmem:[%s10186_s10 + $0x50] sm:$0xf0] }
 0xb04   : > { %v9189_v2 = vadd.f32 %v4215_v27, %v10339_v37  ;;  %v6729_v27 = vld [vmem:[%s10186_s10 + $0xcc] sm:$0xf] }
 0xb05   : > { %v6489_v37 = vor.u32 %v6729_v27, %v6486_v10  ;;  %v6417_v27 = vor.u32 %v6712_v6, %v6414_v9 }
 0xb06   : > { %4269 = vadd.xlane.f32.xlu1 %v9189_v2 }
 0xb07   : > { %4980 = vmatpush.bf16.msrb.mxu3 %v6489_v37  ;;  %v6713_v37 = vld [vmem:[%s10186_s10 + $0x4c] sm:$0xf] }
 0xb09   : > { %v4216_v33 = vpop.f32.mrf.mxu3 }
 0xb0a   : > { %v4217_v32 = vadd.f32 %v9112_v54, %v4216_v33  ;;  %v6460_v33 = vld [vmem:[%s10186_s10 + $0xa0] sm:$0xf] }
 0xb0c   : > { %v9197_v4 = vadd.f32 %v4217_v32, %v10340_v29  ;;  %v6726_v32 = vld [vmem:[%s10186_s10 + $0xac] sm:$0xf0]  ;;  %v6724_v29 = vld [vmem:[%s10186_s10 + $0xa4] sm:$0xf] }
 0xb0e   : > { %4271 = vadd.xlane.f32.xlu2 %v9197_v4  ;;  %4350 = vadd.xlane.f32.xlu1 %v4331_v18  ;;  %v6461_v18 = vor.u32 %v6726_v32, %v6460_v33  ;;  %v6422_v33 = vld [vmem:[%s10186_s10 + $0x58] sm:$0xf0] }
 0xb0f   : > { %v6425_v32 = vor.u32 %v6713_v37, %v6422_v33 }
 0xb10   : > { %4834 = vmatpush.bf16.msra.mxu0 %v6461_v18  ;;  %v6710_v18 = vld [vmem:[%s10186_s10 + $0x2c] sm:$0xf0] }
 0xb11   : > { %v4219_v11 = vpop.f32.mrf.mxu3 }
 0xb12   : > { %v4220_v57 = vadd.f32 %v9112_v54, %v4219_v11  ;;  %v6462_v11 = vld [vmem:[%s10186_s10 + $0xb0] sm:$0xf0] }
 0xb14   : > { %v9204_v0 = vadd.f32 %v4220_v57, %v10341_v31  ;;  %v6468_v57 = vld [vmem:[%s10186_s10 + $0xa8] sm:$0xf]  ;;  %v6727_v31 = vld [vmem:[%s10186_s10 + $0xb4] sm:$0xf0] }
 0xb16   : > { %4273 = vadd.xlane.f32.xlu2 %v9204_v0 }
 0xb19   : > { %v4221_v42 = vpop.f32.mrf.mxu3 }
 0xb1a   : > { %v4222_v60 = vadd.f32 %v9112_v54, %v4221_v42  ;;  %v6465_v42 = vor.u32 %v6724_v29, %v6462_v11  ;;  %v6396_v29 = vld [vmem:[%s10186_s10 + $0x20] sm:$0xf]  ;;  %v6708_v11 = vld [vmem:[%s10186_s10 + $0x24] sm:$0xf] }
 0xb1c   : > { %v9209_v58 = vadd.f32 %v4222_v60, %v10342_v44  ;;  %v6469_v60 = vor.u32 %v6727_v31, %v6468_v57  ;;  %v6725_v44 = vld [vmem:[%s10186_s10 + $0xac] sm:$0xf]  ;;  %4883 = vmatpush.bf16.msra.mxu1 %v6465_v42  ;;  %v6397_v57 = vor.u32 %v6710_v18, %v6396_v29  ;;  %v6398_v31 = vld [vmem:[%s10186_s10 + $0x30] sm:$0xf0]  ;;  %v6404_v42 = vld [vmem:[%s10186_s10 + $0x28] sm:$0xf] }
 0xb1e   : > { %4275 = vadd.xlane.f32.xlu0 %v9209_v58 }
 0xb20   : > { %v4266_v48 = vpop.xlane.xlu0 %4265 }
 0xb21   : > { %v4300_v30 = vmul.f32 %v9166_v40, %v4266_v48  ;;  %v4224_v24 = vpop.f32.mrf.mxu3  ;;  %v6470_v48 = vld [vmem:[%s10186_s10 + $0xb8] sm:$0xf0] }
 0xb22   : > { %v4225_v1 = vadd.f32 %v9112_v54, %v4224_v24  ;;  %v6444_v24 = vld [vmem:[%s10186_s10 + $0x80] sm:$0xf] }
 0xb23   : > { %v9215_v50 = vsub.f32 %v9159_v34, %v4300_v30  ;;  %v6473_v30 = vor.u32 %v6725_v44, %v6470_v48  ;;  %v6401_v48 = vor.u32 %v6708_v11, %v6398_v31 }
 0xb24   : > { %v9218_v49 = vadd.f32 %v4225_v1, %v10343_v46  ;;  %v6722_v1 = vld [vmem:[%s10186_s10 + $0x8c] sm:$0xf0]  ;;  %v6720_v46 = vld [vmem:[%s10186_s10 + $0x84] sm:$0xf] }
 0xb25   : > { %v4332_v12 = vmul.f32 %v9215_v50, %v9215_v50  ;;  %4981 = vmatpush.bf16.msrb.mxu3 %v6473_v30 }
 0xb26   : > { %4277 = vadd.xlane.f32.xlu0 %v9218_v49 }
 0xb27   : > { %4352 = vadd.xlane.f32.xlu1 %v4332_v12  ;;  %v6445_v12 = vor.u32 %v6722_v1, %v6444_v24  ;;  %v6709_v24 = vld [vmem:[%s10186_s10 + $0x2c] sm:$0xf]  ;;  %v6406_v1 = vld [vmem:[%s10186_s10 + $0x38] sm:$0xf0] }
 0xb28   : > { %v4268_v59 = vpop.xlane.xlu1 %4267 }
 0xb29   : > { %v4301_v52 = vmul.f32 %v9166_v40, %v4268_v59  ;;  %v4226_v5 = vpop.f32.mrf.mxu3  ;;  %v6446_v59 = vld [vmem:[%s10186_s10 + $0x90] sm:$0xf0]  ;;  %4835 = vmatpush.bf16.msra.mxu0 %v6445_v12  ;;  %v6380_v12 = vld [vmem:[%s10186_s10] sm:$0xf] }
 0xb2a   : > { %v4227_v63 = vadd.f32 %v9112_v54, %v4226_v5  ;;  %v6723_v5 = vld [vmem:[%s10186_s10 + $0x94] sm:$0xf0] }
 0xb2b   : > { %v9225_v51 = vsub.f32 %v4244_v20, %v4301_v52  ;;  %v6500_v20 = vld [vmem:[%s10186_s10 + $0xe8] sm:$0xf] }
 0xb2c   : > { %v9228_v34 = vadd.f32 %v4227_v63, %v10344_v35  ;;  %v6501_v23 = vor.u32 %v6735_v16, %v6500_v20  ;;  %v6452_v52 = vld [vmem:[%s10186_s10 + $0x88] sm:$0xf]  ;;  %v6449_v35 = vor.u32 %v6720_v46, %v6446_v59  ;;  %v6716_v20 = vld [vmem:[%s10186_s10 + $0x64] sm:$0xf]  ;;  %v6409_v46 = vor.u32 %v6709_v24, %v6406_v1  ;;  %v6706_v59 = vld [vmem:[%s10186_s10 + $0xc] sm:$0xf0] }
 0xb2d   : > { %v4333_v62 = vmul.f32 %v9225_v51, %v9225_v51  ;;  %v6433_v28 = vor.u32 %v6716_v20, %v6430_v41 }
 0xb2e   : > { %4930 = vmatpush.bf16.msra.mxu2 %v6501_v23  ;;  %4884 = vmatpush.bf16.msra.mxu1 %v6449_v35  ;;  %v6436_v23 = vld [vmem:[%s10186_s10 + $0x68] sm:$0xf]  ;;  %v6382_v35 = vld [vmem:[%s10186_s10 + $0x10] sm:$0xf0] }
 0xb2f   : > { %4279 = vadd.xlane.f32.xlu1 %v9228_v34  ;;  %4354 = vadd.xlane.f32.xlu2 %v4333_v62  ;;  %v6453_v62 = vor.u32 %v6723_v5, %v6452_v52  ;;  %v6437_v13 = vor.u32 %v6719_v43, %v6436_v23  ;;  %v6704_v52 = vld [vmem:[%s10186_s10 + $0x4] sm:$0xf] }
 0xb31   : > { %v4229_v21 = vpop.f32.mrf.mxu3 }
 0xb32   : > { %v4230_v25 = vadd.f32 %v9112_v54, %v4229_v21  ;;  %4931 = vmatpush.bf16.msra.mxu2 %v6485_v47  ;;  %v6457_v21 = vor.u32 %v6721_v3, %v6454_v22  ;;  %4885 = vmatpush.bf16.msra.mxu1 %v6433_v28  ;;  %v6715_v47 = vld [vmem:[%s10186_s10 + $0x54] sm:$0xf0]  ;;  %v6385_v22 = vor.u32 %v6704_v52, %v6382_v35  ;;  %v10346_v35 = vld [vmem:[#allocation16_spill] sm:$0xff] }
 0xb33   : > { %v6421_v10 = vor.u32 %v6715_v47, %v6420_v15  ;;  %v6707_v3 = vld [vmem:[%s10186_s10 + $0x14] sm:$0xf0] }
 0xb34   : > { %v9259_v14 = vadd.f32 %v4230_v25, %v10345_v19  ;;  %4982 = vmatpush.bf16.msrb.mxu3 %v6457_v21  ;;  %v6429_v25 = vor.u32 %v6718_v45, %v6428_v38  ;;  %v6438_v19 = vld [vmem:[%s10186_s10 + $0x78] sm:$0xf0]  ;;  %v6705_v21 = vld [vmem:[%s10186_s10 + $0xc] sm:$0xf] }
 0xb35   : > { %v6441_v55 = vor.u32 %v6717_v56, %v6438_v19  ;;  %v6390_v38 = vld [vmem:[%s10186_s10 + $0x18] sm:$0xf0] }
 0xb36   : > { %4932 = vmatpush.bf16.msra.mxu2 %v6469_v60  ;;  %4836 = vmatpush.bf16.msra.mxu0 %v6429_v25  ;;  %v6711_v60 = vld [vmem:[%s10186_s10 + $0x34] sm:$0xf0]  ;;  %v6393_v45 = vor.u32 %v6705_v21, %v6390_v38 }
 0xb37   : > { %4281 = vadd.xlane.f32.xlu1 %v9259_v14  ;;  %4886 = vmatpush.bf16.msra.mxu1 %v6417_v27  ;;  %v6405_v30 = vor.u32 %v6711_v60, %v6404_v42 }
 0xb38   : > { %4983 = vmatpush.bf16.msrb.mxu3 %v6441_v55 }
 0xb39   : > { %v4231_v60 = vpop.f32.mrf.mxu3 }
 0xb3a   : > { %4933 = vmatpush.bf16.msra.mxu2 %v6453_v62  ;;  %4837 = vmatpush.bf16.msra.mxu0 %v6413_v36  ;;  %v6388_v62 = vld [vmem:[%s10186_s10 + $0x8] sm:$0xf]  ;;  %v9440_v36 = vld [vmem:[%s10184_s8] ss:$0 sm:$0xff] }
 0xb3b   : > { %4887 = vmatpush.bf16.msra.mxu1 %v6401_v48 }
 0xb3c   : > { %4984 = vmatpush.bf16.msrb.mxu3 %v6425_v32 }
 0xb3e   : > { %v4345_v63 = vpop.xlane.xlu2 %4344  ;;  %4934 = vmatpush.bf16.msra.mxu2 %v6437_v13  ;;  %4838 = vmatpush.bf16.msra.mxu0 %v6397_v57 }
 0xb3f   : > { %v4376_v7 = vmul.f32 %v4345_v63, %v9166_v40  ;;  %v6381_v63 = vor.u32 %v6706_v59, %v6380_v12  ;;  %4888 = vmatpush.bf16.msra.mxu1 %v6385_v22 }
 0xb40   : > { %4985 = vmatpush.bf16.msrb.mxu3 %v6409_v46  ;;  %v4232_v46 = vadd.f32 %v9112_v54, %v4231_v60 }
 0xb41   : > { %v9344_v16 = vadd.f32 1e-05, %v4376_v7  ;;  %v6389_v7 = vor.u32 %v6707_v3, %v6388_v62 }
 0xb42   : > { %4935 = vmatpush.bf16.msra.mxu2 %v6421_v10  ;;  %4839 = vmatpush.bf16.msra.mxu0 %v6381_v63  ;;  %v9473_v62 = vadd.f32 %v4232_v46, %v10346_v35 }
 0xb43   : > { %7066 = vrsqrt.f32 %v9344_v16  ;;  %vm4414_vm8 = vweird.f32 %v9344_v16 }
 0xb44   : > { %4986 = vmatpush.bf16.msrb.mxu3 %v6393_v45 }
 0xb46   : > { %4936 = vmatpush.bf16.msra.mxu2 %v6405_v30 }
 0xb49   : > { %v7067_v44 = vpop.eup %7066 }
 0xb4a   : > { %v4409_v5 = vmul.f32 %v7067_v44, %v9344_v16  ;;  %4937 = vmatpush.bf16.msra.mxu2 %v6389_v7  ;;  %vm4415_vm7 = vweird.f32 %v7067_v44  ;;  %v9446_v16 = vld [vmem:[%s10185_s9] ss:$0 sm:$0xff] }
 0xb4b   : > { %vm4416_vm9 = vmor %vm4414_vm8, %vm4415_vm7 }
 0xb4c   : > { %v4410_v20 = vmul.f32 %v7067_v44, %v4409_v5  ;;  %v4234_v5 = vpop.f32.mrf.mxu3 }
 0xb4d   : > { %v4235_v21 = vadd.f32 %v9112_v54, %v4234_v5 }
 0xb4e   : > { %v4411_v28 = vmul.f32 0.5, %v4410_v20 }
 0xb50   : > { %v4412_v43 = vsub.f32 1.5, %v4411_v28 }
 0xb51   : > { %v4347_v25 = vpop.xlane.xlu0 %4346 }
 0xb52   : > { %v4377_v41 = vmul.f32 %v4347_v25, %v9166_v40  ;;  %v4413_v19 = vmul.f32 %v7067_v44, %v4412_v43 }
 0xb54   : > { %v4393_v23 = vadd.f32 1e-05, %v4377_v41  ;;  %v4417_v53 = vsel %vm4416_vm9, %v7067_v44, %v4413_v19  ;;  %v10347_v41 = vld [vmem:[#allocation17_spill] sm:$0xff]  ;;  %v4236_v43 = vpop.f32.mrf.mxu3 }
 0xb55   : > { %v4568_v9 = vmul.f32 %v4417_v53, %v9170_v8 }
 0xb56   : > { %7068 = vrsqrt.f32 %v4393_v23  ;;  %vm4424_vm11 = vweird.f32 %v4393_v23 }
 0xb57   : > { %v4587_v27 = vmul.f32 %v9440_v36, %v4568_v9 }
 0xb59   : > { %v4349_v37 = vpop.xlane.xlu0 %4348  ;;  %v9452_v32 = vadd.f32 %v9446_v16, %v4587_v27 }
 0xb5a   : > { %v4378_v29 = vmul.f32 %v4349_v37, %v9166_v40 }
 0xb5c   : > { %v7069_v56 = vpop.eup %7068  ;;  %v4394_v11 = vadd.f32 1e-05, %v4378_v29 }
 0xb5d   : > { %v4419_v13 = vmul.f32 %v7069_v56, %v4393_v23  ;;  %vm4425_vm10 = vweird.f32 %v7069_v56  ;;  %v9484_v23 = vadd.f32 %v4235_v21, %v10347_v41 }
 0xb5e   : > { %vm4426_vm12 = vmor %vm4424_vm11, %vm4425_vm10  ;;  %7070 = vrsqrt.f32 %v4394_v11  ;;  %vm4434_vm14 = vweird.f32 %v4394_v11 }
 0xb5f   : > { %v4420_v55 = vmul.f32 %v7069_v56, %v4419_v13 }
 0xb61   : > { %v4421_v39 = vmul.f32 0.5, %v4420_v55  ;;  %v4237_v55 = vadd.f32 %v9112_v54, %v4236_v43 }
 0xb63   : > { %v4422_v6 = vsub.f32 1.5, %v4421_v39 }
 0xb64   : > { %v7071_v57 = vpop.eup %7070 }
 0xb65   : > { %v4423_v15 = vmul.f32 %v7069_v56, %v4422_v6  ;;  %v4429_v44 = vmul.f32 %v7071_v57, %v4394_v11  ;;  %vm4435_vm13 = vweird.f32 %v7071_v57 }
 0xb66   : > { %vm4436_vm15 = vmor %vm4434_vm14, %vm4435_vm13 }
 0xb67   : > { %v4427_v47 = vsel %vm4426_vm12, %v7069_v56, %v4423_v15  ;;  %v4430_v30 = vmul.f32 %v7071_v57, %v4429_v44 }
 0xb68   : > { %v4569_v10 = vmul.f32 %v4427_v47, %v9176_v61  ;;  %v10348_v47 = vld [vmem:[#allocation18_spill] sm:$0xff] }
 0xb69   : > { %v4431_v63 = vmul.f32 0.5, %v4430_v30  ;;  %v9496_v27 = vadd.f32 %v4237_v55, %v10348_v47 }
 0xb6a   : > { %v4588_v33 = vmul.f32 %v9440_v36, %v4569_v10 }
 0xb6b   : > { %v4432_v22 = vsub.f32 1.5, %v4431_v63 }
 0xb6c   : > { %v9455_v8 = vadd.f32 %v9446_v16, %v4588_v33 }
 0xb6d   : > { %v4433_v20 = vmul.f32 %v7071_v57, %v4432_v22 }
 0xb6e   : > { %v4622_v18 = vpack.c.bf16 %v9455_v8, %v9452_v32 }
 0xb6f   : > { %v4437_v19 = vsel %vm4436_vm15, %v7071_v57, %v4433_v20 }
 0xb70   : > { %4840 = vmatmul.bf16.vlgmr.msra.gmra.mxu0 %v4622_v18  ;;  %4889 = vmatmul.bf16.vlgmr.msra.gmra.mxu1 %v4622_v18  ;;  %v4570_v6 = vmul.f32 %v4437_v19, %v9182_v17 }
 0xb71   : > { %4938 = vmatmul.bf16.vlgmr.msra.gmra.mxu2 %v4622_v18  ;;  %4987 = vmatmul.bf16.vlgmr.msrb.gmra.mxu3 %v4622_v18 }
 0xb72   : > { %v4589_v17 = vmul.f32 %v9440_v36, %v4570_v6 }
 0xb74   : > { %v9510_v57 = vadd.f32 %v9446_v16, %v4589_v17 }
 0xb79   : > { %v4270_v61 = vpop.xlane.xlu1 %4269 }
 0xb7a   : > { %v4302_v31 = vmul.f32 %v9166_v40, %v4270_v61 }
 0xb7c   : > { %v9462_v42 = vsub.f32 %v9189_v2, %v4302_v31 }
 0xb7e   : > { %v4334_v48 = vmul.f32 %v9462_v42, %v9462_v42 }
 0xb80   : > { %4356 = vadd.xlane.f32.xlu2 %v4334_v48 }
 0xb81   : > { %v4272_v24 = vpop.xlane.xlu2 %4271  ;;  %v4351_v1 = vpop.xlane.xlu1 %4350 }
 0xb82   : > { %v4303_v12 = vmul.f32 %v9166_v40, %v4272_v24  ;;  %v4379_v59 = vmul.f32 %v4351_v1, %v9166_v40 }
 0xb84   : > { %v9470_v52 = vsub.f32 %v9197_v4, %v4303_v12  ;;  %v4395_v2 = vadd.f32 1e-05, %v4379_v59 }
 0xb86   : > { %7072 = vrsqrt.f32 %v4395_v2  ;;  %v4335_v3 = vmul.f32 %v9470_v52, %v9470_v52  ;;  %vm4444_vm1 = vweird.f32 %v4395_v2 }
 0xb88   : > { %4358 = vadd.xlane.f32.xlu0 %v4335_v3  ;;  %4283 = vadd.xlane.f32.xlu2 %v9473_v62 }
 0xb89   : > { %v4274_v7 = vpop.xlane.xlu2 %4273 }
 0xb8a   : > { %v4304_v4 = vmul.f32 %v9166_v40, %v4274_v7 }
 0xb8c   : > { %v7073_v38 = vpop.eup %7072  ;;  %v9481_v45 = vsub.f32 %v9204_v0, %v4304_v4 }
 0xb8d   : > { %v4439_v25 = vmul.f32 %v7073_v38, %v4395_v2  ;;  %vm4445_vm0 = vweird.f32 %v7073_v38 }
 0xb8e   : > { %v4336_v28 = vmul.f32 %v9481_v45, %v9481_v45  ;;  %vm4446_vm2 = vmor %vm4444_vm1, %vm4445_vm0 }
 0xb8f   : > { %v4440_v56 = vmul.f32 %v7073_v38, %v4439_v25 }
 0xb90   : > { %4360 = vadd.xlane.f32.xlu0 %v4336_v28  ;;  %4285 = vadd.xlane.f32.xlu2 %v9484_v23 }
 0xb91   : > { %v4441_v13 = vmul.f32 0.5, %v4440_v56  ;;  %v4276_v0 = vpop.xlane.xlu0 %4275 }
 0xb92   : > { %v4305_v53 = vmul.f32 %v9166_v40, %v4276_v0 }
 0xb93   : > { %v4442_v39 = vsub.f32 1.5, %v4441_v13 }
 0xb94   : > { %v9493_v9 = vsub.f32 %v9209_v58, %v4305_v53 }
 0xb95   : > { %v4443_v15 = vmul.f32 %v7073_v38, %v4442_v39 }
 0xb96   : > { %v4337_v10 = vmul.f32 %v9493_v9, %v9493_v9 }
 0xb97   : > { %v4447_v37 = vsel %vm4446_vm2, %v7073_v38, %v4443_v15 }
 0xb98   : > { %v4571_v54 = vmul.f32 %v4447_v37, %v9193_v26  ;;  %4287 = vadd.xlane.f32.xlu0 %v9496_v27  ;;  %4362 = vadd.xlane.f32.xlu1 %v4337_v10 }
 0xb99   : > { %v4278_v33 = vpop.xlane.xlu0 %4277 }
 0xb9a   : > { %v4306_v58 = vmul.f32 %v9166_v40, %v4278_v33  ;;  %v4353_v29 = vpop.xlane.xlu1 %4352  ;;  %v4590_v18 = vmul.f32 %v9440_v36, %v4571_v54 }
 0xb9b   : > { %v4380_v11 = vmul.f32 %v4353_v29, %v9166_v40 }
 0xb9c   : > { %v9507_v61 = vsub.f32 %v9218_v49, %v4306_v58  ;;  %v9513_v26 = vadd.f32 %v9446_v16, %v4590_v18 }
 0xb9d   : > { %v4396_v31 = vadd.f32 1e-05, %v4380_v11 }
 0xb9e   : > { %v4338_v60 = vmul.f32 %v9507_v61, %v9507_v61  ;;  %v4623_v44 = vpack.c.bf16 %v9513_v26, %v9510_v57 }
 0xb9f   : > { %7074 = vrsqrt.f32 %v4396_v31  ;;  %vm4454_vm4 = vweird.f32 %v4396_v31 }
 0xba0   : > { %4364 = vadd.xlane.f32.xlu1 %v4338_v60  ;;  %4845 = vmatmul.bf16.gmra.mxu0 %v4623_v44 }
 0xba1   : > { %4894 = vmatmul.bf16.gmra.mxu1 %v4623_v44  ;;  %4943 = vmatmul.bf16.gmra.mxu2 %v4623_v44 }
 0xba2   : > { %4992 = vmatmul.bf16.gmra.mxu3 %v4623_v44  ;;  %v4355_v49 = vpop.xlane.xlu2 %4354  ;;  %v4280_v48 = vpop.xlane.xlu1 %4279 }
 0xba3   : > { %v4381_v30 = vmul.f32 %v4355_v49, %v9166_v40  ;;  %v4307_v24 = vmul.f32 %v9166_v40, %v4280_v48 }
 0xba5   : > { %v7075_v1 = vpop.eup %7074  ;;  %v4397_v46 = vadd.f32 1e-05, %v4381_v30  ;;  %v9522_v12 = vsub.f32 %v9228_v34, %v4307_v24 }
 0xba6   : > { %v4449_v59 = vmul.f32 %v7075_v1, %v4396_v31  ;;  %vm4455_vm3 = vweird.f32 %v7075_v1 }
 0xba7   : > { %7076 = vrsqrt.f32 %v4397_v46  ;;  %v4339_v2 = vmul.f32 %v9522_v12, %v9522_v12  ;;  %vm4456_vm5 = vmor %vm4454_vm4, %vm4455_vm3  ;;  %vm4464_vm7 = vweird.f32 %v4397_v46 }
 0xba8   : > { %v4450_v5 = vmul.f32 %v7075_v1, %v4449_v59 }
 0xba9   : > { %4366 = vadd.xlane.f32.xlu2 %v4339_v2 }
 0xbaa   : > { %v4451_v63 = vmul.f32 0.5, %v4450_v5  ;;  %v4282_v35 = vpop.xlane.xlu1 %4281 }
 0xbab   : > { %v4308_v3 = vmul.f32 %v9166_v40, %v4282_v35 }
 0xbac   : > { %v4452_v22 = vsub.f32 1.5, %v4451_v63 }
 0xbad   : > { %v7077_v7 = vpop.eup %7076  ;;  %v9528_v21 = vsub.f32 %v9259_v14, %v4308_v3 }
 0xbae   : > { %v4453_v4 = vmul.f32 %v7075_v1, %v4452_v22  ;;  %v4459_v34 = vmul.f32 %v7077_v7, %v4397_v46  ;;  %vm4465_vm6 = vweird.f32 %v7077_v7 }
 0xbaf   : > { %v4340_v38 = vmul.f32 %v9528_v21, %v9528_v21  ;;  %vm4466_vm8 = vmor %vm4464_vm7, %vm4465_vm6 }
 0xbb0   : > { %v4460_v20 = vmul.f32 %v7077_v7, %v4459_v34  ;;  %v4457_v25 = vsel %vm4456_vm5, %v7075_v1, %v4453_v4 }
 0xbb1   : > { %4368 = vadd.xlane.f32.xlu0 %v4340_v38  ;;  %v4572_v43 = vmul.f32 %v4457_v25, %v9215_v50 }
 0xbb2   : > { %v4461_v41 = vmul.f32 0.5, %v4460_v20 }
 0xbb3   : > { %v4591_v13 = vmul.f32 %v9440_v36, %v4572_v43 }
 0xbb4   : > { %v4462_v28 = vsub.f32 1.5, %v4461_v41 }
 0xbb5   : > { %v9537_v55 = vadd.f32 %v9446_v16, %v4591_v13 }
 0xbb6   : > { %v4463_v56 = vmul.f32 %v7077_v7, %v4462_v28 }
 0xbb8   : > { %v4467_v14 = vsel %vm4466_vm8, %v7077_v7, %v4463_v56 }
 0xbb9   : > { %v4573_v19 = vmul.f32 %v4467_v14, %v9225_v51 }
 0xbbb   : > { %v4592_v0 = vmul.f32 %v9440_v36, %v4573_v19 }
 0xbbd   : > { %v9540_v53 = vadd.f32 %v9446_v16, %v4592_v0 }
 0xbbf   : > { %v4624_v39 = vpack.c.bf16 %v9540_v53, %v9537_v55 }
 0xbc1   : > { %4850 = vmatmul.bf16.gmra.mxu0 %v4624_v39  ;;  %4899 = vmatmul.bf16.gmra.mxu1 %v4624_v39 }
 0xbc2   : > { %4948 = vmatmul.bf16.gmra.mxu2 %v4624_v39  ;;  %4997 = vmatmul.bf16.gmra.mxu3 %v4624_v39 }
 0xbf3   : > { %v4357_v50 = vpop.xlane.xlu2 %4356 }
 0xbf4   : > { %v4382_v51 = vmul.f32 %v4357_v50, %v9166_v40 }
 0xbf6   : > { %v4398_v6 = vadd.f32 1e-05, %v4382_v51 }
 0xbf8   : > { %7078 = vrsqrt.f32 %v4398_v6  ;;  %vm4474_vm10 = vweird.f32 %v4398_v6 }
 0xbfb   : > { %v4359_v15 = vpop.xlane.xlu0 %4358  ;;  %v4284_v47 = vpop.xlane.xlu2 %4283 }
 0xbfc   : > { %v4383_v10 = vmul.f32 %v4359_v15, %v9166_v40  ;;  %v4309_v37 = vmul.f32 %v9166_v40, %v4284_v47 }
 0xbfe   : > { %v7079_v54 = vpop.eup %7078  ;;  %v4399_v17 = vadd.f32 1e-05, %v4383_v10  ;;  %v9548_v33 = vsub.f32 %v9473_v62, %v4309_v37 }
 0xbff   : > { %v4469_v58 = vmul.f32 %v7079_v54, %v4398_v6  ;;  %vm4475_vm9 = vweird.f32 %v7079_v54 }
 0xc00   : > { %7080 = vrsqrt.f32 %v4399_v17  ;;  %v4341_v29 = vmul.f32 %v9548_v33, %v9548_v33  ;;  %vm4476_vm11 = vmor %vm4474_vm10, %vm4475_vm9  ;;  %vm4484_vm13 = vweird.f32 %v4399_v17 }
 0xc01   : > { %v4470_v18 = vmul.f32 %v7079_v54, %v4469_v58 }
 0xc02   : > { %4370 = vadd.xlane.f32.xlu1 %v4341_v29 }
 0xc03   : > { %v4471_v11 = vmul.f32 0.5, %v4470_v18  ;;  %v4361_v31 = vpop.xlane.xlu0 %4360  ;;  %v4286_v60 = vpop.xlane.xlu2 %4285 }
 0xc04   : > { %v4384_v44 = vmul.f32 %v4361_v31, %v9166_v40  ;;  %v4310_v49 = vmul.f32 %v9166_v40, %v4286_v60 }
 0xc05   : > { %v4472_v48 = vsub.f32 1.5, %v4471_v11 }
 0xc06   : > { %v7081_v30 = vpop.eup %7080  ;;  %v4400_v24 = vadd.f32 1e-05, %v4384_v44  ;;  %v9555_v62 = vsub.f32 %v9484_v23, %v4310_v49 }
 0xc07   : > { %v4473_v1 = vmul.f32 %v7079_v54, %v4472_v48  ;;  %v4479_v46 = vmul.f32 %v7081_v30, %v4399_v17  ;;  %vm4485_vm12 = vweird.f32 %v7081_v30 }
 0xc08   : > { %7082 = vrsqrt.f32 %v4400_v24  ;;  %v4342_v59 = vmul.f32 %v9555_v62, %v9555_v62  ;;  %vm4486_vm14 = vmor %vm4484_vm13, %vm4485_vm12  ;;  %vm4494_vm0 = vweird.f32 %v4400_v24 }
 0xc09   : > { %v4480_v2 = vmul.f32 %v7081_v30, %v4479_v46  ;;  %v4477_v5 = vsel %vm4476_vm11, %v7079_v54, %v4473_v1 }
 0xc0a   : > { %4372 = vadd.xlane.f32.xlu2 %v4342_v59  ;;  %v4574_v34 = vmul.f32 %v4477_v5, %v9462_v42 }
 0xc0b   : > { %v4481_v63 = vmul.f32 0.5, %v4480_v2  ;;  %v4288_v35 = vpop.xlane.xlu0 %4287  ;;  %v4363_v3 = vpop.xlane.xlu1 %4362 }
 0xc0c   : > { %v4311_v22 = vmul.f32 %v9166_v40, %v4288_v35  ;;  %v4385_v23 = vmul.f32 %v4363_v3, %v9166_v40  ;;  %v4593_v19 = vmul.f32 %v9440_v36, %v4574_v34 }
 0xc0d   : > { %v4482_v7 = vsub.f32 1.5, %v4481_v63 }
 0xc0e   : > { %v7083_v4 = vpop.eup %7082  ;;  %v9563_v38 = vsub.f32 %v9496_v27, %v4311_v22  ;;  %v4401_v20 = vadd.f32 1e-05, %v4385_v23  ;;  %v9572_v6 = vadd.f32 %v9446_v16, %v4593_v19 }
 0xc0f   : > { %v4483_v25 = vmul.f32 %v7081_v30, %v4482_v7  ;;  %v4489_v41 = vmul.f32 %v7083_v4, %v4400_v24  ;;  %vm4495_vm15 = vweird.f32 %v7083_v4 }
 0xc10   : > { %7084 = vrsqrt.f32 %v4401_v20  ;;  %v4343_v28 = vmul.f32 %v9563_v38, %v9563_v38  ;;  %vm4496_vm1 = vmor %vm4494_vm0, %vm4495_vm15  ;;  %vm4504_vm3 = vweird.f32 %v4401_v20 }
 0xc11   : > { %v4487_v43 = vsel %vm4486_vm14, %v7081_v30, %v4483_v25  ;;  %v4490_v56 = vmul.f32 %v7083_v4, %v4489_v41 }
 0xc12   : > { %v4575_v14 = vmul.f32 %v4487_v43, %v9470_v52  ;;  %4374 = vadd.xlane.f32.xlu0 %v4343_v28 }
 0xc13   : > { %v4491_v42 = vmul.f32 0.5, %v4490_v56  ;;  %v4365_v13 = vpop.xlane.xlu1 %4364 }
 0xc14   : > { %v4386_v27 = vmul.f32 %v4365_v13, %v9166_v40  ;;  %v4594_v0 = vmul.f32 %v9440_v36, %v4575_v14 }
 0xc15   : > { %v4492_v39 = vsub.f32 1.5, %v4491_v42 }
 0xc16   : > { %v7085_v50 = vpop.eup %7084  ;;  %v4402_v51 = vadd.f32 1e-05, %v4386_v27  ;;  %v9575_v15 = vadd.f32 %v9446_v16, %v4594_v0 }
 0xc17   : > { %v4499_v47 = vmul.f32 %v7085_v50, %v4401_v20  ;;  %v4493_v10 = vmul.f32 %v7083_v4, %v4492_v39  ;;  %vm4505_vm2 = vweird.f32 %v7085_v50 }
 0xc18   : > { %7086 = vrsqrt.f32 %v4402_v51  ;;  %v4625_v52 = vpack.c.bf16 %v9575_v15, %v9572_v6  ;;  %vm4506_vm4 = vmor %vm4504_vm3, %vm4505_vm2  ;;  %vm4514_vm6 = vweird.f32 %v4402_v51 }
 0xc19   : > { %v4500_v37 = vmul.f32 %v7085_v50, %v4499_v47  ;;  %v4497_v58 = vsel %vm4496_vm1, %v7083_v4, %v4493_v10  ;;  %v6751_v47 = vld [vmem:[%s10188_s12 + $0x78] sm:$0xff] }
 0xc1a   : > { %4855 = vmatmul.bf16.gmra.mxu0 %v4625_v52  ;;  %4904 = vmatmul.bf16.gmra.mxu1 %v4625_v52  ;;  %v4576_v49 = vmul.f32 %v4497_v58, %v9481_v45  ;;  %v6767_v10 = vld [vmem:[%s10188_s12 + $0xf8] sm:$0xff]  ;;  %v6750_v58 = vld [vmem:[%s10188_s12 + $0x70] sm:$0xff] }
 0xc1b   : > { %v4501_v54 = vmul.f32 0.5, %v4500_v37  ;;  %4953 = vmatmul.bf16.gmra.mxu2 %v4625_v52  ;;  %5002 = vmatmul.bf16.gmra.mxu3 %v4625_v52  ;;  %v6759_v52 = vld [vmem:[%s10188_s12 + $0xb8] sm:$0xff] }
 0xc1c   : > { %v4367_v17 = vpop.xlane.xlu2 %4366  ;;  %v4595_v46 = vmul.f32 %v9440_v36, %v4576_v49  ;;  %5433 = vmatpush.bf16.msrb.mxu1 %v6751_v47  ;;  %5482 = vmatpush.bf16.msrb.mxu2 %v6759_v52  ;;  %v6749_v49 = vld [vmem:[%s10188_s12 + $0x68] sm:$0xff] }
 0xc1d   : > { %v4502_v29 = vsub.f32 1.5, %v4501_v54  ;;  %v4387_v18 = vmul.f32 %v4367_v17, %v9166_v40  ;;  %5531 = vmatpush.bf16.msra.mxu3 %v6767_v10  ;;  %v6742_v17 = vld [vmem:[%s10188_s12 + $0x30] sm:$0xff] }
 0xc1e   : > { %v7087_v11 = vpop.eup %7086  ;;  %v9588_v45 = vadd.f32 %v9446_v16, %v4595_v46 }
 0xc1f   : > { %v4503_v31 = vmul.f32 %v7085_v50, %v4502_v29  ;;  %v4509_v60 = vmul.f32 %v7087_v11, %v4402_v51  ;;  %v4403_v44 = vadd.f32 1e-05, %v4387_v18  ;;  %vm4515_vm5 = vweird.f32 %v7087_v11  ;;  %v6743_v51 = vld [vmem:[%s10188_s12 + $0x38] sm:$0xff]  ;;  %v6758_v29 = vld [vmem:[%s10188_s12 + $0xb0] sm:$0xff] }
 0xc20   : > { %vm4516_vm7 = vmor %vm4514_vm6, %vm4515_vm5  ;;  %5384 = vmatpush.bf16.msrb.mxu0 %v6743_v51  ;;  %v6766_v18 = vld [vmem:[%s10188_s12 + $0xf0] sm:$0xff]  ;;  %5434 = vmatpush.bf16.msrb.mxu1 %v6750_v58  ;;  %v9722_v58 = vpop.f32.mrf.mxu0 }
 0xc21   : > { %v4507_v48 = vsel %vm4506_vm4, %v7085_v50, %v4503_v31  ;;  %v4510_v30 = vmul.f32 %v7087_v11, %v4509_v60  ;;  %7088 = vrsqrt.f32 %v4403_v44  ;;  %vm4524_vm9 = vweird.f32 %v4403_v44  ;;  %5483 = vmatpush.bf16.msrb.mxu2 %v6758_v29  ;;  %5532 = vmatpush.bf16.msra.mxu3 %v6766_v18  ;;  %v6762_v51 = vld [vmem:[%s10188_s12 + $0xd0] sm:$0xff]  ;;  %v9724_v29 = vpop.f32.mrf.mxu1 }
 0xc22   : > { %v4577_v24 = vmul.f32 %v4507_v48, %v9493_v9  ;;  %v6757_v48 = vld [vmem:[%s10188_s12 + $0xa8] sm:$0xff] }
 0xc23   : > { %v4511_v1 = vmul.f32 0.5, %v4510_v30  ;;  %v6765_v30 = vld [vmem:[%s10188_s12 + $0xe8] sm:$0xff] }
 0xc24   : > { %v4596_v59 = vmul.f32 %v9440_v36, %v4577_v24  ;;  %5385 = vmatpush.bf16.msrb.mxu0 %v6742_v17  ;;  %5435 = vmatpush.bf16.msrb.mxu1 %v6749_v49  ;;  %v6745_v17 = vld [vmem:[%s10188_s12 + $0x48] sm:$0xff] }
 0xc25   : > { %v4512_v2 = vsub.f32 1.5, %v4511_v1  ;;  %5484 = vmatpush.bf16.msrb.mxu2 %v6757_v48  ;;  %5533 = vmatpush.bf16.msra.mxu3 %v6765_v30 }
 0xc26   : > { %v9585_v5 = vadd.f32 %v9446_v16, %v4596_v59 }
 0xc27   : > { %v7089_v63 = vpop.eup %7088  ;;  %v4513_v35 = vmul.f32 %v7087_v11, %v4512_v2  ;;  %v6740_v2 = vld [vmem:[%s10188_s12 + $0x20] sm:$0xff] }
 0xc28   : > { %v4519_v3 = vmul.f32 %v7089_v63, %v4403_v44  ;;  %v4626_v9 = vpack.c.bf16 %v9585_v5, %v9588_v45  ;;  %vm4525_vm8 = vweird.f32 %v7089_v63  ;;  %v6741_v44 = vld [vmem:[%s10188_s12 + $0x28] sm:$0xff] }
 0xc29   : > { %v4517_v23 = vsel %vm4516_vm7, %v7087_v11, %v4513_v35  ;;  %vm4526_vm10 = vmor %vm4524_vm9, %vm4525_vm8  ;;  %5386 = vmatpush.bf16.msrb.mxu0 %v6741_v44  ;;  %v9731_v44 = vpop.f32.mrf.mxu3 }
 0xc2a   : > { %v4520_v22 = vmul.f32 %v7089_v63, %v4519_v3  ;;  %4860 = vmatmul.bf16.gmra.mxu0 %v4626_v9  ;;  %4909 = vmatmul.bf16.gmra.mxu1 %v4626_v9  ;;  %v4578_v34 = vmul.f32 %v4517_v23, %v9507_v61  ;;  %v4369_v61 = vpop.xlane.xlu0 %4368  ;;  %v6756_v3 = vld [vmem:[%s10188_s12 + $0xa0] sm:$0xff] }
 0xc2b   : > { %4958 = vmatmul.bf16.gmra.mxu2 %v4626_v9  ;;  %5007 = vmatmul.bf16.gmra.mxu3 %v4626_v9 }
 0xc2c   : > { %v4521_v7 = vmul.f32 0.5, %v4520_v22  ;;  %v4597_v28 = vmul.f32 %v9440_v36, %v4578_v34  ;;  %v6764_v22 = vld [vmem:[%s10188_s12 + $0xe0] sm:$0xff]  ;;  %5485 = vmatpush.bf16.msrb.mxu2 %v6756_v3 }
 0xc2d   : > { %5387 = vmatpush.bf16.msrb.mxu0 %v6740_v2  ;;  %5534 = vmatpush.bf16.msra.mxu3 %v6764_v22  ;;  %v6744_v2 = vld [vmem:[%s10188_s12 + $0x40] sm:$0xff] }
 0xc2e   : > { %v4522_v4 = vsub.f32 1.5, %v4521_v7  ;;  %v9597_v56 = vadd.f32 %v9446_v16, %v4597_v28  ;;  %v6760_v3 = vld [vmem:[%s10188_s12 + $0xc0] sm:$0xff] }
 0xc30   : > { %v4523_v20 = vmul.f32 %v7089_v63, %v4522_v4 }
 0xc32   : > { %v4527_v25 = vsel %vm4526_vm10, %v7089_v63, %v4523_v20  ;;  %v6748_v63 = vld [vmem:[%s10188_s12 + $0x60] sm:$0xff]  ;;  %v6739_v20 = vld [vmem:[%s10188_s12 + $0x18] sm:$0xff] }
 0xc33   : > { %v4579_v41 = vmul.f32 %v4527_v25, %v9522_v12  ;;  %v4388_v12 = vmul.f32 %v4369_v61, %v9166_v40  ;;  %5436 = vmatpush.bf16.msrb.mxu1 %v6748_v63  ;;  %v6747_v25 = vld [vmem:[%s10188_s12 + $0x58] sm:$0xff]  ;;  %5388 = vmatpush.bf16.msrb.mxu0 %v6739_v20 }
 0xc35   : > { %v4598_v43 = vmul.f32 %v9440_v36, %v4579_v41  ;;  %v4404_v42 = vadd.f32 1e-05, %v4388_v12  ;;  %v6755_v41 = vld [vmem:[%s10188_s12 + $0x98] sm:$0xff] }
 0xc36   : > { %5486 = vmatpush.bf16.msrb.mxu2 %v6755_v41 }
 0xc37   : > { %v9600_v14 = vadd.f32 %v9446_v16, %v4598_v43  ;;  %7090 = vrsqrt.f32 %v4404_v42  ;;  %vm4534_vm12 = vweird.f32 %v4404_v42  ;;  %v6763_v43 = vld [vmem:[%s10188_s12 + $0xd8] sm:$0xff]  ;;  %5437 = vmatpush.bf16.msrb.mxu1 %v6747_v25  ;;  %v4990_v25 = vpop.f32.mrf.mxu3 }
 0xc38   : > { %5535 = vmatpush.bf16.msra.mxu3 %v6763_v43 }
 0xc39   : > { %v4627_v19 = vpack.c.bf16 %v9600_v14, %v9597_v56 }
 0xc3b   : > { %4865 = vmatmul.bf16.gmra.mxu0 %v4627_v19  ;;  %4914 = vmatmul.bf16.gmra.mxu1 %v4627_v19 }
 0xc3c   : > { %4963 = vmatmul.bf16.gmra.mxu2 %v4627_v19  ;;  %5012 = vmatmul.bf16.gmra.mxu3 %v4627_v19 }
 0xc3d   : > { %v9605_v13 = vpop.eup %7090  ;;  %5536 = vmatpush.bf16.msra.mxu3 %v6762_v51 }
 0xc3e   : > { %v4529_v27 = vmul.f32 %v9605_v13, %v4404_v42  ;;  %vm4535_vm11 = vweird.f32 %v9605_v13 }
 0xc3f   : > { %vm9668_vm13 = vmor %vm4534_vm12, %vm4535_vm11 }
 0xc40   : > { %v4530_v0 = vmul.f32 %v9605_v13, %v4529_v27  ;;  %v6738_v27 = vld [vmem:[%s10188_s12 + $0x10] sm:$0xff] }
 0xc41   : > { %5389 = vmatpush.bf16.msrb.mxu0 %v6738_v27 }
 0xc42   : > { %v4531_v54 = vmul.f32 0.5, %v4530_v0 }
 0xc44   : > { %v4532_v11 = vsub.f32 1.5, %v4531_v54  ;;  %v6737_v54 = vld [vmem:[%s10188_s12 + $0x8] sm:$0xff] }
 0xc45   : > { %5390 = vmatpush.bf16.msrb.mxu0 %v6737_v54 }
 0xc46   : > { %v4533_v46 = vmul.f32 %v9605_v13, %v4532_v11  ;;  %v6761_v11 = vld [vmem:[%s10188_s12 + $0xc8] sm:$0xff] }
 0xc47   : > { %5537 = vmatpush.bf16.msra.mxu3 %v6761_v11 }
 0xc48   : > { %v4537_v23 = vsel %vm9668_vm13, %v9605_v13, %v4533_v46 }
 0xc49   : > { %v4580_v61 = vmul.f32 %v4537_v23, %v9528_v21  ;;  %v6746_v21 = vld [vmem:[%s10188_s12 + $0x50] sm:$0xff] }
 0xc4a   : > { %5438 = vmatpush.bf16.msrb.mxu1 %v6746_v21 }
 0xc4b   : > { %v4599_v52 = vmul.f32 %v9440_v36, %v4580_v61  ;;  %5538 = vmatpush.bf16.msra.mxu3 %v6760_v3 }
 0xc4d   : > { %v9734_v49 = vadd.f32 %v9446_v16, %v4599_v52 }
 0xc4e   : > { %5439 = vmatpush.bf16.msrb.mxu1 %v6745_v17 }
 0xc52   : > { %5440 = vmatpush.bf16.msrb.mxu1 %v6744_v2 }
 0xc75   : > { %v4371_v39 = vpop.xlane.xlu1 %4370 }
 0xc76   : > { %v4389_v50 = vmul.f32 %v4371_v39, %v9166_v40 }
 0xc78   : > { %v9622_v37 = vadd.f32 1e-05, %v4389_v50  ;;  %v6754_v50 = vld [vmem:[%s10188_s12 + $0x90] sm:$0xff] }
 0xc79   : > { %5487 = vmatpush.bf16.msrb.mxu2 %v6754_v50 }
 0xc7a   : > { %7092 = vrsqrt.f32 %v9622_v37  ;;  %vm4544_vm15 = vweird.f32 %v9622_v37 }
 0xc7d   : > { %v4373_v31 = vpop.xlane.xlu2 %4372 }
 0xc7e   : > { %v4390_v60 = vmul.f32 %v4373_v31, %v9166_v40 }
 0xc80   : > { %v7093_v24 = vpop.eup %7092  ;;  %v9650_v1 = vadd.f32 1e-05, %v4390_v60  ;;  %v9729_v60 = vpop.f32.mrf.mxu2 }
 0xc81   : > { %v4539_v59 = vmul.f32 %v7093_v24, %v9622_v37  ;;  %vm4545_vm14 = vweird.f32 %v7093_v24 }
 0xc82   : > { %7094 = vrsqrt.f32 %v9650_v1  ;;  %vm4546_vm0 = vmor %vm4544_vm15, %vm4545_vm14  ;;  %vm4554_vm2 = vweird.f32 %v9650_v1 }
 0xc83   : > { %v4540_v35 = vmul.f32 %v7093_v24, %v4539_v59  ;;  %v6736_v59 = vld [vmem:[%s10188_s12] sm:$0xff] }
 0xc84   : > { %5391 = vmatpush.bf16.msrb.mxu0 %v6736_v59 }
 0xc85   : > { %v4541_v7 = vmul.f32 0.5, %v4540_v35  ;;  %v4375_v4 = vpop.xlane.xlu0 %4374  ;;  %v6752_v35 = vld [vmem:[%s10188_s12 + $0x80] sm:$0xff] }
 0xc86   : > { %v4391_v34 = vmul.f32 %v4375_v4, %v9166_v40  ;;  %v4892_v4 = vpop.f32.mrf.mxu1 }
 0xc87   : > { %v4542_v28 = vsub.f32 1.5, %v4541_v7  ;;  %v4843_v7 = vpop.f32.mrf.mxu0 }
 0xc88   : > { %v9688_v19 = vpop.eup %7094  ;;  %v9691_v12 = vadd.f32 1e-05, %v4391_v34  ;;  %v4941_v20 = vpop.f32.mrf.mxu2 }
 0xc89   : > { %v4543_v42 = vmul.f32 %v7093_v24, %v4542_v28  ;;  %v4549_v13 = vmul.f32 %v9688_v19, %v9650_v1  ;;  %vm4555_vm1 = vweird.f32 %v9688_v19 }
 0xc8a   : > { %7096 = vrsqrt.f32 %v9691_v12  ;;  %vm4556_vm3 = vmor %vm4554_vm2, %vm4555_vm1  ;;  %vm4564_vm5 = vweird.f32 %v9691_v12 }
 0xc8b   : > { %v4547_v0 = vsel %vm4546_vm0, %v7093_v24, %v4543_v42  ;;  %v4550_v39 = vmul.f32 %v9688_v19, %v4549_v13 }
 0xc8c   : > { %v4581_v47 = vmul.f32 %v4547_v0, %v9548_v33  ;;  %v6753_v33 = vld [vmem:[%s10188_s12 + $0x88] sm:$0xff] }
 0xc8d   : > { %v4551_v10 = vmul.f32 0.5, %v4550_v39  ;;  %5488 = vmatpush.bf16.msrb.mxu2 %v6753_v33 }
 0xc8e   : > { %v4600_v37 = vmul.f32 %v9440_v36, %v4581_v47  ;;  %v4895_v13 = vpop.f32.mrf.mxu1 }
 0xc8f   : > { %v4552_v18 = vsub.f32 1.5, %v4551_v10  ;;  %v4846_v42 = vpop.f32.mrf.mxu0 }
 0xc90   : > { %v7097_v31 = vpop.eup %7096  ;;  %v9737_v48 = vadd.f32 %v9446_v16, %v4600_v37  ;;  %v4944_v27 = vpop.f32.mrf.mxu2 }
 0xc91   : > { %v4553_v30 = vmul.f32 %v9688_v19, %v4552_v18  ;;  %v4559_v24 = vmul.f32 %v7097_v31, %v9691_v12  ;;  %vm4565_vm4 = vweird.f32 %v7097_v31  ;;  %5489 = vmatpush.bf16.msrb.mxu2 %v6752_v35  ;;  %v4993_v12 = vpop.f32.mrf.mxu3 }
 0xc92   : > { %v4628_v46 = vpack.c.bf16 %v9737_v48, %v9734_v49  ;;  %vm4566_vm6 = vmor %vm4564_vm5, %vm4565_vm4 }
 0xc93   : > { %v4560_v63 = vmul.f32 %v7097_v31, %v4559_v24  ;;  %v4557_v22 = vsel %vm4556_vm3, %v9688_v19, %v4553_v30 }
 0xc94   : > { %4870 = vmatmul.bf16.gmra.mxu0 %v4628_v46  ;;  %4919 = vmatmul.bf16.gmra.mxu1 %v4628_v46  ;;  %v4582_v23 = vmul.f32 %v4557_v22, %v9555_v62 }
 0xc95   : > { %v4561_v9 = vmul.f32 0.5, %v4560_v63  ;;  %4968 = vmatmul.bf16.gmra.mxu2 %v4628_v46  ;;  %5017 = vmatmul.bf16.gmra.mxu3 %v4628_v46 }
 0xc96   : > { %v4601_v43 = vmul.f32 %v9440_v36, %v4582_v23  ;;  %v4897_v37 = vpop.f32.mrf.mxu1 }
 0xc97   : > { %v4562_v1 = vsub.f32 1.5, %v4561_v9  ;;  %v4848_v10 = vpop.f32.mrf.mxu0 }
 0xc98   : > { %v9764_v61 = vadd.f32 %v9446_v16, %v4601_v43  ;;  %v4946_v33 = vpop.f32.mrf.mxu2 }
 0xc99   : > { %v4563_v34 = vmul.f32 %v7097_v31, %v4562_v1  ;;  %v4995_v18 = vpop.f32.mrf.mxu3 }
 0xc9b   : > { %v4567_v41 = vsel %vm4566_vm6, %v7097_v31, %v4563_v34 }
 0xc9c   : > { %v4583_v28 = vmul.f32 %v4567_v41, %v9563_v38  ;;  %v4662_v38 = vld [vmem:[%s10187_s11] sm:$0xf] }
 0xc9d   : > { %v9776_v0 = vperm.slane %v4662_v38, 1  ;;  %v9780_v39 = vperm.slane %v4662_v38, 3 }
 0xc9e   : > { %v4602_v19 = vmul.f32 %v9440_v36, %v4583_v28  ;;  %v9774_v36 = vperm.slane %v4662_v38, 0  ;;  %v4900_v23 = vpop.f32.mrf.mxu1 }
 0xc9f   : > { %v4893_v51 = vadd.f32 %v4892_v4, %v9776_v0  ;;  %v4991_v52 = vadd.f32 %v4990_v25, %v9780_v39  ;;  %v4891_v17 = vadd.f32 %v9724_v29, %v9776_v0  ;;  %v4989_v31 = vadd.f32 %v9731_v44, %v9780_v39  ;;  %v4851_v1 = vpop.f32.mrf.mxu0 }
 0xca0   : > { %v9767_v62 = vadd.f32 %v9446_v16, %v4602_v19  ;;  %v9778_v16 = vperm.slane %v4662_v38, 2  ;;  %v4844_v50 = vadd.f32 %v4843_v7, %v9774_v36  ;;  %v4842_v54 = vadd.f32 %v9722_v58, %v9774_v36  ;;  %v4949_v7 = vpop.f32.mrf.mxu2 }
 0xca1   : > { %v5033_v24 = vmax.f32 %v4893_v51, 0.0  ;;  %v5035_v59 = vmax.f32 %v4991_v52, 0.0  ;;  %v5029_v63 = vmax.f32 %v4891_v17, 0.0  ;;  %v5031_v3 = vmax.f32 %v4989_v31, 0.0  ;;  %v4998_v4 = vpop.f32.mrf.mxu3 }
 0xca2   : > { %v4629_v21 = vpack.c.bf16 %v9767_v62, %v9764_v61  ;;  %v4942_v47 = vadd.f32 %v4941_v20, %v9778_v16  ;;  %v4940_v11 = vadd.f32 %v9729_v60, %v9778_v16  ;;  %v5032_v30 = vmax.f32 %v4844_v50, 0.0 }
 0xca3   : > { %v5028_v2 = vmax.f32 %v4842_v54, 0.0  ;;  %v5093_v22 = vpack.c.bf16 %v5033_v24, %v5029_v63  ;;  %v5095_v29 = vpack.c.bf16 %v5035_v59, %v5031_v3  ;;  %v4849_v60 = vadd.f32 %v4848_v10, %v9774_v36 }
 0xca4   : > { %4875 = vmatmul.bf16.gmra.mxu0 %v4629_v21  ;;  %4924 = vmatmul.bf16.gmra.mxu1 %v4629_v21  ;;  %v5034_v46 = vmax.f32 %v4942_v47, 0.0  ;;  %v5030_v35 = vmax.f32 %v4940_v11, 0.0  ;;  %v4898_v44 = vadd.f32 %v4897_v37, %v9776_v0  ;;  %v4947_v34 = vadd.f32 %v4946_v33, %v9778_v16 }
 0xca5   : > { %4973 = vmatmul.bf16.gmra.mxu2 %v4629_v21  ;;  %5022 = vmatmul.bf16.gmra.mxu3 %v4629_v21  ;;  %v5092_v58 = vpack.c.bf16 %v5032_v30, %v5028_v2  ;;  %v4996_v20 = vadd.f32 %v4995_v18, %v9780_v39  ;;  %v4847_v25 = vadd.f32 %v4846_v42, %v9774_v36  ;;  %v5040_v38 = vmax.f32 %v4849_v60, 0.0 }
 0xca6   : > { %v5094_v9 = vpack.c.bf16 %v5034_v46, %v5030_v35  ;;  %v4896_v41 = vadd.f32 %v4895_v13, %v9776_v0  ;;  %v4945_v28 = vadd.f32 %v4944_v27, %v9778_v16  ;;  %v4994_v43 = vadd.f32 %v4993_v12, %v9780_v39  ;;  %v4902_v21 = vpop.f32.mrf.mxu1 }
 0xca7   : > { %v4853_v19 = vpop.f32.mrf.mxu0  ;;  %v5041_v50 = vmax.f32 %v4898_v44, 0.0  ;;  %v5042_v52 = vmax.f32 %v4947_v34, 0.0  ;;  %v5043_v10 = vmax.f32 %v4996_v20, 0.0  ;;  %v5036_v37 = vmax.f32 %v4847_v25, 0.0 }
 0xca8   : > { %v4951_v51 = vpop.f32.mrf.mxu2  ;;  %v5037_v54 = vmax.f32 %v4896_v41, 0.0  ;;  %v5038_v17 = vmax.f32 %v4945_v28, 0.0  ;;  %v5039_v33 = vmax.f32 %v4994_v43, 0.0  ;;  %v4854_v24 = vadd.f32 %v4853_v19, %v9774_v36 }
 0xca9   : > { %v5000_v47 = vpop.f32.mrf.mxu3  ;;  %v5096_v18 = vpack.c.bf16 %v5040_v38, %v5036_v37  ;;  %v4903_v46 = vadd.f32 %v4902_v21, %v9776_v0  ;;  %v4952_v59 = vadd.f32 %v4951_v51, %v9778_v16  ;;  %v4852_v63 = vadd.f32 %v4851_v1, %v9774_v36 }
 0xcaa   : > { %v5097_v42 = vpack.c.bf16 %v5041_v50, %v5037_v54  ;;  %v5098_v11 = vpack.c.bf16 %v5042_v52, %v5038_v17  ;;  %v5099_v13 = vpack.c.bf16 %v5043_v10, %v5039_v33  ;;  %v5001_v2 = vadd.f32 %v5000_v47, %v9780_v39 }
 0xcab   : > { %v4901_v35 = vadd.f32 %v4900_v23, %v9776_v0  ;;  %v4950_v3 = vadd.f32 %v4949_v7, %v9778_v16  ;;  %v5044_v20 = vmax.f32 %v4852_v63, 0.0 }
 0xcac   : > { %v5051_v60 = vmax.f32 %v5001_v2, 0.0 }
 0xcad   : > { %v5045_v25 = vmax.f32 %v4901_v35, 0.0  ;;  %v5046_v43 = vmax.f32 %v4950_v3, 0.0 }
 0xcae   : > { %v4905_v12 = vpop.f32.mrf.mxu1 }
 0xcaf   : > { %v4856_v27 = vpop.f32.mrf.mxu0  ;;  %v4906_v17 = vadd.f32 %v4905_v12, %v9776_v0 }
 0xcb0   : > { %v4954_v31 = vpop.f32.mrf.mxu2  ;;  %v4857_v54 = vadd.f32 %v4856_v27, %v9774_v36 }
 0xcb1   : > { %v5003_v30 = vpop.f32.mrf.mxu3  ;;  %v4955_v33 = vadd.f32 %v4954_v31, %v9778_v16 }
 0xcb3   : > { %v5054_v2 = vmax.f32 %v4955_v33, 0.0 }
 0xcb4   : > { %5392 = vmatmul.bf16.vlgmr.msrb.gmra.mxu0 %v5092_v58  ;;  %5441 = vmatmul.bf16.vlgmr.msrb.gmra.mxu1 %v5093_v22  ;;  %v4999_v58 = vadd.f32 %v4998_v4, %v9780_v39  ;;  %v5048_v22 = vmax.f32 %v4854_v24, 0.0 }
 0xcb5   : > { %5490 = vmatmul.bf16.vlgmr.msrb.gmra.mxu2 %v5094_v9  ;;  %5539 = vmatmul.bf16.vlgmr.msra.gmra.mxu3 %v5095_v29  ;;  %v5049_v9 = vmax.f32 %v4903_v46, 0.0  ;;  %v5050_v29 = vmax.f32 %v4952_v59, 0.0  ;;  %v5052_v46 = vmax.f32 %v4857_v54, 0.0  ;;  %v5053_v59 = vmax.f32 %v4906_v17, 0.0 }
 0xcb6   : > { %v4907_v34 = vpop.f32.mrf.mxu1  ;;  %v5047_v19 = vmax.f32 %v4999_v58, 0.0  ;;  %v5100_v21 = vpack.c.bf16 %v5048_v22, %v5044_v20 }
 0xcb7   : > { %v4858_v44 = vpop.f32.mrf.mxu0  ;;  %v5101_v1 = vpack.c.bf16 %v5049_v9, %v5045_v25  ;;  %v5102_v38 = vpack.c.bf16 %v5050_v29, %v5046_v43  ;;  %v4908_v51 = vadd.f32 %v4907_v34, %v9776_v0 }
 0xcb8   : > { %v4956_v41 = vpop.f32.mrf.mxu2  ;;  %v5103_v23 = vpack.c.bf16 %v5051_v60, %v5047_v19  ;;  %v4859_v50 = vadd.f32 %v4858_v44, %v9774_v36 }
 0xcb9   : > { %v5005_v28 = vpop.f32.mrf.mxu3  ;;  %v4957_v10 = vadd.f32 %v4956_v41, %v9778_v16 }
 0xcba   : > { %v5006_v37 = vadd.f32 %v5005_v28, %v9780_v39 }
 0xcbc   : > { %v5059_v24 = vmax.f32 %v5006_v37, 0.0 }
 0xcbe   : > { %v4910_v4 = vpop.f32.mrf.mxu1 }
 0xcbf   : > { %v4861_v7 = vpop.f32.mrf.mxu0  ;;  %v4911_v20 = vadd.f32 %v4910_v4, %v9776_v0 }
 0xcc0   : > { %v4959_v47 = vpop.f32.mrf.mxu2  ;;  %v4862_v34 = vadd.f32 %v4861_v7, %v9774_v36 }
 0xcc1   : > { %v5008_v52 = vpop.f32.mrf.mxu3  ;;  %v4960_v25 = vadd.f32 %v4959_v47, %v9778_v16 }
 0xcc2   : > { %v5009_v41 = vadd.f32 %v5008_v52, %v9780_v39 }
 0xcc3   : > { %v5062_v37 = vmax.f32 %v4960_v25, 0.0 }
 0xcc4   : > { %5397 = vmatmul.bf16.gmra.mxu0 %v5096_v18  ;;  %5446 = vmatmul.bf16.gmra.mxu1 %v5097_v42  ;;  %v5004_v18 = vadd.f32 %v5003_v30, %v9780_v39  ;;  %v5056_v42 = vmax.f32 %v4859_v50, 0.0  ;;  %v5063_v54 = vmax.f32 %v5009_v41, 0.0 }
 0xcc5   : > { %5495 = vmatmul.bf16.gmra.mxu2 %v5098_v11  ;;  %5544 = vmatmul.bf16.gmra.mxu3 %v5099_v13  ;;  %v5057_v11 = vmax.f32 %v4908_v51, 0.0  ;;  %v5058_v13 = vmax.f32 %v4957_v10, 0.0  ;;  %v5060_v51 = vmax.f32 %v4862_v34, 0.0  ;;  %v5061_v10 = vmax.f32 %v4911_v20, 0.0 }
 0xcc6   : > { %v5055_v63 = vmax.f32 %v5004_v18, 0.0  ;;  %v5104_v35 = vpack.c.bf16 %v5056_v42, %v5052_v46  ;;  %v4912_v22 = vpop.f32.mrf.mxu1 }
 0xcc7   : > { %v5105_v3 = vpack.c.bf16 %v5057_v11, %v5053_v59  ;;  %v4863_v58 = vpop.f32.mrf.mxu0  ;;  %v5106_v9 = vpack.c.bf16 %v5058_v13, %v5054_v2  ;;  %v4913_v30 = vadd.f32 %v4912_v22, %v9776_v0 }
 0xcc8   : > { %v5107_v27 = vpack.c.bf16 %v5059_v24, %v5055_v63  ;;  %v4961_v29 = vpop.f32.mrf.mxu2  ;;  %v4864_v31 = vadd.f32 %v4863_v58, %v9774_v36 }
 0xcc9   : > { %v5010_v12 = vpop.f32.mrf.mxu3  ;;  %v4962_v60 = vadd.f32 %v4961_v29, %v9778_v16 }
 0xcca   : > { %v5011_v44 = vadd.f32 %v5010_v12, %v9780_v39  ;;  %v5064_v19 = vmax.f32 %v4864_v31, 0.0 }
 0xccc   : > { %v5067_v50 = vmax.f32 %v5011_v44, 0.0  ;;  %v5108_v7 = vpack.c.bf16 %v5064_v19, %v5060_v51 }
 0xcce   : > { %v4915_v43 = vpop.f32.mrf.mxu1  ;;  %v5111_v4 = vpack.c.bf16 %v5067_v50, %v5063_v54 }
 0xccf   : > { %v4866_v28 = vpop.f32.mrf.mxu0  ;;  %v4916_v2 = vadd.f32 %v4915_v43, %v9776_v0 }
 0xcd0   : > { %v4867_v59 = vadd.f32 %v4866_v28, %v9774_v36 }
 0xcd1   : > { %v5069_v29 = vmax.f32 %v4916_v2, 0.0 }
 0xcd4   : > { %5402 = vmatmul.bf16.gmra.mxu0 %v5100_v21  ;;  %5451 = vmatmul.bf16.gmra.mxu1 %v5101_v1  ;;  %v5065_v21 = vmax.f32 %v4913_v30, 0.0  ;;  %v4964_v1 = vpop.f32.mrf.mxu2 }
 0xcd5   : > { %5500 = vmatmul.bf16.gmra.mxu2 %v5102_v38  ;;  %5549 = vmatmul.bf16.gmra.mxu3 %v5103_v23  ;;  %v5013_v38 = vpop.f32.mrf.mxu3  ;;  %v5066_v23 = vmax.f32 %v4962_v60, 0.0  ;;  %v4965_v63 = vadd.f32 %v4964_v1, %v9778_v16 }
 0xcd6   : > { %v5109_v17 = vpack.c.bf16 %v5065_v21, %v5061_v10  ;;  %v4917_v52 = vpop.f32.mrf.mxu1 }
 0xcd7   : > { %v5110_v33 = vpack.c.bf16 %v5066_v23, %v5062_v37  ;;  %v4868_v47 = vpop.f32.mrf.mxu0  ;;  %v4918_v13 = vadd.f32 %v4917_v52, %v9776_v0  ;;  %v5070_v12 = vmax.f32 %v4965_v63, 0.0 }
 0xcd8   : > { %v4869_v11 = vadd.f32 %v4868_v47, %v9774_v36 }
 0xcd9   : > { %v5073_v58 = vmax.f32 %v4918_v13, 0.0 }
 0xcdb   : > { %v5113_v30 = vpack.c.bf16 %v5073_v58, %v5069_v29 }
 0xcdc   : > { %v4966_v18 = vpop.f32.mrf.mxu2 }
 0xcdd   : > { %v5015_v42 = vpop.f32.mrf.mxu3  ;;  %v4967_v24 = vadd.f32 %v4966_v18, %v9778_v16 }
 0xcde   : > { %v5016_v46 = vadd.f32 %v5015_v42, %v9780_v39 }
 0xcdf   : > { %v5074_v22 = vmax.f32 %v4967_v24, 0.0 }
 0xce1   : > { %v5114_v44 = vpack.c.bf16 %v5074_v22, %v5070_v12 }
 0xce4   : > { %5407 = vmatmul.bf16.gmra.mxu0 %v5104_v35  ;;  %5456 = vmatmul.bf16.gmra.mxu1 %v5105_v3  ;;  %v5014_v35 = vadd.f32 %v5013_v38, %v9780_v39  ;;  %v5072_v3 = vmax.f32 %v4869_v11, 0.0 }
 0xce5   : > { %5505 = vmatmul.bf16.gmra.mxu2 %v5106_v9  ;;  %5554 = vmatmul.bf16.gmra.mxu3 %v5107_v27  ;;  %v5075_v9 = vmax.f32 %v5016_v46, 0.0  ;;  %v5068_v27 = vmax.f32 %v4867_v59, 0.0 }
 0xce6   : > { %v5071_v31 = vmax.f32 %v5014_v35, 0.0 }
 0xce7   : > { %v5112_v60 = vpack.c.bf16 %v5072_v3, %v5068_v27 }
 0xce8   : > { %v5115_v34 = vpack.c.bf16 %v5075_v9, %v5071_v31 }
 0xcf4   : > { %5412 = vmatmul.bf16.gmra.mxu0 %v5108_v7  ;;  %5461 = vmatmul.bf16.gmra.mxu1 %v5109_v17 }
 0xcf5   : > { %5510 = vmatmul.bf16.gmra.mxu2 %v5110_v33  ;;  %5559 = vmatmul.bf16.gmra.mxu3 %v5111_v4 }
 0xd04   : > { %5417 = vmatmul.bf16.gmra.mxu0 %v5112_v60  ;;  %5466 = vmatmul.bf16.gmra.mxu1 %v5113_v30 }
 0xd05   : > { %5515 = vmatmul.bf16.gmra.mxu2 %v5114_v44  ;;  %5564 = vmatmul.bf16.gmra.mxu3 %v5115_v34 }
 0xd11   : > { %v4871_v20 = vpop.f32.mrf.mxu0  ;;  %v4920_v25 = vpop.f32.mrf.mxu1 }
 0xd12   : > { %v4872_v41 = vadd.f32 %v4871_v20, %v9774_v36  ;;  %v4921_v28 = vadd.f32 %v4920_v25, %v9776_v0 }
 0xd14   : > { %v5076_v50 = vmax.f32 %v4872_v41, 0.0  ;;  %v5077_v51 = vmax.f32 %v4921_v28, 0.0  ;;  %v9851_v28 = vld [vmem:[%s10189_s13] ss:$0 sm:$0xff] }
 0xd18   : > { %v4969_v43 = vpop.f32.mrf.mxu2  ;;  %v5018_v19 = vpop.f32.mrf.mxu3 }
 0xd19   : > { %v4873_v21 = vpop.f32.mrf.mxu0  ;;  %v4922_v1 = vpop.f32.mrf.mxu1  ;;  %v4970_v7 = vadd.f32 %v4969_v43, %v9778_v16  ;;  %v5019_v33 = vadd.f32 %v5018_v19, %v9780_v39 }
 0xd1a   : > { %v4874_v38 = vadd.f32 %v4873_v21, %v9774_v36  ;;  %v4923_v23 = vadd.f32 %v4922_v1, %v9776_v0 }
 0xd1b   : > { %v5078_v13 = vmax.f32 %v4970_v7, 0.0  ;;  %v5079_v24 = vmax.f32 %v5019_v33, 0.0 }
 0xd1c   : > { %v5080_v10 = vmax.f32 %v4874_v38, 0.0  ;;  %v5081_v37 = vmax.f32 %v4923_v23, 0.0 }
 0xd1e   : > { %v5117_v54 = vpack.c.bf16 %v5081_v37, %v5077_v51  ;;  %v5116_v17 = vpack.c.bf16 %v5080_v10, %v5076_v50 }
 0xd20   : > { %v4971_v4 = vpop.f32.mrf.mxu2  ;;  %v5020_v47 = vpop.f32.mrf.mxu3  ;;  %5422 = vmatmul.bf16.gmra.mxu0 %v5116_v17  ;;  %5471 = vmatmul.bf16.gmra.mxu1 %v5117_v54 }
 0xd21   : > { %v4972_v52 = vadd.f32 %v4971_v4, %v9778_v16  ;;  %v5021_v18 = vadd.f32 %v5020_v47, %v9780_v39  ;;  %v4876_v42 = vpop.f32.mrf.mxu0  ;;  %v4925_v11 = vpop.f32.mrf.mxu1 }
 0xd22   : > { %v4877_v35 = vadd.f32 %v4876_v42, %v9774_v36  ;;  %v4926_v3 = vadd.f32 %v4925_v11, %v9776_v0 }
 0xd23   : > { %v5082_v46 = vmax.f32 %v4972_v52, 0.0  ;;  %v5083_v59 = vmax.f32 %v5021_v18, 0.0 }
 0xd24   : > { %v5084_v31 = vmax.f32 %v4877_v35, 0.0  ;;  %v5085_v30 = vmax.f32 %v4926_v3, 0.0 }
 0xd25   : > { %v5118_v2 = vpack.c.bf16 %v5082_v46, %v5078_v13  ;;  %v5119_v63 = vpack.c.bf16 %v5083_v59, %v5079_v24 }
 0xd27   : > { %5520 = vmatmul.bf16.gmra.mxu2 %v5118_v2  ;;  %5569 = vmatmul.bf16.gmra.mxu3 %v5119_v63 }
 0xd28   : > { %v4974_v58 = vpop.f32.mrf.mxu2  ;;  %v5023_v22 = vpop.f32.mrf.mxu3 }
 0xd29   : > { %v4878_v9 = vpop.f32.mrf.mxu0  ;;  %v4927_v27 = vpop.f32.mrf.mxu1  ;;  %v4975_v34 = vadd.f32 %v4974_v58, %v9778_v16  ;;  %v5024_v41 = vadd.f32 %v5023_v22, %v9780_v39 }
 0xd2a   : > { %v4879_v29 = vadd.f32 %v4878_v9, %v9774_v36  ;;  %v4928_v12 = vadd.f32 %v4927_v27, %v9776_v0 }
 0xd2b   : > { %v5086_v38 = vmax.f32 %v4975_v34, 0.0  ;;  %v5087_v23 = vmax.f32 %v5024_v41, 0.0 }
 0xd2c   : > { %v5088_v60 = vmax.f32 %v4879_v29, 0.0  ;;  %v5089_v44 = vmax.f32 %v4928_v12, 0.0 }
 0xd2e   : > { %v5121_v20 = vpack.c.bf16 %v5089_v44, %v5085_v30  ;;  %v5120_v25 = vpack.c.bf16 %v5088_v60, %v5084_v31 }
 0xd30   : > { %v4976_v43 = vpop.f32.mrf.mxu2  ;;  %v5025_v19 = vpop.f32.mrf.mxu3  ;;  %5427 = vmatmul.bf16.gmra.mxu0 %v5120_v25  ;;  %5476 = vmatmul.bf16.gmra.mxu1 %v5121_v20 }
 0xd31   : > { %v4977_v36 = vadd.f32 %v4976_v43, %v9778_v16  ;;  %v5026_v0 = vadd.f32 %v5025_v19, %v9780_v39  ;;  %v5393_v21 = vpop.f32.mrf.mxu0  ;;  %v5442_v1 = vpop.f32.mrf.mxu1 }
 0xd32   : > { %v5394_v10 = vadd.f32 %v9851_v28, %v5393_v21 }
 0xd33   : > { %v5090_v50 = vmax.f32 %v4977_v36, 0.0  ;;  %v5091_v51 = vmax.f32 %v5026_v0, 0.0 }
 0xd34   : > { %v5443_v17 = vadd.f32 %v5442_v1, %v5394_v10 }
 0xd35   : > { %v5122_v37 = vpack.c.bf16 %v5090_v50, %v5086_v38  ;;  %v5123_v54 = vpack.c.bf16 %v5091_v51, %v5087_v23 }
 0xd37   : > { %5525 = vmatmul.bf16.gmra.mxu2 %v5122_v37  ;;  %5574 = vmatmul.bf16.gmra.mxu3 %v5123_v54 }
 0xd38   : > { %v5491_v7 = vpop.f32.mrf.mxu2  ;;  %v5540_v33 = vpop.f32.mrf.mxu3 }
 0xd39   : > { %v5492_v4 = vadd.f32 %v5491_v7, %v5443_v17  ;;  %v5395_v47 = vpop.f32.mrf.mxu0  ;;  %v5444_v16 = vpop.f32.mrf.mxu1 }
 0xd3a   : > { %v5396_v39 = vadd.f32 %v9851_v28, %v5395_v47 }
 0xd3b   : > { %v5541_v52 = vadd.f32 %v5540_v33, %v5492_v4 }
 0xd3c   : > { %v5445_v42 = vadd.f32 %v5444_v16, %v5396_v39 }
 0xd3d   : > { %v9858_v18 = vadd.f32 %v5541_v52, %v9452_v32 }
 0xd3f   : > { %5598 = vadd.xlane.f32.xlu1 %v9858_v18 }
 0xd40   : > { %v5493_v11 = vpop.f32.mrf.mxu2  ;;  %v5542_v13 = vpop.f32.mrf.mxu3 }
 0xd41   : > { %v5494_v24 = vadd.f32 %v5493_v11, %v5445_v42  ;;  %v5398_v46 = vpop.f32.mrf.mxu0  ;;  %v5447_v59 = vpop.f32.mrf.mxu1 }
 0xd42   : > { %v5399_v63 = vadd.f32 %v9851_v28, %v5398_v46 }
 0xd43   : > { %v5543_v2 = vadd.f32 %v5542_v13, %v5494_v24 }
 0xd44   : > { %v5448_v3 = vadd.f32 %v5447_v59, %v5399_v63 }
 0xd45   : > { %v9863_v35 = vadd.f32 %v5543_v2, %v9455_v8 }
 0xd47   : > { %5600 = vadd.xlane.f32.xlu2 %v9863_v35 }
 0xd48   : > { %v5496_v58 = vpop.f32.mrf.mxu2  ;;  %v5545_v32 = vpop.f32.mrf.mxu3 }
 0xd49   : > { %v5497_v22 = vadd.f32 %v5496_v58, %v5448_v3  ;;  %v5400_v9 = vpop.f32.mrf.mxu0  ;;  %v5449_v27 = vpop.f32.mrf.mxu1 }
 0xd4a   : > { %v5401_v12 = vadd.f32 %v9851_v28, %v5400_v9 }
 0xd4b   : > { %v5546_v29 = vadd.f32 %v5545_v32, %v5497_v22 }
 0xd4c   : > { %v5450_v30 = vadd.f32 %v5449_v27, %v5401_v12 }
 0xd4d   : > { %v9868_v31 = vadd.f32 %v5546_v29, %v9510_v57 }
 0xd4f   : > { %5602 = vadd.xlane.f32.xlu0 %v9868_v31 }
 0xd50   : > { %v5498_v60 = vpop.f32.mrf.mxu2  ;;  %v5547_v8 = vpop.f32.mrf.mxu3 }
 0xd51   : > { %v5499_v44 = vadd.f32 %v5498_v60, %v5450_v30  ;;  %v5403_v34 = vpop.f32.mrf.mxu0  ;;  %v5452_v20 = vpop.f32.mrf.mxu1 }
 0xd52   : > { %v5404_v41 = vadd.f32 %v9851_v28, %v5403_v34 }
 0xd53   : > { %v5548_v25 = vadd.f32 %v5547_v8, %v5499_v44 }
 0xd54   : > { %v5453_v19 = vadd.f32 %v5452_v20, %v5404_v41 }
 0xd55   : > { %v9873_v43 = vadd.f32 %v5548_v25, %v9513_v26 }
 0xd57   : > { %5604 = vadd.xlane.f32.xlu1 %v9873_v43 }
 0xd58   : > { %v5501_v36 = vpop.f32.mrf.mxu2  ;;  %v5550_v57 = vpop.f32.mrf.mxu3 }
 0xd59   : > { %v5502_v0 = vadd.f32 %v5501_v36, %v5453_v19  ;;  %v5405_v21 = vpop.f32.mrf.mxu0  ;;  %v5454_v23 = vpop.f32.mrf.mxu1 }
 0xd5a   : > { %v5406_v38 = vadd.f32 %v9851_v28, %v5405_v21 }
 0xd5b   : > { %v5551_v1 = vadd.f32 %v5550_v57, %v5502_v0 }
 0xd5c   : > { %v5455_v51 = vadd.f32 %v5454_v23, %v5406_v38 }
 0xd5d   : > { %v9878_v50 = vadd.f32 %v5551_v1, %v9537_v55 }
 0xd5f   : > { %5606 = vadd.xlane.f32.xlu2 %v9878_v50 }
 0xd60   : > { %v5503_v10 = vpop.f32.mrf.mxu2  ;;  %v5552_v26 = vpop.f32.mrf.mxu3 }
 0xd61   : > { %v5504_v37 = vadd.f32 %v5503_v10, %v5455_v51  ;;  %v5408_v54 = vpop.f32.mrf.mxu0  ;;  %v5457_v4 = vpop.f32.mrf.mxu1 }
 0xd62   : > { %v5409_v7 = vadd.f32 %v9851_v28, %v5408_v54 }
 0xd63   : > { %v5553_v17 = vadd.f32 %v5552_v26, %v5504_v37 }
 0xd64   : > { %v5458_v47 = vadd.f32 %v5457_v4, %v5409_v7 }
 0xd65   : > { %v9883_v33 = vadd.f32 %v5553_v17, %v9540_v53 }
 0xd67   : > { %5608 = vadd.xlane.f32.xlu0 %v9883_v33 }
 0xd68   : > { %v5506_v16 = vpop.f32.mrf.mxu2  ;;  %v5555_v52 = vpop.f32.mrf.mxu3 }
 0xd69   : > { %v5507_v55 = vadd.f32 %v5506_v16, %v5458_v47  ;;  %v5410_v11 = vpop.f32.mrf.mxu0  ;;  %v5459_v13 = vpop.f32.mrf.mxu1 }
 0xd6a   : > { %v5411_v2 = vadd.f32 %v9851_v28, %v5410_v11 }
 0xd6b   : > { %v5556_v39 = vadd.f32 %v5555_v52, %v5507_v55 }
 0xd6c   : > { %v5460_v32 = vadd.f32 %v5459_v13, %v5411_v2 }
 0xd6d   : > { %v9887_v42 = vadd.f32 %v5556_v39, %v9572_v6 }
 0xd6f   : > { %5610 = vadd.xlane.f32.xlu0 %v9887_v42 }
 0xd70   : > { %v5508_v24 = vpop.f32.mrf.mxu2  ;;  %v5557_v59 = vpop.f32.mrf.mxu3 }
 0xd71   : > { %v5413_v46 = vpop.f32.mrf.mxu0  ;;  %v5462_v53 = vpop.f32.mrf.mxu1  ;;  %v5509_v6 = vadd.f32 %v5508_v24, %v5460_v32 }
 0xd72   : > { %v5414_v12 = vadd.f32 %v9851_v28, %v5413_v46 }
 0xd73   : > { %v5558_v8 = vadd.f32 %v5557_v59, %v5509_v6 }
 0xd74   : > { %v5463_v20 = vadd.f32 %v5462_v53, %v5414_v12 }
 0xd78   : > { %v5511_v63 = vpop.f32.mrf.mxu2  ;;  %v5560_v27 = vpop.f32.mrf.mxu3 }
 0xd79   : > { %v5415_v22 = vpop.f32.mrf.mxu0  ;;  %v5464_v30 = vpop.f32.mrf.mxu1  ;;  %v5512_v41 = vadd.f32 %v5511_v63, %v5463_v20 }
 0xd7a   : > { %v5416_v57 = vadd.f32 %v9851_v28, %v5415_v22 }
 0xd7b   : > { %v5561_v1 = vadd.f32 %v5560_v27, %v5512_v41 }
 0xd7c   : > { %v5465_v23 = vadd.f32 %v5464_v30, %v5416_v57 }
 0xd7d   : > { %v9914_v10 = vadd.f32 %v5561_v1, %v9588_v45 }
 0xd80   : > { %v5513_v44 = vpop.f32.mrf.mxu2  ;;  %v5562_v0 = vpop.f32.mrf.mxu3 }
 0xd81   : > { %v5418_v19 = vpop.f32.mrf.mxu0  ;;  %v5514_v26 = vadd.f32 %v5513_v44, %v5465_v23 }
 0xd82   : > { %v5419_v54 = vadd.f32 %v9851_v28, %v5418_v19 }
 0xd83   : > { %v5563_v47 = vadd.f32 %v5562_v0, %v5514_v26 }
 0xd85   : > { %v9927_v39 = vadd.f32 %v5563_v47, %v9585_v5 }
 0xd88   : > { %v5516_v51 = vpop.f32.mrf.mxu2  ;;  %v5565_v16 = vpop.f32.mrf.mxu3 }
 0xd89   : > { %v5420_v17 = vpop.f32.mrf.mxu0 }
 0xd8a   : > { %v5421_v24 = vadd.f32 %v9851_v28, %v5420_v17 }
 0xd90   : > { %v5518_v13 = vpop.f32.mrf.mxu2 }
 0xd9d   : > { %v5423_v46 = vpop.f32.mrf.mxu0 }
 0xd9e   : > { %v5424_v27 = vadd.f32 %v9851_v28, %v5423_v46 }
 0xda5   : > { %v5425_v30 = vpop.f32.mrf.mxu0 }
 0xda6   : > { %v5426_v41 = vadd.f32 %v9851_v28, %v5425_v30 }
 0xdaa   : > { %v5521_v6 = vpop.f32.mrf.mxu2 }
 0xdb2   : > { %v5599_v3 = vpop.xlane.xlu1 %5598 }
 0xdb3   : > { %v5630_v58 = vmul.f32 %v5599_v3, %v9166_v40  ;;  %v5567_v3 = vpop.f32.mrf.mxu3 }
 0xdb5   : > { %v9893_v9 = vsub.f32 %v9858_v18, %v5630_v58  ;;  %v9903_v18 = vadd.f32 %v5558_v8, %v9575_v15 }
 0xdb7   : > { %v5662_v29 = vmul.f32 %v9893_v9, %v9893_v9 }
 0xdb9   : > { %5678 = vadd.xlane.f32.xlu1 %v5662_v29 }
 0xdba   : > { %v5601_v60 = vpop.xlane.xlu2 %5600 }
 0xdbb   : > { %v5631_v34 = vmul.f32 %v5601_v60, %v9166_v40  ;;  %v5570_v44 = vpop.f32.mrf.mxu3 }
 0xdbd   : > { %v9900_v25 = vsub.f32 %v9863_v35, %v5631_v34  ;;  %v5467_v35 = vpop.f32.mrf.mxu1 }
 0xdbe   : > { %v5468_v45 = vadd.f32 %v5467_v35, %v5419_v54 }
 0xdbf   : > { %v5663_v36 = vmul.f32 %v9900_v25, %v9900_v25 }
 0xdc0   : > { %v5517_v11 = vadd.f32 %v5516_v51, %v5468_v45  ;;  %v6775_v45 = vld [vmem:[%s10192_s16 + $0x38] sm:$0xff] }
 0xdc1   : > { %5680 = vadd.xlane.f32.xlu2 %v5663_v36  ;;  %5612 = vadd.xlane.f32.xlu1 %v9903_v18  ;;  %v5523_v36 = vpop.f32.mrf.mxu2 }
 0xdc2   : > { %v5603_v21 = vpop.xlane.xlu0 %5602  ;;  %v5566_v53 = vadd.f32 %v5565_v16, %v5517_v11  ;;  %6032 = vmatpush.bf16.msra.mxu0 %v6775_v45  ;;  %v6770_v11 = vld [vmem:[%s10192_s16 + $0x10] sm:$0xff] }
 0xdc3   : > { %v5632_v38 = vmul.f32 %v5603_v21, %v9166_v40  ;;  %v5572_v51 = vpop.f32.mrf.mxu3 }
 0xdc4   : > { %v9938_v22 = vadd.f32 %v5566_v53, %v9597_v56 }
 0xdc5   : > { %v9911_v15 = vsub.f32 %v9868_v31, %v5632_v38  ;;  %v5469_v55 = vpop.f32.mrf.mxu1 }
 0xdc6   : > { %v5470_v2 = vadd.f32 %v5469_v55, %v5421_v24  ;;  %v6773_v55 = vld [vmem:[%s10192_s16 + $0x28] sm:$0xff] }
 0xdc7   : > { %v5664_v37 = vmul.f32 %v9911_v15, %v9911_v15 }
 0xdc8   : > { %v5519_v58 = vadd.f32 %v5518_v13, %v5470_v2  ;;  %v6769_v13 = vld [vmem:[%s10192_s16 + $0x8] sm:$0xff] }
 0xdc9   : > { %5682 = vadd.xlane.f32.xlu2 %v5664_v37  ;;  %5614 = vadd.xlane.f32.xlu1 %v9914_v10  ;;  %v5526_v17 = vpop.f32.mrf.mxu2 }
 0xdca   : > { %v5605_v7 = vpop.xlane.xlu1 %5604  ;;  %v5568_v12 = vadd.f32 %v5567_v3, %v5519_v58 }
 0xdcb   : > { %v5633_v4 = vmul.f32 %v5605_v7, %v9166_v40 }
 0xdcc   : > { %v9947_v34 = vadd.f32 %v5568_v12, %v9600_v14  ;;  %v5428_v14 = vpop.f32.mrf.mxu0 }
 0xdcd   : > { %v9922_v31 = vsub.f32 %v9873_v43, %v5633_v4  ;;  %v5472_v5 = vpop.f32.mrf.mxu1  ;;  %v5429_v26 = vadd.f32 %v9851_v28, %v5428_v14 }
 0xdce   : > { %v5473_v60 = vadd.f32 %v5472_v5, %v5424_v27 }
 0xdcf   : > { %v5665_v52 = vmul.f32 %v9922_v31, %v9922_v31 }
 0xdd0   : > { %v5522_v56 = vadd.f32 %v5521_v6, %v5473_v60 }
 0xdd1   : > { %5684 = vadd.xlane.f32.xlu0 %v5665_v52  ;;  %5616 = vadd.xlane.f32.xlu2 %v9927_v39  ;;  %v6771_v52 = vld [vmem:[%s10192_s16 + $0x18] sm:$0xff] }
 0xdd2   : > { %v5607_v59 = vpop.xlane.xlu2 %5606  ;;  %v5571_v0 = vadd.f32 %v5570_v44, %v5522_v56 }
 0xdd3   : > { %v5634_v43 = vmul.f32 %v5607_v59, %v9166_v40 }
 0xdd4   : > { %v9958_v38 = vadd.f32 %v5571_v0, %v9734_v49  ;;  %v5575_v49 = vpop.f32.mrf.mxu3  ;;  %v5430_v27 = vpop.f32.mrf.mxu0 }
 0xdd5   : > { %v9933_v63 = vsub.f32 %v9878_v50, %v5634_v43  ;;  %v5474_v19 = vpop.f32.mrf.mxu1  ;;  %v6768_v43 = vld [vmem:[%s10192_s16] sm:$0xff]  ;;  %v5431_v30 = vadd.f32 %v9851_v28, %v5430_v27 }
 0xdd6   : > { %v5475_v21 = vadd.f32 %v5474_v19, %v5426_v41 }
 0xdd7   : > { %v5666_v32 = vmul.f32 %v9933_v63, %v9933_v63 }
 0xdd8   : > { %v5524_v35 = vadd.f32 %v5523_v36, %v5475_v21 }
 0xdd9   : > { %5686 = vadd.xlane.f32.xlu0 %v5666_v32  ;;  %5618 = vadd.xlane.f32.xlu2 %v9938_v22 }
 0xdda   : > { %v5609_v29 = vpop.xlane.xlu0 %5608  ;;  %v5573_v37 = vadd.f32 %v5572_v51, %v5524_v35 }
 0xddb   : > { %v5635_v50 = vmul.f32 %v5609_v29, %v9166_v40 }
 0xddd   : > { %v9944_v8 = vsub.f32 %v9883_v33, %v5635_v50  ;;  %v5477_v54 = vpop.f32.mrf.mxu1 }
 0xdde   : > { %v5478_v7 = vadd.f32 %v5477_v54, %v5429_v26  ;;  %v5577_v54 = vpop.f32.mrf.mxu3 }
 0xddf   : > { %v5667_v20 = vmul.f32 %v9944_v8, %v9944_v8 }
 0xde0   : > { %v5527_v4 = vadd.f32 %v5526_v17, %v5478_v7 }
 0xde1   : > { %5688 = vadd.xlane.f32.xlu1 %v5667_v20  ;;  %5620 = vadd.xlane.f32.xlu0 %v9947_v34 }
 0xde2   : > { %v5611_v57 = vpop.xlane.xlu0 %5610  ;;  %v5576_v47 = vadd.f32 %v5575_v49, %v5527_v4 }
 0xde3   : > { %v5636_v33 = vmul.f32 %v5611_v57, %v9166_v40 }
 0xde4   : > { %v9969_v16 = vadd.f32 %v5576_v47, %v9764_v61  ;;  %v6772_v61 = vld [vmem:[%s10192_s16 + $0x20] sm:$0xff] }
 0xde5   : > { %v9955_v1 = vsub.f32 %v9887_v42, %v5636_v33  ;;  %v9965_v42 = vadd.f32 %v5573_v37, %v9737_v48  ;;  %v6774_v48 = vld [vmem:[%s10192_s16 + $0x30] sm:$0xff]  ;;  %v5479_v19 = vpop.f32.mrf.mxu1  ;;  %v10017_v47 = vld [vmem:[%s10190_s14] ss:$0 sm:$0xff] }
 0xde6   : > { %6033 = vmatpush.bf16.msra.mxu0 %v6774_v48  ;;  %v5480_v0 = vadd.f32 %v5479_v19, %v5431_v30 }
 0xde7   : > { %v5668_v23 = vmul.f32 %v9955_v1, %v9955_v1 }
 0xde9   : > { %5690 = vadd.xlane.f32.xlu1 %v5668_v23  ;;  %5622 = vadd.xlane.f32.xlu0 %v9958_v38 }
 0xdea   : > { %6034 = vmatpush.bf16.msra.mxu0 %v6773_v55 }
 0xdee   : > { %6035 = vmatpush.bf16.msra.mxu0 %v6772_v61 }
 0xdf1   : > { %5624 = vadd.xlane.f32.xlu1 %v9965_v42 }
 0xdf2   : > { %6036 = vmatpush.bf16.msra.mxu0 %v6771_v52 }
 0xdf6   : > { %6037 = vmatpush.bf16.msra.mxu0 %v6770_v11 }
 0xdf9   : > { %5626 = vadd.xlane.f32.xlu1 %v9969_v16 }
 0xdfa   : > { %6038 = vmatpush.bf16.msra.mxu0 %v6769_v13 }
 0xdfe   : > { %6039 = vmatpush.bf16.msra.mxu0 %v6768_v43 }
 0xe2c   : > { %v5679_v24 = vpop.xlane.xlu1 %5678 }
 0xe2d   : > { %v5710_v46 = vmul.f32 %v5679_v24, %v9166_v40 }
 0xe2f   : > { %v5726_v59 = vadd.f32 1e-05, %v5710_v46 }
 0xe31   : > { %7098 = vrsqrt.f32 %v5726_v59  ;;  %vm5748_vm8 = vweird.f32 %v5726_v59 }
 0xe34   : > { %v5681_v53 = vpop.xlane.xlu2 %5680  ;;  %v5613_v2 = vpop.xlane.xlu1 %5612 }
 0xe35   : > { %v5711_v3 = vmul.f32 %v5681_v53, %v9166_v40  ;;  %v5637_v58 = vmul.f32 %v5613_v2, %v9166_v40 }
 0xe37   : > { %v7099_v5 = vpop.eup %7098  ;;  %v5727_v32 = vadd.f32 1e-05, %v5711_v3  ;;  %v10000_v6 = vsub.f32 %v9903_v18, %v5637_v58  ;;  %v5528_v18 = vpop.f32.mrf.mxu2 }
 0xe38   : > { %v5743_v29 = vmul.f32 %v7099_v5, %v5726_v59  ;;  %vm5749_vm7 = vweird.f32 %v7099_v5  ;;  %v5529_v35 = vadd.f32 %v5528_v18, %v5480_v0 }
 0xe39   : > { %7100 = vrsqrt.f32 %v5727_v32  ;;  %v5669_v12 = vmul.f32 %v10000_v6, %v10000_v6  ;;  %vm5750_vm9 = vmor %vm5748_vm8, %vm5749_vm7  ;;  %vm5758_vm11 = vweird.f32 %v5727_v32 }
 0xe3a   : > { %v5744_v50 = vmul.f32 %v7099_v5, %v5743_v29 }
 0xe3b   : > { %5692 = vadd.xlane.f32.xlu2 %v5669_v12 }
 0xe3c   : > { %v5745_v60 = vmul.f32 0.5, %v5744_v50  ;;  %v5683_v44 = vpop.xlane.xlu2 %5682  ;;  %v5615_v56 = vpop.xlane.xlu1 %5614 }
 0xe3d   : > { %v5712_v20 = vmul.f32 %v5683_v44, %v9166_v40  ;;  %v5638_v41 = vmul.f32 %v5615_v56, %v9166_v40 }
 0xe3e   : > { %v5746_v36 = vsub.f32 1.5, %v5745_v60 }
 0xe3f   : > { %v7101_v57 = vpop.eup %7100  ;;  %v5728_v33 = vadd.f32 1e-05, %v5712_v20  ;;  %v10008_v21 = vsub.f32 %v9914_v10, %v5638_v41  ;;  %v5578_v10 = vadd.f32 %v5577_v54, %v5529_v35 }
 0xe40   : > { %v5747_v14 = vmul.f32 %v7099_v5, %v5746_v36  ;;  %v5753_v28 = vmul.f32 %v7101_v57, %v5727_v32  ;;  %vm5759_vm10 = vweird.f32 %v7101_v57 }
 0xe41   : > { %7102 = vrsqrt.f32 %v5728_v33  ;;  %v5670_v23 = vmul.f32 %v10008_v21, %v10008_v21  ;;  %v10024_v24 = vadd.f32 %v5578_v10, %v9767_v62  ;;  %vm5760_vm12 = vmor %vm5758_vm11, %vm5759_vm10  ;;  %vm5768_vm14 = vweird.f32 %v5728_v33 }
 0xe42   : > { %v5754_v51 = vmul.f32 %v7101_v57, %v5753_v28  ;;  %v5751_v26 = vsel %vm5750_vm9, %v7099_v5, %v5747_v14 }
 0xe43   : > { %5694 = vadd.xlane.f32.xlu2 %v5670_v23  ;;  %v5902_v45 = vmul.f32 %v5751_v26, %v9893_v9  ;;  %v10031_v9 = vld [vmem:[%s10191_s15] ss:$0 sm:$0xff] }
 0xe44   : > { %v5685_v37 = vpop.xlane.xlu0 %5684  ;;  %v5755_v17 = vmul.f32 0.5, %v5754_v51  ;;  %v5617_v7 = vpop.xlane.xlu2 %5616 }
 0xe45   : > { %v5713_v4 = vmul.f32 %v5685_v37, %v9166_v40  ;;  %v5639_v49 = vmul.f32 %v5617_v7, %v9166_v40  ;;  %v5921_v59 = vmul.f32 %v10017_v47, %v5902_v45 }
 0xe46   : > { %v5756_v48 = vsub.f32 1.5, %v5755_v17 }
 0xe47   : > { %v5729_v55 = vadd.f32 1e-05, %v5713_v4  ;;  %v7103_v61 = vpop.eup %7102  ;;  %v10021_v52 = vsub.f32 %v9927_v39, %v5639_v49  ;;  %v5940_v29 = vadd.f32 %v10031_v9, %v5921_v59 }
 0xe48   : > { %v5757_v11 = vmul.f32 %v7101_v57, %v5756_v48  ;;  %v5763_v13 = vmul.f32 %v7103_v61, %v5728_v33  ;;  %vm5769_vm13 = vweird.f32 %v7103_v61 }
 0xe49   : > { %7104 = vrsqrt.f32 %v5729_v55  ;;  %v5671_v46 = vmul.f32 %v10021_v52, %v10021_v52  ;;  %vm5770_vm15 = vmor %vm5768_vm14, %vm5769_vm13  ;;  %vm5778_vm1 = vweird.f32 %v5729_v55 }
 0xe4a   : > { %v5761_v39 = vsel %vm5760_vm12, %v7101_v57, %v5757_v11  ;;  %v5764_v43 = vmul.f32 %v7103_v61, %v5763_v13 }
 0xe4b   : > { %v5903_v53 = vmul.f32 %v5761_v39, %v9900_v25  ;;  %5628 = vadd.xlane.f32.xlu2 %v10024_v24  ;;  %5696 = vadd.xlane.f32.xlu0 %v5671_v46 }
 0xe4c   : > { %v5687_v62 = vpop.xlane.xlu0 %5686  ;;  %v5765_v2 = vmul.f32 0.5, %v5764_v43  ;;  %v5619_v3 = vpop.xlane.xlu2 %5618 }
 0xe4d   : > { %v5714_v58 = vmul.f32 %v5687_v62, %v9166_v40  ;;  %v5922_v5 = vmul.f32 %v10017_v47, %v5903_v53  ;;  %v5640_v32 = vmul.f32 %v5619_v3, %v9166_v40 }
 0xe4e   : > { %v5766_v12 = vsub.f32 1.5, %v5765_v2 }
 0xe4f   : > { %v7105_v27 = vpop.eup %7104  ;;  %v5730_v50 = vadd.f32 1e-05, %v5714_v58  ;;  %v5941_v30 = vadd.f32 %v10031_v9, %v5922_v5  ;;  %v10042_v60 = vsub.f32 %v9938_v22, %v5640_v32 }
 0xe50   : > { %v5773_v25 = vmul.f32 %v7105_v27, %v5729_v55  ;;  %v5767_v44 = vmul.f32 %v7103_v61, %v5766_v12  ;;  %vm5779_vm0 = vweird.f32 %v7105_v27 }
 0xe51   : > { %7106 = vrsqrt.f32 %v5730_v50  ;;  %v5956_v20 = vpack.c.bf16 %v5941_v30, %v5940_v29  ;;  %v5672_v41 = vmul.f32 %v10042_v60, %v10042_v60  ;;  %vm5780_vm2 = vmor %vm5778_vm1, %vm5779_vm0  ;;  %vm5788_vm4 = vweird.f32 %v5730_v50 }
 0xe52   : > { %v5774_v56 = vmul.f32 %v7105_v27, %v5773_v25  ;;  %v5771_v19 = vsel %vm5770_vm15, %v7103_v61, %v5767_v44 }
 0xe53   : > { %6040 = vmatmul.bf16.vlgmr.msra.gmra.mxu0 %v5956_v20  ;;  %5698 = vadd.xlane.f32.xlu0 %v5672_v41  ;;  %v5904_v33 = vmul.f32 %v5771_v19, %v9911_v15 }
 0xe54   : > { %v5775_v18 = vmul.f32 0.5, %v5774_v56  ;;  %v5621_v36 = vpop.xlane.xlu0 %5620  ;;  %v5689_v57 = vpop.xlane.xlu1 %5688 }
 0xe55   : > { %v5641_v0 = vmul.f32 %v5621_v36, %v9166_v40  ;;  %v5715_v22 = vmul.f32 %v5689_v57, %v9166_v40  ;;  %v5923_v4 = vmul.f32 %v10017_v47, %v5904_v33 }
 0xe56   : > { %v5776_v14 = vsub.f32 1.5, %v5775_v18 }
 0xe57   : > { %v7107_v28 = vpop.eup %7106  ;;  %v10050_v35 = vsub.f32 %v9947_v34, %v5641_v0  ;;  %v5731_v23 = vadd.f32 1e-05, %v5715_v22  ;;  %v5942_v11 = vadd.f32 %v10031_v9, %v5923_v4 }
 0xe58   : > { %v5777_v51 = vmul.f32 %v7105_v27, %v5776_v14  ;;  %v5783_v26 = vmul.f32 %v7107_v28, %v5730_v50  ;;  %vm5789_vm3 = vweird.f32 %v7107_v28 }
 0xe59   : > { %7108 = vrsqrt.f32 %v5731_v23  ;;  %v5673_v37 = vmul.f32 %v10050_v35, %v10050_v35  ;;  %vm5790_vm5 = vmor %vm5788_vm4, %vm5789_vm3  ;;  %vm5798_vm7 = vweird.f32 %v5731_v23 }
 0xe5a   : > { %v5781_v54 = vsel %vm5780_vm2, %v7105_v27, %v5777_v51  ;;  %v5784_v17 = vmul.f32 %v7107_v28, %v5783_v26 }
 0xe5b   : > { %v5905_v7 = vmul.f32 %v5781_v54, %v9922_v31  ;;  %5700 = vadd.xlane.f32.xlu1 %v5673_v37 }
 0xe5c   : > { %v5785_v15 = vmul.f32 0.5, %v5784_v17  ;;  %v5691_v10 = vpop.xlane.xlu1 %5690  ;;  %v5623_v34 = vpop.xlane.xlu0 %5622 }
 0xe5d   : > { %v5642_v49 = vmul.f32 %v5623_v34, %v9166_v40  ;;  %v5924_v45 = vmul.f32 %v10017_v47, %v5905_v7 }
 0xe5e   : > { %v5786_v48 = vsub.f32 1.5, %v5785_v15 }
 0xe5f   : > { %v7109_v55 = vpop.eup %7108  ;;  %v10059_v61 = vsub.f32 %v9958_v38, %v5642_v49  ;;  %v5943_v13 = vadd.f32 %v10031_v9, %v5924_v45 }
 0xe60   : > { %v5787_v31 = vmul.f32 %v7107_v28, %v5786_v48  ;;  %v5793_v46 = vmul.f32 %v7109_v55, %v5731_v23  ;;  %vm5799_vm6 = vweird.f32 %v7109_v55 }
 0xe61   : > { %v5957_v59 = vpack.c.bf16 %v5943_v13, %v5942_v11  ;;  %v5674_v39 = vmul.f32 %v10059_v61, %v10059_v61  ;;  %vm5800_vm8 = vmor %vm5798_vm7, %vm5799_vm6 }
 0xe62   : > { %v5794_v43 = vmul.f32 %v7109_v55, %v5793_v46  ;;  %v5791_v53 = vsel %vm5790_vm5, %v7107_v28, %v5787_v31 }
 0xe63   : > { %5702 = vadd.xlane.f32.xlu2 %v5674_v39  ;;  %6045 = vmatmul.bf16.gmra.mxu0 %v5957_v59  ;;  %v5906_v58 = vmul.f32 %v5791_v53, %v9933_v63 }
 0xe64   : > { %v5795_v62 = vmul.f32 0.5, %v5794_v43  ;;  %v5625_v38 = vpop.xlane.xlu1 %5624 }
 0xe65   : > { %v5643_v2 = vmul.f32 %v5625_v38, %v9166_v40  ;;  %v5925_v50 = vmul.f32 %v10017_v47, %v5906_v58 }
 0xe66   : > { %v5796_v3 = vsub.f32 1.5, %v5795_v62 }
 0xe67   : > { %v10068_v5 = vsub.f32 %v9965_v42, %v5643_v2  ;;  %v5944_v44 = vadd.f32 %v10031_v9, %v5925_v50 }
 0xe68   : > { %v5797_v32 = vmul.f32 %v7109_v55, %v5796_v3 }
 0xe69   : > { %v5675_v27 = vmul.f32 %v10068_v5, %v10068_v5 }
 0xe6a   : > { %v5801_v29 = vsel %vm5800_vm8, %v7109_v55, %v5797_v32 }
 0xe6b   : > { %v5907_v12 = vmul.f32 %v5801_v29, %v9944_v8  ;;  %5704 = vadd.xlane.f32.xlu0 %v5675_v27  ;;  %v5716_v8 = vmul.f32 %v5691_v10, %v9166_v40 }
 0xe6c   : > { %v5627_v30 = vpop.xlane.xlu1 %5626 }
 0xe6d   : > { %v5644_v25 = vmul.f32 %v5627_v30, %v9166_v40  ;;  %v5926_v63 = vmul.f32 %v10017_v47, %v5907_v12  ;;  %v5732_v19 = vadd.f32 1e-05, %v5716_v8 }
 0xe6f   : > { %v10077_v42 = vsub.f32 %v9969_v16, %v5644_v25  ;;  %v5945_v56 = vadd.f32 %v10031_v9, %v5926_v63  ;;  %7110 = vrsqrt.f32 %v5732_v19  ;;  %vm5808_vm10 = vweird.f32 %v5732_v19 }
 0xe71   : > { %v5958_v20 = vpack.c.bf16 %v5945_v56, %v5944_v44  ;;  %v5676_v41 = vmul.f32 %v10077_v42, %v10077_v42  ;;  %v10103_v44 = vld [vmem:[%s10193_s17] ss:$0 sm:$0xff] }
 0xe73   : > { %5706 = vadd.xlane.f32.xlu1 %v5676_v41  ;;  %6050 = vmatmul.bf16.gmra.mxu0 %v5958_v20 }
 0xe75   : > { %v7111_v18 = vpop.eup %7110 }
 0xe76   : > { %v5803_v36 = vmul.f32 %v7111_v18, %v5732_v19  ;;  %vm5809_vm9 = vweird.f32 %v7111_v18 }
 0xe77   : > { %vm5810_vm11 = vmor %vm5808_vm10, %vm5809_vm9 }
 0xe78   : > { %v5804_v57 = vmul.f32 %v7111_v18, %v5803_v36 }
 0xe7a   : > { %v5805_v14 = vmul.f32 0.5, %v5804_v57 }
 0xe7c   : > { %v5806_v28 = vsub.f32 1.5, %v5805_v14 }
 0xe7e   : > { %v5807_v37 = vmul.f32 %v7111_v18, %v5806_v28 }
 0xe80   : > { %v5811_v7 = vsel %vm5810_vm11, %v7111_v18, %v5807_v37 }
 0xe81   : > { %v5908_v55 = vmul.f32 %v5811_v7, %v9955_v1 }
 0xe83   : > { %v5927_v62 = vmul.f32 %v10017_v47, %v5908_v55 }
 0xe85   : > { %v5946_v27 = vadd.f32 %v10031_v9, %v5927_v62 }
 0xeae   : > { %v5693_v0 = vpop.xlane.xlu2 %5692 }
 0xeaf   : > { %v5717_v16 = vmul.f32 %v5693_v0, %v9166_v40 }
 0xeb1   : > { %v5733_v22 = vadd.f32 1e-05, %v5717_v16 }
 0xeb3   : > { %7112 = vrsqrt.f32 %v5733_v22  ;;  %vm5818_vm13 = vweird.f32 %v5733_v22 }
 0xeb6   : > { %v5695_v33 = vpop.xlane.xlu2 %5694 }
 0xeb7   : > { %v5718_v23 = vmul.f32 %v5695_v33, %v9166_v40 }
 0xeb9   : > { %v7113_v51 = vpop.eup %7112  ;;  %v5734_v26 = vadd.f32 1e-05, %v5718_v23 }
 0xeba   : > { %v5813_v54 = vmul.f32 %v7113_v51, %v5733_v22  ;;  %vm5819_vm12 = vweird.f32 %v7113_v51 }
 0xebb   : > { %7114 = vrsqrt.f32 %v5734_v26  ;;  %vm5820_vm14 = vmor %vm5818_vm13, %vm5819_vm12  ;;  %vm5828_vm0 = vweird.f32 %v5734_v26 }
 0xebc   : > { %v5814_v17 = vmul.f32 %v7113_v51, %v5813_v54 }
 0xebe   : > { %v5815_v4 = vmul.f32 0.5, %v5814_v17  ;;  %v5629_v15 = vpop.xlane.xlu2 %5628  ;;  %v5697_v10 = vpop.xlane.xlu0 %5696 }
 0xebf   : > { %v5645_v34 = vmul.f32 %v5629_v15, %v9166_v40  ;;  %v5719_v49 = vmul.f32 %v5697_v10, %v9166_v40 }
 0xec0   : > { %v5816_v45 = vsub.f32 1.5, %v5815_v4 }
 0xec1   : > { %v7115_v48 = vpop.eup %7114  ;;  %v10090_v11 = vsub.f32 %v10024_v24, %v5645_v34  ;;  %v5735_v13 = vadd.f32 1e-05, %v5719_v49 }
 0xec2   : > { %v5817_v31 = vmul.f32 %v7113_v51, %v5816_v45  ;;  %v5823_v46 = vmul.f32 %v7115_v48, %v5734_v26  ;;  %vm5829_vm15 = vweird.f32 %v7115_v48 }
 0xec3   : > { %7116 = vrsqrt.f32 %v5735_v13  ;;  %v5677_v59 = vmul.f32 %v10090_v11, %v10090_v11  ;;  %vm5830_vm1 = vmor %vm5828_vm0, %vm5829_vm15  ;;  %vm5838_vm3 = vweird.f32 %v5735_v13 }
 0xec4   : > { %v5821_v39 = vsel %vm5820_vm14, %v7113_v51, %v5817_v31  ;;  %v5824_v43 = vmul.f32 %v7115_v48, %v5823_v46 }
 0xec5   : > { %v5909_v53 = vmul.f32 %v5821_v39, %v10000_v6  ;;  %5708 = vadd.xlane.f32.xlu2 %v5677_v59 }
 0xec6   : > { %v5825_v1 = vmul.f32 0.5, %v5824_v43  ;;  %v5699_v38 = vpop.xlane.xlu0 %5698 }
 0xec7   : > { %v5720_v24 = vmul.f32 %v5699_v38, %v9166_v40  ;;  %v5928_v2 = vmul.f32 %v10017_v47, %v5909_v53 }
 0xec8   : > { %v5826_v3 = vsub.f32 1.5, %v5825_v1 }
 0xec9   : > { %v7117_v58 = vpop.eup %7116  ;;  %v5736_v32 = vadd.f32 1e-05, %v5720_v24  ;;  %v5947_v29 = vadd.f32 %v10031_v9, %v5928_v2 }
 0xeca   : > { %v5827_v12 = vmul.f32 %v7115_v48, %v5826_v3  ;;  %v5833_v50 = vmul.f32 %v7117_v58, %v5735_v13  ;;  %vm5839_vm2 = vweird.f32 %v7117_v58 }
 0xecb   : > { %7118 = vrsqrt.f32 %v5736_v32  ;;  %v5959_v6 = vpack.c.bf16 %v5947_v29, %v5946_v27  ;;  %vm5840_vm4 = vmor %vm5838_vm3, %vm5839_vm2  ;;  %vm5848_vm6 = vweird.f32 %v5736_v32 }
 0xecc   : > { %v5834_v30 = vmul.f32 %v7117_v58, %v5833_v50  ;;  %v5831_v25 = vsel %vm5830_vm1, %v7115_v48, %v5827_v12 }
 0xecd   : > { %6055 = vmatmul.bf16.gmra.mxu0 %v5959_v6  ;;  %v5910_v41 = vmul.f32 %v5831_v25, %v10008_v21 }
 0xece   : > { %v5701_v63 = vpop.xlane.xlu1 %5700  ;;  %v5835_v56 = vmul.f32 0.5, %v5834_v30 }
 0xecf   : > { %v5721_v20 = vmul.f32 %v5701_v63, %v9166_v40  ;;  %v5929_v14 = vmul.f32 %v10017_v47, %v5910_v41 }
 0xed0   : > { %v5836_v8 = vsub.f32 1.5, %v5835_v56  ;;  %v6041_v18 = vpop.f32.mrf.mxu0 }
 0xed1   : > { %v5737_v19 = vadd.f32 1e-05, %v5721_v20  ;;  %v7119_v36 = vpop.eup %7118  ;;  %v6042_v57 = vadd.f32 %v10103_v44, %v6041_v18  ;;  %v5948_v4 = vadd.f32 %v10031_v9, %v5929_v14 }
 0xed2   : > { %v5837_v0 = vmul.f32 %v7117_v58, %v5836_v8  ;;  %v5843_v16 = vmul.f32 %v7119_v36, %v5736_v32  ;;  %vm5849_vm5 = vweird.f32 %v7119_v36 }
 0xed3   : > { %7120 = vrsqrt.f32 %v5737_v19  ;;  %6081 = vst [vmem:[%s10112_s20] sm:$0xff] %v6042_v57  ;;  %vm5850_vm7 = vmor %vm5848_vm6, %vm5849_vm5  ;;  %vm5858_vm9 = vweird.f32 %v5737_v19 }
 0xed4   : > { %v5841_v21 = vsel %vm5840_vm4, %v7117_v58, %v5837_v0  ;;  %v5844_v22 = vmul.f32 %v7119_v36, %v5843_v16 }
 0xed5   : > { %v5911_v28 = vmul.f32 %v5841_v21, %v10021_v52 }
 0xed6   : > { %v5703_v33 = vpop.xlane.xlu2 %5702  ;;  %v5845_v23 = vmul.f32 0.5, %v5844_v22 }
 0xed7   : > { %v5722_v51 = vmul.f32 %v5703_v33, %v9166_v40  ;;  %v5930_v26 = vmul.f32 %v10017_v47, %v5911_v28 }
 0xed8   : > { %v5846_v54 = vsub.f32 1.5, %v5845_v23  ;;  %v6043_v7 = vpop.f32.mrf.mxu0 }
 0xed9   : > { %v7121_v37 = vpop.eup %7120  ;;  %v5738_v17 = vadd.f32 1e-05, %v5722_v51  ;;  %v6044_v10 = vadd.f32 %v10103_v44, %v6043_v7  ;;  %v5949_v34 = vadd.f32 %v10031_v9, %v5930_v26 }
 0xeda   : > { %v5853_v15 = vmul.f32 %v7121_v37, %v5737_v19  ;;  %v5847_v52 = vmul.f32 %v7119_v36, %v5846_v54  ;;  %vm5859_vm8 = vweird.f32 %v7121_v37 }
 0xedb   : > { %7122 = vrsqrt.f32 %v5738_v17  ;;  %6082 = vst [vmem:[%s10112_s20 + $0x8] sm:$0xff] %v6044_v10  ;;  %v5960_v45 = vpack.c.bf16 %v5949_v34, %v5948_v4  ;;  %vm5860_vm10 = vmor %vm5858_vm9, %vm5859_vm8  ;;  %vm5868_vm12 = vweird.f32 %v5738_v17 }
 0xedc   : > { %v5854_v49 = vmul.f32 %v7121_v37, %v5853_v15  ;;  %v5851_v48 = vsel %vm5850_vm7, %v7119_v36, %v5847_v52 }
 0xedd   : > { %6060 = vmatmul.bf16.gmra.mxu0 %v5960_v45  ;;  %v5912_v39 = vmul.f32 %v5851_v48, %v10042_v60 }
 0xede   : > { %v5855_v55 = vmul.f32 0.5, %v5854_v49  ;;  %v5705_v13 = vpop.xlane.xlu0 %5704 }
 0xedf   : > { %v5723_v31 = vmul.f32 %v5705_v13, %v9166_v40  ;;  %v5931_v58 = vmul.f32 %v10017_v47, %v5912_v39 }
 0xee0   : > { %v5856_v46 = vsub.f32 1.5, %v5855_v55  ;;  %v6046_v53 = vpop.f32.mrf.mxu0 }
 0xee1   : > { %v7123_v59 = vpop.eup %7122  ;;  %v5739_v43 = vadd.f32 1e-05, %v5723_v31  ;;  %v6047_v38 = vadd.f32 %v10103_v44, %v6046_v53  ;;  %v5950_v50 = vadd.f32 %v10031_v9, %v5931_v58 }
 0xee2   : > { %v5857_v62 = vmul.f32 %v7121_v37, %v5856_v46  ;;  %v5863_v1 = vmul.f32 %v7123_v59, %v5738_v17  ;;  %vm5869_vm11 = vweird.f32 %v7123_v59 }
 0xee3   : > { %7124 = vrsqrt.f32 %v5739_v43  ;;  %6083 = vst [vmem:[%s10112_s20 + $0x10] sm:$0xff] %v6047_v38  ;;  %vm5870_vm13 = vmor %vm5868_vm12, %vm5869_vm11  ;;  %vm5878_vm15 = vweird.f32 %v5739_v43 }
 0xee4   : > { %v5861_v24 = vsel %vm5860_vm10, %v7121_v37, %v5857_v62  ;;  %v5864_v2 = vmul.f32 %v7123_v59, %v5863_v1 }
 0xee5   : > { %v5913_v3 = vmul.f32 %v5861_v24, %v10050_v35 }
 0xee6   : > { %v5865_v32 = vmul.f32 0.5, %v5864_v2  ;;  %v5707_v51 = vpop.xlane.xlu1 %5706 }
 0xee7   : > { %v5932_v60 = vmul.f32 %v10017_v47, %v5913_v3  ;;  %v5724_v26 = vmul.f32 %v5707_v51, %v9166_v40 }
 0xee8   : > { %v5866_v27 = vsub.f32 1.5, %v5865_v32  ;;  %v6048_v12 = vpop.f32.mrf.mxu0 }
 0xee9   : > { %v7125_v29 = vpop.eup %7124  ;;  %v5951_v6 = vadd.f32 %v10031_v9, %v5932_v60  ;;  %v6049_v63 = vadd.f32 %v10103_v44, %v6048_v12  ;;  %v5740_v37 = vadd.f32 1e-05, %v5724_v26 }
 0xeea   : > { %v5867_v30 = vmul.f32 %v7123_v59, %v5866_v27  ;;  %v5873_v25 = vmul.f32 %v7125_v29, %v5739_v43  ;;  %vm5879_vm14 = vweird.f32 %v7125_v29 }
 0xeeb   : > { %v5961_v56 = vpack.c.bf16 %v5951_v6, %v5950_v50  ;;  %6084 = vst [vmem:[%s10112_s20 + $0x18] sm:$0xff] %v6049_v63  ;;  %vm5880_vm0 = vmor %vm5878_vm15, %vm5879_vm14  ;;  %7126 = vrsqrt.f32 %v5740_v37  ;;  %vm5888_vm2 = vweird.f32 %v5740_v37 }
 0xeec   : > { %v5874_v35 = vmul.f32 %v7125_v29, %v5873_v25  ;;  %v5871_v20 = vsel %vm5870_vm13, %v7123_v59, %v5867_v30 }
 0xeed   : > { %6065 = vmatmul.bf16.gmra.mxu0 %v5961_v56  ;;  %v5914_v19 = vmul.f32 %v5871_v20, %v10059_v61 }
 0xeee   : > { %v5875_v41 = vmul.f32 0.5, %v5874_v35 }
 0xeef   : > { %v5933_v21 = vmul.f32 %v10017_v47, %v5914_v19 }
 0xef0   : > { %v5876_v8 = vsub.f32 1.5, %v5875_v41  ;;  %v6051_v18 = vpop.f32.mrf.mxu0 }
 0xef1   : > { %v6052_v57 = vadd.f32 %v10103_v44, %v6051_v18  ;;  %v5952_v28 = vadd.f32 %v10031_v9, %v5933_v21 }
 0xef2   : > { %v5877_v36 = vmul.f32 %v7125_v29, %v5876_v8 }
 0xef3   : > { %6085 = vst [vmem:[%s10112_s20 + $0x20] sm:$0xff] %v6052_v57 }
 0xef4   : > { %v5881_v0 = vsel %vm5880_vm0, %v7125_v29, %v5877_v36 }
 0xef5   : > { %v5915_v16 = vmul.f32 %v5881_v0, %v10068_v5  ;;  %v7127_v5 = vpop.eup %7126 }
 0xef6   : > { %v5883_v54 = vmul.f32 %v7127_v5, %v5740_v37  ;;  %vm5889_vm1 = vweird.f32 %v7127_v5 }
 0xef7   : > { %v5934_v22 = vmul.f32 %v10017_v47, %v5915_v16  ;;  %vm5890_vm3 = vmor %vm5888_vm2, %vm5889_vm1 }
 0xef8   : > { %v6053_v14 = vpop.f32.mrf.mxu0  ;;  %v5884_v17 = vmul.f32 %v7127_v5, %v5883_v54 }
 0xef9   : > { %v5953_v61 = vadd.f32 %v10031_v9, %v5934_v22  ;;  %v6054_v33 = vadd.f32 %v10103_v44, %v6053_v14 }
 0xefa   : > { %v5885_v10 = vmul.f32 0.5, %v5884_v17 }
 0xefb   : > { %v5962_v23 = vpack.c.bf16 %v5953_v61, %v5952_v28  ;;  %6086 = vst [vmem:[%s10112_s20 + $0x28] sm:$0xff] %v6054_v33 }
 0xefc   : > { %v5886_v34 = vsub.f32 1.5, %v5885_v10 }
 0xefd   : > { %6070 = vmatmul.bf16.gmra.mxu0 %v5962_v23 }
 0xefe   : > { %v5887_v49 = vmul.f32 %v7127_v5, %v5886_v34 }
 0xf00   : > { %v5891_v55 = vsel %vm5890_vm3, %v7127_v5, %v5887_v49 }
 0xf38   : > { %v5709_v7 = vpop.xlane.xlu2 %5708 }
 0xf39   : > { %v5725_v4 = vmul.f32 %v5709_v7, %v9166_v40  ;;  %v5916_v40 = vmul.f32 %v5891_v55, %v10077_v42 }
 0xf3b   : > { %v5741_v15 = vadd.f32 1e-05, %v5725_v4  ;;  %v5935_v62 = vmul.f32 %v10017_v47, %v5916_v40 }
 0xf3d   : > { %7128 = vrsqrt.f32 %v5741_v15  ;;  %vm5898_vm5 = vweird.f32 %v5741_v15  ;;  %v5954_v42 = vadd.f32 %v10031_v9, %v5935_v62 }
 0xf43   : > { %v7129_v52 = vpop.eup %7128 }
 0xf44   : > { %v5893_v45 = vmul.f32 %v7129_v52, %v5741_v15  ;;  %vm5899_vm4 = vweird.f32 %v7129_v52 }
 0xf45   : > { %vm5900_vm6 = vmor %vm5898_vm5, %vm5899_vm4 }
 0xf46   : > { %v5894_v48 = vmul.f32 %v7129_v52, %v5893_v45 }
 0xf48   : > { %v5895_v13 = vmul.f32 0.5, %v5894_v48 }
 0xf4a   : > { %v5896_v31 = vsub.f32 1.5, %v5895_v13  ;;  %v6056_v46 = vpop.f32.mrf.mxu0 }
 0xf4b   : > { %v6057_v59 = vadd.f32 %v10103_v44, %v6056_v46 }
 0xf4c   : > { %v5897_v39 = vmul.f32 %v7129_v52, %v5896_v31 }
 0xf4d   : > { %6087 = vst [vmem:[%s10112_s20 + $0x30] sm:$0xff] %v6057_v59 }
 0xf4e   : > { %v5901_v43 = vsel %vm5900_vm6, %v7129_v52, %v5897_v39 }
 0xf4f   : > { %v5917_v53 = vmul.f32 %v5901_v43, %v10090_v11 }
 0xf51   : > { %v5936_v1 = vmul.f32 %v10017_v47, %v5917_v53 }
 0xf52   : > { %v6058_v38 = vpop.f32.mrf.mxu0 }
 0xf53   : > { %v6059_v24 = vadd.f32 %v10103_v44, %v6058_v38  ;;  %v5955_v2 = vadd.f32 %v10031_v9, %v5936_v1 }
 0xf55   : > { %6088 = vst [vmem:[%s10112_s20 + $0x38] sm:$0xff] %v6059_v24  ;;  %v5963_v3 = vpack.c.bf16 %v5955_v2, %v5954_v42 }
 0xf57   : > { %6075 = vmatmul.bf16.gmra.mxu0 %v5963_v3 }
 0xf5a   : > { %v6061_v58 = vpop.f32.mrf.mxu0 }
 0xf5b   : > { %v6062_v11 = vadd.f32 %v10103_v44, %v6061_v58 }
 0xf5d   : > { %6089 = vst [vmem:[%s10112_s20 + $0x40] sm:$0xff] %v6062_v11 }
 0xf62   : > { %v6063_v32 = vpop.f32.mrf.mxu0 }
 0xf63   : > { %v6064_v47 = vadd.f32 %v10103_v44, %v6063_v32 }
 0xf65   : > { %6090 = vst [vmem:[%s10112_s20 + $0x48] sm:$0xff] %v6064_v47 }
 0xf6a   : > { %v6066_v60 = vpop.f32.mrf.mxu0 }
 0xf6b   : > { %v6067_v27 = vadd.f32 %v10103_v44, %v6066_v60 }
 0xf6d   : > { %6091 = vst [vmem:[%s10112_s20 + $0x50] sm:$0xff] %v6067_v27 }
 0xf72   : > { %v6068_v9 = vpop.f32.mrf.mxu0 }
 0xf73   : > { %v6069_v29 = vadd.f32 %v10103_v44, %v6068_v9 }
 0xf75   : > { %6092 = vst [vmem:[%s10112_s20 + $0x58] sm:$0xff] %v6069_v29 }
 0xf7a   : > { %v6071_v12 = vpop.f32.mrf.mxu0 }
 0xf7b   : > { %v6072_v50 = vadd.f32 %v10103_v44, %v6071_v12 }
 0xf7d   : > { %6093 = vst [vmem:[%s10112_s20 + $0x60] sm:$0xff] %v6072_v50 }
 0xf82   : > { %v6073_v6 = vpop.f32.mrf.mxu0 }
 0xf83   : > { %v6074_v30 = vadd.f32 %v10103_v44, %v6073_v6 }
 0xf85   : > { %6094 = vst [vmem:[%s10112_s20 + $0x68] sm:$0xff] %v6074_v30 }
 0xfd4   : > { %v6076_v25 = vpop.f32.mrf.mxu0 }
 0xfd5   : > { %v6077_v63 = vadd.f32 %v10103_v44, %v6076_v25 }
 0xfd7   : > { %6095 = vst [vmem:[%s10112_s20 + $0x70] sm:$0xff] %v6077_v63 }
 0xfdc   : > { %v6078_v56 = vpop.f32.mrf.mxu0 }
 0xfdd   : > { %v6079_v35 = vadd.f32 %v10103_v44, %v6078_v56 }
 0xfdf   : > { %6096 = vst [vmem:[%s10112_s20 + $0x78] sm:$0xff] %v6079_v35 }
 0xfe0 PF: > { %s28_s27 = sadd.s32 1, %s7138_s27  }
 0xfe1   : > { %p25_p4 = scmp.ge.s32.totalorder %s28_s27, 4  }
 0xfe3   :  { %27 = sbr.rel (!%p25_p4) target bundleno = 4 (0x4), region = 122 }

</bundles_post_ra>
